<compile_context>
chip_gen: v7x
topology: tpu7x:2x2x1
jax: 0.10.0
libtpu: 0.0.40
codegen_flags: <defaults>
</compile_context>

<pallas_src>
import math

import jax
import jax.numpy as jnp
from jax.experimental import pallas as pl
from jax.experimental.pallas import tpu as pltpu


# ----------------------------------------------------------------------------
# Fused kernel
# ----------------------------------------------------------------------------
def make_fused_kernel(H, W, C):
    HW = H * W
    Hp, Wp = H + 2, W + 2
    SQRT_2_OVER_PI = 0.7978845608028654

    def kernel(x_ref, basis_ref, basisT_ref, fmul_ref,
               wg_ref, gsh_ref,            # conv_gate: BN-scale-folded weight, BN shift
               w1_ref, h1_ref,             # ResBlock conv1 (+bias) + bn1 folded
               w2_ref, h2_ref,             # ResBlock conv2 (+bias) + bn2 folded
               o_ref, pad_ref):
        x = x_ref[0]                               # (H, W, C) f32
        x_flat = x.reshape(HW, C)                  # (HW, C)

        # ---- frequency-domain style removal (exact closed form, see header) ----
        s = jnp.dot(basisT_ref[...], x_flat,
                    preferred_element_type=jnp.float32)          # (8, C) DFT bins
        delta = jnp.dot(basis_ref[...], s * fmul_ref[...],
                        preferred_element_type=jnp.float32)      # (HW, C)
        res = x_flat + delta                                     # == irfft2(modified rfft2(x))

        # ---- shared padded VMEM scratch for the three 3x3 convs ----
        # Border stays zero for all three convs; interior is overwritten per conv.
        pad_ref[...] = jnp.zeros((Hp, Wp, C), jnp.float32)

        def conv3x3(v_flat, w_ref, shift_ref):
            # write interior, im2col the 9 taps, one (HW, 9C) x (9C, C) MXU matmul
            pad_ref[1:H + 1, 1:W + 1, :] = v_flat.reshape(H, W, C)
            patches = jnp.concatenate(
                [pad_ref[kh:kh + H, kw:kw + W, :].reshape(HW, C).astype(jnp.bfloat16)
                 for kh in range(3) for kw in range(3)], axis=-1)            # (HW, 9C)
            out = jnp.dot(patches, w_ref[...],
                          preferred_element_type=jnp.float32)                # (HW, C) f32
            return out + shift_ref[...]                                      # BN shift (+bias)

        # ---- conv_gate = Conv(bias=False) -> BN -> ReLU6 ----
        g = jnp.clip(conv3x3(res, wg_ref, gsh_ref), 0.0, 6.0)

        # gated residual: sigmoid(gelu(conv_gate(res))) * x
        # TODO(synk): PyTorch F.gelu defaults to the exact erf form; tanh approximation used here.
        gelu = 0.5 * g * (1.0 + jnp.tanh(SQRT_2_OVER_PI * (g + 0.044715 * g * g * g)))
        res2 = jax.nn.sigmoid(gelu) * x_flat

        # ---- ResBlock(128, 128): conv1->bn1->relu->conv2->bn2->(+id)->relu ----
        y1 = jnp.maximum(conv3x3(res2, w1_ref, h1_ref), 0.0)
        y2 = conv3x3(y1, w2_ref, h2_ref)
        out = jnp.maximum(y2 + res2, 0.0)

        o_ref[...] = out.reshape(1, H, W, C).astype(o_ref.dtype)

    return kernel


# ----------------------------------------------------------------------------
# Frequency-path helpers (built once in the wrapper, constant under jit)
# ----------------------------------------------------------------------------
def make_freq_basis(H, W):
    a = jnp.arange(H, dtype=jnp.float32)
    b = jnp.arange(W, dtype=jnp.float32)
    theta = 2.0 * jnp.pi * a / H
    cos_a = jnp.broadcast_to(jnp.cos(theta)[:, None], (H, W))
    sin_a = jnp.broadcast_to(jnp.sin(theta)[:, None], (H, W))
    alt_b = jnp.broadcast_to((1.0 - 2.0 * (b % 2))[None, :], (H, W))   # (-1)^b
    ones = jnp.ones((H, W), jnp.float32)
    zeros = jnp.zeros((H, W), jnp.float32)
    basis = jnp.stack(
        [ones, cos_a, sin_a, alt_b, alt_b * cos_a, alt_b * sin_a, zeros, zeros],
        axis=-1).reshape(H * W, 8)
    return basis, basis.T


def make_freq_multiplier(weight, H, W):
    # weight: (C, 2, 2).  Mapping of the fftshifted centre 2x2 onto rfft2 bins:
    #   weight[:,0,0] -> (kh=H-1, kw=W//2)   weight[:,0,1] -> (kh=H-1, kw=0)
    #   weight[:,1,0] -> (kh=0,   kw=W//2)   weight[:,1,1] -> (kh=0,   kw=0)
    inv = 1.0 / float(H * W)
    w00 = weight[:, 0, 0]
    w01 = weight[:, 0, 1]
    w10 = weight[:, 1, 0]
    w11 = weight[:, 1, 1]
    zeros = jnp.zeros_like(w00)
    return jnp.stack([(w11 - 1.0) * inv,      # DC term
                      (w01 - 1.0) * inv,      # cos term   (Re F[H-1, 0])
                      (w01 - 1.0) * inv,      # sin term   (Im F[H-1, 0])
                      (w10 - 1.0) * inv,      # (-1)^b term
                      (w00 - 1.0) * inv,      # (-1)^b cos (Re F[H-1, W/2])
                      (w00 - 1.0) * inv,      # (-1)^b sin (Im F[H-1, W/2])
                      zeros, zeros], axis=0)  # (8, C)


# ----------------------------------------------------------------------------
# Forward wrapper
# ----------------------------------------------------------------------------
@jax.jit
def style_removal_forward(x_nhwc, params):
    N, H, W, C = x_nhwc.shape
    assert H % 2 == 0 and W % 2 == 0 and C == params["freq_weight"].shape[0]

    basis, basisT = make_freq_basis(H, W)
    fmul = make_freq_multiplier(params["freq_weight"], H, W)

    kernel = make_fused_kernel(H, W, C)
    full = lambda n: (0, 0)
    per_img = lambda n: (n, 0, 0, 0)
    conv_spec = pl.BlockSpec((9 * C, C), full)
    vec_spec = pl.BlockSpec((1, C), full)

    return pl.pallas_call(
        kernel,
        out_shape=jax.ShapeDtypeStruct((N, H, W, C), jnp.float32),
        grid=(N,),
        in_specs=[
            pl.BlockSpec((1, H, W, C), per_img),      # x
            pl.BlockSpec((H * W, 8), full),           # basis
            pl.BlockSpec((8, H * W), full),           # basis^T
            pl.BlockSpec((8, C), full),               # freq multipliers
            conv_spec, vec_spec,                      # conv_gate (scale-folded w, shift)
            conv_spec, vec_spec,                      # ResBlock conv1/bn1
            conv_spec, vec_spec,                      # ResBlock conv2/bn2
        ],
        out_specs=pl.BlockSpec((1, H, W, C), per_img),
        scratch_shapes=[pltpu.VMEM((H + 2, W + 2, C), jnp.float32)],
        compiler_params=pltpu.CompilerParams(
            dimension_semantics=("parallel",)),
    )(x_nhwc, basis, basisT, fmul,
      params["gate_w"], params["gate_shift"],
      params["c1_w"], params["c1_shift"],
      params["c2_w"], params["c2_shift"])


# ----------------------------------------------------------------------------
# Deterministic synthetic parameters (eval-mode BatchNorm folded into conv)
# ----------------------------------------------------------------------------
def _init_conv_bn(key, cin, cout, k=3, conv_bias=False, eps=1e-5):
    kw_, kb_, kg, kbt, km, kv = jax.random.split(key, 6)
    std = 1.0 / math.sqrt(cin * k * k)
    w = jax.random.normal(kw_, (k, k, cin, cout), jnp.float32) * std        # HWIO
    bias = std * jax.random.normal(kb_, (cout,), jnp.float32) if conv_bias else None
    gamma = 1.0 + 0.1 * jax.random.normal(kg, (cout,), jnp.float32)
    beta = 0.1 * jax.random.normal(kbt, (cout,), jnp.float32)
    mean = 0.1 * jax.random.normal(km, (cout,), jnp.float32)
    var = 1.0 + 0.1 * jnp.abs(jax.random.normal(kv, (cout,), jnp.float32))
    scale = gamma / jnp.sqrt(var + eps)
    shift = beta - mean * scale if bias is None else beta + (bias - mean) * scale
    # Fold the BN scale into the conv weight (per output channel), im2col order.
    w_folded = (w * scale).reshape(k * k * cin, cout).astype(jnp.bfloat16)
    return w_folded, shift.reshape(1, cout).astype(jnp.float32)


def init_params(key, C=128):
    kf, kg, k1, k2 = jax.random.split(key, 4)
    freq_weight = jax.random.uniform(kf, (C, 2, 2), jnp.float32)            # torch.rand(128,2,2)
    gate_w, gate_shift = _init_conv_bn(kg, C, C, 3, conv_bias=False)
    c1_w, c1_shift = _init_conv_bn(k1, C, C, 3, conv_bias=True)
    c2_w, c2_shift = _init_conv_bn(k2, C, C, 3, conv_bias=True)
    return dict(freq_weight=freq_weight,
                gate_w=gate_w, gate_shift=gate_shift,
                c1_w=c1_w, c1_shift=c1_shift,
                c2_w=c2_w, c2_shift=c2_shift)


# ----------------------------------------------------------------------------
# Main
# ----------------------------------------------------------------------------
if __name__ == "__main__":
    N, C, H, W = 2, 128, 16, 16          # C = 128 is fixed by the module definition
    root = jax.random.PRNGKey(0)
    k_in, k_p = jax.random.split(root)

    # Example input in PyTorch NCHW convention, moved to NHWC for the kernel.
    x_nchw = jax.random.normal(k_in, (N, C, H, W), jnp.float32)
    x_nhwc = jnp.transpose(x_nchw, (0, 2, 3, 1))

    params = init_params(k_p, C)

    out = style_removal_forward(x_nhwc, params)
    out = jax.block_until_ready(out)

    assert out.shape == (N, H, W, C)
    assert bool(jnp.all(jnp.isfinite(out)))
    print("KERNEL_OK")
</pallas_src>

<mosaic_0001>
module attributes {stable_mosaic.version = 11 : i64} {
  func.func @kernel(%arg0: i32, %arg1: memref<1x16x16x128xf32, #tpu.memory_space<vmem>>, %arg2: memref<256x8xf32, #tpu.memory_space<vmem>>, %arg3: memref<8x256xf32, #tpu.memory_space<vmem>>, %arg4: memref<8x128xf32, #tpu.memory_space<vmem>>, %arg5: memref<1152x128xbf16, #tpu.memory_space<vmem>>, %arg6: memref<1x128xf32, #tpu.memory_space<vmem>>, %arg7: memref<1152x128xbf16, #tpu.memory_space<vmem>>, %arg8: memref<1x128xf32, #tpu.memory_space<vmem>>, %arg9: memref<1152x128xbf16, #tpu.memory_space<vmem>>, %arg10: memref<1x128xf32, #tpu.memory_space<vmem>>, %arg11: memref<1x16x16x128xf32, #tpu.memory_space<vmem>>, %arg12: memref<18x18x128xf32, #tpu.memory_space<vmem>>) attributes {dimension_semantics = [#tpu.dimension_semantics<parallel>], iteration_bounds = array<i64: 2>, scalar_prefetch = 0 : i64, scratch_operands = 1 : i64, tpu.core_type = #tpu.core_type<tc>, window_params = [{transform_indices = @transform_0, window_bounds = array<i64: 1, 16, 16, 128>}, {pipeline_mode = #tpu.pipeline_mode<synchronous>, transform_indices = @transform_1, window_bounds = array<i64: 256, 8>}, {pipeline_mode = #tpu.pipeline_mode<synchronous>, transform_indices = @transform_2, window_bounds = array<i64: 8, 256>}, {pipeline_mode = #tpu.pipeline_mode<synchronous>, transform_indices = @transform_3, window_bounds = array<i64: 8, 128>}, {pipeline_mode = #tpu.pipeline_mode<synchronous>, transform_indices = @transform_4, window_bounds = array<i64: 1152, 128>}, {pipeline_mode = #tpu.pipeline_mode<synchronous>, transform_indices = @transform_5, window_bounds = array<i64: 1, 128>}, {pipeline_mode = #tpu.pipeline_mode<synchronous>, transform_indices = @transform_6, window_bounds = array<i64: 1152, 128>}, {pipeline_mode = #tpu.pipeline_mode<synchronous>, transform_indices = @transform_7, window_bounds = array<i64: 1, 128>}, {pipeline_mode = #tpu.pipeline_mode<synchronous>, transform_indices = @transform_8, window_bounds = array<i64: 1152, 128>}, {pipeline_mode = #tpu.pipeline_mode<synchronous>, transform_indices = @transform_9, window_bounds = array<i64: 1, 128>}, {transform_indices = @transform_10, window_bounds = array<i64: 1, 16, 16, 128>}]} {
    %c0 = arith.constant 0 : index
    %c0_0 = arith.constant 0 : index
    %c0_1 = arith.constant 0 : index
    %c0_2 = arith.constant 0 : index
    %0 = vector.load %arg1[%c0, %c0_0, %c0_1, %c0_2] : memref<1x16x16x128xf32, #tpu.memory_space<vmem>>, vector<1x16x16x128xf32>
    %1 = vector.shape_cast %0 : vector<1x16x16x128xf32> to vector<16x16x128xf32>
    %2 = vector.shape_cast %1 : vector<16x16x128xf32> to vector<256x128xf32>
    %c0_3 = arith.constant 0 : index
    %c0_4 = arith.constant 0 : index
    %3 = vector.load %arg3[%c0_3, %c0_4] : memref<8x256xf32, #tpu.memory_space<vmem>>, vector<8x256xf32>
    %cst = arith.constant dense<0.000000e+00> : vector<8x128xf32>
    %4 = tpu.matmul %3, %2, %cst {dimension_numbers = #tpu.dot_dimension_numbers<[1], [0], [0], [1], [0, 0, 1, 1], [], []>} : vector<8x256xf32>, vector<256x128xf32>, vector<8x128xf32> -> vector<8x128xf32>
    %c0_5 = arith.constant 0 : index
    %c0_6 = arith.constant 0 : index
    %5 = vector.load %arg2[%c0_5, %c0_6] : memref<256x8xf32, #tpu.memory_space<vmem>>, vector<256x8xf32>
    %c0_7 = arith.constant 0 : index
    %c0_8 = arith.constant 0 : index
    %6 = vector.load %arg4[%c0_7, %c0_8] : memref<8x128xf32, #tpu.memory_space<vmem>>, vector<8x128xf32>
    %7 = arith.mulf %4, %6 : vector<8x128xf32>
    %cst_9 = arith.constant dense<0.000000e+00> : vector<256x128xf32>
    %8 = tpu.matmul %5, %7, %cst_9 {dimension_numbers = #tpu.dot_dimension_numbers<[1], [0], [0], [1], [0, 0, 1, 1], [], []>} : vector<256x8xf32>, vector<8x128xf32>, vector<256x128xf32> -> vector<256x128xf32>
    %9 = arith.addf %2, %8 : vector<256x128xf32>
    %cst_10 = arith.constant 0.000000e+00 : f32
    %10 = vector.broadcast %cst_10 : f32 to vector<18x18x128xf32>
    %c0_11 = arith.constant 0 : index
    %c0_12 = arith.constant 0 : index
    %c0_13 = arith.constant 0 : index
    %11 = vector.load %arg12[%c0_11, %c0_12, %c0_13] : memref<18x18x128xf32, #tpu.memory_space<vmem>>, vector<18x18x128xf32>
    tpu.vector_store %arg12[%c0_11, %c0_12, %c0_13], %10 {strides = array<i32>} : memref<18x18x128xf32, #tpu.memory_space<vmem>>, vector<18x18x128xf32>,
    %12 = vector.shape_cast %9 : vector<256x128xf32> to vector<16x16x128xf32>
    %c1 = arith.constant 1 : index
    %c1_14 = arith.constant 1 : index
    %c0_15 = arith.constant 0 : index
    %13 = vector.load %arg12[%c1, %c1_14, %c0_15] : memref<18x18x128xf32, #tpu.memory_space<vmem>>, vector<16x16x128xf32>
    tpu.vector_store %arg12[%c1, %c1_14, %c0_15], %12 {strides = array<i32>} : memref<18x18x128xf32, #tpu.memory_space<vmem>>, vector<16x16x128xf32>,
    %c0_16 = arith.constant 0 : index
    %c0_17 = arith.constant 0 : index
    %c0_18 = arith.constant 0 : index
    %14 = vector.load %arg12[%c0_16, %c0_17, %c0_18] : memref<18x18x128xf32, #tpu.memory_space<vmem>>, vector<16x16x128xf32>
    %15 = vector.shape_cast %14 : vector<16x16x128xf32> to vector<256x128xf32>
    %16 = arith.truncf %15 : vector<256x128xf32> to vector<256x128xbf16>
    %c0_19 = arith.constant 0 : index
    %c1_20 = arith.constant 1 : index
    %c0_21 = arith.constant 0 : index
    %17 = vector.load %arg12[%c0_19, %c1_20, %c0_21] : memref<18x18x128xf32, #tpu.memory_space<vmem>>, vector<16x16x128xf32>
    %18 = vector.shape_cast %17 : vector<16x16x128xf32> to vector<256x128xf32>
    %19 = arith.truncf %18 : vector<256x128xf32> to vector<256x128xbf16>
    %c0_22 = arith.constant 0 : index
    %c2 = arith.constant 2 : index
    %c0_23 = arith.constant 0 : index
    %20 = vector.load %arg12[%c0_22, %c2, %c0_23] : memref<18x18x128xf32, #tpu.memory_space<vmem>>, vector<16x16x128xf32>
    %21 = vector.shape_cast %20 : vector<16x16x128xf32> to vector<256x128xf32>
    %22 = arith.truncf %21 : vector<256x128xf32> to vector<256x128xbf16>
    %c1_24 = arith.constant 1 : index
    %c0_25 = arith.constant 0 : index
    %c0_26 = arith.constant 0 : index
    %23 = vector.load %arg12[%c1_24, %c0_25, %c0_26] : memref<18x18x128xf32, #tpu.memory_space<vmem>>, vector<16x16x128xf32>
    %24 = vector.shape_cast %23 : vector<16x16x128xf32> to vector<256x128xf32>
    %25 = arith.truncf %24 : vector<256x128xf32> to vector<256x128xbf16>
    %c1_27 = arith.constant 1 : index
    %c1_28 = arith.constant 1 : index
    %c0_29 = arith.constant 0 : index
    %26 = vector.load %arg12[%c1_27, %c1_28, %c0_29] : memref<18x18x128xf32, #tpu.memory_space<vmem>>, vector<16x16x128xf32>
    %27 = vector.shape_cast %26 : vector<16x16x128xf32> to vector<256x128xf32>
    %28 = arith.truncf %27 : vector<256x128xf32> to vector<256x128xbf16>
    %c1_30 = arith.constant 1 : index
    %c2_31 = arith.constant 2 : index
    %c0_32 = arith.constant 0 : index
    %29 = vector.load %arg12[%c1_30, %c2_31, %c0_32] : memref<18x18x128xf32, #tpu.memory_space<vmem>>, vector<16x16x128xf32>
    %30 = vector.shape_cast %29 : vector<16x16x128xf32> to vector<256x128xf32>
    %31 = arith.truncf %30 : vector<256x128xf32> to vector<256x128xbf16>
    %c2_33 = arith.constant 2 : index
    %c0_34 = arith.constant 0 : index
    %c0_35 = arith.constant 0 : index
    %32 = vector.load %arg12[%c2_33, %c0_34, %c0_35] : memref<18x18x128xf32, #tpu.memory_space<vmem>>, vector<16x16x128xf32>
    %33 = vector.shape_cast %32 : vector<16x16x128xf32> to vector<256x128xf32>
    %34 = arith.truncf %33 : vector<256x128xf32> to vector<256x128xbf16>
    %c2_36 = arith.constant 2 : index
    %c1_37 = arith.constant 1 : index
    %c0_38 = arith.constant 0 : index
    %35 = vector.load %arg12[%c2_36, %c1_37, %c0_38] : memref<18x18x128xf32, #tpu.memory_space<vmem>>, vector<16x16x128xf32>
    %36 = vector.shape_cast %35 : vector<16x16x128xf32> to vector<256x128xf32>
    %37 = arith.truncf %36 : vector<256x128xf32> to vector<256x128xbf16>
    %c2_39 = arith.constant 2 : index
    %c2_40 = arith.constant 2 : index
    %c0_41 = arith.constant 0 : index
    %38 = vector.load %arg12[%c2_39, %c2_40, %c0_41] : memref<18x18x128xf32, #tpu.memory_space<vmem>>, vector<16x16x128xf32>
    %39 = vector.shape_cast %38 : vector<16x16x128xf32> to vector<256x128xf32>
    %40 = arith.truncf %39 : vector<256x128xf32> to vector<256x128xbf16>
    %41 = tpu.concatenate %16, %19, %22, %25, %28, %31, %34, %37, %40 in 1 : vector<256x128xbf16>, vector<256x128xbf16>, vector<256x128xbf16>, vector<256x128xbf16>, vector<256x128xbf16>, vector<256x128xbf16>, vector<256x128xbf16>, vector<256x128xbf16>, vector<256x128xbf16> -> vector<256x1152xbf16>
    %c0_42 = arith.constant 0 : index
    %c0_43 = arith.constant 0 : index
    %42 = vector.load %arg5[%c0_42, %c0_43] : memref<1152x128xbf16, #tpu.memory_space<vmem>>, vector<1152x128xbf16>
    %cst_44 = arith.constant dense<0.000000e+00> : vector<256x128xf32>
    %43 = tpu.matmul %41, %42, %cst_44 {dimension_numbers = #tpu.dot_dimension_numbers<[1], [0], [0], [1], [0, 0, 1, 1], [], []>} : vector<256x1152xbf16>, vector<1152x128xbf16>, vector<256x128xf32> -> vector<256x128xf32>
    %c0_45 = arith.constant 0 : index
    %c0_46 = arith.constant 0 : index
    %44 = vector.load %arg6[%c0_45, %c0_46] : memref<1x128xf32, #tpu.memory_space<vmem>>, vector<1x128xf32>
    %45 = vector.broadcast %44 : vector<1x128xf32> to vector<256x128xf32>
    %46 = arith.addf %43, %45 : vector<256x128xf32>
    %cst_47 = arith.constant 0.000000e+00 : f32
    %cst_48 = arith.constant 6.000000e+00 : f32
    %47 = vector.broadcast %cst_47 : f32 to vector<256x128xf32>
    %48 = arith.maximumf %47, %46 : vector<256x128xf32>
    %49 = vector.broadcast %cst_48 : f32 to vector<256x128xf32>
    %50 = arith.minimumf %49, %48 : vector<256x128xf32>
    %cst_49 = arith.constant 5.000000e-01 : f32
    %51 = vector.broadcast %cst_49 : f32 to vector<256x128xf32>
    %52 = arith.mulf %51, %50 : vector<256x128xf32>
    %cst_50 = arith.constant 4.471500e-02 : f32
    %53 = vector.broadcast %cst_50 : f32 to vector<256x128xf32>
    %54 = arith.mulf %53, %50 : vector<256x128xf32>
    %55 = arith.mulf %54, %50 : vector<256x128xf32>
    %56 = arith.mulf %55, %50 : vector<256x128xf32>
    %57 = arith.addf %50, %56 : vector<256x128xf32>
    %cst_51 = arith.constant 0.797884583 : f32
    %58 = vector.broadcast %cst_51 : f32 to vector<256x128xf32>
    %59 = arith.mulf %58, %57 : vector<256x128xf32>
    %60 = math.tanh %59 : vector<256x128xf32>
    %cst_52 = arith.constant 1.000000e+00 : f32
    %61 = vector.broadcast %cst_52 : f32 to vector<256x128xf32>
    %62 = arith.addf %61, %60 : vector<256x128xf32>
    %63 = arith.mulf %52, %62 : vector<256x128xf32>
    %64 = arith.negf %63 : vector<256x128xf32>
    %65 = math.exp %64 : vector<256x128xf32>
    %cst_53 = arith.constant 1.000000e+00 : f32
    %66 = vector.broadcast %cst_53 : f32 to vector<256x128xf32>
    %67 = arith.addf %66, %65 : vector<256x128xf32>
    %68 = arith.divf %66, %67 : vector<256x128xf32>
    %69 = arith.mulf %68, %2 : vector<256x128xf32>
    %70 = vector.shape_cast %69 : vector<256x128xf32> to vector<16x16x128xf32>
    %c1_54 = arith.constant 1 : index
    %c1_55 = arith.constant 1 : index
    %c0_56 = arith.constant 0 : index
    %71 = vector.load %arg12[%c1_54, %c1_55, %c0_56] : memref<18x18x128xf32, #tpu.memory_space<vmem>>, vector<16x16x128xf32>
    tpu.vector_store %arg12[%c1_54, %c1_55, %c0_56], %70 {strides = array<i32>} : memref<18x18x128xf32, #tpu.memory_space<vmem>>, vector<16x16x128xf32>,
    %c0_57 = arith.constant 0 : index
    %c0_58 = arith.constant 0 : index
    %c0_59 = arith.constant 0 : index
    %72 = vector.load %arg12[%c0_57, %c0_58, %c0_59] : memref<18x18x128xf32, #tpu.memory_space<vmem>>, vector<16x16x128xf32>
    %73 = vector.shape_cast %72 : vector<16x16x128xf32> to vector<256x128xf32>
    %74 = arith.truncf %73 : vector<256x128xf32> to vector<256x128xbf16>
    %c0_60 = arith.constant 0 : index
    %c1_61 = arith.constant 1 : index
    %c0_62 = arith.constant 0 : index
    %75 = vector.load %arg12[%c0_60, %c1_61, %c0_62] : memref<18x18x128xf32, #tpu.memory_space<vmem>>, vector<16x16x128xf32>
    %76 = vector.shape_cast %75 : vector<16x16x128xf32> to vector<256x128xf32>
    %77 = arith.truncf %76 : vector<256x128xf32> to vector<256x128xbf16>
    %c0_63 = arith.constant 0 : index
    %c2_64 = arith.constant 2 : index
    %c0_65 = arith.constant 0 : index
    %78 = vector.load %arg12[%c0_63, %c2_64, %c0_65] : memref<18x18x128xf32, #tpu.memory_space<vmem>>, vector<16x16x128xf32>
    %79 = vector.shape_cast %78 : vector<16x16x128xf32> to vector<256x128xf32>
    %80 = arith.truncf %79 : vector<256x128xf32> to vector<256x128xbf16>
    %c1_66 = arith.constant 1 : index
    %c0_67 = arith.constant 0 : index
    %c0_68 = arith.constant 0 : index
    %81 = vector.load %arg12[%c1_66, %c0_67, %c0_68] : memref<18x18x128xf32, #tpu.memory_space<vmem>>, vector<16x16x128xf32>
    %82 = vector.shape_cast %81 : vector<16x16x128xf32> to vector<256x128xf32>
    %83 = arith.truncf %82 : vector<256x128xf32> to vector<256x128xbf16>
    %c1_69 = arith.constant 1 : index
    %c1_70 = arith.constant 1 : index
    %c0_71 = arith.constant 0 : index
    %84 = vector.load %arg12[%c1_69, %c1_70, %c0_71] : memref<18x18x128xf32, #tpu.memory_space<vmem>>, vector<16x16x128xf32>
    %85 = vector.shape_cast %84 : vector<16x16x128xf32> to vector<256x128xf32>
    %86 = arith.truncf %85 : vector<256x128xf32> to vector<256x128xbf16>
    %c1_72 = arith.constant 1 : index
    %c2_73 = arith.constant 2 : index
    %c0_74 = arith.constant 0 : index
    %87 = vector.load %arg12[%c1_72, %c2_73, %c0_74] : memref<18x18x128xf32, #tpu.memory_space<vmem>>, vector<16x16x128xf32>
    %88 = vector.shape_cast %87 : vector<16x16x128xf32> to vector<256x128xf32>
    %89 = arith.truncf %88 : vector<256x128xf32> to vector<256x128xbf16>
    %c2_75 = arith.constant 2 : index
    %c0_76 = arith.constant 0 : index
    %c0_77 = arith.constant 0 : index
    %90 = vector.load %arg12[%c2_75, %c0_76, %c0_77] : memref<18x18x128xf32, #tpu.memory_space<vmem>>, vector<16x16x128xf32>
    %91 = vector.shape_cast %90 : vector<16x16x128xf32> to vector<256x128xf32>
    %92 = arith.truncf %91 : vector<256x128xf32> to vector<256x128xbf16>
    %c2_78 = arith.constant 2 : index
    %c1_79 = arith.constant 1 : index
    %c0_80 = arith.constant 0 : index
    %93 = vector.load %arg12[%c2_78, %c1_79, %c0_80] : memref<18x18x128xf32, #tpu.memory_space<vmem>>, vector<16x16x128xf32>
    %94 = vector.shape_cast %93 : vector<16x16x128xf32> to vector<256x128xf32>
    %95 = arith.truncf %94 : vector<256x128xf32> to vector<256x128xbf16>
    %c2_81 = arith.constant 2 : index
    %c2_82 = arith.constant 2 : index
    %c0_83 = arith.constant 0 : index
    %96 = vector.load %arg12[%c2_81, %c2_82, %c0_83] : memref<18x18x128xf32, #tpu.memory_space<vmem>>, vector<16x16x128xf32>
    %97 = vector.shape_cast %96 : vector<16x16x128xf32> to vector<256x128xf32>
    %98 = arith.truncf %97 : vector<256x128xf32> to vector<256x128xbf16>
    %99 = tpu.concatenate %74, %77, %80, %83, %86, %89, %92, %95, %98 in 1 : vector<256x128xbf16>, vector<256x128xbf16>, vector<256x128xbf16>, vector<256x128xbf16>, vector<256x128xbf16>, vector<256x128xbf16>, vector<256x128xbf16>, vector<256x128xbf16>, vector<256x128xbf16> -> vector<256x1152xbf16>
    %c0_84 = arith.constant 0 : index
    %c0_85 = arith.constant 0 : index
    %100 = vector.load %arg7[%c0_84, %c0_85] : memref<1152x128xbf16, #tpu.memory_space<vmem>>, vector<1152x128xbf16>
    %cst_86 = arith.constant dense<0.000000e+00> : vector<256x128xf32>
    %101 = tpu.matmul %99, %100, %cst_86 {dimension_numbers = #tpu.dot_dimension_numbers<[1], [0], [0], [1], [0, 0, 1, 1], [], []>} : vector<256x1152xbf16>, vector<1152x128xbf16>, vector<256x128xf32> -> vector<256x128xf32>
    %c0_87 = arith.constant 0 : index
    %c0_88 = arith.constant 0 : index
    %102 = vector.load %arg8[%c0_87, %c0_88] : memref<1x128xf32, #tpu.memory_space<vmem>>, vector<1x128xf32>
    %103 = vector.broadcast %102 : vector<1x128xf32> to vector<256x128xf32>
    %104 = arith.addf %101, %103 : vector<256x128xf32>
    %cst_89 = arith.constant 0.000000e+00 : f32
    %105 = vector.broadcast %cst_89 : f32 to vector<256x128xf32>
    %106 = arith.maximumf %104, %105 : vector<256x128xf32>
    %107 = vector.shape_cast %106 : vector<256x128xf32> to vector<16x16x128xf32>
    %c1_90 = arith.constant 1 : index
    %c1_91 = arith.constant 1 : index
    %c0_92 = arith.constant 0 : index
    %108 = vector.load %arg12[%c1_90, %c1_91, %c0_92] : memref<18x18x128xf32, #tpu.memory_space<vmem>>, vector<16x16x128xf32>
    tpu.vector_store %arg12[%c1_90, %c1_91, %c0_92], %107 {strides = array<i32>} : memref<18x18x128xf32, #tpu.memory_space<vmem>>, vector<16x16x128xf32>,
    %c0_93 = arith.constant 0 : index
    %c0_94 = arith.constant 0 : index
    %c0_95 = arith.constant 0 : index
    %109 = vector.load %arg12[%c0_93, %c0_94, %c0_95] : memref<18x18x128xf32, #tpu.memory_space<vmem>>, vector<16x16x128xf32>
    %110 = vector.shape_cast %109 : vector<16x16x128xf32> to vector<256x128xf32>
    %111 = arith.truncf %110 : vector<256x128xf32> to vector<256x128xbf16>
    %c0_96 = arith.constant 0 : index
    %c1_97 = arith.constant 1 : index
    %c0_98 = arith.constant 0 : index
    %112 = vector.load %arg12[%c0_96, %c1_97, %c0_98] : memref<18x18x128xf32, #tpu.memory_space<vmem>>, vector<16x16x128xf32>
    %113 = vector.shape_cast %112 : vector<16x16x128xf32> to vector<256x128xf32>
    %114 = arith.truncf %113 : vector<256x128xf32> to vector<256x128xbf16>
    %c0_99 = arith.constant 0 : index
    %c2_100 = arith.constant 2 : index
    %c0_101 = arith.constant 0 : index
    %115 = vector.load %arg12[%c0_99, %c2_100, %c0_101] : memref<18x18x128xf32, #tpu.memory_space<vmem>>, vector<16x16x128xf32>
    %116 = vector.shape_cast %115 : vector<16x16x128xf32> to vector<256x128xf32>
    %117 = arith.truncf %116 : vector<256x128xf32> to vector<256x128xbf16>
    %c1_102 = arith.constant 1 : index
    %c0_103 = arith.constant 0 : index
    %c0_104 = arith.constant 0 : index
    %118 = vector.load %arg12[%c1_102, %c0_103, %c0_104] : memref<18x18x128xf32, #tpu.memory_space<vmem>>, vector<16x16x128xf32>
    %119 = vector.shape_cast %118 : vector<16x16x128xf32> to vector<256x128xf32>
    %120 = arith.truncf %119 : vector<256x128xf32> to vector<256x128xbf16>
    %c1_105 = arith.constant 1 : index
    %c1_106 = arith.constant 1 : index
    %c0_107 = arith.constant 0 : index
    %121 = vector.load %arg12[%c1_105, %c1_106, %c0_107] : memref<18x18x128xf32, #tpu.memory_space<vmem>>, vector<16x16x128xf32>
    %122 = vector.shape_cast %121 : vector<16x16x128xf32> to vector<256x128xf32>
    %123 = arith.truncf %122 : vector<256x128xf32> to vector<256x128xbf16>
    %c1_108 = arith.constant 1 : index
    %c2_109 = arith.constant 2 : index
    %c0_110 = arith.constant 0 : index
    %124 = vector.load %arg12[%c1_108, %c2_109, %c0_110] : memref<18x18x128xf32, #tpu.memory_space<vmem>>, vector<16x16x128xf32>
    %125 = vector.shape_cast %124 : vector<16x16x128xf32> to vector<256x128xf32>
    %126 = arith.truncf %125 : vector<256x128xf32> to vector<256x128xbf16>
    %c2_111 = arith.constant 2 : index
    %c0_112 = arith.constant 0 : index
    %c0_113 = arith.constant 0 : index
    %127 = vector.load %arg12[%c2_111, %c0_112, %c0_113] : memref<18x18x128xf32, #tpu.memory_space<vmem>>, vector<16x16x128xf32>
    %128 = vector.shape_cast %127 : vector<16x16x128xf32> to vector<256x128xf32>
    %129 = arith.truncf %128 : vector<256x128xf32> to vector<256x128xbf16>
    %c2_114 = arith.constant 2 : index
    %c1_115 = arith.constant 1 : index
    %c0_116 = arith.constant 0 : index
    %130 = vector.load %arg12[%c2_114, %c1_115, %c0_116] : memref<18x18x128xf32, #tpu.memory_space<vmem>>, vector<16x16x128xf32>
    %131 = vector.shape_cast %130 : vector<16x16x128xf32> to vector<256x128xf32>
    %132 = arith.truncf %131 : vector<256x128xf32> to vector<256x128xbf16>
    %c2_117 = arith.constant 2 : index
    %c2_118 = arith.constant 2 : index
    %c0_119 = arith.constant 0 : index
    %133 = vector.load %arg12[%c2_117, %c2_118, %c0_119] : memref<18x18x128xf32, #tpu.memory_space<vmem>>, vector<16x16x128xf32>
    %134 = vector.shape_cast %133 : vector<16x16x128xf32> to vector<256x128xf32>
    %135 = arith.truncf %134 : vector<256x128xf32> to vector<256x128xbf16>
    %136 = tpu.concatenate %111, %114, %117, %120, %123, %126, %129, %132, %135 in 1 : vector<256x128xbf16>, vector<256x128xbf16>, vector<256x128xbf16>, vector<256x128xbf16>, vector<256x128xbf16>, vector<256x128xbf16>, vector<256x128xbf16>, vector<256x128xbf16>, vector<256x128xbf16> -> vector<256x1152xbf16>
    %c0_120 = arith.constant 0 : index
    %c0_121 = arith.constant 0 : index
    %137 = vector.load %arg9[%c0_120, %c0_121] : memref<1152x128xbf16, #tpu.memory_space<vmem>>, vector<1152x128xbf16>
    %cst_122 = arith.constant dense<0.000000e+00> : vector<256x128xf32>
    %138 = tpu.matmul %136, %137, %cst_122 {dimension_numbers = #tpu.dot_dimension_numbers<[1], [0], [0], [1], [0, 0, 1, 1], [], []>} : vector<256x1152xbf16>, vector<1152x128xbf16>, vector<256x128xf32> -> vector<256x128xf32>
    %c0_123 = arith.constant 0 : index
    %c0_124 = arith.constant 0 : index
    %139 = vector.load %arg10[%c0_123, %c0_124] : memref<1x128xf32, #tpu.memory_space<vmem>>, vector<1x128xf32>
    %140 = vector.broadcast %139 : vector<1x128xf32> to vector<256x128xf32>
    %141 = arith.addf %138, %140 : vector<256x128xf32>
    %142 = arith.addf %141, %69 : vector<256x128xf32>
    %cst_125 = arith.constant 0.000000e+00 : f32
    %143 = vector.broadcast %cst_125 : f32 to vector<256x128xf32>
    %144 = arith.maximumf %142, %143 : vector<256x128xf32>
    %145 = vector.shape_cast %144 : vector<256x128xf32> to vector<1x16x16x128xf32>
    %c0_126 = arith.constant 0 : index
    %c0_127 = arith.constant 0 : index
    %c0_128 = arith.constant 0 : index
    %c0_129 = arith.constant 0 : index
    %146 = vector.load %arg11[%c0_126, %c0_127, %c0_128, %c0_129] : memref<1x16x16x128xf32, #tpu.memory_space<vmem>>, vector<1x16x16x128xf32>
    tpu.vector_store %arg11[%c0_126, %c0_127, %c0_128, %c0_129], %145 {strides = array<i32>} : memref<1x16x16x128xf32, #tpu.memory_space<vmem>>, vector<1x16x16x128xf32>,
    return
  }
  func.func @transform_0(%arg0: i32) -> (i32, i32, i32, i32) {
    %c0_i32 = arith.constant 0 : i32
    %c0_i32_0 = arith.constant 0 : i32
    %c0_i32_1 = arith.constant 0 : i32
    %c0_i32_2 = arith.constant 0 : i32
    return %arg0, %c0_i32, %c0_i32_0, %c0_i32_1 : i32, i32, i32, i32
  }
  func.func @transform_1(%arg0: i32) -> (i32, i32) {
    %c0_i32 = arith.constant 0 : i32
    %c0_i32_0 = arith.constant 0 : i32
    %c0_i32_1 = arith.constant 0 : i32
    return %c0_i32, %c0_i32_0 : i32, i32
  }
  func.func @transform_2(%arg0: i32) -> (i32, i32) {
    %c0_i32 = arith.constant 0 : i32
    %c0_i32_0 = arith.constant 0 : i32
    %c0_i32_1 = arith.constant 0 : i32
    return %c0_i32, %c0_i32_0 : i32, i32
  }
  func.func @transform_3(%arg0: i32) -> (i32, i32) {
    %c0_i32 = arith.constant 0 : i32
    %c0_i32_0 = arith.constant 0 : i32
    %c0_i32_1 = arith.constant 0 : i32
    return %c0_i32, %c0_i32_0 : i32, i32
  }
  func.func @transform_4(%arg0: i32) -> (i32, i32) {
    %c0_i32 = arith.constant 0 : i32
    %c0_i32_0 = arith.constant 0 : i32
    %c0_i32_1 = arith.constant 0 : i32
    return %c0_i32, %c0_i32_0 : i32, i32
  }
  func.func @transform_5(%arg0: i32) -> (i32, i32) {
    %c0_i32 = arith.constant 0 : i32
    %c0_i32_0 = arith.constant 0 : i32
    %c0_i32_1 = arith.constant 0 : i32
    return %c0_i32, %c0_i32_0 : i32, i32
  }
  func.func @transform_6(%arg0: i32) -> (i32, i32) {
    %c0_i32 = arith.constant 0 : i32
    %c0_i32_0 = arith.constant 0 : i32
    %c0_i32_1 = arith.constant 0 : i32
    return %c0_i32, %c0_i32_0 : i32, i32
  }
  func.func @transform_7(%arg0: i32) -> (i32, i32) {
    %c0_i32 = arith.constant 0 : i32
    %c0_i32_0 = arith.constant 0 : i32
    %c0_i32_1 = arith.constant 0 : i32
    return %c0_i32, %c0_i32_0 : i32, i32
  }
  func.func @transform_8(%arg0: i32) -> (i32, i32) {
    %c0_i32 = arith.constant 0 : i32
    %c0_i32_0 = arith.constant 0 : i32
    %c0_i32_1 = arith.constant 0 : i32
    return %c0_i32, %c0_i32_0 : i32, i32
  }
  func.func @transform_9(%arg0: i32) -> (i32, i32) {
    %c0_i32 = arith.constant 0 : i32
    %c0_i32_0 = arith.constant 0 : i32
    %c0_i32_1 = arith.constant 0 : i32
    return %c0_i32, %c0_i32_0 : i32, i32
  }
  func.func @transform_10(%arg0: i32) -> (i32, i32, i32, i32) {
    %c0_i32 = arith.constant 0 : i32
    %c0_i32_0 = arith.constant 0 : i32
    %c0_i32_1 = arith.constant 0 : i32
    %c0_i32_2 = arith.constant 0 : i32
    return %arg0, %c0_i32, %c0_i32_0, %c0_i32_1 : i32, i32, i32, i32
  }
}

</mosaic_0001>

<bundles_post_ra>
// kernel: style_removal_forward.1
= control target key start
LH: loop header
LB: loop body
LE: loop exit
PB: predicated region body
PF: predicated region fallthrough
CT: control target
= control target key end

     0   :  { %15 = vsyncpa [#allocation4], 0  ;;  %s12346_s0 = inlined_call_operand.vmem [shape: f32[2,16,16,128], index: 0, kind: input, shape index: {}]   ;;  %s12347_s1 = inlined_call_operand.vmem [shape: f32[256,8], index: 1, kind: input, shape index: {}]   ;;  %s12348_s2 = inlined_call_operand.vmem [shape: f32[8,256], index: 2, kind: input, shape index: {}]   ;;  %s12349_s3 = inlined_call_operand.vmem [shape: f32[8,128], index: 3, kind: input, shape index: {}]   ;;  %s12350_s4 = inlined_call_operand.hbm [shape: bf16[1152,128], index: 4, kind: input, shape index: {}]   ;;  %s12351_s5 = inlined_call_operand.vmem [shape: f32[1,128], index: 5, kind: input, shape index: {}]   ;;  %s12352_s6 = inlined_call_operand.hbm [shape: bf16[1152,128], index: 6, kind: input, shape index: {}]   ;;  %s12353_s7 = inlined_call_operand.vmem [shape: f32[1,128], index: 7, kind: input, shape index: {}]   ;;  %s12354_s8 = inlined_call_operand.hbm [shape: bf16[1152,128], index: 8, kind: input, shape index: {}]   ;;  %s12355_s9 = inlined_call_operand.vmem [shape: f32[1,128], index: 9, kind: input, shape index: {}]   ;;  %s12356_s10 = inlined_call_operand.hbm [shape: f32[2,16,16,128], index: 10, kind: output, shape index: {}]  }
   0x1   :  { %16 = vsyncpa [#allocation7], 0 }
   0x2   :  { %17 = vsyncpa [#allocation5], 0 }
   0x3   :  { %19 = vsyncpa [#allocation5 + $0x1], 0  ;;  %s10119_s13 = smov 0   ;;  %s10121_s14 = smov 0  }
   0x4   :  { %s10123_s15 = smov 0   ;;  %s10125_s16 = smov 0  }
   0x5 LB: > { %12388 = sst [smem:[#allocation13_spill]] %s10040_s13  ;;  %s10140_s17 = sadd.s32 4294967295, %s10052_s16   ;;  %s10052_s16 = sphi %s10125_s16, %s12457_s16   ;;  %s10048_s15 = sphi %s10123_s15, %s12459_s15   ;;  %s10044_s14 = sphi %s10121_s14, %s12461_s14   ;;  %s10040_s13 = sphi %s10119_s13, %s12460_s13  }
   0x6   : > { %12389 = sst [smem:[#allocation14_spill]] %s10048_s15  ;;  %s7318_s18 = sadd.s32 4294967294, %s10052_s16  }
   0x7   : > { %12390 = sst [smem:[#allocation15_spill]] %s10052_s16  ;;  %s10144_s19 = sadd.s32 1, %s10052_s16  }
   0x8   : > { %12391 = sst [smem:[#allocation16_spill]] %s10144_s19  ;;  %s247_s20 = sadd.s32 1, %s10048_s15 }
   0x9   : > { %s244_s21 = ssub.s32 %s10052_s16, %s10144_s19  ;;  %p257_p0 = scmp.ne.s32.totalorder %s10048_s15, %s10044_s14 }
   0xa   : > { %p245_p1 = scmp.eq.s32.totalorder %s244_s21, 0  ;;  %p258_p2 = scmp.eq.s32.totalorder %s10140_s17, 1 }
   0xb   : > { %p263_p3 = scmp.ne.s32.totalorder %s10044_s14, %s10040_s13  ;;  %p264_p4 = scmp.eq.s32.totalorder %s7318_s18, 1 }
   0xc   : > { %s10155_s22 = scalar_select %p245_p1, %s10048_s15, %s247_s20  }
   0xd   : > { %p10157_p5 = por %p258_p2, %p257_p0  ;;  %p10161_p6 = por %p264_p4, %p263_p3 }
   0xe   : > { %12392 = sst [smem:[#allocation17_spill]] %s10155_s22  ;;  %p7319_p7 = scmp.ge.s32.totalorder %s10052_s16, 1 }
   0xf   : > { %s12393_s23 = scalar_select %p10157_p5, 1, 0 }
  0x10   : > { %s12394_s24 = scalar_select %p10161_p6, 1, 0 }
  0x11   : > { %p271_p8 = scmp.lt.s32.totalorder %s10052_s16, 3  ;;  %p12358_p9 = scmp.eq.s32.totalorder %s10140_s17, 0 }
  0x12   : > { %12395 = sst [smem:[#allocation18_spill]] %s12394_s24  ;;  %s10054_s26 = smov [#allocation6]  }
  0x13   : > { %p10168_p10 = pnand %p7319_p7, %p271_p8  ;;  %s308_s27 = sshll.u32 %s10054_s26, 4  ;;  %s10174_s27 = int_to_ptr.vmem [resolvable:$true] %s308_s27 }
  0x14   : > { %s10055_s29 = smov [#allocation3]   ;;  %s10056_s11 = smov [#allocation8]  }
  0x15   : > { %s12396_s25 = scalar_select %p10168_p10, 1, 0 }
  0x16   : > { %p9361_p11 = pneg %p10168_p10  ;;  %s292_s30 = sshll.u32 %s10055_s29, 4  ;;  %s10182_s30 = int_to_ptr.vmem [resolvable:$true] %s292_s30 }
  0x17   : > { %s10184_s12 = sshll.u32 %s10056_s11, 4  ;;  %s9898_s21 = scalar_lea.hbm %s12352_s6, 9216  ;;  %s325_s12 = int_to_ptr.vmem [resolvable:$true] %s10184_s12 }
  0x18   : > { %p10178_p12 = pnand %p12358_p9, %p9361_p11  ;;  %p9899_p13 = scmp.ne.s32.totalorder %s12352_s6, %s9898_s21 }
  0x19   : > { %p9905_p3 = scmp.lt.u32.totalorder %s9898_s21, %s12352_s6 }
  0x1a   : > { %p10194_p0 = pneg %p10178_p12 }
  0x1c   : > { %p9901_p1 = pnand %p10194_p0, %p9899_p13 }
  0x1e   : > { %p9902_p2 = pneg %p9901_p1 }
  0x20   : > { %p9907_p4 = pnand %p9905_p3, %p9902_p2 }
  0x22   : > { %9910 = shalt.err (!%p9907_p4)
}
  0x23   : > { %s9911_s22 = scalar_lea.vmem %s10174_s27, 9216  ;;  %p9919_p9 = scmp.lt.s32.totalorder %s10174_s27, %s10174_s27 }
  0x24   : > { %p9912_p7 = scmp.ne.s32.totalorder %s10174_s27, %s9911_s22  ;;  %p9920_p6 = scmp.lt.s32.totalorder %s9911_s22, %s9911_s22 }
  0x26   : > { %p9914_p8 = pnand %p9912_p7, %p10194_p0  ;;  %p9921_p13 = por %p9920_p6, %p9919_p9 }
  0x28   : > { %p9915_p11 = pneg %p9914_p8 }
  0x2a   : > { %p9922_p1 = pnand %p9921_p13, %p9915_p11 }
  0x2c   : > { %9925 = shalt.err (!%p9922_p1)
}
  0x2d   : > { %s10057_s18 = smov 64   ;;  %s10058_s20 = smov 4  }
  0x2e   : > { %9367 = dma.hbm_to_vmem [thread:$0]  (!%p10178_p12), %s12352_s6, 9216, %s10174_s27, [#allocation7], %s10057_s18, %s10057_s18, %s10058_s20  }
  0x2f   : > { %s9926_s22 = scalar_lea.hbm %s12350_s4, 9216 }
  0x30   : > { %p9927_p6 = scmp.ne.s32.totalorder %s12350_s4, %s9926_s22  ;;  %p9933_p3 = scmp.lt.u32.totalorder %s9926_s22, %s12350_s4 }
  0x32   : > { %p9929_p9 = pnand %p9927_p6, %p10194_p0 }
  0x34   : > { %p9930_p2 = pneg %p9929_p9 }
  0x36   : > { %p9935_p4 = pnand %p9933_p3, %p9930_p2 }
  0x38   : > { %9938 = shalt.err (!%p9935_p4)
}
  0x39   : > { %s9939_s27 = scalar_lea.vmem %s10182_s30, 9216  ;;  %p9947_p13 = scmp.lt.s32.totalorder %s10182_s30, %s10182_s30 }
  0x3a   : > { %p9940_p7 = scmp.ne.s32.totalorder %s10182_s30, %s9939_s27  ;;  %p9948_p1 = scmp.lt.s32.totalorder %s9939_s27, %s9939_s27 }
  0x3c   : > { %p9942_p8 = pnand %p9940_p7, %p10194_p0  ;;  %p9949_p6 = por %p9948_p1, %p9947_p13 }
  0x3e   : > { %p9943_p11 = pneg %p9942_p8 }
  0x40   : > { %p9950_p9 = pnand %p9949_p6, %p9943_p11 }
  0x42   : > { %9953 = shalt.err (!%p9950_p9)
}
  0x43   : > { %9364 = dma.hbm_to_vmem [thread:$0]  (!%p10178_p12), %s12350_s4, 9216, %s10182_s30, [#allocation4], %s10057_s18, %s10057_s18, %s10058_s20  }
  0x44   : > { %s9954_s21 = scalar_lea.hbm %s12354_s8, 9216 }
  0x45   : > { %p9955_p2 = scmp.ne.s32.totalorder %s12354_s8, %s9954_s21  ;;  %p9961_p7 = scmp.lt.u32.totalorder %s9954_s21, %s12354_s8 }
  0x47   : > { %p9957_p3 = pnand %p9955_p2, %p10194_p0 }
  0x49   : > { %p9958_p4 = pneg %p9957_p3 }
  0x4b   : > { %p9963_p8 = pnand %p9961_p7, %p9958_p4 }
  0x4d   : > { %9966 = shalt.err (!%p9963_p8)
}
  0x4e   : > { %s9967_s27 = scalar_lea.vmem %s325_s12, 9216  ;;  %p9975_p6 = scmp.lt.s32.totalorder %s325_s12, %s325_s12 }
  0x4f   : > { %p9968_p11 = scmp.ne.s32.totalorder %s325_s12, %s9967_s27  ;;  %p9976_p9 = scmp.lt.s32.totalorder %s9967_s27, %s9967_s27 }
  0x51   : > { %p9970_p13 = pnand %p9968_p11, %p10194_p0  ;;  %p9977_p5 = por %p9976_p9, %p9975_p6 }
  0x53   : > { %p9971_p1 = pneg %p9970_p13 }
  0x55   : > { %p9978_p10 = pnand %p9977_p5, %p9971_p1 }
  0x57   : > { %9981 = shalt.err (!%p9978_p10)
}
  0x58   : > { %9370 = dma.hbm_to_vmem [thread:$0]  (!%p10178_p12), %s12354_s8, 9216, %s325_s12, [#allocation7], %s10057_s18, %s10057_s18, %s10058_s20  }
  0x59   : > { %p12399_p2 = scmp.ne.s32.totalorder %s12396_s25, 0 }
  0x5b   : > { %351 = sbr.rel (%p12399_p2) target bundleno = 2196 (0x894), region = 60 }
  0x62   : > { %p12400_p0 = scmp.eq.s32.totalorder %s10140_s17, 0 }
  0x64   : > { %10027 = dma.done.wait (%p12400_p0), [#allocation4], 9216   ;;  %p12401_p3 = pmov %p12400_p0 }
  0x65   : > { %p12402_p5 = pmov %p12400_p0 }
  0x66   : > { %10029 = vsyncadd (%p12401_p3), [#allocation4], 4294958080 }
  0x67   : > { %10031 = dma.done.wait (%p12402_p5), [#allocation7], 18432   ;;  %p12403_p10 = pmov %p12400_p0 }
  0x68   : > { %p397_p4 = scmp.lt.s32.totalorder %s10140_s17, 1  ;;  %v436_v25 = vld [vmem:[%s12348_s2 + $0x8] sm:$0xff]  ;;  %v435_v49 = vld [vmem:[%s12348_s2] sm:$0xff]  ;;  %vm541_vm0 = vcmask 64512   ;;  %v9422_v51 = vld [vmem:[#allocation3 + $0x40] sm:$0xff]   ;;  %s394_s13 = sand.u32 1, %s10044_s14  }
  0x69   : > { %10033 = vsyncadd (%p12403_p10), [#allocation7], 4294948864  ;;  %501 = vmatprep.mubr.f32.mxu0 %v436_v25  ;;  %v507_v50 = vld [vmem:[%s12347_s1] sm:$0xff]  ;;  %v9423_v52 = vld [vmem:[#allocation3] sm:$0xff]   ;;  %s7620_s12 = sshll.u32 %s10140_s17, 12  ;;  %p12452_p7 = scmp.ne.s32.totalorder %s12393_s23, 0 }
  0x6a   : > { %s398_s15 = scalar_select %p397_p4, %s10140_s17, 1  ;;  %9107 = vmatprep.mubr.msk.f32.mxu1 %vm541_vm0, %v507_v50  ;;  %v9424_v53 = vld [vmem:[#allocation3 + $0x48] sm:$0xff]   ;;  %v9426_v55 = vld [vmem:[#allocation3 + $0x50] sm:$0xff]   ;;  %v9429_v57 = vld [vmem:[#allocation3 + $0x58] sm:$0xff]  }
  0x6b   : > { %v9425_v54 = vld [vmem:[#allocation3 + $0x8] sm:$0xff]   ;;  %v9427_v56 = vld [vmem:[#allocation3 + $0x10] sm:$0xff]   ;;  %v9431_v58 = vld [vmem:[#allocation3 + $0x18] sm:$0xff]   ;;  %s12296_s19 = scalar_lea.hbm %s12356_s10, %s7620_s12  ;;  %s12305_s17 = scalar_lea.sflag [#allocation5], %s394_s13 }
  0x6c   : > { %s7619_s28 = sshll.u32 %s398_s15, 8  ;;  %v9433_v59 = vld [vmem:[#allocation3 + $0x60] sm:$0xff]   ;;  %v9437_v61 = vld [vmem:[#allocation3 + $0x68] sm:$0xff]   ;;  %v9441_v63 = vld [vmem:[#allocation3 + $0x70] sm:$0xff]   ;;  %s7328_s15 = sshll.u32 %s394_s13, 8 }
  0x6d   : > { %s10281_s18 = scalar_lea.vmem %s12346_s0, %s7619_s28  ;;  %v9435_v60 = vld [vmem:[#allocation3 + $0x20] sm:$0xff]   ;;  %v9439_v62 = vld [vmem:[#allocation3 + $0x28] sm:$0xff]   ;;  %s12202_s28 = scalar_lea.vmem [#allocation9], %s7328_s15 }
  0x6e   : > { %v419_v0 = vld [vmem:[%s10281_s18 + $0x80] sm:$0xff]  ;;  %v420_v1 = vld [vmem:[%s10281_s18 + $0x88] sm:$0xff]  ;;  %v421_v5 = vld [vmem:[%s10281_s18 + $0x90] sm:$0xff]  ;;  %s7225_s25 = sshll.u32 %s12202_s28, 4  ;;  %s10061_s21 = smov [#allocation9]   ;;  %s12298_s25 = int_to_ptr.vmem [resolvable:$true] %s7225_s25 }
  0x6f   : > { %v403_v2 = vld [vmem:[%s10281_s18] sm:$0xff]  ;;  %v9299_v3 = vpack.c.bf16 %v420_v1, %v419_v0  ;;  %v404_v4 = vld [vmem:[%s10281_s18 + $0x8] sm:$0xff]  ;;  %v422_v6 = vld [vmem:[%s10281_s18 + $0x98] sm:$0xff]  ;;  %s9982_s24 = scalar_lea.vmem %s12298_s25, 4096  ;;  %s9986_s26 = sshll.u32 %s10061_s21, 4  ;;  %s9987_s26 = int_to_ptr.vmem [resolvable:$false] %s9986_s26 }
  0x70   : > { %v9301_v7 = vpack.c.bf16 %v404_v4, %v403_v2  ;;  %v9303_v8 = vpack.c.bf16 %v422_v6, %v421_v5  ;;  %v405_v9 = vld [vmem:[%s10281_s18 + $0x10] sm:$0xff]  ;;  %v406_v10 = vld [vmem:[%s10281_s18 + $0x18] sm:$0xff]  ;;  %v423_v11 = vld [vmem:[%s10281_s18 + $0xa0] sm:$0xff]  ;;  %p9983_p12 = scmp.ne.s32.totalorder %s12298_s25, %s9982_s24  ;;  %s9988_s29 = scalar_lea.vmem %s9987_s26, 8192 }
  0x71   : > { %9300 = vmatprep.subr.bf16.mxu0 %v9299_v3  ;;  %v424_v12 = vld [vmem:[%s10281_s18 + $0xa8] sm:$0xff]  ;;  %v9305_v13 = vpack.c.bf16 %v406_v10, %v405_v9  ;;  %v407_v15 = vld [vmem:[%s10281_s18 + $0x20] sm:$0xff]  ;;  %v425_v17 = vld [vmem:[%s10281_s18 + $0xb0] sm:$0xff]  ;;  %p9989_p13 = scmp.lt.s32.totalorder %s12298_s25, %s9987_s26  ;;  %p9990_p1 = scmp.lt.s32.totalorder %s9988_s29, %s9982_s24 }
  0x72   : > { %9302 = vmatpush3.bf16.msra.mxu0 %v9301_v7  ;;  %v9307_v14 = vpack.c.bf16 %v424_v12, %v423_v11  ;;  %v408_v16 = vld [vmem:[%s10281_s18 + $0x28] sm:$0xff]  ;;  %v426_v18 = vld [vmem:[%s10281_s18 + $0xb8] sm:$0xff]  ;;  %v409_v21 = vld [vmem:[%s10281_s18 + $0x30] sm:$0xff]  ;;  %p9984_p8 = pnand %p9983_p12, %p12452_p7 }
  0x73   : > { %9304 = vmatprep.subr.bf16.mxu0 %v9303_v8  ;;  %v9309_v19 = vpack.c.bf16 %v408_v16, %v407_v15  ;;  %v9311_v20 = vpack.c.bf16 %v426_v18, %v425_v17  ;;  %v410_v22 = vld [vmem:[%s10281_s18 + $0x38] sm:$0xff]  ;;  %v427_v23 = vld [vmem:[%s10281_s18 + $0xc0] sm:$0xff]  ;;  %v428_v24 = vld [vmem:[%s10281_s18 + $0xc8] sm:$0xff]  ;;  %p9991_p6 = por %p9990_p1, %p9989_p13 }
  0x74   : > { %v411_v26 = vld [vmem:[%s10281_s18 + $0x40] sm:$0xff]  ;;  %v412_v27 = vld [vmem:[%s10281_s18 + $0x48] sm:$0xff]  ;;  %v9313_v28 = vpack.c.bf16 %v410_v22, %v409_v21  ;;  %v429_v29 = vld [vmem:[%s10281_s18 + $0xd0] sm:$0xff]  ;;  %v9315_v31 = vpack.c.bf16 %v428_v24, %v427_v23  ;;  %p9985_p11 = pneg %p9984_p8 }
  0x75   : > { %v430_v30 = vld [vmem:[%s10281_s18 + $0xd8] sm:$0xff]  ;;  %v413_v32 = vld [vmem:[%s10281_s18 + $0x50] sm:$0xff]  ;;  %v9317_v34 = vpack.c.bf16 %v412_v27, %v411_v26  ;;  %v431_v35 = vld [vmem:[%s10281_s18 + $0xe0] sm:$0xff] }
  0x76   : > { %9306 = vmatpush3.bf16.msra.mxu0 %v9305_v13  ;;  %v414_v33 = vld [vmem:[%s10281_s18 + $0x58] sm:$0xff]  ;;  %v432_v36 = vld [vmem:[%s10281_s18 + $0xe8] sm:$0xff]  ;;  %v9319_v37 = vpack.c.bf16 %v430_v30, %v429_v29  ;;  %v415_v38 = vld [vmem:[%s10281_s18 + $0x60] sm:$0xff]  ;;  %p9992_p9 = pnand %p9991_p6, %p9985_p11 }
  0x77   : > { %9308 = vmatprep.subr.bf16.mxu0 %v9307_v14  ;;  %v416_v39 = vld [vmem:[%s10281_s18 + $0x68] sm:$0xff]  ;;  %v9321_v40 = vpack.c.bf16 %v414_v33, %v413_v32  ;;  %v433_v41 = vld [vmem:[%s10281_s18 + $0xf0] sm:$0xff]  ;;  %v434_v42 = vld [vmem:[%s10281_s18 + $0xf8] sm:$0xff]  ;;  %v9323_v43 = vpack.c.bf16 %v432_v36, %v431_v35 }
  0x78   : > { %v417_v44 = vld [vmem:[%s10281_s18 + $0x70] sm:$0xff]  ;;  %v418_v45 = vld [vmem:[%s10281_s18 + $0x78] sm:$0xff]  ;;  %v9325_v46 = vpack.c.bf16 %v416_v39, %v415_v38  ;;  %v9327_v47 = vpack.c.bf16 %v434_v42, %v433_v41  ;;  %v9443_v0 = vld [vmem:[#allocation3 + $0x30] sm:$0xff]  }
  0x79   : > { %v9329_v48 = vpack.c.bf16 %v418_v45, %v417_v44  ;;  %v539_v3 = vld [vmem:[%s12349_s3] sm:$0xff]  ;;  %v9428_v6 = vld [vmem:[#allocation3 + $0xc0] sm:$0xff]   ;;  %v508_v7 = vld [vmem:[%s12347_s1 + $0x8] sm:$0xff] }
  0x7a   : > { %9310 = vmatpush3.bf16.msra.mxu0 %v9309_v19  ;;  %v9430_v8 = vld [vmem:[#allocation3 + $0x80] sm:$0xff]   ;;  %v9432_v10 = vld [vmem:[#allocation3 + $0xc8] sm:$0xff]   ;;  %v511_v13 = vld [vmem:[%s12347_s1 + $0x20] sm:$0xff] }
  0x7b   : > { %9312 = vmatprep.subr.bf16.mxu0 %v9311_v20  ;;  %v509_v9 = vld [vmem:[%s12347_s1 + $0x10] sm:$0xff]  ;;  %v510_v11 = vld [vmem:[%s12347_s1 + $0x18] sm:$0xff]  ;;  %v9436_v14 = vld [vmem:[#allocation3 + $0xd0] sm:$0xff]  }
  0x7c   : > { %v9434_v12 = vld [vmem:[#allocation3 + $0x88] sm:$0xff]   ;;  %v512_v15 = vld [vmem:[%s12347_s1 + $0x28] sm:$0xff]  ;;  %v9438_v16 = vld [vmem:[#allocation3 + $0x90] sm:$0xff]  }
  0x7d   : > { %v513_v17 = vld [vmem:[%s12347_s1 + $0x30] sm:$0xff]  ;;  %v9440_v18 = vld [vmem:[#allocation3 + $0xd8] sm:$0xff]   ;;  %v514_v19 = vld [vmem:[%s12347_s1 + $0x38] sm:$0xff] }
  0x7e   : > { %9314 = vmatpush3.bf16.msra.mxu0 %v9313_v28  ;;  %v9442_v20 = vld [vmem:[#allocation3 + $0x98] sm:$0xff]   ;;  %v515_v21 = vld [vmem:[%s12347_s1 + $0x40] sm:$0xff]  ;;  %v9444_v22 = vld [vmem:[#allocation3 + $0xe0] sm:$0xff]  }
  0x7f   : > { %9316 = vmatprep.subr.bf16.mxu0 %v9315_v31  ;;  %v516_v23 = vld [vmem:[%s12347_s1 + $0x48] sm:$0xff]  ;;  %v517_v24 = vld [vmem:[%s12347_s1 + $0x50] sm:$0xff]  ;;  %v518_v25 = vld [vmem:[%s12347_s1 + $0x58] sm:$0xff] }
  0x80   : > { %v519_v26 = vld [vmem:[%s12347_s1 + $0x60] sm:$0xff]  ;;  %v520_v27 = vld [vmem:[%s12347_s1 + $0x68] sm:$0xff]  ;;  %v521_v28 = vld [vmem:[%s12347_s1 + $0x70] sm:$0xff] }
  0x81   : > { %v522_v29 = vld [vmem:[%s12347_s1 + $0x78] sm:$0xff]  ;;  %v523_v30 = vld [vmem:[%s12347_s1 + $0x80] sm:$0xff]  ;;  %v524_v31 = vld [vmem:[%s12347_s1 + $0x88] sm:$0xff] }
  0x82   : > { %9318 = vmatpush3.bf16.msra.mxu0 %v9317_v34  ;;  %v525_v32 = vld [vmem:[%s12347_s1 + $0x90] sm:$0xff]  ;;  %v526_v33 = vld [vmem:[%s12347_s1 + $0x98] sm:$0xff]  ;;  %v527_v34 = vld [vmem:[%s12347_s1 + $0xa0] sm:$0xff] }
  0x83   : > { %9320 = vmatprep.subr.bf16.mxu0 %v9319_v37  ;;  %v528_v35 = vld [vmem:[%s12347_s1 + $0xa8] sm:$0xff]  ;;  %v529_v36 = vld [vmem:[%s12347_s1 + $0xb0] sm:$0xff]  ;;  %v530_v37 = vld [vmem:[%s12347_s1 + $0xb8] sm:$0xff] }
  0x84   : > { %v531_v38 = vld [vmem:[%s12347_s1 + $0xc0] sm:$0xff]  ;;  %v532_v39 = vld [vmem:[%s12347_s1 + $0xc8] sm:$0xff]  ;;  %v534_v41 = vld [vmem:[%s12347_s1 + $0xd8] sm:$0xff] }
  0x85   : > { %v535_v42 = vld [vmem:[%s12347_s1 + $0xe0] sm:$0xff]  ;;  %v537_v44 = vld [vmem:[%s12347_s1 + $0xf0] sm:$0xff]  ;;  %v538_v45 = vld [vmem:[%s12347_s1 + $0xf8] sm:$0xff] }
  0x86   : > { %9322 = vmatpush3.bf16.msra.mxu0 %v9321_v40  ;;  %v533_v40 = vld [vmem:[%s12347_s1 + $0xd0] sm:$0xff] }
  0x87   : > { %9324 = vmatprep.subr.bf16.mxu0 %v9323_v43  ;;  %v536_v43 = vld [vmem:[%s12347_s1 + $0xe8] sm:$0xff] }
  0x8a   : > { %9326 = vmatpush3.bf16.msra.mxu0 %v9325_v46  ;;  %v10059_v46 = vmov 0.0  }
  0x8b   : > { %9328 = vmatprep.subr.bf16.mxu0 %v9327_v47  ;;  %899 = vst [vmem:[#allocation2 + $0x20] sm:$0xff] %v10059_v46  ;;  %900 = vst [vmem:[#allocation2 + $0x28] sm:$0x3] %v10059_v46  ;;  %v9445_v47 = vld [vmem:[#allocation3 + $0x78] sm:$0xff]  }
  0x8c   : > { %895 = vst [vmem:[#allocation2] sm:$0xff] %v10059_v46  ;;  %896 = vst [vmem:[#allocation2 + $0x8] sm:$0xff] %v10059_v46 }
  0x8d   : > { %897 = vst [vmem:[#allocation2 + $0x10] sm:$0x3] %v10059_v46  ;;  %898 = vst [vmem:[#allocation2 + $0x18] sm:$0xff] %v10059_v46 }
  0x8e   : > { %9330 = vmatpush3.bf16.msra.mxu0 %v9329_v48  ;;  %901 = vst [vmem:[#allocation2 + $0x30] sm:$0xff] %v10059_v46  ;;  %902 = vst [vmem:[#allocation2 + $0x38] sm:$0xff] %v10059_v46  ;;  %v9446_v48 = vld [vmem:[#allocation3 + $0xa0] sm:$0xff]  }
  0x8f   : > { %7689 = vmatprep.subr.bf16.mxu0 %v9422_v51  ;;  %903 = vst [vmem:[#allocation2 + $0x40] sm:$0x3] %v10059_v46  ;;  %904 = vst [vmem:[#allocation2 + $0x48] sm:$0xff] %v10059_v46 }
  0x90   : > { %905 = vst [vmem:[#allocation2 + $0x50] sm:$0xff] %v10059_v46  ;;  %906 = vst [vmem:[#allocation2 + $0x58] sm:$0x3] %v10059_v46 }
  0x91   : > { %502 = vmatmul.mubr.f32.vlgmr.msra.gmra.mrb[0].mxu0 %v435_v49  ;;  %907 = vst [vmem:[#allocation2 + $0x60] sm:$0xff] %v10059_v46  ;;  %908 = vst [vmem:[#allocation2 + $0x68] sm:$0xff] %v10059_v46  ;;  %v9447_v49 = vld [vmem:[#allocation3 + $0x38] sm:$0xff]  }
  0x92   : > { %7690 = vmatpush3.bf16.msra.mxu0 %v9423_v52  ;;  %909 = vst [vmem:[#allocation2 + $0x70] sm:$0x3] %v10059_v46  ;;  %910 = vst [vmem:[#allocation2 + $0x78] sm:$0xff] %v10059_v46 }
  0x93   : > { %7691 = vmatprep.subr.bf16.mxu0 %v9424_v53  ;;  %911 = vst [vmem:[#allocation2 + $0x80] sm:$0xff] %v10059_v46  ;;  %912 = vst [vmem:[#allocation2 + $0x88] sm:$0x3] %v10059_v46  ;;  %v1030_v50 = vld [vmem:[#allocation2 + $0x1] sm:$0xff]  ;;  %v9448_v53 = vld [vmem:[#allocation3 + $0xe8] sm:$0xff]  }
  0x94   : > { %913 = vst [vmem:[#allocation2 + $0x90] sm:$0xff] %v10059_v46  ;;  %914 = vst [vmem:[#allocation2 + $0x98] sm:$0xff] %v10059_v46  ;;  %v1031_v51 = vld [vmem:[#allocation2 + $0x9] sm:$0xff] }
  0x95   : > { %915 = vst [vmem:[#allocation2 + $0xa0] sm:$0x3] %v10059_v46  ;;  %916 = vst [vmem:[#allocation2 + $0xa8] sm:$0xff] %v10059_v46  ;;  %v1062_v52 = vpack.c.bf16 %v1031_v51, %v1030_v50 }
  0x96   : > { %7692 = vmatpush3.bf16.msra.mxu0 %v9425_v54  ;;  %917 = vst [vmem:[#allocation2 + $0xb0] sm:$0xff] %v10059_v46  ;;  %918 = vst [vmem:[#allocation2 + $0xb8] sm:$0x3] %v10059_v46  ;;  %v9449_v54 = vld [vmem:[#allocation3 + $0xa8] sm:$0xff]  }
  0x97   : > { %7693 = vmatprep.subr.bf16.mxu0 %v9426_v55  ;;  %919 = vst [vmem:[#allocation2 + $0xc0] sm:$0xff] %v10059_v46  ;;  %920 = vst [vmem:[#allocation2 + $0xc8] sm:$0xff] %v10059_v46  ;;  %2030 = vmatprep.mubr.bf16.mxu0 %v1062_v52  ;;  %v10060_v55 = vmov 0.0|0.0  }
  0x98   : > { %921 = vst [vmem:[#allocation2 + $0xd0] sm:$0x3] %v10059_v46  ;;  %922 = vst [vmem:[#allocation2 + $0xd8] sm:$0xff] %v10059_v46 }
  0x99   : > { %923 = vst [vmem:[#allocation2 + $0xe0] sm:$0xff] %v10059_v46  ;;  %924 = vst [vmem:[#allocation2 + $0xe8] sm:$0x3] %v10059_v46 }
  0x9a   : > { %7694 = vmatpush3.bf16.msra.mxu0 %v9427_v56  ;;  %925 = vst [vmem:[#allocation2 + $0xf0] sm:$0xff] %v10059_v46  ;;  %926 = vst [vmem:[#allocation2 + $0xf8] sm:$0xff] %v10059_v46  ;;  %v9450_v56 = vld [vmem:[#allocation3 + $0x140] sm:$0xff]  }
  0x9b   : > { %7695 = vmatprep.subr.bf16.mxu0 %v9429_v57  ;;  %927 = vst [vmem:[#allocation2 + $0x100] sm:$0x3] %v10059_v46  ;;  %928 = vst [vmem:[#allocation2 + $0x108] sm:$0xff] %v10059_v46  ;;  %v9451_v57 = vld [vmem:[#allocation3 + $0xf0] sm:$0xff]  }
  0x9c   : > { %929 = vst [vmem:[#allocation2 + $0x110] sm:$0xff] %v10059_v46  ;;  %930 = vst [vmem:[#allocation2 + $0x118] sm:$0x3] %v10059_v46 }
  0x9d   : > { %931 = vst [vmem:[#allocation2 + $0x120] sm:$0xff] %v10059_v46  ;;  %932 = vst [vmem:[#allocation2 + $0x128] sm:$0xff] %v10059_v46 }
  0x9e   : > { %7696 = vmatpush3.bf16.msra.mxu0 %v9431_v58  ;;  %933 = vst [vmem:[#allocation2 + $0x130] sm:$0x3] %v10059_v46  ;;  %934 = vst [vmem:[#allocation2 + $0x138] sm:$0xff] %v10059_v46  ;;  %v9453_v58 = vld [vmem:[#allocation3 + $0xb0] sm:$0xff]  }
  0x9f   : > { %7697 = vmatprep.subr.bf16.mxu0 %v9433_v59  ;;  %935 = vst [vmem:[#allocation2 + $0x140] sm:$0xff] %v10059_v46  ;;  %936 = vst [vmem:[#allocation2 + $0x148] sm:$0x3] %v10059_v46  ;;  %v9452_v59 = vld [vmem:[#allocation3 + $0x100] sm:$0xff]  }
  0xa0   : > { %937 = vst [vmem:[#allocation2 + $0x150] sm:$0xff] %v10059_v46  ;;  %938 = vst [vmem:[#allocation2 + $0x158] sm:$0xff] %v10059_v46 }
  0xa1   : > { %939 = vst [vmem:[#allocation2 + $0x160] sm:$0x3] %v10059_v46  ;;  %940 = vst [vmem:[#allocation2 + $0x168] sm:$0xff] %v10059_v46 }
  0xa2   : > { %7698 = vmatpush3.bf16.msra.mxu0 %v9435_v60  ;;  %941 = vst [vmem:[#allocation2 + $0x170] sm:$0xff] %v10059_v46  ;;  %942 = vst [vmem:[#allocation2 + $0x178] sm:$0x3] %v10059_v46  ;;  %v9454_v60 = vld [vmem:[#allocation3 + $0xf8] sm:$0xff]  }
  0xa3   : > { %7699 = vmatprep.subr.bf16.mxu0 %v9437_v61  ;;  %943 = vst [vmem:[#allocation2 + $0x180] sm:$0xff] %v10059_v46  ;;  %944 = vst [vmem:[#allocation2 + $0x188] sm:$0xff] %v10059_v46  ;;  %v9455_v61 = vld [vmem:[#allocation3 + $0xb8] sm:$0xff]  }
  0xa4   : > { %945 = vst [vmem:[#allocation2 + $0x190] sm:$0x3] %v10059_v46  ;;  %946 = vst [vmem:[#allocation2 + $0x198] sm:$0xff] %v10059_v46 }
  0xa5   : > { %947 = vst [vmem:[#allocation2 + $0x1a0] sm:$0xff] %v10059_v46  ;;  %948 = vst [vmem:[#allocation2 + $0x1a8] sm:$0x3] %v10059_v46  ;;  %v9467_v46 = vld [vmem:[#allocation3 + $0x1c8] sm:$0xff]  }
  0xa6   : > { %7700 = vmatpush3.bf16.msra.mxu0 %v9439_v62  ;;  %v9456_v62 = vld [vmem:[#allocation3 + $0x148] sm:$0xff]  }
  0xa7   : > { %7701 = vmatprep.subr.bf16.mxu0 %v9441_v63  ;;  %v9457_v63 = vld [vmem:[#allocation3 + $0x108] sm:$0xff]  }
  0xaa   : > { %7702 = vmatpush3.bf16.msra.mxu0 %v9443_v0  ;;  %v9458_v0 = vld [vmem:[#allocation3 + $0x150] sm:$0xff]  }
  0xab   : > { %7703 = vmatprep.subr.bf16.mxu0 %v9445_v47  ;;  %v9837_v47 = vld [vmem:[%s10281_s18 + $0x30] sm:$0xff] }
  0xae   : > { %7704 = vmatpush3.bf16.msra.mxu0 %v9447_v49 }
  0xaf   : > { %7913 = vmatprep.subr.bf16.mxu0 %v9450_v56 }
  0xb1   : > { %2031 = vmatmul.mubr.bf16.vlgmr.msra.gmra.mrb[4].mxu0 %v10060_v55  ;;  %v9838_v55 = vld [vmem:[%s10281_s18 + $0x48] sm:$0xff] }
  0xb2   : > { %7914 = vmatpush3.bf16.msra.mxu0 %v9452_v59 }
  0xb3   : > { %7915 = vmatprep.subr.bf16.mxu0 %v9456_v62 }
  0xb6   : > { %7916 = vmatpush3.bf16.msra.mxu0 %v9457_v63 }
  0xb7   : > { %7917 = vmatprep.subr.bf16.mxu0 %v9458_v0 }
 0x164   : > { %v7653_v1 = vpop.f32.mrb[0].mxu0 }
 0x165   : > { %v7654_v2 = vpop.f32.mrb[1].mxu0 }
 0x166   : > { %v7655_v4 = vadd.f32 %v7654_v2, %v7653_v1  ;;  %v9459_v1 = vld [vmem:[#allocation3 + $0x110] sm:$0xff]   ;;  %v9460_v2 = vld [vmem:[#allocation3 + $0x158] sm:$0xff]  }
 0x167   : > { %7918 = vmatpush3.bf16.msra.mxu0 %v9459_v1 }
 0x168   : > { %v540_v5 = vmul.f32 %v7655_v4, %v539_v3  ;;  %7919 = vmatprep.subr.bf16.mxu0 %v9460_v2  ;;  %v9461_v3 = vld [vmem:[#allocation3 + $0x118] sm:$0xff]   ;;  %v9462_v4 = vld [vmem:[#allocation3 + $0x160] sm:$0xff]  }
 0x16a   : > { %9105 = vmatprep.subr.mxu1 %v540_v5 }
 0x16b   : > { %9106 = vmatpush3.msra.mxu1 %v540_v5  ;;  %7920 = vmatpush3.bf16.msra.mxu0 %v9461_v3  ;;  %v9463_v5 = vld [vmem:[#allocation3 + $0x1c0] sm:$0xff]  }
 0x16c   : > { %9108 = vmatmul.mubr.msk.f32.vlgmr.msra.gmra.mrb[0].mxu1 %vm541_vm0, %v508_v7  ;;  %7801 = vmatprep.subr.bf16.mxu1 %v9428_v6  ;;  %v9464_v6 = vld [vmem:[#allocation3 + $0x120] sm:$0xff]   ;;  %v9466_v7 = vld [vmem:[#allocation3 + $0x168] sm:$0xff]  }
 0x16d   : > { %9110 = vmatprep.mubr.msk.f32.mxu1 %vm541_vm0, %v509_v9  ;;  %7802 = vmatpush3.bf16.msra.mxu1 %v9430_v8  ;;  %v9468_v8 = vld [vmem:[#allocation3 + $0x128] sm:$0xff]   ;;  %v9470_v9 = vld [vmem:[#allocation3 + $0x170] sm:$0xff]  }
 0x16e   : > { %7803 = vmatprep.subr.bf16.mxu1 %v9432_v10  ;;  %7921 = vmatprep.subr.bf16.mxu0 %v9462_v4  ;;  %v9472_v10 = vld [vmem:[#allocation3 + $0x130] sm:$0xff]  }
 0x16f   : > { %7922 = vmatpush3.bf16.msra.mxu0 %v9464_v6  ;;  %v9473_v4 = vld [vmem:[#allocation3 + $0x190] sm:$0xff]   ;;  %v9840_v6 = vld [vmem:[%s10281_s18 + $0x58] sm:$0xff] }
 0x170   : > { %9111 = vmatmul.mubr.msk.f32.gmra.mrb[2].mxu1 %vm541_vm0, %v510_v11  ;;  %7923 = vmatprep.subr.bf16.mxu0 %v9466_v7  ;;  %v9474_v11 = vld [vmem:[#allocation3 + $0x178] sm:$0xff]  }
 0x171   : > { %9113 = vmatprep.mubr.msk.f32.mxu1 %vm541_vm0, %v511_v13  ;;  %7804 = vmatpush3.bf16.msra.mxu1 %v9434_v12  ;;  %v9476_v12 = vld [vmem:[#allocation3 + $0x138] sm:$0xff]  }
 0x172   : > { %7805 = vmatprep.subr.bf16.mxu1 %v9436_v14  ;;  %v10452_v14 = vld [vmem:[#allocation3 + $0x200] sm:$0xff]  }
 0x173   : > { %7924 = vmatpush3.bf16.msra.mxu0 %v9468_v8 }
 0x174   : > { %9114 = vmatmul.mubr.msk.f32.gmra.mrb[4].mxu1 %vm541_vm0, %v512_v15  ;;  %7925 = vmatprep.subr.bf16.mxu0 %v9470_v9  ;;  %v9830_v15 = vld [vmem:[%s10281_s18 + $0x8] sm:$0xff] }
 0x175   : > { %9116 = vmatprep.mubr.msk.f32.mxu1 %vm541_vm0, %v513_v17  ;;  %7806 = vmatpush3.bf16.msra.mxu1 %v9438_v16  ;;  %v9475_v9 = vld [vmem:[#allocation3 + $0x1d8] sm:$0xff]  }
 0x176   : > { %7807 = vmatprep.subr.bf16.mxu1 %v9440_v18  ;;  %v9831_v18 = vld [vmem:[%s10281_s18] sm:$0xff] }
 0x177   : > { %7926 = vmatpush3.bf16.msra.mxu0 %v9472_v10  ;;  %v9841_v10 = vld [vmem:[%s10281_s18 + $0x50] sm:$0xff] }
 0x178   : > { %9117 = vmatmul.mubr.msk.f32.gmra.mrb[6].mxu1 %vm541_vm0, %v514_v19  ;;  %7927 = vmatprep.subr.bf16.mxu0 %v9474_v11 }
 0x179   : > { %9119 = vmatprep.mubr.msk.f32.mxu1 %vm541_vm0, %v515_v21  ;;  %7808 = vmatpush3.bf16.msra.mxu1 %v9442_v20 }
 0x17a   : > { %7809 = vmatprep.subr.bf16.mxu1 %v9444_v22  ;;  %v9832_v22 = vld [vmem:[%s10281_s18 + $0x18] sm:$0xff] }
 0x17b   : > { %7928 = vmatpush3.bf16.msra.mxu0 %v9476_v12 }
 0x17c   : > { %9120 = vmatmul.mubr.msk.f32.gmra.mrb[8].mxu1 %vm541_vm0, %v516_v23  ;;  %9155 = vmatprep.subr.bf16.mxu0 %v10452_v14 }
 0x17d   : > { %9122 = vmatprep.mubr.msk.f32.mxu1 %vm541_vm0, %v517_v24  ;;  %7810 = vmatpush3.bf16.msra.mxu1 %v9446_v48 }
 0x17e   : > { %7811 = vmatprep.subr.bf16.mxu1 %v9448_v53 }
 0x180   : > { %9123 = vmatmul.mubr.msk.f32.gmra.mrb[10].mxu1 %vm541_vm0, %v518_v25  ;;  %v9833_v25 = vld [vmem:[%s10281_s18 + $0x10] sm:$0xff] }
 0x181   : > { %9125 = vmatprep.mubr.msk.f32.mxu1 %vm541_vm0, %v519_v26  ;;  %7812 = vmatpush3.bf16.msra.mxu1 %v9449_v54  ;;  %v9469_v54 = vld [vmem:[#allocation3 + $0x188] sm:$0xff]  }
 0x182   : > { %7813 = vmatprep.subr.bf16.mxu1 %v9451_v57 }
 0x184   : > { %9126 = vmatmul.mubr.msk.f32.gmra.mrb[12].mxu1 %vm541_vm0, %v520_v27 }
 0x185   : > { %9128 = vmatprep.mubr.msk.f32.mxu1 %vm541_vm0, %v521_v28  ;;  %7814 = vmatpush3.bf16.msra.mxu1 %v9453_v58  ;;  %v1078_v28 = vld [vmem:[#allocation2 + $0x2] sm:$0xff] }
 0x186   : > { %7815 = vmatprep.subr.bf16.mxu1 %v9454_v60  ;;  %v9471_v58 = vld [vmem:[#allocation3 + $0x1d0] sm:$0xff]  }
 0x188   : > { %9129 = vmatmul.mubr.msk.f32.gmra.mrb[14].mxu1 %vm541_vm0, %v522_v29  ;;  %v1079_v29 = vld [vmem:[#allocation2 + $0xa] sm:$0xff] }
 0x189   : > { %9131 = vmatprep.mubr.msk.f32.mxu1 %vm541_vm0, %v523_v30  ;;  %7816 = vmatpush3.bf16.msra.mxu1 %v9455_v61  ;;  %v9839_v61 = vld [vmem:[%s10281_s18 + $0x40] sm:$0xff] }
 0x18a   : > { %8025 = vmatprep.subr.bf16.mxu1 %v9463_v5 }
 0x18c   : > { %9132 = vmatmul.mubr.msk.f32.gmra.mrb[16].mxu1 %vm541_vm0, %v524_v31  ;;  %v9834_v31 = vld [vmem:[%s10281_s18 + $0x28] sm:$0xff] }
 0x18d   : > { %9134 = vmatprep.mubr.msk.f32.mxu1 %vm541_vm0, %v525_v32 }
 0x190   : > { %9135 = vmatmul.mubr.msk.f32.gmra.mrb[18].mxu1 %vm541_vm0, %v526_v33 }
 0x191   : > { %9137 = vmatprep.mubr.msk.f32.mxu1 %vm541_vm0, %v527_v34  ;;  %v9835_v34 = vld [vmem:[%s10281_s18 + $0x20] sm:$0xff] }
 0x194   : > { %9138 = vmatmul.mubr.msk.f32.gmra.mrb[20].mxu1 %vm541_vm0, %v528_v35 }
 0x195   : > { %9140 = vmatprep.mubr.msk.f32.mxu1 %vm541_vm0, %v529_v36 }
 0x198   : > { %9141 = vmatmul.mubr.msk.f32.gmra.mrb[22].mxu1 %vm541_vm0, %v530_v37 }
 0x199   : > { %9143 = vmatprep.mubr.msk.f32.mxu1 %vm541_vm0, %v531_v38  ;;  %v1110_v38 = vpack.c.bf16 %v1079_v29, %v1078_v28 }
 0x19c   : > { %9144 = vmatmul.mubr.msk.f32.gmra.mrb[24].mxu1 %vm541_vm0, %v532_v39 }
 0x19d   : > { %9146 = vmatprep.mubr.msk.f32.mxu1 %vm541_vm0, %v533_v40 }
 0x1a0   : > { %9147 = vmatmul.mubr.msk.f32.gmra.mrb[26].mxu1 %vm541_vm0, %v534_v41 }
 0x1a1   : > { %9149 = vmatprep.mubr.msk.f32.mxu1 %vm541_vm0, %v535_v42  ;;  %v9465_v42 = vld [vmem:[#allocation3 + $0x180] sm:$0xff]  }
 0x1a4   : > { %9150 = vmatmul.mubr.msk.f32.gmra.mrb[28].mxu1 %vm541_vm0, %v536_v43  ;;  %v9836_v43 = vld [vmem:[%s10281_s18 + $0x38] sm:$0xff] }
 0x1a5   : > { %9152 = vmatprep.mubr.msk.f32.mxu1 %vm541_vm0, %v537_v44 }
 0x1a8   : > { %9153 = vmatmul.mubr.msk.f32.gmra.mrb[30].mxu1 %vm541_vm0, %v538_v45 }
 0x23f   : > { %v9109_v13 = vpop.f32.mrb[0].mxu1 }
 0x240   : > { %v864_v16 = vadd.f32 %v9830_v15, %v9109_v13  ;;  %v704_v17 = vpop.f32.mrb[1].mxu1  ;;  %v9477_v15 = vld [vmem:[#allocation3 + $0x198] sm:$0xff]  }
 0x241   : > { %v10456_v19 = vadd.f32 %v9831_v18, %v704_v17  ;;  %v9842_v18 = vld [vmem:[%s10281_s18 + $0x68] sm:$0xff] }
 0x242   : > { %951 = vst [vmem:[#allocation2 + $0x21] sm:$0xff] %v864_v16 }
 0x243   : > { %950 = vst [vmem:[#allocation2 + $0x19] sm:$0xff] %v10456_v19  ;;  %v9112_v20 = vpop.f32.mrb[2].mxu1  ;;  %v1063_v21 = vpack.c.bf16 %v864_v16, %v10456_v19 }
 0x244   : > { %v866_v23 = vadd.f32 %v9832_v22, %v9112_v20  ;;  %v714_v24 = vpop.f32.mrb[3].mxu1  ;;  %v9478_v22 = vld [vmem:[#allocation3 + $0x1e0] sm:$0xff]  }
 0x245   : > { %v865_v26 = vadd.f32 %v9833_v25, %v714_v24  ;;  %2038 = vmatprep.mubr.bf16.mxu0 %v1063_v21  ;;  %v9843_v25 = vld [vmem:[%s10281_s18 + $0x60] sm:$0xff] }
 0x246   : > { %953 = vst [vmem:[#allocation2 + $0x39] sm:$0xff] %v866_v23 }
 0x247   : > { %952 = vst [vmem:[#allocation2 + $0x31] sm:$0xff] %v865_v26  ;;  %v9115_v27 = vpop.f32.mrb[4].mxu1  ;;  %v10463_v30 = vpack.c.bf16 %v866_v23, %v865_v26 }
 0x248   : > { %v868_v32 = vadd.f32 %v9834_v31, %v9115_v27  ;;  %v724_v33 = vpop.f32.mrb[5].mxu1  ;;  %v9479_v31 = vld [vmem:[#allocation3 + $0x1a0] sm:$0xff]  }
 0x249   : > { %v867_v35 = vadd.f32 %v9835_v34, %v724_v33  ;;  %v1081_v60 = vld [vmem:[#allocation2 + $0x22] sm:$0xff]  ;;  %v9844_v33 = vld [vmem:[%s10281_s18 + $0x78] sm:$0xff] }
 0x24a   : > { %v1126_v36 = vld [vmem:[#allocation2 + $0x18] sm:$0xff]  ;;  %v1127_v37 = vld [vmem:[#allocation2 + $0x20] sm:$0xff]  ;;  %955 = vst [vmem:[#allocation2 + $0x51] sm:$0xff] %v868_v32 }
 0x24b   : > { %v1158_v39 = vpack.c.bf16 %v1127_v37, %v1126_v36  ;;  %954 = vst [vmem:[#allocation2 + $0x49] sm:$0xff] %v867_v35  ;;  %v9118_v40 = vpop.f32.mrb[6].mxu1  ;;  %v10467_v41 = vpack.c.bf16 %v868_v32, %v867_v35  ;;  %v1080_v59 = vld [vmem:[#allocation2 + $0x1a] sm:$0xff]  ;;  %v9845_v37 = vld [vmem:[%s10281_s18 + $0x70] sm:$0xff] }
 0x24c   : > { %v870_v44 = vadd.f32 %v9836_v43, %v9118_v40  ;;  %v734_v45 = vpop.f32.mrb[7].mxu1  ;;  %v10483_v5 = vpack.c.bf16 %v1081_v60, %v1080_v59  ;;  %v9480_v36 = vld [vmem:[#allocation3 + $0x1e8] sm:$0xff]  }
 0x24d   : > { %2191 = vmatprep.mubr.bf16.mxu1 %v1158_v39  ;;  %2039 = vmatmul.mubr.bf16.gmra.mrb[8].mxu0 %v1158_v39  ;;  %v869_v48 = vadd.f32 %v9837_v47, %v734_v45  ;;  %v1083_v24 = vld [vmem:[#allocation2 + $0x3a] sm:$0xff]  ;;  %v9846_v45 = vld [vmem:[%s10281_s18 + $0x88] sm:$0xff] }
 0x24e   : > { %2192 = vmatmul.mubr.bf16.vlgmr.msra.gmra.mrb[32].mxu1 %v1110_v38  ;;  %2046 = vmatprep.mubr.bf16.mxu0 %v10463_v30  ;;  %v1128_v49 = vld [vmem:[#allocation2 + $0x30] sm:$0xff]  ;;  %v1129_v50 = vld [vmem:[#allocation2 + $0x38] sm:$0xff]  ;;  %957 = vst [vmem:[#allocation2 + $0x69] sm:$0xff] %v870_v44 }
 0x24f   : > { %v10472_v51 = vpack.c.bf16 %v1129_v50, %v1128_v49  ;;  %956 = vst [vmem:[#allocation2 + $0x61] sm:$0xff] %v869_v48  ;;  %v9121_v52 = vpop.f32.mrb[8].mxu1  ;;  %v10474_v53 = vpack.c.bf16 %v870_v44, %v869_v48  ;;  %8026 = vmatpush3.bf16.msra.mxu1 %v9465_v42  ;;  %v1082_v23 = vld [vmem:[#allocation2 + $0x32] sm:$0xff]  ;;  %v9483_v48 = vld [vmem:[#allocation3 + $0x1f0] sm:$0xff]  }
 0x250   : > { %v872_v56 = vadd.f32 %v9838_v55, %v9121_v52  ;;  %v744_v57 = vpop.f32.mrb[9].mxu1  ;;  %8027 = vmatprep.subr.bf16.mxu1 %v9467_v46  ;;  %v10499_v32 = vpack.c.bf16 %v1083_v24, %v1082_v23  ;;  %v9481_v42 = vld [vmem:[#allocation3 + $0x1a8] sm:$0xff]   ;;  %v9847_v52 = vld [vmem:[%s10281_s18 + $0x80] sm:$0xff] }
 0x251   : > { %2199 = vmatprep.mubr.bf16.mxu1 %v10472_v51  ;;  %v871_v62 = vadd.f32 %v9839_v61, %v744_v57  ;;  %v1085_v50 = vld [vmem:[#allocation2 + $0x52] sm:$0xff] }
 0x252   : > { %v1130_v63 = vld [vmem:[#allocation2 + $0x48] sm:$0xff]  ;;  %v1131_v0 = vld [vmem:[#allocation2 + $0x50] sm:$0xff]  ;;  %959 = vst [vmem:[#allocation2 + $0x81] sm:$0xff] %v872_v56  ;;  %v9848_v60 = vld [vmem:[%s10281_s18 + $0x98] sm:$0xff] }
 0x253   : > { %v10479_v1 = vpack.c.bf16 %v1131_v0, %v1130_v63  ;;  %958 = vst [vmem:[#allocation2 + $0x79] sm:$0xff] %v871_v62  ;;  %v9124_v2 = vpop.f32.mrb[10].mxu1  ;;  %v10481_v3 = vpack.c.bf16 %v872_v56, %v871_v62  ;;  %8028 = vmatpush3.bf16.msra.mxu1 %v9469_v54  ;;  %v1084_v49 = vld [vmem:[#allocation2 + $0x4a] sm:$0xff]  ;;  %v9852_v24 = vld [vmem:[%s10281_s18 + $0xb8] sm:$0xff] }
 0x254   : > { %v874_v7 = vadd.f32 %v9840_v6, %v9124_v2  ;;  %v754_v8 = vpop.f32.mrb[11].mxu1  ;;  %8029 = vmatprep.subr.bf16.mxu1 %v9471_v58  ;;  %v9484_v58 = vld [vmem:[#allocation3 + $0x1b0] sm:$0xff]   ;;  %v10515_v59 = vpack.c.bf16 %v1085_v50, %v1084_v49  ;;  %v9485_v63 = vld [vmem:[#allocation3 + $0x1f8] sm:$0xff]   ;;  %v9849_v0 = vld [vmem:[%s10281_s18 + $0x90] sm:$0xff] }
 0x255   : > { %2047 = vmatmul.mubr.bf16.gmra.mrb[12].mxu0 %v10472_v51  ;;  %v873_v11 = vadd.f32 %v9841_v10, %v754_v8  ;;  %v9850_v10 = vld [vmem:[%s10281_s18 + $0xa8] sm:$0xff]  ;;  %v9856_v50 = vld [vmem:[%s10281_s18 + $0xd8] sm:$0xff] }
 0x256   : > { %2200 = vmatmul.mubr.bf16.gmra.mrb[36].mxu1 %v10483_v5  ;;  %2054 = vmatprep.mubr.bf16.mxu0 %v10467_v41  ;;  %961 = vst [vmem:[#allocation2 + $0x99] sm:$0xff] %v874_v7  ;;  %v1132_v16 = vld [vmem:[#allocation2 + $0x60] sm:$0xff]  ;;  %v1133_v17 = vld [vmem:[#allocation2 + $0x68] sm:$0xff] }
 0x257   : > { %2207 = vmatprep.mubr.bf16.mxu1 %v10479_v1  ;;  %960 = vst [vmem:[#allocation2 + $0x91] sm:$0xff] %v873_v11  ;;  %v9127_v12 = vpop.f32.mrb[12].mxu1  ;;  %v10491_v13 = vpack.c.bf16 %v874_v7, %v873_v11  ;;  %8030 = vmatpush3.bf16.msra.mxu1 %v9473_v4  ;;  %v10495_v27 = vpack.c.bf16 %v1133_v17, %v1132_v16  ;;  %v9486_v7 = vld [vmem:[#allocation3 + $0x1b8] sm:$0xff]   ;;  %v9851_v17 = vld [vmem:[%s10281_s18 + $0xa0] sm:$0xff] }
 0x258   : > { %v876_v20 = vadd.f32 %v9842_v18, %v9127_v12  ;;  %v764_v21 = vpop.f32.mrb[13].mxu1  ;;  %8031 = vmatprep.subr.bf16.mxu1 %v9475_v9  ;;  %v1087_v16 = vld [vmem:[#allocation2 + $0x6a] sm:$0xff] }
 0x259   : > { %v875_v26 = vadd.f32 %v9843_v25, %v764_v21 }
 0x25a   : > { %963 = vst [vmem:[#allocation2 + $0xb1] sm:$0xff] %v876_v20  ;;  %v1134_v43 = vld [vmem:[#allocation2 + $0x78] sm:$0xff]  ;;  %v1135_v44 = vld [vmem:[#allocation2 + $0x80] sm:$0xff] }
 0x25b   : > { %962 = vst [vmem:[#allocation2 + $0xa9] sm:$0xff] %v875_v26  ;;  %v9130_v28 = vpop.f32.mrb[14].mxu1  ;;  %v10497_v29 = vpack.c.bf16 %v876_v20, %v875_v26  ;;  %8032 = vmatpush3.bf16.msra.mxu1 %v9477_v15  ;;  %v10511_v55 = vpack.c.bf16 %v1135_v44, %v1134_v43  ;;  %v1086_v15 = vld [vmem:[#allocation2 + $0x62] sm:$0xff] }
 0x25c   : > { %v878_v34 = vadd.f32 %v9844_v33, %v9130_v28  ;;  %v774_v35 = vpop.f32.mrb[15].mxu1  ;;  %8033 = vmatprep.subr.bf16.mxu1 %v9478_v22  ;;  %v10531_v23 = vpack.c.bf16 %v1087_v16, %v1086_v15  ;;  %v9853_v28 = vld [vmem:[%s10281_s18 + $0xb0] sm:$0xff]  ;;  %v1089_v43 = vld [vmem:[#allocation2 + $0x82] sm:$0xff] }
 0x25d   : > { %2055 = vmatmul.mubr.bf16.gmra.mrb[16].mxu0 %v10479_v1  ;;  %v877_v38 = vadd.f32 %v9845_v37, %v774_v35  ;;  %v9854_v37 = vld [vmem:[%s10281_s18 + $0xc8] sm:$0xff]  ;;  %v9855_v44 = vld [vmem:[%s10281_s18 + $0xc0] sm:$0xff] }
 0x25e   : > { %2208 = vmatmul.mubr.bf16.gmra.mrb[40].mxu1 %v10499_v32  ;;  %2062 = vmatprep.mubr.bf16.mxu0 %v10474_v53  ;;  %965 = vst [vmem:[#allocation2 + $0xc9] sm:$0xff] %v878_v34  ;;  %v1136_v8 = vld [vmem:[#allocation2 + $0x90] sm:$0xff]  ;;  %v1137_v9 = vld [vmem:[#allocation2 + $0x98] sm:$0xff] }
 0x25f   : > { %2215 = vmatprep.mubr.bf16.mxu1 %v10495_v27  ;;  %964 = vst [vmem:[#allocation2 + $0xc1] sm:$0xff] %v877_v38  ;;  %v9133_v39 = vpop.f32.mrb[16].mxu1  ;;  %v10507_v40 = vpack.c.bf16 %v878_v34, %v877_v38  ;;  %8034 = vmatpush3.bf16.msra.mxu1 %v9479_v31  ;;  %v10527_v20 = vpack.c.bf16 %v1137_v9, %v1136_v8  ;;  %v1091_v8 = vld [vmem:[#allocation2 + $0x9a] sm:$0xff] }
 0x260   : > { %v880_v46 = vadd.f32 %v9846_v45, %v9133_v39  ;;  %v784_v47 = vpop.f32.mrb[17].mxu1  ;;  %8035 = vmatprep.subr.bf16.mxu1 %v9480_v36  ;;  %v9859_v9 = vld [vmem:[%s10281_s18 + $0xe0] sm:$0xff] }
 0x261   : > { %v879_v54 = vadd.f32 %v9847_v52, %v784_v47 }
 0x262   : > { %967 = vst [vmem:[#allocation2 + $0xe1] sm:$0xff] %v880_v46  ;;  %v1138_v35 = vld [vmem:[#allocation2 + $0xa8] sm:$0xff]  ;;  %v1139_v36 = vld [vmem:[#allocation2 + $0xb0] sm:$0xff] }
 0x263   : > { %966 = vst [vmem:[#allocation2 + $0xd9] sm:$0xff] %v879_v54  ;;  %v9136_v56 = vpop.f32.mrb[18].mxu1  ;;  %v10513_v57 = vpack.c.bf16 %v880_v46, %v879_v54  ;;  %8036 = vmatpush3.bf16.msra.mxu1 %v9481_v42  ;;  %v1088_v42 = vld [vmem:[#allocation2 + $0x7a] sm:$0xff]  ;;  %v10544_v46 = vpack.c.bf16 %v1139_v36, %v1138_v35  ;;  %v1093_v35 = vld [vmem:[#allocation2 + $0xb2] sm:$0xff] }
 0x264   : > { %v882_v61 = vadd.f32 %v9848_v60, %v9136_v56  ;;  %v794_v62 = vpop.f32.mrb[19].mxu1  ;;  %8037 = vmatprep.subr.bf16.mxu1 %v9483_v48  ;;  %v10548_v49 = vpack.c.bf16 %v1089_v43, %v1088_v42  ;;  %v9857_v56 = vld [vmem:[%s10281_s18 + $0xd0] sm:$0xff] }
 0x265   : > { %2063 = vmatmul.mubr.bf16.gmra.mrb[20].mxu0 %v10495_v27  ;;  %v881_v2 = vadd.f32 %v9849_v0, %v794_v62  ;;  %v9858_v0 = vld [vmem:[%s10281_s18 + $0xe8] sm:$0xff] }
 0x266   : > { %2216 = vmatmul.mubr.bf16.gmra.mrb[44].mxu1 %v10515_v59  ;;  %2070 = vmatprep.mubr.bf16.mxu0 %v10481_v3  ;;  %969 = vst [vmem:[#allocation2 + $0xf9] sm:$0xff] %v882_v61  ;;  %v1140_v62 = vld [vmem:[#allocation2 + $0xc0] sm:$0xff]  ;;  %v1095_v43 = vld [vmem:[#allocation2 + $0xca] sm:$0xff] }
 0x267   : > { %2223 = vmatprep.mubr.bf16.mxu1 %v10511_v55  ;;  %968 = vst [vmem:[#allocation2 + $0xf1] sm:$0xff] %v881_v2  ;;  %v9139_v4 = vpop.f32.mrb[20].mxu1  ;;  %v10523_v6 = vpack.c.bf16 %v882_v61, %v881_v2  ;;  %8038 = vmatpush3.bf16.msra.mxu1 %v9484_v58  ;;  %v1094_v42 = vld [vmem:[#allocation2 + $0xc2] sm:$0xff] }
 0x268   : > { %v884_v11 = vadd.f32 %v9850_v10, %v9139_v4  ;;  %v804_v12 = vpop.f32.mrb[21].mxu1  ;;  %8039 = vmatprep.subr.bf16.mxu1 %v9485_v63  ;;  %v1141_v63 = vld [vmem:[#allocation2 + $0xc8] sm:$0xff] }
 0x269   : > { %v883_v18 = vadd.f32 %v9851_v17, %v804_v12  ;;  %v9860_v17 = vld [vmem:[%s10281_s18 + $0xf8] sm:$0xff] }
 0x26a   : > { %971 = vst [vmem:[#allocation2 + $0x111] sm:$0xff] %v884_v11 }
 0x26b   : > { %970 = vst [vmem:[#allocation2 + $0x109] sm:$0xff] %v883_v18  ;;  %v9142_v21 = vpop.f32.mrb[22].mxu1  ;;  %v10529_v22 = vpack.c.bf16 %v884_v11, %v883_v18  ;;  %8040 = vmatpush3.bf16.msra.mxu1 %v9486_v7  ;;  %v1090_v7 = vld [vmem:[#allocation2 + $0x92] sm:$0xff]  ;;  %v10560_v11 = vpack.c.bf16 %v1141_v63, %v1140_v62 }
 0x26c   : > { %v886_v25 = vadd.f32 %v9852_v24, %v9142_v21  ;;  %v814_v26 = vpop.f32.mrb[23].mxu1  ;;  %9331 = vmatprep.subr.bf16.mxu1 %v10452_v14  ;;  %v10564_v16 = vpack.c.bf16 %v1091_v8, %v1090_v7  ;;  %v9861_v24 = vld [vmem:[%s10281_s18 + $0xf0] sm:$0xff] }
 0x26d   : > { %2071 = vmatmul.mubr.bf16.gmra.mrb[24].mxu0 %v10511_v55  ;;  %v885_v31 = vadd.f32 %v9853_v28, %v814_v26  ;;  %v1142_v28 = vld [vmem:[#allocation2 + $0xd8] sm:$0xff] }
 0x26e   : > { %2224 = vmatmul.mubr.bf16.gmra.mrb[48].mxu1 %v10531_v23  ;;  %2078 = vmatprep.mubr.bf16.mxu0 %v10491_v13  ;;  %973 = vst [vmem:[#allocation2 + $0x129] sm:$0xff] %v886_v25  ;;  %v1098_v8 = vld [vmem:[#allocation2 + $0xf2] sm:$0xff] }
 0x26f   : > { %2231 = vmatprep.mubr.bf16.mxu1 %v10527_v20  ;;  %972 = vst [vmem:[#allocation2 + $0x121] sm:$0xff] %v885_v31  ;;  %v9145_v33 = vpop.f32.mrb[24].mxu1  ;;  %v10540_v34 = vpack.c.bf16 %v886_v25, %v885_v31  ;;  %v1143_v31 = vld [vmem:[#allocation2 + $0xe0] sm:$0xff] }
 0x270   : > { %v888_v38 = vadd.f32 %v9854_v37, %v9145_v33  ;;  %v824_v39 = vpop.f32.mrb[25].mxu1  ;;  %v1092_v33 = vld [vmem:[#allocation2 + $0xaa] sm:$0xff]  ;;  %v10574_v36 = vpack.c.bf16 %v1143_v31, %v1142_v28 }
 0x271   : > { %v887_v45 = vadd.f32 %v9855_v44, %v824_v39  ;;  %v10576_v37 = vpack.c.bf16 %v1093_v35, %v1092_v33  ;;  %v1145_v39 = vld [vmem:[#allocation2 + $0xf8] sm:$0xff] }
 0x272   : > { %975 = vst [vmem:[#allocation2 + $0x141] sm:$0xff] %v888_v38 }
 0x273   : > { %974 = vst [vmem:[#allocation2 + $0x139] sm:$0xff] %v887_v45  ;;  %v9148_v47 = vpop.f32.mrb[26].mxu1  ;;  %v10546_v48 = vpack.c.bf16 %v888_v38, %v887_v45  ;;  %v1144_v38 = vld [vmem:[#allocation2 + $0xf0] sm:$0xff]  ;;  %v10584_v45 = vpack.c.bf16 %v1095_v43, %v1094_v42 }
 0x274   : > { %v890_v52 = vadd.f32 %v9856_v50, %v9148_v47  ;;  %v834_v54 = vpop.f32.mrb[27].mxu1  ;;  %v10582_v44 = vpack.c.bf16 %v1145_v39, %v1144_v38  ;;  %v1146_v47 = vld [vmem:[#allocation2 + $0x108] sm:$0xff]  ;;  %v1147_v50 = vld [vmem:[#allocation2 + $0x110] sm:$0xff] }
 0x275   : > { %2079 = vmatmul.mubr.bf16.gmra.mrb[28].mxu0 %v10527_v20  ;;  %v889_v58 = vadd.f32 %v9857_v56, %v834_v54  ;;  %v1097_v54 = vld [vmem:[#allocation2 + $0xe2] sm:$0xff]  ;;  %v10590_v56 = vpack.c.bf16 %v1147_v50, %v1146_v47  ;;  %v1103_v39 = vld [vmem:[#allocation2 + $0x12a] sm:$0xff] }
 0x276   : > { %2232 = vmatmul.mubr.bf16.gmra.mrb[52].mxu1 %v10548_v49  ;;  %2086 = vmatprep.mubr.bf16.mxu0 %v10497_v29  ;;  %977 = vst [vmem:[#allocation2 + $0x159] sm:$0xff] %v890_v52  ;;  %v1102_v38 = vld [vmem:[#allocation2 + $0x122] sm:$0xff] }
 0x277   : > { %2239 = vmatprep.mubr.bf16.mxu1 %v10544_v46  ;;  %976 = vst [vmem:[#allocation2 + $0x151] sm:$0xff] %v889_v58  ;;  %v9151_v60 = vpop.f32.mrb[28].mxu1  ;;  %v10556_v61 = vpack.c.bf16 %v890_v52, %v889_v58  ;;  %v1096_v52 = vld [vmem:[#allocation2 + $0xda] sm:$0xff]  ;;  %v10620_v43 = vpack.c.bf16 %v1103_v39, %v1102_v38  ;;  %v9489_v38 = vld [vmem:[#allocation3 + $0x218] sm:$0xff]  }
 0x278   : > { %v892_v2 = vadd.f32 %v9858_v0, %v9151_v60  ;;  %v844_v4 = vpop.f32.mrb[29].mxu1  ;;  %v10592_v58 = vpack.c.bf16 %v1097_v54, %v1096_v52  ;;  %v7705_v60 = vpop.f32.mrb[4].mxu0 }
 0x279   : > { %v891_v10 = vadd.f32 %v9859_v9, %v844_v4  ;;  %v7706_v62 = vpop.f32.mrb[5].mxu0  ;;  %v1149_v4 = vld [vmem:[#allocation2 + $0x128] sm:$0xff]  ;;  %v1099_v9 = vld [vmem:[#allocation2 + $0xfa] sm:$0xff] }
 0x27a   : > { %979 = vst [vmem:[#allocation2 + $0x171] sm:$0xff] %v892_v2  ;;  %v10598_v63 = vadd.f32 %v7706_v62, %v7705_v60  ;;  %v7708_v0 = vpop.f32.mrb[6].mxu0  ;;  %v1104_v52 = vld [vmem:[#allocation2 + $0x13a] sm:$0xff]  ;;  %v1105_v54 = vld [vmem:[#allocation2 + $0x142] sm:$0xff] }
 0x27b   : > { %978 = vst [vmem:[#allocation2 + $0x169] sm:$0xff] %v891_v10  ;;  %v9154_v12 = vpop.f32.mrb[30].mxu1  ;;  %v10562_v15 = vpack.c.bf16 %v892_v2, %v891_v10  ;;  %v1148_v2 = vld [vmem:[#allocation2 + $0x120] sm:$0xff]  ;;  %v7709_v7 = vpop.f32.mrb[7].mxu0  ;;  %v10628_v62 = vpack.c.bf16 %v1105_v54, %v1104_v52 }
 0x27c   : > { %v894_v18 = vadd.f32 %v9860_v17, %v9154_v12  ;;  %v854_v21 = vpop.f32.mrb[31].mxu1  ;;  %v10600_v10 = vadd.f32 %v7709_v7, %v7708_v0  ;;  %v10602_v12 = vpack.c.bf16 %v1149_v4, %v1148_v2  ;;  %v10604_v17 = vpack.c.bf16 %v1099_v9, %v1098_v8 }
 0x27d   : > { %2087 = vmatmul.mubr.bf16.gmra.mrb[32].mxu0 %v10544_v46  ;;  %v893_v25 = vadd.f32 %v9861_v24, %v854_v21  ;;  %v1151_v21 = vld [vmem:[#allocation2 + $0x140] sm:$0xff]  ;;  %v1100_v24 = vld [vmem:[#allocation2 + $0x10a] sm:$0xff] }
 0x27e   : > { %2240 = vmatmul.mubr.bf16.gmra.mrb[56].mxu1 %v10564_v16  ;;  %2094 = vmatprep.mubr.bf16.mxu0 %v10507_v40  ;;  %981 = vst [vmem:[#allocation2 + $0x189] sm:$0xff] %v894_v18  ;;  %v1152_v33 = vld [vmem:[#allocation2 + $0x150] sm:$0xff]  ;;  %v1153_v35 = vld [vmem:[#allocation2 + $0x158] sm:$0xff] }
 0x27f   : > { %2247 = vmatprep.mubr.bf16.mxu1 %v10560_v11  ;;  %980 = vst [vmem:[#allocation2 + $0x181] sm:$0xff] %v893_v25  ;;  %v10572_v26 = vpack.c.bf16 %v894_v18, %v893_v25  ;;  %v1150_v18 = vld [vmem:[#allocation2 + $0x138] sm:$0xff]  ;;  %v10618_v42 = vpack.c.bf16 %v1153_v35, %v1152_v33 }
 0x280   : > { %v1101_v25 = vld [vmem:[#allocation2 + $0x112] sm:$0xff]  ;;  %v10610_v28 = vpack.c.bf16 %v1151_v21, %v1150_v18  ;;  %v1107_v7 = vld [vmem:[#allocation2 + $0x15a] sm:$0xff] }
 0x281   : > { %v10612_v31 = vpack.c.bf16 %v1101_v25, %v1100_v24  ;;  %v1106_v4 = vld [vmem:[#allocation2 + $0x152] sm:$0xff]  ;;  %v1175_v18 = vld [vmem:[#allocation2 + $0x21] sm:$0xff] }
 0x282   : > { %v1154_v47 = vld [vmem:[#allocation2 + $0x168] sm:$0xff]  ;;  %v1155_v50 = vld [vmem:[#allocation2 + $0x170] sm:$0xff]  ;;  %v10636_v9 = vpack.c.bf16 %v1107_v7, %v1106_v4  ;;  %v1206_v25 = vpack.c.bf16 %v1175_v18, %v10456_v19  ;;  %v9487_v35 = vld [vmem:[#allocation3 + $0x208] sm:$0xff]  }
 0x283   : > { %v10626_v60 = vpack.c.bf16 %v1155_v50, %v1154_v47  ;;  %v1108_v21 = vld [vmem:[#allocation2 + $0x16a] sm:$0xff]  ;;  %v1109_v24 = vld [vmem:[#allocation2 + $0x172] sm:$0xff] }
 0x284   : > { %v10643_v33 = vpack.c.bf16 %v1109_v24, %v1108_v21  ;;  %v9490_v19 = vld [vmem:[#allocation3 + $0x220] sm:$0xff]  }
 0x285   : > { %2095 = vmatmul.mubr.bf16.gmra.mrb[36].mxu0 %v10560_v11  ;;  %v1253_v50 = vld [vmem:[#allocation2 + $0x18a] sm:$0xff] }
 0x286   : > { %2248 = vmatmul.mubr.bf16.gmra.mrb[60].mxu1 %v10576_v37  ;;  %2102 = vmatprep.mubr.bf16.mxu0 %v10513_v57  ;;  %v1156_v0 = vld [vmem:[#allocation2 + $0x180] sm:$0xff]  ;;  %v1157_v2 = vld [vmem:[#allocation2 + $0x188] sm:$0xff] }
 0x287   : > { %2255 = vmatprep.mubr.bf16.mxu1 %v10574_v36  ;;  %v10634_v8 = vpack.c.bf16 %v1157_v2, %v1156_v0  ;;  %v1252_v47 = vld [vmem:[#allocation2 + $0x182] sm:$0xff] }
 0x28d   : > { %2103 = vmatmul.mubr.bf16.gmra.mrb[40].mxu0 %v10574_v36 }
 0x28e   : > { %2256 = vmatmul.mubr.bf16.gmra.mrb[64].mxu1 %v10584_v45  ;;  %2110 = vmatprep.mubr.bf16.mxu0 %v10523_v6 }
 0x28f   : > { %2263 = vmatprep.mubr.bf16.mxu1 %v10582_v44 }
 0x295   : > { %2111 = vmatmul.mubr.bf16.gmra.mrb[44].mxu0 %v10582_v44 }
 0x296   : > { %2264 = vmatmul.mubr.bf16.gmra.mrb[68].mxu1 %v10592_v58  ;;  %2118 = vmatprep.mubr.bf16.mxu0 %v10529_v22 }
 0x297   : > { %2271 = vmatprep.mubr.bf16.mxu1 %v10590_v56 }
 0x29d   : > { %2119 = vmatmul.mubr.bf16.gmra.mrb[48].mxu0 %v10590_v56 }
 0x29e   : > { %2272 = vmatmul.mubr.bf16.gmra.mrb[72].mxu1 %v10604_v17  ;;  %2126 = vmatprep.mubr.bf16.mxu0 %v10540_v34 }
 0x29f   : > { %2279 = vmatprep.mubr.bf16.mxu1 %v10602_v12 }
 0x2a5   : > { %2127 = vmatmul.mubr.bf16.gmra.mrb[52].mxu0 %v10602_v12 }
 0x2a6   : > { %2280 = vmatmul.mubr.bf16.gmra.mrb[76].mxu1 %v10612_v31  ;;  %2134 = vmatprep.mubr.bf16.mxu0 %v10546_v48 }
 0x2a7   : > { %2287 = vmatprep.mubr.bf16.mxu1 %v10610_v28 }
 0x2ad   : > { %2135 = vmatmul.mubr.bf16.gmra.mrb[56].mxu0 %v10610_v28 }
 0x2ae   : > { %2288 = vmatmul.mubr.bf16.gmra.mrb[80].mxu1 %v10620_v43  ;;  %2142 = vmatprep.mubr.bf16.mxu0 %v10556_v61 }
 0x2af   : > { %2295 = vmatprep.mubr.bf16.mxu1 %v10618_v42 }
 0x2b5   : > { %2143 = vmatmul.mubr.bf16.gmra.mrb[60].mxu0 %v10618_v42 }
 0x2b6   : > { %2296 = vmatmul.mubr.bf16.gmra.mrb[84].mxu1 %v10628_v62  ;;  %2150 = vmatprep.mubr.bf16.mxu0 %v10562_v15 }
 0x2b7   : > { %2303 = vmatprep.mubr.bf16.mxu1 %v10626_v60 }
 0x2bd   : > { %2151 = vmatmul.mubr.bf16.gmra.mrb[64].mxu0 %v10626_v60 }
 0x2be   : > { %2304 = vmatmul.mubr.bf16.gmra.mrb[88].mxu1 %v10636_v9  ;;  %2352 = vmatprep.mubr.bf16.mxu0 %v10483_v5  ;;  %v9488_v5 = vld [vmem:[#allocation3 + $0x210] sm:$0xff]  }
 0x2bf   : > { %2311 = vmatprep.mubr.bf16.mxu1 %v10634_v8 }
 0x2c5   : > { %2353 = vmatmul.mubr.bf16.vlgmr.msra.gmra.mrb[68].mxu0 %v1206_v25 }
 0x2c6   : > { %2312 = vmatmul.mubr.bf16.gmra.mrb[92].mxu1 %v10643_v33  ;;  %9156 = vmatpush3.bf16.msra.mxu0 %v10452_v14 }
 0x2c7   : > { %2360 = vmatprep.mubr.bf16.mxu0 %v10499_v32  ;;  %2513 = vmatprep.mubr.bf16.mxu1 %v10463_v30  ;;  %v9491_v32 = vld [vmem:[#allocation3 + $0x228] sm:$0xff]  }
 0x2c8   : > { %9157 = vmatprep.subr.bf16.mxu0 %v9487_v35 }
 0x2ca   : > { %9158 = vmatpush3.bf16.msra.mxu0 %v9487_v35 }
 0x2cb   : > { %9159 = vmatprep.subr.bf16.mxu0 %v9488_v5 }
 0x2cd   : > { %2361 = vmatmul.mubr.bf16.gmra.mrb[72].mxu0 %v10463_v30  ;;  %v9492_v30 = vld [vmem:[#allocation3 + $0x230] sm:$0xff]  }
 0x2ce   : > { %2514 = vmatmul.mubr.bf16.vlgmr.msra.gmra.mrb[96].mxu1 %v10472_v51  ;;  %2368 = vmatprep.mubr.bf16.mxu0 %v10515_v59 }
 0x2cf   : > { %2521 = vmatprep.mubr.bf16.mxu1 %v10467_v41  ;;  %9160 = vmatpush3.bf16.msra.mxu0 %v9488_v5 }
 0x2d0   : > { %9161 = vmatprep.subr.bf16.mxu0 %v9489_v38  ;;  %9339 = vmatpush3.bf16.msra.mxu1 %v10452_v14  ;;  %v9493_v14 = vld [vmem:[#allocation3 + $0x238] sm:$0xff]  }
 0x2d1   : > { %9332 = vmatprep.subr.bf16.mxu1 %v9487_v35 }
 0x2d3   : > { %9162 = vmatpush3.bf16.msra.mxu0 %v9489_v38 }
 0x2d4   : > { %9163 = vmatprep.subr.bf16.mxu0 %v9490_v19  ;;  %9340 = vmatpush3.bf16.msra.mxu1 %v9487_v35  ;;  %v1349_v35 = vld [vmem:[#allocation2 + $0x199] sm:$0xff] }
 0x2d5   : > { %2369 = vmatmul.mubr.bf16.gmra.mrb[76].mxu0 %v10467_v41  ;;  %9333 = vmatprep.subr.bf16.mxu1 %v9488_v5  ;;  %v10697_v41 = vld [vmem:[%s12351_s5] ss:$0 sm:$0xff] }
 0x2d6   : > { %2522 = vmatmul.mubr.bf16.gmra.mrb[100].mxu1 %v10479_v1  ;;  %2376 = vmatprep.mubr.bf16.mxu0 %v10531_v23 }
 0x2d7   : > { %2529 = vmatprep.mubr.bf16.mxu1 %v10474_v53  ;;  %9164 = vmatpush3.bf16.msra.mxu0 %v9490_v19 }
 0x2d8   : > { %9165 = vmatprep.subr.bf16.mxu0 %v9491_v32  ;;  %9341 = vmatpush3.bf16.msra.mxu1 %v9488_v5  ;;  %v1350_v5 = vld [vmem:[#allocation2 + $0x1a1] sm:$0xff] }
 0x2d9   : > { %9334 = vmatprep.subr.bf16.mxu1 %v9489_v38 }
 0x2db   : > { %9166 = vmatpush3.bf16.msra.mxu0 %v9491_v32 }
 0x2dc   : > { %9167 = vmatprep.subr.bf16.mxu0 %v9492_v30  ;;  %9342 = vmatpush3.bf16.msra.mxu1 %v9489_v38 }
 0x2dd   : > { %2377 = vmatmul.mubr.bf16.gmra.mrb[80].mxu0 %v10474_v53  ;;  %9335 = vmatprep.subr.bf16.mxu1 %v9490_v19 }
 0x2de   : > { %2530 = vmatmul.mubr.bf16.gmra.mrb[104].mxu1 %v10495_v27  ;;  %2384 = vmatprep.mubr.bf16.mxu0 %v10548_v49 }
 0x2df   : > { %2537 = vmatprep.mubr.bf16.mxu1 %v10481_v3  ;;  %9168 = vmatpush3.bf16.msra.mxu0 %v9492_v30 }
 0x2e0   : > { %9169 = vmatprep.subr.bf16.mxu0 %v9493_v14  ;;  %9343 = vmatpush3.bf16.msra.mxu1 %v9490_v19 }
 0x2e1   : > { %9336 = vmatprep.subr.bf16.mxu1 %v9491_v32 }
 0x2e3   : > { %9170 = vmatpush3.bf16.msra.mxu0 %v9493_v14 }
 0x2e4   : > { %9344 = vmatpush3.bf16.msra.mxu1 %v9491_v32  ;;  %v1367_v32 = vld [vmem:[#allocation2 + $0x32] sm:$0xff] }
 0x2e5   : > { %2385 = vmatmul.mubr.bf16.gmra.mrb[84].mxu0 %v10481_v3  ;;  %9337 = vmatprep.subr.bf16.mxu1 %v9492_v30 }
 0x2e6   : > { %2538 = vmatmul.mubr.bf16.gmra.mrb[108].mxu1 %v10511_v55  ;;  %2392 = vmatprep.mubr.bf16.mxu0 %v10564_v16 }
 0x2e7   : > { %2545 = vmatprep.mubr.bf16.mxu1 %v10491_v13 }
 0x2e8   : > { %9345 = vmatpush3.bf16.msra.mxu1 %v9492_v30  ;;  %v1368_v30 = vld [vmem:[#allocation2 + $0x3a] sm:$0xff] }
 0x2e9   : > { %9338 = vmatprep.subr.bf16.mxu1 %v9493_v14 }
 0x2ec   : > { %9346 = vmatpush3.bf16.msra.mxu1 %v9493_v14 }
 0x2ed   : > { %2393 = vmatmul.mubr.bf16.gmra.mrb[88].mxu0 %v10491_v13 }
 0x2ee   : > { %2546 = vmatmul.mubr.bf16.gmra.mrb[112].mxu1 %v10527_v20  ;;  %2400 = vmatprep.mubr.bf16.mxu0 %v10576_v37  ;;  %v2036_v20 = vadd.f32 %v10600_v10, %v10697_v41 }
 0x2ef   : > { %2553 = vmatprep.mubr.bf16.mxu1 %v10497_v29 }
 0x2f5   : > { %2401 = vmatmul.mubr.bf16.gmra.mrb[92].mxu0 %v10497_v29  ;;  %v2033_v29 = vadd.f32 %v10598_v63, %v10697_v41 }
 0x2f6   : > { %2554 = vmatmul.mubr.bf16.gmra.mrb[116].mxu1 %v10544_v46  ;;  %2408 = vmatprep.mubr.bf16.mxu0 %v10584_v45 }
 0x2f7   : > { %2561 = vmatprep.mubr.bf16.mxu1 %v10507_v40 }
 0x2fd   : > { %2409 = vmatmul.mubr.bf16.gmra.mrb[96].mxu0 %v10507_v40 }
 0x2fe   : > { %2562 = vmatmul.mubr.bf16.gmra.mrb[120].mxu1 %v10560_v11  ;;  %2416 = vmatprep.mubr.bf16.mxu0 %v10592_v58 }
 0x2ff   : > { %2569 = vmatprep.mubr.bf16.mxu1 %v10513_v57 }
 0x305   : > { %2417 = vmatmul.mubr.bf16.gmra.mrb[100].mxu0 %v10513_v57 }
 0x306   : > { %2570 = vmatmul.mubr.bf16.gmra.mrb[124].mxu1 %v10574_v36  ;;  %2424 = vmatprep.mubr.bf16.mxu0 %v10604_v17 }
 0x307   : > { %2577 = vmatprep.mubr.bf16.mxu1 %v10523_v6 }
 0x30d   : > { %2425 = vmatmul.mubr.bf16.gmra.mrb[104].mxu0 %v10523_v6 }
 0x30e   : > { %2578 = vmatmul.mubr.bf16.gmra.mrb[128].mxu1 %v10582_v44  ;;  %2432 = vmatprep.mubr.bf16.mxu0 %v10612_v31 }
 0x30f   : > { %2585 = vmatprep.mubr.bf16.mxu1 %v10529_v22 }
 0x315   : > { %2433 = vmatmul.mubr.bf16.gmra.mrb[108].mxu0 %v10529_v22 }
 0x316   : > { %2586 = vmatmul.mubr.bf16.gmra.mrb[132].mxu1 %v10590_v56  ;;  %2440 = vmatprep.mubr.bf16.mxu0 %v10620_v43 }
 0x317   : > { %2593 = vmatprep.mubr.bf16.mxu1 %v10540_v34 }
 0x31d   : > { %2441 = vmatmul.mubr.bf16.gmra.mrb[112].mxu0 %v10540_v34 }
 0x31e   : > { %2594 = vmatmul.mubr.bf16.gmra.mrb[136].mxu1 %v10602_v12  ;;  %2448 = vmatprep.mubr.bf16.mxu0 %v10628_v62 }
 0x31f   : > { %2601 = vmatprep.mubr.bf16.mxu1 %v10546_v48 }
 0x320   : > { %v7711_v51 = vpop.f32.mrb[8].mxu0 }
 0x321   : > { %v7817_v53 = vpop.f32.mrb[32].mxu1  ;;  %v7712_v1 = vpop.f32.mrb[9].mxu0 }
 0x322   : > { %v7713_v3 = vadd.f32 %v7712_v1, %v7711_v51  ;;  %v7818_v13 = vpop.f32.mrb[33].mxu1  ;;  %v7714_v27 = vpop.f32.mrb[10].mxu0 }
 0x323   : > { %v7819_v40 = vadd.f32 %v7818_v13, %v7817_v53  ;;  %v7820_v55 = vpop.f32.mrb[34].mxu1  ;;  %v7715_v57 = vpop.f32.mrb[11].mxu0  ;;  %v1366_v13 = vpack.c.bf16 %v1350_v5, %v1349_v35  ;;  %v1375_v35 = vld [vmem:[#allocation2 + $0x92] sm:$0xff] }
 0x324   : > { %v7716_v59 = vadd.f32 %v7715_v57, %v7714_v27  ;;  %v7821_v6 = vpop.f32.mrb[35].mxu1  ;;  %v2041_v44 = vadd.f32 %v7713_v3, %v10697_v41 }
 0x325   : > { %v10703_v22 = vadd.f32 %v7819_v40, %v2033_v29  ;;  %v7822_v23 = vadd.f32 %v7821_v6, %v7820_v55  ;;  %2449 = vmatmul.mubr.bf16.gmra.mrb[116].mxu0 %v10546_v48  ;;  %v1399_v40 = vpack.c.bf16 %v1368_v30, %v1367_v32  ;;  %v1387_v32 = vld [vmem:[#allocation2 + $0x122] sm:$0xff]  ;;  %v1388_v30 = vld [vmem:[#allocation2 + $0x12a] sm:$0xff] }
 0x326   : > { %2602 = vmatmul.mubr.bf16.gmra.mrb[140].mxu1 %v10610_v28  ;;  %2456 = vmatprep.mubr.bf16.mxu0 %v10636_v9  ;;  %v2044_v10 = vadd.f32 %v7716_v59, %v10697_v41  ;;  %v10722_v9 = vpack.c.bf16 %v1253_v50, %v1252_v47 }
 0x327   : > { %v10708_v34 = vadd.f32 %v7822_v23, %v2036_v20  ;;  %2609 = vmatprep.mubr.bf16.mxu1 %v10556_v61  ;;  %v1369_v23 = vld [vmem:[#allocation2 + $0x4a] sm:$0xff] }
 0x328   : > { %v7717_v46 = vpop.f32.mrb[12].mxu0 }
 0x329   : > { %v7823_v49 = vpop.f32.mrb[36].mxu1  ;;  %v7718_v11 = vpop.f32.mrb[13].mxu0 }
 0x32a   : > { %v7719_v16 = vadd.f32 %v7718_v11, %v7717_v46  ;;  %v7824_v36 = vpop.f32.mrb[37].mxu1  ;;  %v7720_v37 = vpop.f32.mrb[14].mxu0  ;;  %v1370_v46 = vld [vmem:[#allocation2 + $0x52] sm:$0xff] }
 0x32b   : > { %v7825_v45 = vadd.f32 %v7824_v36, %v7823_v49  ;;  %v7826_v56 = vpop.f32.mrb[38].mxu1  ;;  %v7721_v58 = vpop.f32.mrb[15].mxu0  ;;  %v1372_v36 = vld [vmem:[#allocation2 + $0x6a] sm:$0xff] }
 0x32c   : > { %v7722_v48 = vadd.f32 %v7721_v58, %v7720_v37  ;;  %v7827_v63 = vpop.f32.mrb[39].mxu1  ;;  %v2049_v0 = vadd.f32 %v7719_v16, %v10697_v41  ;;  %v1371_v16 = vld [vmem:[#allocation2 + $0x62] sm:$0xff] }
 0x32d   : > { %v10713_v12 = vadd.f32 %v7825_v45, %v2041_v44  ;;  %v7828_v17 = vadd.f32 %v7827_v63, %v7826_v56  ;;  %2457 = vmatmul.mubr.bf16.gmra.mrb[120].mxu0 %v10556_v61  ;;  %v9862_v56 = vld [vmem:[#allocation2] sm:$0xff]  ;;  %v1401_v47 = vpack.c.bf16 %v1372_v36, %v1371_v16 }
 0x32e   : > { %2610 = vmatmul.mubr.bf16.gmra.mrb[144].mxu1 %v10618_v42  ;;  %2464 = vmatprep.mubr.bf16.mxu0 %v10643_v33  ;;  %v2052_v18 = vadd.f32 %v7722_v48, %v10697_v41  ;;  %v1318_v58 = vpack.c.bf16 %v9862_v56, %v9862_v56  ;;  %v1383_v48 = vld [vmem:[#allocation2 + $0xf2] sm:$0xff] }
 0x32f   : > { %v10718_v28 = vadd.f32 %v7828_v17, %v2044_v10  ;;  %2617 = vmatprep.mubr.bf16.mxu1 %v10562_v15 }
 0x330   : > { %v7723_v31 = vpop.f32.mrb[16].mxu0 }
 0x331   : > { %v7829_v39 = vpop.f32.mrb[40].mxu1  ;;  %v7724_v43 = vpop.f32.mrb[17].mxu0 }
 0x332   : > { %v7725_v52 = vadd.f32 %v7724_v43, %v7723_v31  ;;  %v7830_v54 = vpop.f32.mrb[41].mxu1  ;;  %v7726_v62 = vpop.f32.mrb[18].mxu0  ;;  %v1400_v31 = vpack.c.bf16 %v1370_v46, %v1369_v23  ;;  %v1377_v46 = vld [vmem:[#allocation2 + $0xaa] sm:$0xff] }
 0x333   : > { %v7831_v2 = vadd.f32 %v7830_v54, %v7829_v39  ;;  %v7832_v61 = vpop.f32.mrb[42].mxu1  ;;  %v7727_v4 = vpop.f32.mrb[19].mxu0 }
 0x334   : > { %v7728_v42 = vadd.f32 %v7727_v4, %v7726_v62  ;;  %v7833_v7 = vpop.f32.mrb[43].mxu1  ;;  %v1374_v4 = vld [vmem:[#allocation2 + $0x82] sm:$0xff] }
 0x335   : > { %v10725_v21 = vadd.f32 %v7831_v2, %v2049_v0  ;;  %v7834_v24 = vadd.f32 %v7833_v7, %v7832_v61  ;;  %2465 = vmatmul.mubr.bf16.gmra.mrb[124].mxu0 %v10562_v15  ;;  %v2057_v15 = vadd.f32 %v7725_v52, %v10697_v41  ;;  %v1373_v61 = vld [vmem:[#allocation2 + $0x7a] sm:$0xff] }
 0x336   : > { %2618 = vmatmul.mubr.bf16.gmra.mrb[148].mxu1 %v10626_v60  ;;  %2472 = vmatprep.mubr.bf16.mxu0 %v10722_v9  ;;  %v2060_v55 = vadd.f32 %v7728_v42, %v10697_v41  ;;  %v1376_v42 = vld [vmem:[#allocation2 + $0x9a] sm:$0xff] }
 0x337   : > { %v10730_v25 = vadd.f32 %v7834_v24, %v2052_v18  ;;  %2625 = vmatprep.mubr.bf16.mxu1 %v10572_v26  ;;  %v1385_v24 = vld [vmem:[#allocation2 + $0x10a] sm:$0xff] }
 0x338   : > { %v7729_v33 = vpop.f32.mrb[20].mxu0 }
 0x339   : > { %v7835_v38 = vpop.f32.mrb[44].mxu1  ;;  %v7730_v19 = vpop.f32.mrb[21].mxu0 }
 0x33a   : > { %v7731_v14 = vadd.f32 %v7730_v19, %v7729_v33  ;;  %v7836_v51 = vpop.f32.mrb[45].mxu1  ;;  %v7732_v53 = vpop.f32.mrb[22].mxu0  ;;  %v1386_v33 = vld [vmem:[#allocation2 + $0x112] sm:$0xff] }
 0x33b   : > { %v7837_v1 = vadd.f32 %v7836_v51, %v7835_v38  ;;  %v7838_v60 = vpop.f32.mrb[46].mxu1  ;;  %v7733_v3 = vpop.f32.mrb[23].mxu0 }
 0x33c   : > { %v7734_v27 = vadd.f32 %v7733_v3, %v7732_v53  ;;  %v7839_v29 = vpop.f32.mrb[47].mxu1 }
 0x33d   : > { %v10735_v57 = vadd.f32 %v7837_v1, %v2057_v15  ;;  %v7840_v59 = vadd.f32 %v7839_v29, %v7838_v60  ;;  %2473 = vmatmul.mubr.bf16.gmra.mrb[128].mxu0 %v10572_v26  ;;  %v1384_v26 = vld [vmem:[#allocation2 + $0xfa] sm:$0xff]  ;;  %v1402_v1 = vpack.c.bf16 %v1374_v4, %v1373_v61 }
 0x33e   : > { %2626 = vmatmul.mubr.bf16.gmra.mrb[152].mxu1 %v10634_v8  ;;  %9171 = vmatprep.mubr.bf16.mxu0 %v1399_v40  ;;  %v2065_v8 = vadd.f32 %v7731_v14, %v10697_v41  ;;  %v2068_v50 = vadd.f32 %v7734_v27, %v10697_v41  ;;  %v1407_v62 = vpack.c.bf16 %v1384_v26, %v1383_v48  ;;  %v1391_v26 = vld [vmem:[#allocation2 + $0x152] sm:$0xff] }
 0x33f   : > { %v10739_v6 = vadd.f32 %v7840_v59, %v2060_v55  ;;  %2633 = vmatprep.mubr.bf16.mxu1 %v1366_v13  ;;  %v1408_v13 = vpack.c.bf16 %v1386_v33, %v1385_v24  ;;  %v1403_v27 = vpack.c.bf16 %v1376_v42, %v1375_v35  ;;  %v1409_v59 = vpack.c.bf16 %v1388_v30, %v1387_v32  ;;  %v1382_v24 = vld [vmem:[#allocation2 + $0xe2] sm:$0xff] }
 0x340   : > { %v7735_v20 = vpop.f32.mrb[24].mxu0 }
 0x341   : > { %v7841_v49 = vpop.f32.mrb[48].mxu1  ;;  %v7736_v11 = vpop.f32.mrb[25].mxu0 }
 0x342   : > { %v7737_v37 = vadd.f32 %v7736_v11, %v7735_v20  ;;  %v7842_v44 = vpop.f32.mrb[49].mxu1  ;;  %v7738_v45 = vpop.f32.mrb[26].mxu0  ;;  %v1380_v11 = vld [vmem:[#allocation2 + $0xca] sm:$0xff] }
 0x343   : > { %v7843_v63 = vadd.f32 %v7842_v44, %v7841_v49  ;;  %v7844_v10 = vpop.f32.mrb[50].mxu1  ;;  %v7739_v17 = vpop.f32.mrb[27].mxu0  ;;  %v1378_v49 = vld [vmem:[#allocation2 + $0xb2] sm:$0xff]  ;;  %v1390_v44 = vld [vmem:[#allocation2 + $0x142] sm:$0xff] }
 0x344   : > { %v7740_v39 = vadd.f32 %v7739_v17, %v7738_v45  ;;  %v7845_v43 = vpop.f32.mrb[51].mxu1  ;;  %v2073_v14 = vadd.f32 %v7737_v37, %v10697_v41  ;;  %v1389_v37 = vld [vmem:[#allocation2 + $0x13a] sm:$0xff]  ;;  %v1379_v45 = vld [vmem:[#allocation2 + $0xc2] sm:$0xff] }
 0x345   : > { %v10743_v52 = vadd.f32 %v7843_v63, %v2065_v8  ;;  %v7846_v54 = vadd.f32 %v7845_v43, %v7844_v10  ;;  %9172 = vmatmul.mubr.bf16.vlgmr.msra.gmra.mrb[132].mxu0 %v1400_v31  ;;  %v1392_v8 = vld [vmem:[#allocation2 + $0x15a] sm:$0xff] }
 0x346   : > { %2634 = vmatmul.mubr.bf16.gmra.mrb[156].mxu1 %v1318_v58  ;;  %9175 = vmatprep.mubr.bf16.mxu0 %v1401_v47  ;;  %v2076_v29 = vadd.f32 %v7740_v39, %v10697_v41  ;;  %v1404_v39 = vpack.c.bf16 %v1378_v49, %v1377_v46  ;;  %v1411_v4 = vpack.c.bf16 %v1392_v8, %v1391_v26  ;;  %v1398_v46 = vld [vmem:[#allocation2 + $0x1a2] sm:$0xff] }
 0x347   : > { %v10745_v0 = vadd.f32 %v7846_v54, %v2068_v50  ;;  %9187 = vmatprep.mubr.bf16.mxu1 %v1407_v62  ;;  %v1410_v50 = vpack.c.bf16 %v1390_v44, %v1389_v37  ;;  %v1405_v54 = vpack.c.bf16 %v1380_v11, %v1379_v45 }
 0x348   : > { %v7741_v2 = vpop.f32.mrb[28].mxu0 }
 0x349   : > { %v7847_v7 = vpop.f32.mrb[52].mxu1  ;;  %v7742_v18 = vpop.f32.mrb[29].mxu0 }
 0x34a   : > { %v7743_v5 = vadd.f32 %v7742_v18, %v7741_v2  ;;  %v7848_v38 = vpop.f32.mrb[53].mxu1  ;;  %v7744_v19 = vpop.f32.mrb[30].mxu0  ;;  %v1381_v18 = vld [vmem:[#allocation2 + $0xda] sm:$0xff] }
 0x34b   : > { %v7849_v51 = vadd.f32 %v7848_v38, %v7847_v7  ;;  %v7850_v53 = vpop.f32.mrb[54].mxu1  ;;  %v7745_v15 = vpop.f32.mrb[31].mxu0  ;;  %v1394_v38 = vld [vmem:[#allocation2 + $0x172] sm:$0xff] }
 0x34c   : > { %v7746_v60 = vadd.f32 %v7745_v15, %v7744_v19  ;;  %v7851_v3 = vpop.f32.mrb[55].mxu1  ;;  %v2081_v63 = vadd.f32 %v7743_v5, %v10697_v41  ;;  %v1393_v5 = vld [vmem:[#allocation2 + $0x16a] sm:$0xff] }
 0x34d   : > { %v10749_v40 = vadd.f32 %v7849_v51, %v2073_v14  ;;  %v7852_v55 = vadd.f32 %v7851_v3, %v7850_v53  ;;  %9176 = vmatmul.mubr.bf16.gmra.mrb[136].mxu0 %v1402_v1  ;;  %v1406_v1 = vpack.c.bf16 %v1382_v24, %v1381_v18 }
 0x34e   : > { %9188 = vmatmul.mubr.bf16.vlgmr.msra.gmra.mrb[160].mxu1 %v1408_v13  ;;  %9179 = vmatprep.mubr.bf16.mxu0 %v1403_v27  ;;  %v2084_v62 = vadd.f32 %v7746_v60, %v10697_v41  ;;  %v1412_v13 = vpack.c.bf16 %v1394_v38, %v1393_v5 }
 0x34f   : > { %v10751_v20 = vadd.f32 %v7852_v55, %v2076_v29  ;;  %9191 = vmatprep.mubr.bf16.mxu1 %v1409_v59 }
 0x350   : > { %v7747_v23 = vpop.f32.mrb[32].mxu0 }
 0x351   : > { %v7853_v16 = vpop.f32.mrb[56].mxu1  ;;  %v7748_v36 = vpop.f32.mrb[33].mxu0 }
 0x352   : > { %v7749_v56 = vadd.f32 %v7748_v36, %v7747_v23  ;;  %v7854_v58 = vpop.f32.mrb[57].mxu1  ;;  %v7750_v48 = vpop.f32.mrb[34].mxu0  ;;  %v1397_v23 = vld [vmem:[#allocation2 + $0x19a] sm:$0xff] }
 0x353   : > { %v7855_v10 = vadd.f32 %v7854_v58, %v7853_v16  ;;  %v7856_v17 = vpop.f32.mrb[58].mxu1  ;;  %v7751_v31 = vpop.f32.mrb[35].mxu0  ;;  %v1414_v45 = vpack.c.bf16 %v1398_v46, %v1397_v23 }
 0x354   : > { %v7752_v43 = vadd.f32 %v7751_v31, %v7750_v48  ;;  %v7857_v47 = vpop.f32.mrb[59].mxu1  ;;  %v2089_v14 = vadd.f32 %v7749_v56, %v10697_v41 }
 0x355   : > { %v10755_v2 = vadd.f32 %v7855_v10, %v2081_v63  ;;  %v7858_v61 = vadd.f32 %v7857_v47, %v7856_v17  ;;  %9180 = vmatmul.mubr.bf16.gmra.mrb[140].mxu0 %v1404_v39 }
 0x356   : > { %9192 = vmatmul.mubr.bf16.gmra.mrb[164].mxu1 %v1410_v50  ;;  %9183 = vmatprep.mubr.bf16.mxu0 %v1405_v54  ;;  %v2092_v27 = vadd.f32 %v7752_v43, %v10697_v41 }
 0x357   : > { %v10757_v42 = vadd.f32 %v7858_v61, %v2084_v62  ;;  %9195 = vmatprep.mubr.bf16.mxu1 %v1411_v4 }
 0x358   : > { %v7753_v7 = vpop.f32.mrb[36].mxu0 }
 0x359   : > { %v7859_v33 = vpop.f32.mrb[60].mxu1  ;;  %v7754_v35 = vpop.f32.mrb[37].mxu0 }
 0x35a   : > { %v7755_v19 = vadd.f32 %v7754_v35, %v7753_v7  ;;  %v7860_v32 = vpop.f32.mrb[61].mxu1  ;;  %v7756_v30 = vpop.f32.mrb[38].mxu0 }
 0x35b   : > { %v7861_v51 = vadd.f32 %v7860_v32, %v7859_v33  ;;  %v7862_v53 = vpop.f32.mrb[62].mxu1  ;;  %v7757_v15 = vpop.f32.mrb[39].mxu0 }
 0x35c   : > { %v7758_v60 = vadd.f32 %v7757_v15, %v7756_v30  ;;  %v7863_v3 = vpop.f32.mrb[63].mxu1  ;;  %v2097_v56 = vadd.f32 %v7755_v19, %v10697_v41 }
 0x35d   : > { %v10761_v29 = vadd.f32 %v7861_v51, %v2089_v14  ;;  %v7864_v55 = vadd.f32 %v7863_v3, %v7862_v53  ;;  %9184 = vmatmul.mubr.bf16.gmra.mrb[144].mxu0 %v1406_v1 }
 0x35e   : > { %9196 = vmatmul.mubr.bf16.gmra.mrb[168].mxu1 %v1412_v13  ;;  %v2100_v10 = vadd.f32 %v7758_v60, %v10697_v41 }
 0x35f   : > { %v10763_v59 = vadd.f32 %v7864_v55, %v2092_v27  ;;  %9199 = vmatprep.mubr.bf16.mxu1 %v10722_v9 }
 0x360   : > { %v7759_v49 = vpop.f32.mrb[40].mxu0 }
 0x361   : > { %v7865_v11 = vpop.f32.mrb[64].mxu1  ;;  %v7760_v16 = vpop.f32.mrb[41].mxu0 }
 0x362   : > { %v7761_v36 = vadd.f32 %v7760_v16, %v7759_v49  ;;  %v7866_v37 = vpop.f32.mrb[65].mxu1  ;;  %v7762_v44 = vpop.f32.mrb[42].mxu0 }
 0x363   : > { %v7867_v58 = vadd.f32 %v7866_v37, %v7865_v11  ;;  %v7868_v48 = vpop.f32.mrb[66].mxu1  ;;  %v7763_v26 = vpop.f32.mrb[43].mxu0 }
 0x364   : > { %v7764_v8 = vadd.f32 %v7763_v26, %v7762_v44  ;;  %v7869_v63 = vpop.f32.mrb[67].mxu1  ;;  %v2105_v61 = vadd.f32 %v7761_v36, %v10697_v41 }
 0x365   : > { %v10768_v17 = vadd.f32 %v7867_v58, %v2097_v56  ;;  %v7870_v9 = vadd.f32 %v7869_v63, %v7868_v48 }
 0x366   : > { %9200 = vmatmul.mubr.bf16.gmra.mrb[172].mxu1 %v1414_v45  ;;  %v2108_v35 = vadd.f32 %v7764_v8, %v10697_v41 }
 0x367   : > { %v10770_v31 = vadd.f32 %v7870_v9, %v2100_v10 }
 0x368   : > { %v7765_v39 = vpop.f32.mrb[44].mxu0 }
 0x369   : > { %v7871_v43 = vpop.f32.mrb[68].mxu1  ;;  %v7766_v47 = vpop.f32.mrb[45].mxu0 }
 0x36a   : > { %v7767_v50 = vadd.f32 %v7766_v47, %v7765_v39  ;;  %v7872_v54 = vpop.f32.mrb[69].mxu1  ;;  %v7768_v62 = vpop.f32.mrb[46].mxu0 }
 0x36b   : > { %v7873_v4 = vadd.f32 %v7872_v54, %v7871_v43  ;;  %v7874_v7 = vpop.f32.mrb[70].mxu1  ;;  %v7769_v18 = vpop.f32.mrb[47].mxu0 }
 0x36c   : > { %v7770_v24 = vadd.f32 %v7769_v18, %v7768_v62  ;;  %v7875_v33 = vpop.f32.mrb[71].mxu1  ;;  %v2113_v1 = vadd.f32 %v7767_v50, %v10697_v41 }
 0x36d   : > { %v10774_v5 = vadd.f32 %v7873_v4, %v2105_v61  ;;  %v7876_v38 = vadd.f32 %v7875_v33, %v7874_v7 }
 0x36e   : > { %v2116_v23 = vadd.f32 %v7770_v24, %v10697_v41 }
 0x36f   : > { %v10776_v19 = vadd.f32 %v7876_v38, %v2108_v35 }
 0x370   : > { %v7771_v32 = vpop.f32.mrb[48].mxu0 }
 0x371   : > { %v7877_v30 = vpop.f32.mrb[72].mxu1  ;;  %v7772_v14 = vpop.f32.mrb[49].mxu0 }
 0x372   : > { %v7773_v51 = vadd.f32 %v7772_v14, %v7771_v32  ;;  %v7878_v53 = vpop.f32.mrb[73].mxu1  ;;  %v7774_v15 = vpop.f32.mrb[50].mxu0 }
 0x373   : > { %v7879_v60 = vadd.f32 %v7878_v53, %v7877_v30  ;;  %v7880_v3 = vpop.f32.mrb[74].mxu1  ;;  %v7775_v13 = vpop.f32.mrb[51].mxu0 }
 0x374   : > { %v7776_v27 = vadd.f32 %v7775_v13, %v7774_v15  ;;  %v7881_v55 = vpop.f32.mrb[75].mxu1  ;;  %v2121_v58 = vadd.f32 %v7773_v51, %v10697_v41 }
 0x375   : > { %v10780_v46 = vadd.f32 %v7879_v60, %v2113_v1  ;;  %v7882_v49 = vadd.f32 %v7881_v55, %v7880_v3 }
 0x376   : > { %v2124_v9 = vadd.f32 %v7776_v27, %v10697_v41 }
 0x377   : > { %v10782_v11 = vadd.f32 %v7882_v49, %v2116_v23 }
 0x378   : > { %v7777_v16 = vpop.f32.mrb[52].mxu0 }
 0x379   : > { %v7883_v36 = vpop.f32.mrb[76].mxu1  ;;  %v7778_v37 = vpop.f32.mrb[53].mxu0 }
 0x37a   : > { %v7779_v44 = vadd.f32 %v7778_v37, %v7777_v16  ;;  %v7884_v45 = vpop.f32.mrb[77].mxu1  ;;  %v7780_v56 = vpop.f32.mrb[54].mxu0 }
 0x37b   : > { %v7885_v48 = vadd.f32 %v7884_v45, %v7883_v36  ;;  %v7886_v26 = vpop.f32.mrb[78].mxu1  ;;  %v7781_v8 = vpop.f32.mrb[55].mxu0 }
 0x37c   : > { %v7782_v63 = vadd.f32 %v7781_v8, %v7780_v56  ;;  %v7887_v10 = vpop.f32.mrb[79].mxu1  ;;  %v2129_v18 = vadd.f32 %v7779_v44, %v10697_v41 }
 0x37d   : > { %v10786_v39 = vadd.f32 %v7885_v48, %v2121_v58  ;;  %v7888_v43 = vadd.f32 %v7887_v10, %v7886_v26 }
 0x37e   : > { %v2132_v30 = vadd.f32 %v7782_v63, %v10697_v41 }
 0x37f   : > { %v10788_v47 = vadd.f32 %v7888_v43, %v2124_v9 }
 0x380   : > { %v7783_v50 = vpop.f32.mrb[56].mxu0 }
 0x381   : > { %v7889_v54 = vpop.f32.mrb[80].mxu1  ;;  %v7784_v62 = vpop.f32.mrb[57].mxu0 }
 0x382   : > { %v7785_v61 = vadd.f32 %v7784_v62, %v7783_v50  ;;  %v7890_v4 = vpop.f32.mrb[81].mxu1  ;;  %v7786_v7 = vpop.f32.mrb[58].mxu0 }
 0x383   : > { %v7891_v24 = vadd.f32 %v7890_v4, %v7889_v54  ;;  %v7892_v33 = vpop.f32.mrb[82].mxu1  ;;  %v7787_v35 = vpop.f32.mrb[59].mxu0 }
 0x384   : > { %v7788_v38 = vadd.f32 %v7787_v35, %v7786_v7  ;;  %v7893_v32 = vpop.f32.mrb[83].mxu1  ;;  %v2137_v55 = vadd.f32 %v7785_v61, %v10697_v41 }
 0x385   : > { %v10792_v14 = vadd.f32 %v7891_v24, %v2129_v18  ;;  %v7894_v51 = vadd.f32 %v7893_v32, %v7892_v33 }
 0x386   : > { %v2140_v44 = vadd.f32 %v7788_v38, %v10697_v41 }
 0x387   : > { %v10794_v53 = vadd.f32 %v7894_v51, %v2132_v30 }
 0x388   : > { %v7789_v15 = vpop.f32.mrb[60].mxu0 }
 0x389   : > { %v7895_v1 = vpop.f32.mrb[84].mxu1  ;;  %v7790_v60 = vpop.f32.mrb[61].mxu0 }
 0x38a   : > { %v7791_v3 = vadd.f32 %v7790_v60, %v7789_v15  ;;  %v7896_v13 = vpop.f32.mrb[85].mxu1  ;;  %v7792_v27 = vpop.f32.mrb[62].mxu0 }
 0x38b   : > { %v7897_v23 = vadd.f32 %v7896_v13, %v7895_v1  ;;  %v7898_v49 = vpop.f32.mrb[86].mxu1  ;;  %v7793_v16 = vpop.f32.mrb[63].mxu0 }
 0x38c   : > { %v7794_v36 = vadd.f32 %v7793_v16, %v7792_v27  ;;  %v7899_v37 = vpop.f32.mrb[87].mxu1  ;;  %v2145_v43 = vadd.f32 %v7791_v3, %v10697_v41 }
 0x38d   : > { %v10798_v45 = vadd.f32 %v7897_v23, %v2137_v55  ;;  %v7900_v56 = vadd.f32 %v7899_v37, %v7898_v49 }
 0x38e   : > { %v2148_v7 = vadd.f32 %v7794_v36, %v10697_v41 }
 0x38f   : > { %v10800_v58 = vadd.f32 %v7900_v56, %v2140_v44 }
 0x390   : > { %v7795_v48 = vpop.f32.mrb[64].mxu0 }
 0x391   : > { %v7901_v26 = vpop.f32.mrb[88].mxu1  ;;  %v7796_v8 = vpop.f32.mrb[65].mxu0 }
 0x392   : > { %v7797_v63 = vadd.f32 %v7796_v8, %v7795_v48  ;;  %v7902_v10 = vpop.f32.mrb[89].mxu1  ;;  %v7798_v9 = vpop.f32.mrb[66].mxu0 }
 0x393   : > { %v7903_v50 = vadd.f32 %v7902_v10, %v7901_v26  ;;  %v7904_v54 = vpop.f32.mrb[90].mxu1  ;;  %v7799_v62 = vpop.f32.mrb[67].mxu0 }
 0x394   : > { %v7800_v61 = vadd.f32 %v7799_v62, %v7798_v9  ;;  %v7905_v4 = vpop.f32.mrb[91].mxu1  ;;  %v2153_v1 = vadd.f32 %v7797_v63, %v10697_v41 }
 0x395   : > { %v10804_v18 = vadd.f32 %v7903_v50, %v2145_v43  ;;  %v7906_v24 = vadd.f32 %v7905_v4, %v7904_v54 }
 0x396   : > { %v2156_v49 = vadd.f32 %v7800_v61, %v10697_v41 }
 0x397   : > { %v10806_v33 = vadd.f32 %v7906_v24, %v2148_v7 }
 0x398   : > { %v7929_v35 = vpop.f32.mrb[68].mxu0 }
 0x399   : > { %v7907_v38 = vpop.f32.mrb[92].mxu1  ;;  %v7930_v32 = vpop.f32.mrb[69].mxu0 }
 0x39a   : > { %v7908_v30 = vpop.f32.mrb[93].mxu1  ;;  %v7931_v51 = vadd.f32 %v7930_v32, %v7929_v35  ;;  %v7932_v15 = vpop.f32.mrb[70].mxu0 }
 0x39b   : > { %v7909_v60 = vadd.f32 %v7908_v30, %v7907_v38  ;;  %v7910_v3 = vpop.f32.mrb[94].mxu1  ;;  %v7933_v13 = vpop.f32.mrb[71].mxu0 }
 0x39c   : > { %v2355_v27 = vadd.f32 %v7931_v51, %v10703_v22  ;;  %v7911_v55 = vpop.f32.mrb[95].mxu1  ;;  %v7934_v23 = vadd.f32 %v7933_v13, %v7932_v15 }
 0x39d   : > { %v10811_v16 = vadd.f32 %v7909_v60, %v2153_v1  ;;  %v7912_v36 = vadd.f32 %v7911_v55, %v7910_v3 }
 0x39e   : > { %v2358_v37 = vadd.f32 %v7934_v23, %v10708_v34 }
 0x39f   : > { %v10814_v44 = vadd.f32 %v7912_v36, %v2156_v49 }
 0x3a0   : > { %v7935_v56 = vpop.f32.mrb[72].mxu0 }
 0x3a1   : > { %v8041_v48 = vpop.f32.mrb[96].mxu1  ;;  %v7936_v26 = vpop.f32.mrb[73].mxu0 }
 0x3a2   : > { %v7937_v8 = vadd.f32 %v7936_v26, %v7935_v56  ;;  %v8042_v63 = vpop.f32.mrb[97].mxu1  ;;  %v7938_v10 = vpop.f32.mrb[74].mxu0 }
 0x3a3   : > { %v8043_v9 = vadd.f32 %v8042_v63, %v8041_v48  ;;  %v8044_v43 = vpop.f32.mrb[98].mxu1  ;;  %v7939_v22 = vpop.f32.mrb[75].mxu0 }
 0x3a4   : > { %v2363_v50 = vadd.f32 %v7937_v8, %v10713_v12  ;;  %v7940_v54 = vadd.f32 %v7939_v22, %v7938_v10  ;;  %v8045_v41 = vpop.f32.mrb[99].mxu1 }
 0x3a5   : > { %v8046_v62 = vadd.f32 %v8045_v41, %v8044_v43  ;;  %v10817_v61 = vadd.f32 %v8043_v9, %v2355_v27 }
 0x3a6   : > { %v2366_v34 = vadd.f32 %v7940_v54, %v10718_v28 }
 0x3a7   : > { %v10820_v4 = vadd.f32 %v8046_v62, %v2358_v37 }
 0x3a8   : > { %v7941_v7 = vpop.f32.mrb[76].mxu0 }
 0x3a9   : > { %v8047_v24 = vpop.f32.mrb[100].mxu1  ;;  %v7942_v35 = vpop.f32.mrb[77].mxu0 }
 0x3aa   : > { %v7943_v38 = vadd.f32 %v7942_v35, %v7941_v7  ;;  %v8048_v32 = vpop.f32.mrb[101].mxu1  ;;  %v7944_v30 = vpop.f32.mrb[78].mxu0 }
 0x3ab   : > { %v8049_v51 = vadd.f32 %v8048_v32, %v8047_v24  ;;  %v8050_v15 = vpop.f32.mrb[102].mxu1  ;;  %v7945_v1 = vpop.f32.mrb[79].mxu0 }
 0x3ac   : > { %v2371_v12 = vadd.f32 %v7943_v38, %v10725_v21  ;;  %v7946_v60 = vadd.f32 %v7945_v1, %v7944_v30  ;;  %v8051_v3 = vpop.f32.mrb[103].mxu1 }
 0x3ad   : > { %v8052_v13 = vadd.f32 %v8051_v3, %v8050_v15  ;;  %v10823_v27 = vadd.f32 %v8049_v51, %v2363_v50 }
 0x3ae   : > { %v2374_v28 = vadd.f32 %v7946_v60, %v10730_v25 }
 0x3af   : > { %v10826_v55 = vadd.f32 %v8052_v13, %v2366_v34 }
 0x3b0   : > { %v7947_v23 = vpop.f32.mrb[80].mxu0 }
 0x3b1   : > { %v8053_v49 = vpop.f32.mrb[104].mxu1  ;;  %v7948_v36 = vpop.f32.mrb[81].mxu0 }
 0x3b2   : > { %v7949_v37 = vadd.f32 %v7948_v36, %v7947_v23  ;;  %v8054_v56 = vpop.f32.mrb[105].mxu1  ;;  %v7950_v48 = vpop.f32.mrb[82].mxu0 }
 0x3b3   : > { %v8055_v26 = vadd.f32 %v8054_v56, %v8053_v49  ;;  %v8056_v8 = vpop.f32.mrb[106].mxu1  ;;  %v7951_v63 = vpop.f32.mrb[83].mxu0 }
 0x3b4   : > { %v2379_v21 = vadd.f32 %v7949_v37, %v10735_v57  ;;  %v7952_v10 = vadd.f32 %v7951_v63, %v7950_v48  ;;  %v8057_v9 = vpop.f32.mrb[107].mxu1 }
 0x3b5   : > { %v8058_v43 = vadd.f32 %v8057_v9, %v8056_v8  ;;  %v10829_v22 = vadd.f32 %v8055_v26, %v2371_v12 }
 0x3b6   : > { %v2382_v25 = vadd.f32 %v7952_v10, %v10739_v6 }
 0x3b7   : > { %v10832_v50 = vadd.f32 %v8058_v43, %v2374_v28 }
 0x3b8   : > { %v7953_v54 = vpop.f32.mrb[84].mxu0 }
 0x3b9   : > { %v8059_v41 = vpop.f32.mrb[108].mxu1  ;;  %v7954_v62 = vpop.f32.mrb[85].mxu0 }
 0x3ba   : > { %v7955_v34 = vadd.f32 %v7954_v62, %v7953_v54  ;;  %v8060_v7 = vpop.f32.mrb[109].mxu1  ;;  %v7956_v24 = vpop.f32.mrb[86].mxu0 }
 0x3bb   : > { %v8061_v35 = vadd.f32 %v8060_v7, %v8059_v41  ;;  %v8062_v38 = vpop.f32.mrb[110].mxu1  ;;  %v7957_v32 = vpop.f32.mrb[87].mxu0 }
 0x3bc   : > { %v2387_v57 = vadd.f32 %v7955_v34, %v10743_v52  ;;  %v7958_v30 = vadd.f32 %v7957_v32, %v7956_v24  ;;  %v8063_v51 = vpop.f32.mrb[111].mxu1 }
 0x3bd   : > { %v8064_v15 = vadd.f32 %v8063_v51, %v8062_v38  ;;  %v10835_v1 = vadd.f32 %v8061_v35, %v2379_v21 }
 0x3be   : > { %v2390_v6 = vadd.f32 %v7958_v30, %v10745_v0 }
 0x3bf   : > { %v10838_v12 = vadd.f32 %v8064_v15, %v2382_v25 }
 0x3c0   : > { %v7959_v60 = vpop.f32.mrb[88].mxu0 }
 0x3c1   : > { %v8065_v3 = vpop.f32.mrb[112].mxu1  ;;  %v7960_v13 = vpop.f32.mrb[89].mxu0 }
 0x3c2   : > { %v7961_v28 = vadd.f32 %v7960_v13, %v7959_v60  ;;  %v8066_v23 = vpop.f32.mrb[113].mxu1  ;;  %v7962_v49 = vpop.f32.mrb[90].mxu0 }
 0x3c3   : > { %v8067_v36 = vadd.f32 %v8066_v23, %v8065_v3  ;;  %v8068_v37 = vpop.f32.mrb[114].mxu1  ;;  %v7963_v56 = vpop.f32.mrb[91].mxu0 }
 0x3c4   : > { %v2395_v52 = vadd.f32 %v7961_v28, %v10749_v40  ;;  %v7964_v48 = vadd.f32 %v7963_v56, %v7962_v49  ;;  %v8069_v26 = vpop.f32.mrb[115].mxu1 }
 0x3c5   : > { %v8070_v8 = vadd.f32 %v8069_v26, %v8068_v37  ;;  %v10841_v63 = vadd.f32 %v8067_v36, %v2387_v57 }
 0x3c6   : > { %v2398_v0 = vadd.f32 %v7964_v48, %v10751_v20 }
 0x3c7   : > { %v10844_v21 = vadd.f32 %v8070_v8, %v2390_v6 }
 0x3c8   : > { %v7965_v10 = vpop.f32.mrb[92].mxu0 }
 0x3c9   : > { %v8071_v9 = vpop.f32.mrb[116].mxu1  ;;  %v7966_v43 = vpop.f32.mrb[93].mxu0 }
 0x3ca   : > { %v7967_v25 = vadd.f32 %v7966_v43, %v7965_v10  ;;  %v8072_v54 = vpop.f32.mrb[117].mxu1  ;;  %v7968_v41 = vpop.f32.mrb[94].mxu0 }
 0x3cb   : > { %v8073_v62 = vadd.f32 %v8072_v54, %v8071_v9  ;;  %v8074_v34 = vpop.f32.mrb[118].mxu1  ;;  %v7969_v7 = vpop.f32.mrb[95].mxu0 }
 0x3cc   : > { %v2403_v40 = vadd.f32 %v7967_v25, %v10755_v2  ;;  %v7970_v24 = vadd.f32 %v7969_v7, %v7968_v41  ;;  %v8075_v35 = vpop.f32.mrb[119].mxu1 }
 0x3cd   : > { %v8076_v38 = vadd.f32 %v8075_v35, %v8074_v34  ;;  %v10847_v32 = vadd.f32 %v8073_v62, %v2395_v52 }
 0x3ce   : > { %v2406_v20 = vadd.f32 %v7970_v24, %v10757_v42 }
 0x3cf   : > { %v10850_v57 = vadd.f32 %v8076_v38, %v2398_v0 }
 0x3d0   : > { %v7971_v30 = vpop.f32.mrb[96].mxu0 }
 0x3d1   : > { %v8077_v51 = vpop.f32.mrb[120].mxu1  ;;  %v7972_v15 = vpop.f32.mrb[97].mxu0 }
 0x3d2   : > { %v7973_v6 = vadd.f32 %v7972_v15, %v7971_v30  ;;  %v8078_v60 = vpop.f32.mrb[121].mxu1  ;;  %v7974_v3 = vpop.f32.mrb[98].mxu0 }
 0x3d3   : > { %v8079_v13 = vadd.f32 %v8078_v60, %v8077_v51  ;;  %v8080_v28 = vpop.f32.mrb[122].mxu1  ;;  %v7975_v23 = vpop.f32.mrb[99].mxu0 }
 0x3d4   : > { %v2411_v2 = vadd.f32 %v7973_v6, %v10761_v29  ;;  %v7976_v49 = vadd.f32 %v7975_v23, %v7974_v3  ;;  %v8081_v36 = vpop.f32.mrb[123].mxu1 }
 0x3d5   : > { %v8082_v37 = vadd.f32 %v8081_v36, %v8080_v28  ;;  %v10853_v56 = vadd.f32 %v8079_v13, %v2403_v40 }
 0x3d6   : > { %v2414_v42 = vadd.f32 %v7976_v49, %v10763_v59 }
 0x3d7   : > { %v10856_v52 = vadd.f32 %v8082_v37, %v2406_v20 }
 0x3d8   : > { %v7977_v48 = vpop.f32.mrb[100].mxu0 }
 0x3d9   : > { %v8083_v26 = vpop.f32.mrb[124].mxu1  ;;  %v7978_v8 = vpop.f32.mrb[101].mxu0 }
 0x3da   : > { %v7979_v0 = vadd.f32 %v7978_v8, %v7977_v48  ;;  %v8084_v10 = vpop.f32.mrb[125].mxu1  ;;  %v7980_v9 = vpop.f32.mrb[102].mxu0 }
 0x3db   : > { %v8085_v43 = vadd.f32 %v8084_v10, %v8083_v26  ;;  %v8086_v25 = vpop.f32.mrb[126].mxu1  ;;  %v7981_v54 = vpop.f32.mrb[103].mxu0 }
 0x3dc   : > { %v2419_v29 = vadd.f32 %v7979_v0, %v10768_v17  ;;  %v7982_v41 = vadd.f32 %v7981_v54, %v7980_v9  ;;  %v8087_v62 = vpop.f32.mrb[127].mxu1 }
 0x3dd   : > { %v8088_v34 = vadd.f32 %v8087_v62, %v8086_v25  ;;  %v10859_v7 = vadd.f32 %v8085_v43, %v2411_v2 }
 0x3de   : > { %v2422_v59 = vadd.f32 %v7982_v41, %v10770_v31 }
 0x3df   : > { %v10862_v40 = vadd.f32 %v8088_v34, %v2414_v42 }
 0x3e0   : > { %v7983_v24 = vpop.f32.mrb[104].mxu0 }
 0x3e1   : > { %v8089_v35 = vpop.f32.mrb[128].mxu1  ;;  %v7984_v38 = vpop.f32.mrb[105].mxu0 }
 0x3e2   : > { %v7985_v20 = vadd.f32 %v7984_v38, %v7983_v24  ;;  %v8090_v30 = vpop.f32.mrb[129].mxu1  ;;  %v7986_v51 = vpop.f32.mrb[106].mxu0 }
 0x3e3   : > { %v8091_v15 = vadd.f32 %v8090_v30, %v8089_v35  ;;  %v8092_v6 = vpop.f32.mrb[130].mxu1  ;;  %v7987_v60 = vpop.f32.mrb[107].mxu0 }
 0x3e4   : > { %v2427_v17 = vadd.f32 %v7985_v20, %v10774_v5  ;;  %v7988_v3 = vadd.f32 %v7987_v60, %v7986_v51  ;;  %v8093_v13 = vpop.f32.mrb[131].mxu1 }
 0x3e5   : > { %v8094_v28 = vadd.f32 %v8093_v13, %v8092_v6  ;;  %v10865_v23 = vadd.f32 %v8091_v15, %v2419_v29 }
 0x3e6   : > { %v2430_v31 = vadd.f32 %v7988_v3, %v10776_v19 }
 0x3e7   : > { %v10868_v2 = vadd.f32 %v8094_v28, %v2422_v59 }
 0x3e8   : > { %v7989_v49 = vpop.f32.mrb[108].mxu0 }
 0x3e9   : > { %v8095_v36 = vpop.f32.mrb[132].mxu1  ;;  %v7990_v37 = vpop.f32.mrb[109].mxu0 }
 0x3ea   : > { %v7991_v42 = vadd.f32 %v7990_v37, %v7989_v49  ;;  %v8096_v48 = vpop.f32.mrb[133].mxu1  ;;  %v7992_v26 = vpop.f32.mrb[110].mxu0 }
 0x3eb   : > { %v8097_v8 = vadd.f32 %v8096_v48, %v8095_v36  ;;  %v8098_v0 = vpop.f32.mrb[134].mxu1  ;;  %v7993_v10 = vpop.f32.mrb[111].mxu0 }
 0x3ec   : > { %v2435_v5 = vadd.f32 %v7991_v42, %v10780_v46  ;;  %v7994_v9 = vadd.f32 %v7993_v10, %v7992_v26  ;;  %v8099_v43 = vpop.f32.mrb[135].mxu1 }
 0x3ed   : > { %v8100_v25 = vadd.f32 %v8099_v43, %v8098_v0  ;;  %v10871_v54 = vadd.f32 %v8097_v8, %v2427_v17 }
 0x3ee   : > { %v2438_v19 = vadd.f32 %v7994_v9, %v10782_v11  ;;  %v9494_v9 = vld [vmem:[#allocation6 + $0x40] sm:$0xff]  }
 0x3ef   : > { %v10874_v29 = vadd.f32 %v8100_v25, %v2430_v31  ;;  %v9495_v25 = vld [vmem:[#allocation6] sm:$0xff]   ;;  %8161 = vmatprep.subr.bf16.mxu1 %v9494_v9  ;;  %v9498_v9 = vld [vmem:[#allocation6 + $0x50] sm:$0xff]  }
 0x3f0   : > { %v7995_v41 = vpop.f32.mrb[112].mxu0  ;;  %8162 = vmatpush3.bf16.msra.mxu1 %v9495_v25  ;;  %v9499_v25 = vld [vmem:[#allocation6 + $0x10] sm:$0xff]  }
 0x3f1   : > { %v8101_v62 = vpop.f32.mrb[136].mxu1  ;;  %v7996_v34 = vpop.f32.mrb[113].mxu0 }
 0x3f2   : > { %v7997_v59 = vadd.f32 %v7996_v34, %v7995_v41  ;;  %v8102_v24 = vpop.f32.mrb[137].mxu1  ;;  %v7998_v35 = vpop.f32.mrb[114].mxu0 }
 0x3f3   : > { %v8103_v38 = vadd.f32 %v8102_v24, %v8101_v62  ;;  %v8104_v20 = vpop.f32.mrb[138].mxu1  ;;  %v7999_v30 = vpop.f32.mrb[115].mxu0 }
 0x3f4   : > { %v2443_v46 = vadd.f32 %v7997_v59, %v10786_v39  ;;  %v8000_v51 = vadd.f32 %v7999_v30, %v7998_v35  ;;  %v8105_v15 = vpop.f32.mrb[139].mxu1 }
 0x3f5   : > { %v8106_v6 = vadd.f32 %v8105_v15, %v8104_v20  ;;  %v10877_v60 = vadd.f32 %v8103_v38, %v2435_v5 }
 0x3f6   : > { %v2446_v11 = vadd.f32 %v8000_v51, %v10788_v47 }
 0x3f7   : > { %v10880_v17 = vadd.f32 %v8106_v6, %v2438_v19 }
 0x3f8   : > { %v8001_v3 = vpop.f32.mrb[116].mxu0 }
 0x3f9   : > { %v8107_v13 = vpop.f32.mrb[140].mxu1  ;;  %v8002_v28 = vpop.f32.mrb[117].mxu0 }
 0x3fa   : > { %v8003_v31 = vadd.f32 %v8002_v28, %v8001_v3  ;;  %v8108_v49 = vpop.f32.mrb[141].mxu1  ;;  %v8004_v36 = vpop.f32.mrb[118].mxu0 }
 0x3fb   : > { %v8109_v37 = vadd.f32 %v8108_v49, %v8107_v13  ;;  %v8110_v42 = vpop.f32.mrb[142].mxu1  ;;  %v8005_v48 = vpop.f32.mrb[119].mxu0 }
 0x3fc   : > { %v2451_v39 = vadd.f32 %v8003_v31, %v10792_v14  ;;  %v8006_v26 = vadd.f32 %v8005_v48, %v8004_v36  ;;  %v8111_v8 = vpop.f32.mrb[143].mxu1 }
 0x3fd   : > { %v8112_v0 = vadd.f32 %v8111_v8, %v8110_v42  ;;  %v10883_v10 = vadd.f32 %v8109_v37, %v2443_v46  ;;  %v9496_v42 = vld [vmem:[#allocation6 + $0x48] sm:$0xff]  }
 0x3fe   : > { %v2454_v47 = vadd.f32 %v8006_v26, %v10794_v53  ;;  %8163 = vmatprep.subr.bf16.mxu1 %v9496_v42 }
 0x3ff   : > { %v10886_v5 = vadd.f32 %v8112_v0, %v2446_v11 }
 0x400   : > { %v8007_v43 = vpop.f32.mrb[120].mxu0 }
 0x401   : > { %v8113_v19 = vpop.f32.mrb[144].mxu1  ;;  %v8008_v41 = vpop.f32.mrb[121].mxu0 }
 0x402   : > { %v8009_v62 = vadd.f32 %v8008_v41, %v8007_v43  ;;  %v8114_v34 = vpop.f32.mrb[145].mxu1  ;;  %v8010_v59 = vpop.f32.mrb[122].mxu0 }
 0x403   : > { %v8115_v14 = vadd.f32 %v8114_v34, %v8113_v19  ;;  %v8116_v24 = vpop.f32.mrb[146].mxu1  ;;  %v8011_v35 = vpop.f32.mrb[123].mxu0 }
 0x404   : > { %v2459_v38 = vadd.f32 %v8009_v62, %v10798_v45  ;;  %v8012_v20 = vadd.f32 %v8011_v35, %v8010_v59  ;;  %v8117_v30 = vpop.f32.mrb[147].mxu1  ;;  %v9500_v59 = vld [vmem:[#allocation6 + $0xc0] sm:$0xff]  }
 0x405   : > { %v8118_v53 = vadd.f32 %v8117_v30, %v8116_v24  ;;  %v10889_v46 = vadd.f32 %v8115_v14, %v2451_v39  ;;  %v9497_v39 = vld [vmem:[#allocation6 + $0x8] sm:$0xff]   ;;  %8273 = vmatprep.subr.bf16.mxu0 %v9500_v59 }
 0x406   : > { %v2462_v51 = vadd.f32 %v8012_v20, %v10800_v58  ;;  %8164 = vmatpush3.bf16.msra.mxu1 %v9497_v39  ;;  %v9502_v20 = vld [vmem:[#allocation6 + $0x80] sm:$0xff]  }
 0x407   : > { %v10892_v15 = vadd.f32 %v8118_v53, %v2454_v47  ;;  %8165 = vmatprep.subr.bf16.mxu1 %v9498_v9  ;;  %8274 = vmatpush3.bf16.msra.mxu0 %v9502_v20 }
 0x408   : > { %v8013_v6 = vpop.f32.mrb[124].mxu0 }
 0x409   : > { %v8119_v11 = vpop.f32.mrb[148].mxu1  ;;  %v8014_v3 = vpop.f32.mrb[125].mxu0 }
 0x40a   : > { %v8015_v13 = vadd.f32 %v8014_v3, %v8013_v6  ;;  %v8120_v28 = vpop.f32.mrb[149].mxu1  ;;  %v8016_v31 = vpop.f32.mrb[126].mxu0  ;;  %8166 = vmatpush3.bf16.msra.mxu1 %v9499_v25 }
 0x40b   : > { %v8121_v49 = vadd.f32 %v8120_v28, %v8119_v11  ;;  %v8122_v36 = vpop.f32.mrb[150].mxu1  ;;  %v8017_v37 = vpop.f32.mrb[127].mxu0 }
 0x40c   : > { %v2467_v45 = vadd.f32 %v8015_v13, %v10804_v18  ;;  %v8018_v48 = vadd.f32 %v8017_v37, %v8016_v31  ;;  %v8123_v26 = vpop.f32.mrb[151].mxu1  ;;  %v9504_v13 = vld [vmem:[#allocation6 + $0xc8] sm:$0xff]   ;;  %v9505_v31 = vld [vmem:[#allocation6 + $0x60] sm:$0xff]  }
 0x40d   : > { %v8124_v8 = vadd.f32 %v8123_v26, %v8122_v36  ;;  %v10895_v0 = vadd.f32 %v8121_v49, %v2459_v38  ;;  %v9501_v38 = vld [vmem:[#allocation6 + $0x58] sm:$0xff]   ;;  %v9506_v49 = vld [vmem:[#allocation6 + $0x88] sm:$0xff]   ;;  %8275 = vmatprep.subr.bf16.mxu0 %v9504_v13 }
 0x40e   : > { %v2470_v58 = vadd.f32 %v8018_v48, %v10806_v33  ;;  %8167 = vmatprep.subr.bf16.mxu1 %v9501_v38  ;;  %8276 = vmatpush3.bf16.msra.mxu0 %v9506_v49 }
 0x40f   : > { %v10898_v47 = vadd.f32 %v8124_v8, %v2462_v51  ;;  %v9503_v51 = vld [vmem:[#allocation6 + $0x18] sm:$0xff]  }
 0x410   : > { %v8019_v43 = vpop.f32.mrb[128].mxu0  ;;  %8168 = vmatpush3.bf16.msra.mxu1 %v9503_v51  ;;  %v9513_v51 = vld [vmem:[#allocation6 + $0x70] sm:$0xff]  }
 0x411   : > { %v8125_v19 = vpop.f32.mrb[152].mxu1  ;;  %v8020_v41 = vpop.f32.mrb[129].mxu0  ;;  %8169 = vmatprep.subr.bf16.mxu1 %v9505_v31 }
 0x412   : > { %v8021_v62 = vadd.f32 %v8020_v41, %v8019_v43  ;;  %v8126_v18 = vpop.f32.mrb[153].mxu1  ;;  %v8022_v34 = vpop.f32.mrb[130].mxu0  ;;  %v9510_v41 = vld [vmem:[#allocation6 + $0x90] sm:$0xff]  }
 0x413   : > { %v8127_v14 = vadd.f32 %v8126_v18, %v8125_v19  ;;  %v8128_v24 = vpop.f32.mrb[154].mxu1  ;;  %v8023_v35 = vpop.f32.mrb[131].mxu0  ;;  %v9509_v19 = vld [vmem:[#allocation6 + $0x68] sm:$0xff]  }
 0x414   : > { %v2475_v33 = vadd.f32 %v8021_v62, %v10811_v16  ;;  %v8024_v30 = vadd.f32 %v8023_v35, %v8022_v34  ;;  %v8129_v53 = vpop.f32.mrb[155].mxu1  ;;  %v9507_v16 = vld [vmem:[#allocation6 + $0x20] sm:$0xff]   ;;  %v9511_v34 = vld [vmem:[#allocation6 + $0x28] sm:$0xff]  }
 0x415   : > { %v8130_v6 = vadd.f32 %v8129_v53, %v8128_v24  ;;  %v10901_v11 = vadd.f32 %v8127_v14, %v2467_v45  ;;  %8170 = vmatpush3.bf16.msra.mxu1 %v9507_v16 }
 0x416   : > { %v2478_v3 = vadd.f32 %v8024_v30, %v10814_v44  ;;  %v9508_v44 = vld [vmem:[#allocation6 + $0xd0] sm:$0xff]   ;;  %8171 = vmatprep.subr.bf16.mxu1 %v9509_v19  ;;  %v9517_v19 = vld [vmem:[#allocation6 + $0x78] sm:$0xff]  }
 0x417   : > { %v10904_v28 = vadd.f32 %v8130_v6, %v2470_v58  ;;  %8277 = vmatprep.subr.bf16.mxu0 %v9508_v44  ;;  %v9516_v44 = vld [vmem:[#allocation6 + $0xe0] sm:$0xff]  }
 0x418   : > { %v9173_v36 = vpop.f32.mrb[132].mxu0  ;;  %8278 = vmatpush3.bf16.msra.mxu0 %v9510_v41  ;;  %v9518_v41 = vld [vmem:[#allocation6 + $0xa0] sm:$0xff]  }
 0x419   : > { %12404 = vst [vmem:[#allocation19_spill] sm:$0xff] %v10904_v28  ;;  %v8131_v37 = vpop.f32.mrb[156].mxu1  ;;  %v2685_v42 = vadd.f32 %v9173_v36, %v10823_v27  ;;  %v2676_v48 = vpop.f32.mrb[133].mxu0  ;;  %8172 = vmatpush3.bf16.msra.mxu1 %v9511_v34 }
 0x41a   : > { %v8132_v45 = vpop.f32.mrb[157].mxu1  ;;  %v2677_v26 = vadd.f32 %v2676_v48, %v10817_v61  ;;  %v9174_v39 = vpop.f32.mrb[134].mxu0  ;;  %8173 = vmatprep.subr.bf16.mxu1 %v9513_v51 }
 0x41b   : > { %v2805_v8 = vmax.f32 %v2685_v42, 0.0  ;;  %v8133_v58 = vadd.f32 %v8132_v45, %v8131_v37  ;;  %v8134_v9 = vpop.f32.mrb[158].mxu1  ;;  %v2688_v43 = vadd.f32 %v9174_v39, %v10826_v55  ;;  %v2679_v25 = vpop.f32.mrb[135].mxu0  ;;  %v9512_v55 = vld [vmem:[#allocation6 + $0xd8] sm:$0xff]  }
 0x41c   : > { %v2803_v62 = vmax.f32 %v2677_v26, 0.0  ;;  %v8135_v18 = vpop.f32.mrb[159].mxu1  ;;  %v2680_v27 = vadd.f32 %v2679_v25, %v10820_v4  ;;  %v9514_v4 = vld [vmem:[#allocation6 + $0x98] sm:$0xff]   ;;  %8279 = vmatprep.subr.bf16.mxu0 %v9512_v55 }
 0x41d   : > { %v2837_v59 = vmin.f32 %v2805_v8, 6.0  ;;  %v2806_v14 = vmax.f32 %v2688_v43, 0.0  ;;  %v8136_v61 = vadd.f32 %v8135_v18, %v8134_v9  ;;  %v10910_v24 = vadd.f32 %v8133_v58, %v2475_v33  ;;  %v9515_v33 = vld [vmem:[#allocation6 + $0x30] sm:$0xff]   ;;  %8280 = vmatpush3.bf16.msra.mxu0 %v9514_v4 }
 0x41e   : > { %v2835_v35 = vmin.f32 %v2803_v62, 6.0  ;;  %v2804_v38 = vmax.f32 %v2680_v27, 0.0  ;;  %8174 = vmatpush3.bf16.msra.mxu1 %v9515_v33  ;;  %8281 = vmatprep.subr.bf16.mxu0 %v9516_v44 }
 0x41f   : > { %v2901_v20 = vmul.f32 0.044715, %v2837_v59  ;;  %v10912_v30 = vmin.f32 %v2806_v14, 6.0  ;;  %v10914_v53 = vadd.f32 %v8136_v61, %v2478_v3  ;;  %v9519_v14 = vld [vmem:[#allocation6 + $0x38] sm:$0xff]   ;;  %8175 = vmatprep.subr.bf16.mxu1 %v9517_v19 }
 0x420   : > { %v2899_v6 = vmul.f32 0.044715, %v2835_v35  ;;  %v10916_v13 = vmin.f32 %v2804_v38, 6.0  ;;  %v9177_v31 = vpop.f32.mrb[136].mxu0 }
 0x421   : > { %12405 = vst [vmem:[#allocation20_spill] sm:$0xff] %v10914_v53  ;;  %v2933_v49 = vmul.f32 %v2901_v20, %v2837_v59  ;;  %v2902_v36 = vmul.f32 0.044715, %v10912_v30  ;;  %v2701_v16 = vadd.f32 %v9177_v31, %v10835_v1  ;;  %v9189_v37 = vpop.f32.mrb[160].mxu1  ;;  %v2692_v42 = vpop.f32.mrb[137].mxu0  ;;  %8282 = vmatpush3.bf16.msra.mxu0 %v9518_v41  ;;  %v9520_v31 = vld [vmem:[#allocation6 + $0xe8] sm:$0xff]  }
 0x422   : > { %v2931_v48 = vmul.f32 %v2899_v6, %v2835_v35  ;;  %v2900_v3 = vmul.f32 0.044715, %v10916_v13  ;;  %v2749_v45 = vadd.f32 %v9189_v37, %v10871_v54  ;;  %v2740_v26 = vpop.f32.mrb[161].mxu1  ;;  %v10922_v39 = vpop.f32.mrb[138].mxu0  ;;  %v2693_v1 = vadd.f32 %v2692_v42, %v10829_v22  ;;  %8176 = vmatpush3.bf16.msra.mxu1 %v9519_v14  ;;  %8283 = vmatprep.subr.bf16.mxu0 %v9520_v31 }
 0x423   : > { %v2965_v8 = vmul.f32 %v2933_v49, %v2837_v59  ;;  %v2934_v58 = vmul.f32 %v2902_v36, %v10912_v30  ;;  %v2809_v9 = vmax.f32 %v2701_v16, 0.0  ;;  %v10926_v43 = vpop.f32.mrb[162].mxu1  ;;  %v10928_v25 = vpop.f32.mrb[139].mxu0  ;;  %v2741_v27 = vadd.f32 %v2740_v26, %v10865_v23  ;;  %v9521_v16 = vld [vmem:[#allocation6 + $0xa8] sm:$0xff]  }
 0x424   : > { %v2963_v62 = vmul.f32 %v2931_v48, %v2835_v35  ;;  %v2932_v54 = vmul.f32 %v2900_v3, %v10916_v13  ;;  %v2821_v18 = vmax.f32 %v2749_v45, 0.0  ;;  %v2743_v34 = vpop.f32.mrb[163].mxu1  ;;  %v2807_v22 = vmax.f32 %v2693_v1, 0.0 }
 0x425   : > { %v2997_v61 = vadd.f32 %v2965_v8, %v2837_v59  ;;  %v2966_v38 = vmul.f32 %v2934_v58, %v10912_v30  ;;  %v10933_v55 = vmin.f32 %v2809_v9, 6.0  ;;  %v2819_v6 = vmax.f32 %v2741_v27, 0.0  ;;  %8284 = vmatpush3.bf16.msra.mxu0 %v9521_v16 }
 0x426   : > { %v2995_v20 = vadd.f32 %v2963_v62, %v2835_v35  ;;  %v2964_v51 = vmul.f32 %v2932_v54, %v10916_v13  ;;  %v10936_v4 = vmin.f32 %v2821_v18, 6.0  ;;  %v10938_v23 = vmul.f32 0.5, %v2837_v59  ;;  %v9523_v62 = vld [vmem:[#allocation6 + $0xf0] sm:$0xff]  }
 0x427   : > { %v3029_v33 = vmul.f32 0.7978846, %v2997_v61  ;;  %v2998_v49 = vadd.f32 %v2966_v38, %v10912_v30  ;;  %v2905_v36 = vmul.f32 0.044715, %v10933_v55  ;;  %v10942_v37 = vmul.f32 0.5, %v2835_v35  ;;  %v9525_v38 = vld [vmem:[#allocation6 + $0xb0] sm:$0xff]   ;;  %8285 = vmatprep.subr.bf16.mxu0 %v9523_v62 }
 0x428   : > { %v3027_v42 = vmul.f32 0.7978846, %v2995_v20  ;;  %v2996_v48 = vadd.f32 %v2964_v51, %v10916_v13  ;;  %v2917_v3 = vmul.f32 0.044715, %v10936_v4  ;;  %v10946_v45 = vpop.f32.mrb[140].mxu0  ;;  %v2839_v44 = vmin.f32 %v2807_v22, 6.0 }
 0x429   : > { %9638 = vtanh.f32 %v3029_v33  ;;  %v3030_v26 = vmul.f32 0.7978846, %v2998_v49  ;;  %v2937_v59 = vmul.f32 %v2905_v36, %v10933_v55  ;;  %v10949_v8 = vpop.f32.mrb[164].mxu1  ;;  %v10951_v58 = vpop.f32.mrb[141].mxu0  ;;  %v10954_v1 = vmin.f32 %v2819_v6, 6.0  ;;  %8286 = vmatpush3.bf16.msra.mxu0 %v9525_v38 }
 0x42a   : > { %9640 = vtanh.f32 %v3027_v42  ;;  %v3028_v35 = vmul.f32 0.7978846, %v2996_v48  ;;  %v2949_v9 = vmul.f32 %v2917_v3, %v10936_v4  ;;  %v10956_v19 = vpop.f32.mrb[165].mxu1  ;;  %v10958_v41 = vpop.f32.mrb[142].mxu0  ;;  %v10961_v54 = vmul.f32 0.5, %v10912_v30  ;;  %v9526_v48 = vld [vmem:[#allocation6 + $0xf8] sm:$0xff]  }
 0x42b   : > { %9642 = vtanh.f32 %v3030_v26  ;;  %v2969_v18 = vmul.f32 %v2937_v59, %v10933_v55  ;;  %v2903_v27 = vmul.f32 0.044715, %v2839_v44  ;;  %v10964_v14 = vpop.f32.mrb[166].mxu1  ;;  %v10966_v61 = vpop.f32.mrb[143].mxu0  ;;  %v10969_v22 = vmul.f32 0.5, %v10916_v13  ;;  %8287 = vmatprep.subr.bf16.mxu0 %v9526_v48 }
 0x42c   : > { %9644 = vtanh.f32 %v3028_v35  ;;  %v2981_v20 = vmul.f32 %v2949_v9, %v10936_v4  ;;  %v2915_v51 = vmul.f32 0.044715, %v10954_v1  ;;  %v10973_v6 = vpop.f32.mrb[167].mxu1  ;;  %v2704_v33 = vadd.f32 %v10922_v39, %v10838_v12  ;;  %v9527_v9 = vld [vmem:[#allocation6 + $0xb8] sm:$0xff]  }
 0x42d   : > { %v3001_v30 = vadd.f32 %v2969_v18, %v10933_v55  ;;  %v2935_v31 = vmul.f32 %v2903_v27, %v2839_v44  ;;  %v2752_v49 = vadd.f32 %v10926_v43, %v10874_v29  ;;  %v2696_v16 = vadd.f32 %v10928_v25, %v10832_v50  ;;  %8288 = vmatpush3.bf16.msra.mxu0 %v9527_v9 }
 0x42e   : > { %v3013_v13 = vadd.f32 %v2981_v20, %v10936_v4  ;;  %v2947_v36 = vmul.f32 %v2915_v51, %v10954_v1  ;;  %v2744_v42 = vadd.f32 %v2743_v34, %v10868_v2  ;;  %v2810_v59 = vmax.f32 %v2704_v33, 0.0 }
 0x42f   : > { %v3033_v3 = vmul.f32 0.7978846, %v3001_v30  ;;  %v2967_v26 = vmul.f32 %v2935_v31, %v2839_v44  ;;  %v2822_v35 = vmax.f32 %v2752_v49, 0.0  ;;  %v2808_v29 = vmax.f32 %v2696_v16, 0.0 }
 0x430   : > { %v3045_v12 = vmul.f32 0.7978846, %v3013_v13  ;;  %v2979_v39 = vmul.f32 %v2947_v36, %v10954_v1  ;;  %v2820_v43 = vmax.f32 %v2744_v42, 0.0  ;;  %v10986_v62 = vpop.f32.mrb[144].mxu0  ;;  %v10988_v27 = vmin.f32 %v2810_v59, 6.0 }
 0x431   : > { %9646 = vtanh.f32 %v3033_v3  ;;  %v2999_v18 = vadd.f32 %v2967_v26, %v2839_v44  ;;  %v10990_v50 = vmin.f32 %v2822_v35, 6.0  ;;  %v10992_v2 = vpop.f32.mrb[168].mxu1  ;;  %v10994_v25 = vpop.f32.mrb[145].mxu0  ;;  %v10997_v34 = vmul.f32 0.5, %v10933_v55 }
 0x432   : > { %9648 = vtanh.f32 %v3045_v12  ;;  %v3011_v38 = vadd.f32 %v2979_v39, %v10954_v1  ;;  %v11000_v20 = vmin.f32 %v2808_v29, 6.0  ;;  %v11002_v51 = vpop.f32.mrb[169].mxu1  ;;  %v11004_v30 = vpop.f32.mrb[146].mxu0  ;;  %v2885_v33 = vmul.f32 0.5, %v10936_v4 }
 0x433   : > { %v9639_v31 = vpop.eup %9638  ;;  %v11007_v49 = vmul.f32 0.5, %v2839_v44  ;;  %v3031_v13 = vmul.f32 0.7978846, %v2999_v18  ;;  %v2906_v36 = vmul.f32 0.044715, %v10988_v27  ;;  %v11011_v3 = vmin.f32 %v2820_v43, 6.0 }
 0x434   : > { %v9641_v16 = vpop.eup %9640  ;;  %v3093_v55 = vadd.f32 1.0, %v9639_v31  ;;  %v3043_v42 = vmul.f32 0.7978846, %v3011_v38  ;;  %v2918_v48 = vmul.f32 0.044715, %v10990_v50  ;;  %v11015_v4 = vpop.f32.mrb[170].mxu1 }
 0x435   : > { %v9643_v26 = vpop.eup %9642  ;;  %v3091_v59 = vadd.f32 1.0, %v9641_v16  ;;  %9650 = vtanh.f32 %v3031_v13  ;;  %v2938_v35 = vmul.f32 %v2906_v36, %v10988_v27  ;;  %v2904_v9 = vmul.f32 0.044715, %v11000_v20  ;;  %v11017_v44 = vpop.f32.mrb[147].mxu0 }
 0x436   : > { %v9645_v12 = vpop.eup %9644  ;;  %v3125_v39 = vmul.f32 %v3093_v55, %v10938_v23  ;;  %v3094_v29 = vadd.f32 1.0, %v9643_v26  ;;  %9652 = vtanh.f32 %v3043_v42  ;;  %v2950_v18 = vmul.f32 %v2918_v48, %v10990_v50  ;;  %v11021_v43 = vpop.f32.mrb[171].mxu1 }
 0x437   : > { %v3123_v38 = vmul.f32 %v3091_v59, %v10942_v37  ;;  %v3092_v31 = vadd.f32 1.0, %v9645_v12  ;;  %v2970_v13 = vmul.f32 %v2938_v35, %v10988_v27  ;;  %v2936_v36 = vmul.f32 %v2904_v9, %v11000_v20 }
 0x438   : > { %v7438_v16 = vmul.f32 -1.442695, %v3125_v39  ;;  %v3126_v28 = vmul.f32 %v3094_v29, %v10961_v54  ;;  %v2883_v53 = vmul.f32 0.5, %v10954_v1  ;;  %v2982_v23 = vmul.f32 %v2950_v18, %v10990_v50 }
 0x439   : > { %v7436_v55 = vmul.f32 -1.442695, %v3123_v38  ;;  %v3124_v42 = vmul.f32 %v3092_v31, %v10969_v22  ;;  %v3002_v48 = vadd.f32 %v2970_v13, %v10988_v27  ;;  %v2968_v26 = vmul.f32 %v2936_v36, %v11000_v20  ;;  %v11032_v37 = vpop.f32.mrb[172].mxu1 }
 0x43a   : > { %9654 = vpow2.f32 %v7438_v16  ;;  %v7439_v59 = vmul.f32 -1.442695, %v3126_v28  ;;  %v3014_v35 = vadd.f32 %v2982_v23, %v10990_v50  ;;  %v2916_v9 = vmul.f32 0.044715, %v11011_v3  ;;  %v11036_v54 = vpop.f32.mrb[173].mxu1 }
 0x43b   : > { %v9647_v1 = vpop.eup %9646  ;;  %9656 = vpow2.f32 %v7436_v55  ;;  %v7437_v12 = vmul.f32 -1.442695, %v3124_v42  ;;  %v3034_v39 = vmul.f32 0.7978846, %v3002_v48  ;;  %v3000_v22 = vadd.f32 %v2968_v26, %v11000_v20  ;;  %v11039_v29 = vpop.f32.mrb[174].mxu1 }
 0x43c   : > { %v9649_v18 = vpop.eup %9648  ;;  %9658 = vpow2.f32 %v7439_v59  ;;  %v3097_v38 = vadd.f32 1.0, %v9647_v1  ;;  %v3046_v31 = vmul.f32 0.7978846, %v3014_v35  ;;  %v2948_v28 = vmul.f32 %v2916_v9, %v11011_v3  ;;  %v11042_v13 = vpop.f32.mrb[175].mxu1 }
 0x43d   : > { %9660 = vpow2.f32 %v7437_v12  ;;  %v3109_v36 = vadd.f32 1.0, %v9649_v18  ;;  %v3032_v16 = vmul.f32 0.7978846, %v3000_v22  ;;  %v2717_v23 = vadd.f32 %v10946_v45, %v10847_v32 }
 0x43e   : > { %v3129_v55 = vmul.f32 %v3097_v38, %v10997_v34  ;;  %9662 = vtanh.f32 %v3034_v39  ;;  %v2980_v42 = vmul.f32 %v2948_v28, %v11011_v3  ;;  %v2765_v48 = vadd.f32 %v10949_v8, %v10883_v10 }
 0x43f   : > { %v9651_v26 = vpop.eup %9650  ;;  %v3141_v59 = vmul.f32 %v3109_v36, %v2885_v33  ;;  %9664 = vtanh.f32 %v3046_v31  ;;  %v2813_v35 = vmax.f32 %v2717_v23, 0.0  ;;  %v2709_v9 = vadd.f32 %v10951_v58, %v10841_v63 }
 0x440   : > { %v9653_v1 = vpop.eup %9652  ;;  %v7442_v12 = vmul.f32 -1.442695, %v3129_v55  ;;  %v3095_v22 = vadd.f32 1.0, %v9651_v26  ;;  %9666 = vtanh.f32 %v3032_v16  ;;  %v3012_v32 = vadd.f32 %v2980_v42, %v11011_v3 }
 0x441   : > { %v7454_v45 = vmul.f32 -1.442695, %v3141_v59  ;;  %v3107_v34 = vadd.f32 1.0, %v9653_v1  ;;  %v11053_v39 = vmin.f32 %v2813_v35, 6.0  ;;  %v2825_v18 = vmax.f32 %v2765_v48, 0.0 }
 0x442   : > { %9668 = vpow2.f32 %v7442_v12  ;;  %v3127_v10 = vmul.f32 %v3095_v22, %v11007_v49  ;;  %v3044_v8 = vmul.f32 0.7978846, %v3012_v32  ;;  %v2811_v33 = vmax.f32 %v2709_v9, 0.0 }
 0x443   : > { %9670 = vpow2.f32 %v7454_v45  ;;  %v3139_v38 = vmul.f32 %v3107_v34, %v2883_v53  ;;  %v2874_v63 = vmul.f32 0.5, %v10988_v27  ;;  %v2909_v58 = vmul.f32 0.044715, %v11053_v39 }
 0x444   : > { %v9655_v31 = vpop.eup %9654  ;;  %v7440_v28 = vmul.f32 -1.442695, %v3127_v10  ;;  %9672 = vtanh.f32 %v3044_v8  ;;  %v11058_v36 = vmin.f32 %v2825_v18, 6.0  ;;  %v11060_v16 = vmin.f32 %v2811_v33, 6.0 }
 0x445   : > { %v9657_v23 = vpop.eup %9656  ;;  %v3253_v55 = vadd.f32 1.0, %v9655_v31  ;;  %v2886_v42 = vmul.f32 0.5, %v10990_v50  ;;  %v2941_v49 = vmul.f32 %v2909_v58, %v11053_v39  ;;  %v2757_v53 = vadd.f32 %v10956_v19, %v10877_v60 }
 0x446   : > { %v9659_v48 = vpop.eup %9658  ;;  %v3251_v27 = vadd.f32 1.0, %v9657_v23  ;;  %9674 = vpow2.f32 %v7440_v28  ;;  %v2872_v26 = vmul.f32 0.5, %v11000_v20  ;;  %v2921_v59 = vmul.f32 0.044715, %v11058_v36 }
 0x447   : > { %v9661_v35 = vpop.eup %9660  ;;  %9676 = vrcp.f32 %v3253_v55  ;;  %v3254_v9 = vadd.f32 1.0, %v9659_v48  ;;  %v7452_v1 = vmul.f32 -1.442695, %v3139_v38  ;;  %v2973_v12 = vmul.f32 %v2941_v49, %v11053_v39  ;;  %v9522_v38 = vld [vmem:[#allocation6 + $0x140] sm:$0xff]  }
 0x448   : > { %v9663_v22 = vpop.eup %9662  ;;  %9678 = vrcp.f32 %v3251_v27  ;;  %v3252_v50 = vadd.f32 1.0, %v9661_v35  ;;  %v2953_v32 = vmul.f32 %v2921_v59, %v11058_v36  ;;  %v2907_v60 = vmul.f32 0.044715, %v11060_v16  ;;  %8385 = vmatprep.subr.bf16.mxu1 %v9522_v38 }
 0x449   : > { %v9665_v19 = vpop.eup %9664  ;;  %9680 = vrcp.f32 %v3254_v9  ;;  %v3098_v45 = vadd.f32 1.0, %v9663_v22  ;;  %v3005_v20 = vadd.f32 %v2973_v12, %v11053_v39  ;;  %v2823_v34 = vmax.f32 %v2757_v53, 0.0 }
 0x44a   : > { %v9667_v18 = vpop.eup %9666  ;;  %9682 = vrcp.f32 %v3252_v50  ;;  %v3110_v10 = vadd.f32 1.0, %v9665_v19  ;;  %v2985_v8 = vmul.f32 %v2953_v32, %v11058_v36  ;;  %v2939_v33 = vmul.f32 %v2907_v60, %v11060_v16 }
 0x44b   : > { %9684 = vpow2.f32 %v7452_v1  ;;  %v3130_v58 = vmul.f32 %v3098_v45, %v2874_v63  ;;  %v3096_v31 = vadd.f32 1.0, %v9667_v18  ;;  %v3037_v28 = vmul.f32 0.7978846, %v3005_v20 }
 0x44c   : > { %v9669_v23 = vpop.eup %9668  ;;  %v3142_v55 = vmul.f32 %v3110_v10, %v2886_v42  ;;  %v3017_v49 = vadd.f32 %v2985_v8, %v11058_v36  ;;  %v2971_v48 = vmul.f32 %v2939_v33, %v11060_v16  ;;  %v11076_v27 = vmin.f32 %v2823_v34, 6.0  ;;  %v9863_v33 = vld [vmem:[%s10281_s18 + $0x10] sm:$0xff] }
 0x44d   : > { %v9671_v53 = vpop.eup %9670  ;;  %v3257_v59 = vadd.f32 1.0, %v9669_v23  ;;  %v7443_v35 = vmul.f32 -1.442695, %v3130_v58  ;;  %v3128_v9 = vmul.f32 %v3096_v31, %v2872_v26  ;;  %9686 = vtanh.f32 %v3037_v28  ;;  %v9864_v23 = vld [vmem:[%s10281_s18] sm:$0xff] }
 0x44e   : > { %v9673_v12 = vpop.eup %9672  ;;  %v3269_v22 = vadd.f32 1.0, %v9671_v53  ;;  %v7455_v1 = vmul.f32 -1.442695, %v3142_v55  ;;  %v2884_v63 = vmul.f32 0.5, %v11011_v3  ;;  %v3003_v50 = vadd.f32 %v2971_v48, %v11060_v16 }
 0x44f   : > { %9688 = vrcp.f32 %v3257_v59  ;;  %v7441_v42 = vmul.f32 -1.442695, %v3128_v9  ;;  %v3108_v32 = vadd.f32 1.0, %v9673_v12  ;;  %v3049_v60 = vmul.f32 0.7978846, %v3017_v49 }
 0x450   : > { %v9675_v19 = vpop.eup %9674  ;;  %9690 = vrcp.f32 %v3269_v22  ;;  %v3035_v45 = vmul.f32 0.7978846, %v3003_v50  ;;  %v2919_v20 = vmul.f32 0.044715, %v11076_v27  ;;  %v2720_v26 = vadd.f32 %v10958_v41, %v10850_v57 }
 0x451   : > { %v9677_v34 = vpop.eup %9676  ;;  %v3255_v18 = vadd.f32 1.0, %v9675_v19  ;;  %9692 = vpow2.f32 %v7443_v35  ;;  %v3140_v3 = vmul.f32 %v3108_v32, %v2884_v63  ;;  %v2768_v10 = vadd.f32 %v10964_v14, %v10886_v5  ;;  %v9865_v5 = vld [vmem:[%s10281_s18 + $0x18] sm:$0xff]  ;;  %v9866_v35 = vld [vmem:[%s10281_s18 + $0x8] sm:$0xff] }
 0x452   : > { %v9679_v8 = vpop.eup %9678  ;;  %v11086_v38 = vmul.f32 %v9863_v33, %v9677_v34  ;;  %9694 = vpow2.f32 %v7455_v1  ;;  %v2951_v58 = vmul.f32 %v2919_v20, %v11076_v27  ;;  %v2814_v31 = vmax.f32 %v2720_v26, 0.0 }
 0x453   : > { %v9681_v28 = vpop.eup %9680  ;;  %v11090_v57 = vmul.f32 %v9864_v23, %v9679_v8  ;;  %9696 = vrcp.f32 %v3255_v18  ;;  %v7453_v41 = vmul.f32 -1.442695, %v3140_v3  ;;  %v2826_v55 = vmax.f32 %v2768_v10, 0.0  ;;  %v9867_v3 = vld [vmem:[%s10281_s18 + $0x30] sm:$0xff] }
 0x454   : > { %v9683_v49 = vpop.eup %9682  ;;  %3381 = vst [vmem:[#allocation2 + $0x31] sm:$0xff] %v11086_v38  ;;  %v11094_v14 = vmul.f32 %v9865_v5, %v9681_v28  ;;  %9698 = vpow2.f32 %v7441_v42  ;;  %v2983_v48 = vmul.f32 %v2951_v58, %v11076_v27  ;;  %v11097_v53 = vmin.f32 %v2814_v31, 6.0  ;;  %v9868_v31 = vld [vmem:[%s10281_s18 + $0x90] sm:$0xff] }
 0x455   : > { %v9685_v59 = vpop.eup %9684  ;;  %3379 = vst [vmem:[#allocation2 + $0x19] sm:$0xff] %v11090_v57  ;;  %v11101_v9 = vmul.f32 %v9866_v35, %v9683_v49  ;;  %9700 = vpow2.f32 %v7453_v41  ;;  %v11103_v12 = vmin.f32 %v2826_v55, 6.0  ;;  %v2712_v22 = vadd.f32 %v10966_v61, %v10844_v21 }
 0x456   : > { %3382 = vst [vmem:[#allocation2 + $0x39] sm:$0xff] %v11094_v14  ;;  %v3267_v1 = vadd.f32 1.0, %v9685_v59  ;;  %v2877_v63 = vmul.f32 0.5, %v11053_v39  ;;  %9702 = vtanh.f32 %v3049_v60  ;;  %v3015_v50 = vadd.f32 %v2983_v48, %v11076_v27 }
 0x457   : > { %v9687_v42 = vpop.eup %9686  ;;  %3380 = vst [vmem:[#allocation2 + $0x21] sm:$0xff] %v11101_v9  ;;  %v11112_v32 = vmul.f32 0.5, %v11058_v36  ;;  %9704 = vtanh.f32 %v3035_v45  ;;  %v2910_v19 = vmul.f32 0.044715, %v11097_v53  ;;  %v2922_v21 = vmul.f32 0.044715, %v11103_v12 }
 0x458   : > { %9706 = vrcp.f32 %v3267_v1  ;;  %v3101_v61 = vadd.f32 1.0, %v9687_v42  ;;  %v3047_v20 = vmul.f32 0.7978846, %v3015_v50  ;;  %v2812_v39 = vmax.f32 %v2712_v22, 0.0 }
 0x459   : > { %v9689_v60 = vpop.eup %9688  ;;  %v2942_v26 = vmul.f32 %v2910_v19, %v11097_v53  ;;  %v2954_v34 = vmul.f32 %v2922_v21, %v11103_v12  ;;  %v2760_v18 = vadd.f32 %v10973_v6, %v10880_v17  ;;  %v2733_v36 = vadd.f32 %v10986_v62, %v10859_v7 }
 0x45a   : > { %v9691_v45 = vpop.eup %9690  ;;  %v11123_v10 = vmul.f32 %v9867_v3, %v9689_v60  ;;  %v3133_v8 = vmul.f32 %v3101_v61, %v2877_v63  ;;  %9708 = vtanh.f32 %v3047_v20  ;;  %v11125_v33 = vmin.f32 %v2812_v39, 6.0  ;;  %v9869_v63 = vld [vmem:[%s10281_s18 + $0x20] sm:$0xff] }
 0x45b   : > { %v9693_v58 = vpop.eup %9692  ;;  %v11128_v28 = vmul.f32 %v9868_v31, %v9691_v45  ;;  %v2974_v23 = vmul.f32 %v2942_v26, %v11097_v53  ;;  %v2986_v17 = vmul.f32 %v2954_v34, %v11103_v12  ;;  %v2824_v6 = vmax.f32 %v2760_v18, 0.0 }
 0x45c   : > { %v9695_v41 = vpop.eup %9694  ;;  %3385 = vst [vmem:[#allocation2 + $0x61] sm:$0xff] %v11123_v10  ;;  %v3258_v7 = vadd.f32 1.0, %v9693_v58  ;;  %v7446_v62 = vmul.f32 -1.442695, %v3133_v8  ;;  %v2875_v55 = vmul.f32 0.5, %v11060_v16  ;;  %v2817_v16 = vmax.f32 %v2733_v36, 0.0 }
 0x45d   : > { %12406 = vst [vmem:[#allocation21_spill] sm:$0xff] %v11128_v28  ;;  %v2908_v49 = vmul.f32 0.044715, %v11125_v33  ;;  %v9697_v5 = vpop.eup %9696  ;;  %3397 = vst [vmem:[#allocation2 + $0xf1] sm:$0xff] %v11128_v28  ;;  %v3270_v48 = vadd.f32 1.0, %v9695_v41  ;;  %v3006_v59 = vadd.f32 %v2974_v23, %v11097_v53  ;;  %v3018_v35 = vadd.f32 %v2986_v17, %v11103_v12  ;;  %v9870_v23 = vld [vmem:[%s10281_s18 + $0x80] sm:$0xff] }
 0x45e   : > { %v11138_v22 = vmin.f32 %v2824_v6, 6.0  ;;  %v9699_v1 = vpop.eup %9698  ;;  %v11141_v50 = vmul.f32 %v9869_v63, %v9697_v5  ;;  %9710 = vrcp.f32 %v3258_v7  ;;  %v2887_v61 = vmul.f32 0.5, %v11076_v27 }
 0x45f   : > { %v2940_v42 = vmul.f32 %v2908_v49, %v11125_v33  ;;  %v9701_v19 = vpop.eup %9700  ;;  %9712 = vrcp.f32 %v3270_v48  ;;  %v3256_v21 = vadd.f32 1.0, %v9699_v1  ;;  %v3038_v20 = vmul.f32 0.7978846, %v3006_v59 }
 0x460   : > { %v9703_v39 = vpop.eup %9702  ;;  %3383 = vst [vmem:[#allocation2 + $0x49] sm:$0xff] %v11141_v50  ;;  %v3268_v60 = vadd.f32 1.0, %v9701_v19  ;;  %9714 = vpow2.f32 %v7446_v62  ;;  %v3050_v26 = vmul.f32 0.7978846, %v3018_v35  ;;  %v2920_v36 = vmul.f32 0.044715, %v11138_v22 }
 0x461   : > { %v2972_v34 = vmul.f32 %v2940_v42, %v11125_v33  ;;  %v9705_v18 = vpop.eup %9704  ;;  %9716 = vrcp.f32 %v3256_v21  ;;  %v3113_v45 = vadd.f32 1.0, %v9703_v39  ;;  %v11148_v3 = vmin.f32 %v2817_v16, 6.0  ;;  %v9871_v39 = vld [vmem:[%s10281_s18 + $0x38] sm:$0xff] }
 0x462   : > { %v9707_v8 = vpop.eup %9706  ;;  %9718 = vrcp.f32 %v3268_v60  ;;  %v3099_v27 = vadd.f32 1.0, %v9705_v18  ;;  %v2781_v31 = vadd.f32 %v10992_v2, %v10895_v0  ;;  %v2952_v41 = vmul.f32 %v2920_v36, %v11138_v22 }
 0x463   : > { %v3004_v58 = vadd.f32 %v2972_v34, %v11125_v33  ;;  %v11154_v17 = vmul.f32 %v9870_v23, %v9707_v8  ;;  %v3145_v6 = vmul.f32 %v3113_v45, %v11112_v32  ;;  %9720 = vtanh.f32 %v3038_v20  ;;  %v9872_v34 = vld [vmem:[%s10281_s18 + $0x98] sm:$0xff]  ;;  %v9873_v23 = vld [vmem:[%s10281_s18 + $0x28] sm:$0xff] }
 0x464   : > { %v9709_v7 = vpop.eup %9708  ;;  %v3131_v62 = vmul.f32 %v3099_v27, %v2875_v55  ;;  %v11159_v49 = vmul.f32 0.5, %v11097_v53  ;;  %9722 = vtanh.f32 %v3050_v26  ;;  %v2984_v0 = vmul.f32 %v2952_v41, %v11138_v22 }
 0x465   : > { %12407 = vst [vmem:[#allocation22_spill] sm:$0xff] %v11154_v17  ;;  %v3036_v5 = vmul.f32 0.7978846, %v3004_v58  ;;  %3395 = vst [vmem:[#allocation2 + $0xd9] sm:$0xff] %v11154_v17  ;;  %v7458_v48 = vmul.f32 -1.442695, %v3145_v6  ;;  %v2725_v55 = vadd.f32 %v10994_v25, %v10853_v56  ;;  %v2773_v21 = vadd.f32 %v11002_v51, %v10889_v46 }
 0x466   : > { %v3111_v59 = vadd.f32 1.0, %v9709_v7  ;;  %v2913_v2 = vmul.f32 0.044715, %v11148_v3  ;;  %v7444_v32 = vmul.f32 -1.442695, %v3131_v62  ;;  %v2829_v35 = vmax.f32 %v2781_v31, 0.0 }
 0x467   : > { %9724 = vtanh.f32 %v3036_v5  ;;  %v3016_v1 = vadd.f32 %v2984_v0, %v11138_v22  ;;  %v2815_v19 = vmax.f32 %v2725_v55, 0.0  ;;  %v2890_v45 = vmul.f32 0.5, %v11103_v12  ;;  %v9874_v62 = vld [vmem:[%s10281_s18 + $0x88] sm:$0xff] }
 0x468   : > { %9726 = vpow2.f32 %v7458_v48  ;;  %v3143_v53 = vmul.f32 %v3111_v59, %v2887_v61  ;;  %v2945_v63 = vmul.f32 %v2913_v2, %v11148_v3  ;;  %v9711_v42 = vpop.eup %9710  ;;  %v11168_v16 = vmin.f32 %v2829_v35, 6.0 }
 0x469   : > { %9728 = vpow2.f32 %v7444_v32  ;;  %v9713_v20 = vpop.eup %9712  ;;  %v11173_v60 = vmul.f32 %v9871_v39, %v9711_v42  ;;  %v3048_v25 = vmul.f32 0.7978846, %v3016_v1  ;;  %v11181_v8 = vmin.f32 %v2815_v19, 6.0 }
 0x46a   : > { %v7456_v56 = vmul.f32 -1.442695, %v3143_v53  ;;  %v2977_v61 = vmul.f32 %v2945_v63, %v11148_v3  ;;  %v9715_v26 = vpop.eup %9714  ;;  %v11177_v18 = vmul.f32 %v9872_v34, %v9713_v20  ;;  %v2925_v36 = vmul.f32 0.044715, %v11168_v16 }
 0x46b   : > { %v9717_v46 = vpop.eup %9716  ;;  %3386 = vst [vmem:[#allocation2 + $0x69] sm:$0xff] %v11173_v60  ;;  %v3261_v51 = vadd.f32 1.0, %v9715_v26  ;;  %v2827_v58 = vmax.f32 %v2773_v21, 0.0  ;;  %v2876_v12 = vmul.f32 0.5, %v11125_v33  ;;  %v2911_v59 = vmul.f32 0.044715, %v11181_v8 }
 0x46c   : > { %12408 = vst [vmem:[#allocation23_spill] sm:$0xff] %v11177_v18  ;;  %9730 = vpow2.f32 %v7456_v56  ;;  %v3009_v27 = vadd.f32 %v2977_v61, %v11148_v3  ;;  %v9719_v31 = vpop.eup %9718  ;;  %3398 = vst [vmem:[#allocation2 + $0xf9] sm:$0xff] %v11177_v18  ;;  %v11187_v6 = vmul.f32 %v9873_v23, %v9717_v46  ;;  %v2957_v41 = vmul.f32 %v2925_v36, %v11168_v16 }
 0x46d   : > { %9732 = vtanh.f32 %v3048_v25  ;;  %v9721_v7 = vpop.eup %9720  ;;  %v11192_v5 = vmul.f32 %v9874_v62, %v9719_v31  ;;  %v11197_v35 = vmin.f32 %v2827_v58, 6.0  ;;  %v2736_v33 = vadd.f32 %v11004_v30, %v10862_v40 }
 0x46e   : > { %9734 = vrcp.f32 %v3261_v51  ;;  %v3041_v48 = vmul.f32 0.7978846, %v3009_v27  ;;  %v9723_v0 = vpop.eup %9722  ;;  %3384 = vst [vmem:[#allocation2 + $0x51] sm:$0xff] %v11187_v6  ;;  %v3102_v2 = vadd.f32 1.0, %v9721_v7  ;;  %v2989_v32 = vmul.f32 %v2957_v41, %v11168_v16 }
 0x46f   : > { %12409 = vst [vmem:[#allocation24_spill] sm:$0xff] %v11192_v5  ;;  %3396 = vst [vmem:[#allocation2 + $0xe1] sm:$0xff] %v11192_v5  ;;  %v3114_v55 = vadd.f32 1.0, %v9723_v0  ;;  %v2943_v53 = vmul.f32 %v2911_v59, %v11181_v8  ;;  %v2784_v1 = vadd.f32 %v11015_v4, %v10898_v47  ;;  %v2888_v19 = vmul.f32 0.5, %v11138_v22 }
 0x470   : > { %9736 = vtanh.f32 %v3041_v48  ;;  %v3134_v42 = vmul.f32 %v3102_v2, %v11159_v49  ;;  %v3021_v21 = vadd.f32 %v2989_v32, %v11168_v16  ;;  %v2923_v20 = vmul.f32 0.044715, %v11197_v35  ;;  %v9875_v32 = vld [vmem:[%s10281_s18 + $0x50] sm:$0xff] }
 0x471   : > { %v9725_v63 = vpop.eup %9724  ;;  %v3146_v40 = vmul.f32 %v3114_v55, %v2890_v45  ;;  %v2975_v56 = vmul.f32 %v2943_v53, %v11181_v8  ;;  %v2818_v25 = vmax.f32 %v2736_v33, 0.0  ;;  %v2881_v47 = vmul.f32 0.5, %v11148_v3 }
 0x472   : > { %v9727_v39 = vpop.eup %9726  ;;  %v3100_v30 = vadd.f32 1.0, %v9725_v63  ;;  %v7447_v34 = vmul.f32 -1.442695, %v3134_v42  ;;  %v2955_v4 = vmul.f32 %v2923_v20, %v11197_v35  ;;  %v2830_v27 = vmax.f32 %v2784_v1, 0.0 }
 0x473   : > { %v9729_v61 = vpop.eup %9728  ;;  %v3273_v26 = vadd.f32 1.0, %v9727_v39  ;;  %v7459_v36 = vmul.f32 -1.442695, %v3146_v40  ;;  %v3007_v46 = vadd.f32 %v2975_v56, %v11181_v8  ;;  %v11214_v45 = vmin.f32 %v2818_v25, 6.0 }
 0x474   : > { %v3259_v49 = vadd.f32 1.0, %v9729_v61  ;;  %v3132_v22 = vmul.f32 %v3100_v30, %v2876_v12  ;;  %v2987_v51 = vmul.f32 %v2955_v4, %v11197_v35  ;;  %v3053_v23 = vmul.f32 0.7978846, %v3021_v21 }
 0x475   : > { %9738 = vrcp.f32 %v3273_v26  ;;  %v2728_v3 = vadd.f32 %v11017_v44, %v10856_v52  ;;  %v3039_v12 = vmul.f32 0.7978846, %v3007_v46  ;;  %v2914_v0 = vmul.f32 0.044715, %v11214_v45 }
 0x476   : > { %v9731_v58 = vpop.eup %9730  ;;  %9740 = vrcp.f32 %v3259_v49  ;;  %v7445_v31 = vmul.f32 -1.442695, %v3132_v22  ;;  %v3019_v62 = vadd.f32 %v2987_v51, %v11197_v35  ;;  %v11220_v2 = vmin.f32 %v2830_v27, 6.0 }
 0x477   : > { %v9733_v41 = vpop.eup %9732  ;;  %v3271_v7 = vadd.f32 1.0, %v9731_v58  ;;  %9742 = vpow2.f32 %v7447_v34  ;;  %v2816_v53 = vmax.f32 %v2728_v3, 0.0  ;;  %v11226_v1 = vmul.f32 0.5, %v11168_v16  ;;  %v9540_v34 = vld [vmem:[#allocation6 + $0x1c0] sm:$0xff]  }
 0x478   : > { %v9735_v48 = vpop.eup %9734  ;;  %9744 = vpow2.f32 %v7459_v36  ;;  %v3112_v59 = vadd.f32 1.0, %v9733_v41  ;;  %v3051_v55 = vmul.f32 0.7978846, %v3019_v62  ;;  %v2946_v63 = vmul.f32 %v2914_v0, %v11214_v45  ;;  %v9876_v36 = vld [vmem:[%s10281_s18 + $0xb0] sm:$0xff]  ;;  %8497 = vmatprep.subr.bf16.mxu0 %v9540_v34 }
 0x479   : > { %v11223_v33 = vmul.f32 %v9875_v32, %v9735_v48  ;;  %9746 = vrcp.f32 %v3271_v7  ;;  %v2926_v21 = vmul.f32 0.044715, %v11220_v2  ;;  %v11231_v20 = vmin.f32 %v2816_v53, 6.0  ;;  %v9878_v32 = vld [vmem:[%s10281_s18 + $0xa0] sm:$0xff] }
 0x47a   : > { %v9737_v52 = vpop.eup %9736  ;;  %9748 = vpow2.f32 %v7445_v31  ;;  %v3144_v44 = vmul.f32 %v3112_v59, %v2888_v19  ;;  %v2978_v40 = vmul.f32 %v2946_v63, %v11214_v45  ;;  %v2776_v19 = vadd.f32 %v11021_v43, %v10892_v15  ;;  %v9877_v31 = vld [vmem:[%s10281_s18 + $0x40] sm:$0xff] }
 0x47b   : > { %3389 = vst [vmem:[#allocation2 + $0x91] sm:$0xff] %v11223_v33  ;;  %v3105_v42 = vadd.f32 1.0, %v9737_v52  ;;  %9750 = vtanh.f32 %v3053_v23  ;;  %v11237_v30 = vmul.f32 0.5, %v11181_v8  ;;  %v2958_v56 = vmul.f32 %v2926_v21, %v11220_v2 }
 0x47c   : > { %v7457_v39 = vmul.f32 -1.442695, %v3144_v44  ;;  %9752 = vtanh.f32 %v3039_v12  ;;  %v3010_v25 = vadd.f32 %v2978_v40, %v11214_v45  ;;  %v2912_v61 = vmul.f32 0.044715, %v11231_v20 }
 0x47d   : > { %v3137_v16 = vmul.f32 %v3105_v42, %v2881_v47  ;;  %9754 = vtanh.f32 %v3051_v55  ;;  %v2828_v26 = vmax.f32 %v2776_v19, 0.0  ;;  %v2990_v15 = vmul.f32 %v2958_v56, %v11220_v2 }
 0x47e   : > { %9756 = vpow2.f32 %v7457_v39  ;;  %v2797_v43 = vadd.f32 %v11032_v37, %v10910_v24  ;;  %v2789_v8 = vadd.f32 %v11036_v54, %v10901_v11  ;;  %v3042_v46 = vmul.f32 0.7978846, %v3010_v25 }
 0x47f   : > { %v9739_v4 = vpop.eup %9738  ;;  %v7450_v49 = vmul.f32 -1.442695, %v3137_v16  ;;  %v2944_v51 = vmul.f32 %v2912_v61, %v11231_v20  ;;  %v11251_v27 = vmin.f32 %v2828_v26, 6.0  ;;  %v3022_v24 = vadd.f32 %v2990_v15, %v11220_v2 }
 0x480   : > { %v9741_v47 = vpop.eup %9740  ;;  %v11248_v22 = vmul.f32 %v9876_v36, %v9739_v4  ;;  %v2833_v37 = vmax.f32 %v2797_v43, 0.0  ;;  %v2891_v3 = vmul.f32 0.5, %v11197_v35  ;;  %v2831_v35 = vmax.f32 %v2789_v8, 0.0 }
 0x481   : > { %v9743_v58 = vpop.eup %9742  ;;  %v11254_v23 = vmul.f32 %v9877_v31, %v9741_v47  ;;  %9758 = vpow2.f32 %v7450_v49  ;;  %v2976_v41 = vmul.f32 %v2944_v51, %v11231_v20  ;;  %v3054_v62 = vmul.f32 0.7978846, %v3022_v24  ;;  %v12412_v24 = vld [vmem:[#allocation20_spill] sm:$0xff] }
 0x482   : > { %12410 = vst [vmem:[#allocation25_spill] sm:$0xff] %v11248_v22  ;;  %v9745_v11 = vpop.eup %9744  ;;  %3401 = vst [vmem:[#allocation2 + $0x121] sm:$0xff] %v11248_v22  ;;  %v3262_v54 = vadd.f32 1.0, %v9743_v58  ;;  %9760 = vtanh.f32 %v3042_v46  ;;  %v2924_v48 = vmul.f32 0.044715, %v11251_v27  ;;  %v11262_v59 = vmin.f32 %v2833_v37, 6.0 }
 0x483   : > { %v9747_v7 = vpop.eup %9746  ;;  %3387 = vst [vmem:[#allocation2 + $0x79] sm:$0xff] %v11254_v23  ;;  %v3274_v12 = vadd.f32 1.0, %v9745_v11  ;;  %v3008_v53 = vadd.f32 %v2976_v41, %v11231_v20  ;;  %v2882_v63 = vmul.f32 0.5, %v11214_v45  ;;  %v11273_v61 = vmin.f32 %v2831_v35, 6.0  ;;  %v3459_v11 = vld [vmem:[#allocation2 + $0x1] sm:$0xff] }
 0x484   : > { %v9749_v0 = vpop.eup %9748  ;;  %v11265_v55 = vmul.f32 %v9878_v32, %v9747_v7  ;;  %9762 = vrcp.f32 %v3262_v54  ;;  %v2956_v42 = vmul.f32 %v2924_v48, %v11251_v27  ;;  %v2929_v19 = vmul.f32 0.044715, %v11262_v59  ;;  %v3460_v54 = vld [vmem:[#allocation2 + $0x9] sm:$0xff] }
 0x485   : > { %v9751_v52 = vpop.eup %9750  ;;  %9764 = vrcp.f32 %v3274_v12  ;;  %v3260_v44 = vadd.f32 1.0, %v9749_v0  ;;  %v3040_v40 = vmul.f32 0.7978846, %v3008_v53  ;;  %v2894_v43 = vmul.f32 0.5, %v11220_v2  ;;  %v12413_v32 = vld [vmem:[#allocation19_spill] sm:$0xff] }
 0x486   : > { %12411 = vst [vmem:[#allocation26_spill] sm:$0xff] %v11265_v55  ;;  %v9753_v21 = vpop.eup %9752  ;;  %3399 = vst [vmem:[#allocation2 + $0x109] sm:$0xff] %v11265_v55  ;;  %v3117_v39 = vadd.f32 1.0, %v9751_v52  ;;  %9766 = vtanh.f32 %v3054_v62  ;;  %v2988_v25 = vmul.f32 %v2956_v42, %v11251_v27  ;;  %v2961_v4 = vmul.f32 %v2929_v19, %v11262_v59  ;;  %v9879_v52 = vld [vmem:[%s10281_s18 + $0x58] sm:$0xff] }
 0x487   : > { %v9755_v16 = vpop.eup %9754  ;;  %9768 = vrcp.f32 %v3260_v44  ;;  %v3103_v56 = vadd.f32 1.0, %v9753_v21  ;;  %v2927_v51 = vmul.f32 0.044715, %v11273_v61  ;;  %v2800_v37 = vadd.f32 %v11039_v29, %v12412_v24 }
 0x488   : > { %v9757_v26 = vpop.eup %9756  ;;  %v3149_v45 = vmul.f32 %v3117_v39, %v11226_v1  ;;  %v3115_v34 = vadd.f32 1.0, %v9755_v16  ;;  %9770 = vtanh.f32 %v3040_v40  ;;  %v3020_v8 = vadd.f32 %v2988_v25, %v11251_v27  ;;  %v9880_v40 = vld [vmem:[%s10281_s18 + $0xb8] sm:$0xff] }
 0x489   : > { %v3272_v49 = vadd.f32 1.0, %v9757_v26  ;;  %v3135_v15 = vmul.f32 %v3103_v56, %v11237_v30  ;;  %v2993_v46 = vmul.f32 %v2961_v4, %v11262_v59  ;;  %v2959_v12 = vmul.f32 %v2927_v51, %v11273_v61 }
 0x48a   : > { %v7462_v47 = vmul.f32 -1.442695, %v3149_v45  ;;  %v3147_v36 = vmul.f32 %v3115_v34, %v2891_v3  ;;  %v3052_v31 = vmul.f32 0.7978846, %v3020_v8  ;;  %v2834_v62 = vmax.f32 %v2800_v37, 0.0  ;;  %v9881_v34 = vld [vmem:[%s10281_s18 + $0x48] sm:$0xff] }
 0x48b   : > { %v9759_v58 = vpop.eup %9758  ;;  %9772 = vrcp.f32 %v3272_v49  ;;  %v7448_v1 = vmul.f32 -1.442695, %v3135_v15  ;;  %v3025_v3 = vadd.f32 %v2993_v46, %v11262_v59  ;;  %v2792_v29 = vadd.f32 %v11042_v13, %v12413_v32 }
 0x48c   : > { %v9761_v30 = vpop.eup %9760  ;;  %v3265_v2 = vadd.f32 1.0, %v9759_v58  ;;  %9774 = vpow2.f32 %v7462_v47  ;;  %v7460_v41 = vmul.f32 -1.442695, %v3147_v36  ;;  %v3491_v53 = vpack.c.bf16 %v3460_v54, %v3459_v11  ;;  %v3462_v47 = vld [vmem:[#allocation2 + $0x21] sm:$0xff]  ;;  %v9524_v58 = vld [vmem:[#allocation6 + $0x100] sm:$0xff]   ;;  %v3461_v54 = vld [vmem:[#allocation2 + $0x19] sm:$0xff] }
 0x48d   : > { %9776 = vpow2.f32 %v7448_v1  ;;  %v3106_v7 = vadd.f32 1.0, %v9761_v30  ;;  %v3057_v0 = vmul.f32 0.7978846, %v3025_v3  ;;  %v2991_v21 = vmul.f32 %v2959_v12, %v11273_v61  ;;  %v3556_v1 = vld [vmem:[#allocation2 + $0x20] sm:$0xff]  ;;  %v3508_v30 = vld [vmem:[#allocation2 + $0xa] sm:$0xff]  ;;  %v3555_v12 = vld [vmem:[#allocation2 + $0x18] sm:$0xff] }
 0x48e   : > { %v9763_v48 = vpop.eup %9762  ;;  %9778 = vrcp.f32 %v3265_v2  ;;  %v11295_v16 = vmin.f32 %v2834_v62, 6.0  ;;  %v2832_v56 = vmax.f32 %v2792_v29, 0.0  ;;  %4458 = vmatprep.mubr.bf16.mxu1 %v3491_v53  ;;  %v2880_v49 = vmul.f32 0.5, %v11231_v20  ;;  %v9882_v20 = vld [vmem:[#allocation2] sm:$0xff]  ;;  %v9528_v2 = vld [vmem:[#allocation6 + $0x148] sm:$0xff]  }
 0x48f   : > { %v9765_v35 = vpop.eup %9764  ;;  %v11289_v44 = vmul.f32 %v9879_v52, %v9763_v48  ;;  %9780 = vpow2.f32 %v7460_v41  ;;  %v3138_v42 = vmul.f32 %v3106_v7, %v2882_v63  ;;  %v3023_v63 = vadd.f32 %v2991_v21, %v11273_v61  ;;  %v9883_v48 = vld [vmem:[%s10281_s18 + $0xa8] sm:$0xff]  ;;  %v9541_v52 = vld [vmem:[#allocation6 + $0x180] sm:$0xff]  }
 0x490   : > { %v9767_v39 = vpop.eup %9766  ;;  %v11293_v19 = vmul.f32 %v9880_v40, %v9765_v35  ;;  %9782 = vtanh.f32 %v3052_v31  ;;  %v2930_v15 = vmul.f32 0.044715, %v11295_v16  ;;  %v11305_v8 = vmin.f32 %v2832_v56, 6.0  ;;  %v3507_v31 = vld [vmem:[#allocation2 + $0x2] sm:$0xff]  ;;  %v3558_v35 = vld [vmem:[#allocation2 + $0x38] sm:$0xff] }
 0x491   : > { %12414 = vst [vmem:[#allocation20_spill] sm:$0xff] %v11289_v44  ;;  %v9769_v13 = vpop.eup %9768  ;;  %3390 = vst [vmem:[#allocation2 + $0x99] sm:$0xff] %v11289_v44  ;;  %v7451_v25 = vmul.f32 -1.442695, %v3138_v42  ;;  %v3118_v26 = vadd.f32 1.0, %v9767_v39  ;;  %9784 = vtanh.f32 %v3057_v0  ;;  %v3443_v11 = vpack.c.bf16 %v9882_v20, %v9882_v20  ;;  %v9529_v56 = vld [vmem:[#allocation6 + $0x108] sm:$0xff]  }
 0x492   : > { %12415 = vst [vmem:[#allocation19_spill] sm:$0xff] %v11293_v19  ;;  %v9771_v45 = vpop.eup %9770  ;;  %3402 = vst [vmem:[#allocation2 + $0x129] sm:$0xff] %v11293_v19  ;;  %v11301_v4 = vmul.f32 %v9881_v34, %v9769_v13  ;;  %v3055_v51 = vmul.f32 0.7978846, %v3023_v63  ;;  %v2962_v24 = vmul.f32 %v2930_v15, %v11295_v16  ;;  %v2928_v37 = vmul.f32 0.044715, %v11305_v8 }
 0x493   : > { %9786 = vpow2.f32 %v7451_v25  ;;  %v3150_v36 = vmul.f32 %v3118_v26, %v2894_v43  ;;  %v3104_v46 = vadd.f32 1.0, %v9771_v45  ;;  %v11310_v7 = vpack.c.bf16 %v3462_v47, %v3461_v54  ;;  %4459 = vmatmul.mubr.bf16.vlgmr.msra.gmra.mrb[176].mxu1 %v3443_v11  ;;  %v3557_v45 = vld [vmem:[#allocation2 + $0x30] sm:$0xff]  ;;  %v9530_v34 = vld [vmem:[#allocation6 + $0x150] sm:$0xff]   ;;  %v9543_v20 = vld [vmem:[#allocation6 + $0x188] sm:$0xff]  }
 0x494   : > { %12416 = vst [vmem:[#allocation27_spill] sm:$0xff] %v11301_v4  ;;  %3388 = vst [vmem:[#allocation2 + $0x81] sm:$0xff] %v11301_v4  ;;  %9788 = vtanh.f32 %v3055_v51  ;;  %v2994_v32 = vmul.f32 %v2962_v24, %v11295_v16  ;;  %v2960_v29 = vmul.f32 %v2928_v37, %v11305_v8  ;;  %v3587_v53 = vpack.c.bf16 %v3556_v1, %v3555_v12  ;;  %v9884_v47 = vld [vmem:[%s10281_s18 + $0x70] sm:$0xff]  ;;  %v3464_v24 = vld [vmem:[#allocation2 + $0x39] sm:$0xff] }
 0x495   : > { %v9773_v41 = vpop.eup %9772  ;;  %v7463_v3 = vmul.f32 -1.442695, %v3150_v36  ;;  %v3136_v43 = vmul.f32 %v3104_v46, %v2880_v49  ;;  %8386 = vmatpush3.bf16.msra.mxu1 %v9524_v58  ;;  %4466 = vmatprep.mubr.bf16.mxu1 %v11310_v7  ;;  %v3539_v40 = vpack.c.bf16 %v3508_v30, %v3507_v31  ;;  %v9542_v49 = vld [vmem:[#allocation6 + $0x1c8] sm:$0xff]   ;;  %v11324_v46 = vpack.c.bf16 %v3558_v35, %v3557_v45  ;;  %v9531_v37 = vld [vmem:[#allocation6 + $0x110] sm:$0xff]  }
 0x496   : > { %v9775_v62 = vpop.eup %9774  ;;  %v11313_v0 = vmul.f32 %v9883_v48, %v9773_v41  ;;  %v3026_v26 = vadd.f32 %v2994_v32, %v11295_v16  ;;  %v2992_v63 = vmul.f32 %v2960_v29, %v11305_v8  ;;  %4619 = vmatprep.mubr.bf16.mxu0 %v3587_v53  ;;  %8387 = vmatprep.subr.bf16.mxu1 %v9528_v2  ;;  %v2892_v54 = vmul.f32 0.5, %v11251_v27  ;;  %v3463_v2 = vld [vmem:[#allocation2 + $0x31] sm:$0xff]  ;;  %v3509_v41 = vld [vmem:[#allocation2 + $0x1a] sm:$0xff]  ;;  %v3510_v48 = vld [vmem:[#allocation2 + $0x22] sm:$0xff] }
 0x497   : > { %v9777_v42 = vpop.eup %9776  ;;  %v3277_v21 = vadd.f32 1.0, %v9775_v62  ;;  %9790 = vpow2.f32 %v7463_v3  ;;  %v7449_v39 = vmul.f32 -1.442695, %v3136_v43  ;;  %4620 = vmatmul.mubr.bf16.vlgmr.msra.gmra.mrb[148].mxu0 %v3539_v40  ;;  %v9532_v3 = vld [vmem:[#allocation6 + $0x158] sm:$0xff]   ;;  %v2897_v43 = vmul.f32 0.5, %v11262_v59  ;;  %v9546_v32 = vld [vmem:[#allocation6 + $0x1d0] sm:$0xff]  }
 0x498   : > { %12417 = vst [vmem:[#allocation28_spill] sm:$0xff] %v11313_v0  ;;  %v9779_v13 = vpop.eup %9778  ;;  %3400 = vst [vmem:[#allocation2 + $0x111] sm:$0xff] %v11313_v0  ;;  %v3263_v25 = vadd.f32 1.0, %v9777_v42  ;;  %v3058_v1 = vmul.f32 0.7978846, %v3026_v26  ;;  %v3024_v31 = vadd.f32 %v2992_v63, %v11305_v8  ;;  %8498 = vmatpush3.bf16.msra.mxu0 %v9541_v52  ;;  %4627 = vmatprep.mubr.bf16.mxu0 %v11324_v46  ;;  %v3560_v52 = vld [vmem:[#allocation2 + $0x50] sm:$0xff] }
 0x499   : > { %v9781_v15 = vpop.eup %9780  ;;  %v11322_v36 = vmul.f32 %v9884_v47, %v9779_v13  ;;  %9792 = vrcp.f32 %v3277_v21  ;;  %8388 = vmatpush3.bf16.msra.mxu1 %v9529_v56  ;;  %8499 = vmatprep.subr.bf16.mxu0 %v9542_v49  ;;  %v11331_v27 = vpack.c.bf16 %v3464_v24, %v3463_v2  ;;  %v2895_v56 = vmul.f32 0.5, %v11273_v61  ;;  %v9533_v26 = vld [vmem:[#allocation6 + $0x118] sm:$0xff]   ;;  %v3512_v24 = vld [vmem:[#allocation2 + $0x3a] sm:$0xff] }
 0x49a   : > { %v9783_v51 = vpop.eup %9782  ;;  %9794 = vrcp.f32 %v3263_v25  ;;  %v3275_v58 = vadd.f32 1.0, %v9781_v15  ;;  %v3056_v62 = vmul.f32 0.7978846, %v3024_v31  ;;  %8389 = vmatprep.subr.bf16.mxu1 %v9530_v34  ;;  %v11335_v13 = vpack.c.bf16 %v3510_v48, %v3509_v41  ;;  %v3559_v25 = vld [vmem:[#allocation2 + $0x48] sm:$0xff]  ;;  %v3511_v31 = vld [vmem:[#allocation2 + $0x32] sm:$0xff]  ;;  %v3528_v0 = vld [vmem:[#allocation2 + $0xfa] sm:$0xff] }
 0x49b   : > { %12418 = vst [vmem:[#allocation29_spill] sm:$0xff] %v11322_v36  ;;  %v9785_v11 = vpop.eup %9784  ;;  %3393 = vst [vmem:[#allocation2 + $0xc1] sm:$0xff] %v11322_v36  ;;  %9796 = vpow2.f32 %v7449_v39  ;;  %v3116_v30 = vadd.f32 1.0, %v9783_v51  ;;  %4467 = vmatmul.mubr.bf16.gmra.mrb[180].mxu1 %v3587_v53  ;;  %v9547_v39 = vld [vmem:[#allocation6 + $0x190] sm:$0xff]   ;;  %v11337_v34 = vpack.c.bf16 %v3560_v52, %v3559_v25  ;;  %v9534_v53 = vld [vmem:[#allocation6 + $0x160] sm:$0xff]  }
 0x49c   : > { %9798 = vrcp.f32 %v3275_v58  ;;  %v3121_v12 = vadd.f32 1.0, %v9785_v11  ;;  %8500 = vmatpush3.bf16.msra.mxu0 %v9543_v20  ;;  %4474 = vmatprep.mubr.bf16.mxu1 %v11331_v27  ;;  %v9548_v49 = vld [vmem:[#allocation6 + $0x1d8] sm:$0xff]   ;;  %v3466_v51 = vld [vmem:[#allocation2 + $0x51] sm:$0xff] }
 0x49d   : > { %v9787_v29 = vpop.eup %9786  ;;  %v3148_v35 = vmul.f32 %v3116_v30, %v2892_v54  ;;  %9800 = vtanh.f32 %v3058_v1  ;;  %8390 = vmatpush3.bf16.msra.mxu1 %v9531_v37  ;;  %8501 = vmatprep.subr.bf16.mxu0 %v9546_v32  ;;  %v9549_v58 = vld [vmem:[#allocation6 + $0x198] sm:$0xff]   ;;  %v9535_v37 = vld [vmem:[#allocation6 + $0x120] sm:$0xff]   ;;  %v9536_v41 = vld [vmem:[#allocation6 + $0x168] sm:$0xff]  }
 0x49e   : > { %v3266_v42 = vadd.f32 1.0, %v9787_v29  ;;  %v3153_v21 = vmul.f32 %v3121_v12, %v2897_v43  ;;  %9802 = vtanh.f32 %v3056_v62  ;;  %v9789_v40 = vpop.eup %9788  ;;  %8391 = vmatprep.subr.bf16.mxu1 %v9532_v3  ;;  %v9885_v11 = vld [vmem:[%s10281_s18 + $0xd0] sm:$0xff]  ;;  %v9886_v12 = vld [vmem:[%s10281_s18 + $0x60] sm:$0xff]  ;;  %v3562_v32 = vld [vmem:[#allocation2 + $0x68] sm:$0xff] }
 0x49f   : > { %v7461_v59 = vmul.f32 -1.442695, %v3148_v35  ;;  %v3119_v45 = vadd.f32 1.0, %v9789_v40  ;;  %4628 = vmatmul.mubr.bf16.gmra.mrb[152].mxu0 %v11335_v13  ;;  %v3465_v2 = vld [vmem:[#allocation2 + $0x49] sm:$0xff]  ;;  %v11356_v40 = vpack.c.bf16 %v3512_v24, %v3511_v31  ;;  %v9552_v25 = vld [vmem:[#allocation6 + $0x1e8] sm:$0xff]   ;;  %v3483_v19 = vld [vmem:[#allocation2 + $0x121] sm:$0xff] }
 0x4a0   : > { %9804 = vrcp.f32 %v3266_v42  ;;  %v7466_v63 = vmul.f32 -1.442695, %v3153_v21  ;;  %4635 = vmatprep.mubr.bf16.mxu0 %v11337_v34  ;;  %8502 = vmatpush3.bf16.msra.mxu0 %v9547_v39  ;;  %v9550_v3 = vld [vmem:[#allocation6 + $0x1e0] sm:$0xff]   ;;  %v11347_v48 = vpack.c.bf16 %v3466_v51, %v3465_v2  ;;  %v9887_v21 = vld [vmem:[%s10281_s18 + $0xc0] sm:$0xff]  ;;  %v9888_v31 = vld [vmem:[%s10281_s18 + $0x78] sm:$0xff] }
 0x4a1   : > { %v9791_v15 = vpop.eup %9790  ;;  %9806 = vpow2.f32 %v7461_v59  ;;  %v3151_v47 = vmul.f32 %v3119_v45, %v2895_v56  ;;  %8392 = vmatpush3.bf16.msra.mxu1 %v9533_v26  ;;  %8503 = vmatprep.subr.bf16.mxu0 %v9548_v49  ;;  %v9551_v52 = vld [vmem:[#allocation6 + $0x1a0] sm:$0xff]   ;;  %v3561_v59 = vld [vmem:[#allocation2 + $0x60] sm:$0xff]  ;;  %v9537_v56 = vld [vmem:[#allocation6 + $0x128] sm:$0xff]  }
 0x4a2   : > { %v3278_v61 = vadd.f32 1.0, %v9791_v15  ;;  %9808 = vpow2.f32 %v7466_v63  ;;  %8393 = vmatprep.subr.bf16.mxu1 %v9534_v53  ;;  %v2898_v63 = vmul.f32 0.5, %v11295_v16  ;;  %v11359_v53 = vpack.c.bf16 %v3562_v32, %v3561_v59  ;;  %v9538_v49 = vld [vmem:[#allocation6 + $0x170] sm:$0xff]   ;;  %v9553_v16 = vld [vmem:[#allocation6 + $0x1a8] sm:$0xff]   ;;  %v3529_v55 = vld [vmem:[#allocation2 + $0x10a] sm:$0xff] }
 0x4a3   : > { %v9793_v1 = vpop.eup %9792  ;;  %v7464_v30 = vmul.f32 -1.442695, %v3151_v47  ;;  %4475 = vmatmul.mubr.bf16.gmra.mrb[184].mxu1 %v11324_v46  ;;  %v2896_v15 = vmul.f32 0.5, %v11305_v8  ;;  %v9889_v59 = vld [vmem:[%s10281_s18 + $0xd8] sm:$0xff]  ;;  %v3531_v5 = vld [vmem:[#allocation2 + $0x122] sm:$0xff]  ;;  %v3532_v18 = vld [vmem:[#allocation2 + $0x12a] sm:$0xff] }
 0x4a4   : > { %v9795_v20 = vpop.eup %9794  ;;  %v11342_v54 = vmul.f32 %v9885_v11, %v9793_v1  ;;  %9810 = vrcp.f32 %v3278_v61  ;;  %8504 = vmatpush3.bf16.msra.mxu0 %v9549_v58  ;;  %4482 = vmatprep.mubr.bf16.mxu1 %v11347_v48  ;;  %v3468_v58 = vld [vmem:[#allocation2 + $0x69] sm:$0xff]  ;;  %v3530_v22 = vld [vmem:[#allocation2 + $0x112] sm:$0xff] }
 0x4a5   : > { %v9797_v43 = vpop.eup %9796  ;;  %v11345_v62 = vmul.f32 %v9886_v12, %v9795_v20  ;;  %9812 = vpow2.f32 %v7464_v30  ;;  %8394 = vmatpush3.bf16.msra.mxu1 %v9535_v37  ;;  %8505 = vmatprep.subr.bf16.mxu0 %v9550_v3  ;;  %v3467_v20 = vld [vmem:[#allocation2 + $0x61] sm:$0xff]  ;;  %v3513_v11 = vld [vmem:[#allocation2 + $0x4a] sm:$0xff]  ;;  %v3514_v3 = vld [vmem:[#allocation2 + $0x52] sm:$0xff] }
 0x4a6   : > { %12419 = vst [vmem:[#allocation30_spill] sm:$0xff] %v11342_v54  ;;  %v9799_v29 = vpop.eup %9798  ;;  %3405 = vst [vmem:[#allocation2 + $0x151] sm:$0xff] %v11342_v54  ;;  %v3264_v35 = vadd.f32 1.0, %v9797_v43  ;;  %8395 = vmatprep.subr.bf16.mxu1 %v9536_v41  ;;  %v9539_v30 = vld [vmem:[#allocation6 + $0x130] sm:$0xff]   ;;  %v9544_v43 = vld [vmem:[#allocation6 + $0x178] sm:$0xff]  }
 0x4a7   : > { %12420 = vst [vmem:[#allocation31_spill] sm:$0xff] %v11345_v62  ;;  %v9801_v42 = vpop.eup %9800  ;;  %3391 = vst [vmem:[#allocation2 + $0xa9] sm:$0xff] %v11345_v62  ;;  %v11353_v39 = vmul.f32 %v9887_v21, %v9799_v29  ;;  %4636 = vmatmul.mubr.bf16.gmra.mrb[156].mxu0 %v11356_v40  ;;  %v9555_v12 = vld [vmem:[#allocation6 + $0x1f0] sm:$0xff]   ;;  %v3527_v54 = vld [vmem:[#allocation2 + $0xf2] sm:$0xff] }
 0x4a8   : > { %v9803_v26 = vpop.eup %9802  ;;  %9814 = vrcp.f32 %v3264_v35  ;;  %v3122_v45 = vadd.f32 1.0, %v9801_v42  ;;  %4643 = vmatprep.mubr.bf16.mxu0 %v11359_v53  ;;  %8506 = vmatpush3.bf16.msra.mxu0 %v9551_v52  ;;  %v11369_v35 = vpack.c.bf16 %v3468_v58, %v3467_v20  ;;  %v3564_v52 = vld [vmem:[#allocation2 + $0x80] sm:$0xff]  ;;  %v3516_v20 = vld [vmem:[#allocation2 + $0x6a] sm:$0xff] }
 0x4a9   : > { %12421 = vst [vmem:[#allocation32_spill] sm:$0xff] %v11353_v39  ;;  %3403 = vst [vmem:[#allocation2 + $0x139] sm:$0xff] %v11353_v39  ;;  %v3120_v61 = vadd.f32 1.0, %v9803_v26  ;;  %8396 = vmatpush3.bf16.msra.mxu1 %v9537_v56  ;;  %8507 = vmatprep.subr.bf16.mxu0 %v9552_v25  ;;  %v9556_v21 = vld [vmem:[#allocation6 + $0x1b0] sm:$0xff]   ;;  %v11376_v25 = vpack.c.bf16 %v3514_v3, %v3513_v11  ;;  %v3563_v26 = vld [vmem:[#allocation2 + $0x78] sm:$0xff] }
 0x4aa   : > { %v9805_v47 = vpop.eup %9804  ;;  %v3154_v51 = vmul.f32 %v3122_v45, %v2898_v63  ;;  %8397 = vmatprep.subr.bf16.mxu1 %v9538_v49  ;;  %v9545_v63 = vld [vmem:[#allocation6 + $0x138] sm:$0xff]   ;;  %v11384_v58 = vld [vmem:[#allocation2 + $0x79] sm:$0xff] }
 0x4ab   : > { %v9807_v1 = vpop.eup %9806  ;;  %v11366_v24 = vmul.f32 %v9888_v31, %v9805_v47  ;;  %v3152_v37 = vmul.f32 %v3120_v61, %v2896_v15  ;;  %4483 = vmatmul.mubr.bf16.gmra.mrb[188].mxu1 %v11337_v34  ;;  %v9557_v45 = vld [vmem:[#allocation6 + $0x1f8] sm:$0xff]   ;;  %v11378_v15 = vpack.c.bf16 %v3564_v52, %v3563_v26  ;;  %v11380_v61 = vld [vmem:[#allocation6 + $0x200] sm:$0xff]   ;;  %v3496_v11 = vpack.c.bf16 %v11301_v4, %v11384_v58 }
 0x4ac   : > { %v9809_v8 = vpop.eup %9808  ;;  %v3276_v2 = vadd.f32 1.0, %v9807_v1  ;;  %v7467_v41 = vmul.f32 -1.442695, %v3154_v51  ;;  %8508 = vmatpush3.bf16.msra.mxu0 %v9553_v16  ;;  %4490 = vmatprep.mubr.bf16.mxu1 %v11369_v35  ;;  %v9558_v16 = vld [vmem:[#allocation6 + $0x1b8] sm:$0xff]   ;;  %v9892_v52 = vld [vmem:[%s10281_s18 + $0xf0] sm:$0xff] }
 0x4ad   : > { %12422 = vst [vmem:[#allocation33_spill] sm:$0xff] %v11366_v24  ;;  %3394 = vst [vmem:[#allocation2 + $0xc9] sm:$0xff] %v11366_v24  ;;  %v3281_v32 = vadd.f32 1.0, %v9809_v8  ;;  %v7465_v29 = vmul.f32 -1.442695, %v3152_v37  ;;  %8398 = vmatpush3.bf16.msra.mxu1 %v9539_v30  ;;  %8509 = vmatprep.subr.bf16.mxu0 %v9555_v12  ;;  %v9890_v1 = vld [vmem:[%s10281_s18 + $0x68] sm:$0xff] }
 0x4ae   : > { %v9811_v42 = vpop.eup %9810  ;;  %9816 = vrcp.f32 %v3276_v2  ;;  %8399 = vmatprep.subr.bf16.mxu1 %v9544_v43  ;;  %v3515_v37 = vld [vmem:[#allocation2 + $0x62] sm:$0xff]  ;;  %v3566_v30 = vld [vmem:[#allocation2 + $0x98] sm:$0xff]  ;;  %v3565_v2 = vld [vmem:[#allocation2 + $0x90] sm:$0xff] }
 0x4af   : > { %v11373_v56 = vmul.f32 %v9889_v59, %v9811_v42  ;;  %9818 = vrcp.f32 %v3281_v32  ;;  %v9813_v49 = vpop.eup %9812  ;;  %4644 = vmatmul.mubr.bf16.gmra.mrb[160].mxu0 %v11376_v25  ;;  %v11395_v8 = vpack.c.bf16 %v3516_v20, %v3515_v37  ;;  %v11397_v3 = vpack.c.bf16 %v3566_v30, %v3565_v2  ;;  %v9891_v12 = vld [vmem:[%s10281_s18 + $0xc8] sm:$0xff]  ;;  %v9893_v37 = vld [vmem:[%s10281_s18 + $0xe0] sm:$0xff]  ;;  %v3487_v17 = vld [vmem:[#allocation2 + $0x151] sm:$0xff] }
 0x4b0   : > { %9820 = vpow2.f32 %v7467_v41  ;;  %v3279_v47 = vadd.f32 1.0, %v9813_v49  ;;  %4651 = vmatprep.mubr.bf16.mxu0 %v11378_v15  ;;  %8510 = vmatpush3.bf16.msra.mxu0 %v9556_v21  ;;  %v3472_v21 = vld [vmem:[#allocation2 + $0x99] sm:$0xff]  ;;  %v3567_v30 = vld [vmem:[#allocation2 + $0xa8] sm:$0xff] }
 0x4b1   : > { %12423 = vst [vmem:[#allocation34_spill] sm:$0xff] %v11373_v56  ;;  %3406 = vst [vmem:[#allocation2 + $0x159] sm:$0xff] %v11373_v56  ;;  %9822 = vpow2.f32 %v7465_v29  ;;  %8400 = vmatpush3.bf16.msra.mxu1 %v9545_v63  ;;  %8511 = vmatprep.subr.bf16.mxu0 %v9557_v45  ;;  %v3471_v45 = vld [vmem:[#allocation2 + $0x91] sm:$0xff]  ;;  %v3517_v49 = vld [vmem:[#allocation2 + $0x7a] sm:$0xff] }
 0x4b2   : > { %v9815_v51 = vpop.eup %9814  ;;  %9824 = vrcp.f32 %v3279_v47  ;;  %9203 = vmatprep.subr.bf16.mxu1 %v11380_v61  ;;  %v3518_v47 = vld [vmem:[#allocation2 + $0x82] sm:$0xff] }
 0x4b3   : > { %v11388_v31 = vmul.f32 %v9890_v1, %v9815_v51  ;;  %4491 = vmatmul.mubr.bf16.gmra.mrb[192].mxu1 %v11359_v53  ;;  %v3526_v56 = vld [vmem:[#allocation2 + $0xe2] sm:$0xff] }
 0x4b4   : > { %8512 = vmatpush3.bf16.msra.mxu0 %v9558_v16  ;;  %4498 = vmatprep.mubr.bf16.mxu1 %v3496_v11  ;;  %v11409_v16 = vpack.c.bf16 %v3472_v21, %v3471_v45  ;;  %v11416_v11 = vpack.c.bf16 %v3518_v47, %v3517_v49  ;;  %v9895_v47 = vld [vmem:[%s10281_s18 + $0xe8] sm:$0xff] }
 0x4b5   : > { %12424 = vst [vmem:[#allocation35_spill] sm:$0xff] %v11388_v31  ;;  %3392 = vst [vmem:[#allocation2 + $0xb1] sm:$0xff] %v11388_v31  ;;  %v3481_v39 = vld [vmem:[#allocation2 + $0x109] sm:$0xff] }
 0x4b7   : > { %4652 = vmatmul.mubr.bf16.gmra.mrb[164].mxu0 %v11395_v8 }
 0x4b8   : > { %v9817_v41 = vpop.eup %9816  ;;  %4659 = vmatprep.mubr.bf16.mxu0 %v11397_v3 }
 0x4b9   : > { %v9819_v43 = vpop.eup %9818  ;;  %v11400_v32 = vmul.f32 %v9891_v12, %v9817_v41  ;;  %v3519_v41 = vld [vmem:[#allocation2 + $0x92] sm:$0xff]  ;;  %v3498_v12 = vpack.c.bf16 %v11388_v31, %v11345_v62 }
 0x4ba   : > { %v9821_v29 = vpop.eup %9820  ;;  %v11404_v42 = vmul.f32 %v9892_v52, %v9819_v43  ;;  %v3520_v43 = vld [vmem:[#allocation2 + $0x9a] sm:$0xff] }
 0x4bb   : > { %12425 = vst [vmem:[#allocation36_spill] sm:$0xff] %v11400_v32  ;;  %v9823_v59 = vpop.eup %9822  ;;  %3404 = vst [vmem:[#allocation2 + $0x141] sm:$0xff] %v11400_v32  ;;  %v3282_v26 = vadd.f32 1.0, %v9821_v29  ;;  %4499 = vmatmul.mubr.bf16.gmra.mrb[196].mxu1 %v11378_v15  ;;  %v3570_v29 = vld [vmem:[#allocation2 + $0xc8] sm:$0xff]  ;;  %v11426_v21 = vpack.c.bf16 %v3520_v43, %v3519_v41  ;;  %v3572_v41 = vld [vmem:[#allocation2 + $0xe0] sm:$0xff] }
 0x4bc   : > { %12426 = vst [vmem:[#allocation37_spill] sm:$0xff] %v11404_v42  ;;  %3409 = vst [vmem:[#allocation2 + $0x181] sm:$0xff] %v11404_v42  ;;  %v3280_v63 = vadd.f32 1.0, %v9823_v59  ;;  %v9825_v51 = vpop.eup %9824  ;;  %v3568_v1 = vld [vmem:[#allocation2 + $0xb0] sm:$0xff]  ;;  %4506 = vmatprep.mubr.bf16.mxu1 %v11409_v16  ;;  %v3569_v59 = vld [vmem:[#allocation2 + $0xc0] sm:$0xff] }
 0x4bd   : > { %9826 = vrcp.f32 %v3282_v26  ;;  %v11412_v20 = vmul.f32 %v9893_v37, %v9825_v51  ;;  %v11419_v2 = vpack.c.bf16 %v3568_v1, %v3567_v30  ;;  %v11431_v49 = vpack.c.bf16 %v3570_v29, %v3569_v59  ;;  %v3521_v1 = vld [vmem:[#allocation2 + $0xaa] sm:$0xff]  ;;  %v3522_v37 = vld [vmem:[#allocation2 + $0xb2] sm:$0xff]  ;;  %v3525_v42 = vld [vmem:[#allocation2 + $0xda] sm:$0xff] }
 0x4be   : > { %9828 = vrcp.f32 %v3280_v63  ;;  %v9894_v63 = vld [vmem:[%s10281_s18 + $0xf8] sm:$0xff]  ;;  %v3499_v30 = vpack.c.bf16 %v11366_v24, %v11322_v36  ;;  %v11443_v43 = vpack.c.bf16 %v3522_v37, %v3521_v1  ;;  %v3573_v37 = vld [vmem:[#allocation2 + $0xf0] sm:$0xff]  ;;  %v9584_v36 = vld [vmem:[#allocation8 + $0x78] sm:$0xff]  }
 0x4bf   : > { %12427 = vst [vmem:[#allocation38_spill] sm:$0xff] %v11412_v20  ;;  %3407 = vst [vmem:[#allocation2 + $0x169] sm:$0xff] %v11412_v20  ;;  %4660 = vmatmul.mubr.bf16.gmra.mrb[168].mxu0 %v11416_v11  ;;  %v3477_v59 = vld [vmem:[#allocation2 + $0xd9] sm:$0xff] }
 0x4c0   : > { %4667 = vmatprep.mubr.bf16.mxu0 %v11419_v2 }
 0x4c2   : > { %v3533_v28 = vld [vmem:[#allocation2 + $0x13a] sm:$0xff]  ;;  %v3534_v31 = vld [vmem:[#allocation2 + $0x142] sm:$0xff] }
 0x4c3   : > { %4507 = vmatmul.mubr.bf16.gmra.mrb[200].mxu1 %v11397_v3 }
 0x4c4   : > { %4514 = vmatprep.mubr.bf16.mxu1 %v3498_v12  ;;  %v3571_v12 = vld [vmem:[#allocation2 + $0xd8] sm:$0xff] }
 0x4c5   : > { %v11445_v29 = vpack.c.bf16 %v3572_v41, %v3571_v12  ;;  %v3480_v41 = vld [vmem:[#allocation2 + $0xf9] sm:$0xff]  ;;  %v3479_v12 = vld [vmem:[#allocation2 + $0xf1] sm:$0xff] }
 0x4c7   : > { %v9827_v52 = vpop.eup %9826  ;;  %4668 = vmatmul.mubr.bf16.gmra.mrb[172].mxu0 %v11426_v21 }
 0x4c8   : > { %v9829_v26 = vpop.eup %9828  ;;  %v11429_v45 = vmul.f32 %v9894_v63, %v9827_v52  ;;  %4675 = vmatprep.mubr.bf16.mxu0 %v11431_v49  ;;  %v3478_v52 = vld [vmem:[#allocation2 + $0xe1] sm:$0xff]  ;;  %v3524_v63 = vld [vmem:[#allocation2 + $0xca] sm:$0xff] }
 0x4c9   : > { %v11434_v51 = vmul.f32 %v9895_v47, %v9829_v26  ;;  %v3523_v26 = vld [vmem:[#allocation2 + $0xc2] sm:$0xff]  ;;  %v11449_v47 = vpack.c.bf16 %v3478_v52, %v3477_v59  ;;  %v11459_v52 = vpack.c.bf16 %v3480_v41, %v3479_v12  ;;  %v3576_v59 = vld [vmem:[#allocation2 + $0x110] sm:$0xff] }
 0x4ca   : > { %12428 = vst [vmem:[#allocation39_spill] sm:$0xff] %v11429_v45  ;;  %3410 = vst [vmem:[#allocation2 + $0x189] sm:$0xff] %v11429_v45  ;;  %v3574_v45 = vld [vmem:[#allocation2 + $0xf8] sm:$0xff]  ;;  %v11453_v1 = vpack.c.bf16 %v3524_v63, %v3523_v26  ;;  %v11463_v26 = vpack.c.bf16 %v3526_v56, %v3525_v42  ;;  %v3575_v63 = vld [vmem:[#allocation2 + $0x108] sm:$0xff]  ;;  %v11473_v56 = vpack.c.bf16 %v3528_v0, %v3527_v54 }
 0x4cb   : > { %12429 = vst [vmem:[#allocation40_spill] sm:$0xff] %v11434_v51  ;;  %3408 = vst [vmem:[#allocation2 + $0x171] sm:$0xff] %v11434_v51  ;;  %4515 = vmatmul.mubr.bf16.gmra.mrb[204].mxu1 %v11419_v2  ;;  %v3578_v12 = vld [vmem:[#allocation2 + $0x128] sm:$0xff]  ;;  %v3577_v42 = vld [vmem:[#allocation2 + $0x120] sm:$0xff]  ;;  %v11483_v0 = vpack.c.bf16 %v3530_v22, %v3529_v55  ;;  %v11494_v22 = vpack.c.bf16 %v3532_v18, %v3531_v5  ;;  %v11504_v18 = vpack.c.bf16 %v3534_v31, %v3533_v28 }
 0x4cc   : > { %4522 = vmatprep.mubr.bf16.mxu1 %v3499_v30  ;;  %v11455_v30 = vpack.c.bf16 %v3574_v45, %v3573_v37  ;;  %v11465_v45 = vpack.c.bf16 %v3576_v59, %v3575_v63  ;;  %v3482_v37 = vld [vmem:[#allocation2 + $0x111] sm:$0xff]  ;;  %v11475_v59 = vpack.c.bf16 %v3578_v12, %v3577_v42  ;;  %v3484_v63 = vld [vmem:[#allocation2 + $0x129] sm:$0xff]  ;;  %v11488_v42 = vld [vmem:[#allocation2 + $0x139] sm:$0xff] }
 0x4cd   : > { %v11469_v41 = vpack.c.bf16 %v3482_v37, %v3481_v39  ;;  %v11479_v39 = vpack.c.bf16 %v3484_v63, %v3483_v19  ;;  %v3580_v37 = vld [vmem:[#allocation2 + $0x140] sm:$0xff]  ;;  %v3579_v54 = vld [vmem:[#allocation2 + $0x138] sm:$0xff]  ;;  %v3504_v19 = vpack.c.bf16 %v11400_v32, %v11488_v42  ;;  %v3581_v55 = vld [vmem:[#allocation2 + $0x150] sm:$0xff] }
 0x4ce   : > { %v11485_v12 = vpack.c.bf16 %v3580_v37, %v3579_v54  ;;  %v3582_v63 = vld [vmem:[#allocation2 + $0x158] sm:$0xff]  ;;  %v3583_v5 = vld [vmem:[#allocation2 + $0x168] sm:$0xff]  ;;  %v3585_v28 = vld [vmem:[#allocation2 + $0x180] sm:$0xff] }
 0x4cf   : > { %4676 = vmatmul.mubr.bf16.gmra.mrb[176].mxu0 %v11443_v43  ;;  %v11496_v37 = vpack.c.bf16 %v3582_v63, %v3581_v55  ;;  %v3488_v54 = vld [vmem:[#allocation2 + $0x159] sm:$0xff] }
 0x4d0   : > { %4683 = vmatprep.mubr.bf16.mxu0 %v11445_v29  ;;  %v11500_v24 = vpack.c.bf16 %v3488_v54, %v3487_v17  ;;  %v3535_v63 = vld [vmem:[#allocation2 + $0x152] sm:$0xff]  ;;  %v3536_v55 = vld [vmem:[#allocation2 + $0x15a] sm:$0xff]  ;;  %v3506_v17 = vpack.c.bf16 %v11434_v51, %v11412_v20 }
 0x4d1   : > { %v3586_v54 = vld [vmem:[#allocation2 + $0x188] sm:$0xff]  ;;  %v11513_v62 = vpack.c.bf16 %v3536_v55, %v3535_v63  ;;  %v9559_v63 = vld [vmem:[#allocation6 + $0x208] sm:$0xff]   ;;  %v9560_v55 = vld [vmem:[#allocation6 + $0x210] sm:$0xff]  }
 0x4d2   : > { %v3584_v32 = vld [vmem:[#allocation2 + $0x170] sm:$0xff]  ;;  %v11515_v31 = vpack.c.bf16 %v3586_v54, %v3585_v28 }
 0x4d3   : > { %4523 = vmatmul.mubr.bf16.gmra.mrb[208].mxu1 %v11431_v49 }
 0x4d4   : > { %4530 = vmatprep.mubr.bf16.mxu1 %v11449_v47 }
 0x4d7   : > { %4684 = vmatmul.mubr.bf16.gmra.mrb[180].mxu0 %v11453_v1 }
 0x4d8   : > { %4691 = vmatprep.mubr.bf16.mxu0 %v11455_v30 }
 0x4db   : > { %4531 = vmatmul.mubr.bf16.gmra.mrb[212].mxu1 %v11445_v29 }
 0x4dc   : > { %4538 = vmatprep.mubr.bf16.mxu1 %v11459_v52 }
 0x4df   : > { %4692 = vmatmul.mubr.bf16.gmra.mrb[184].mxu0 %v11463_v26 }
 0x4e0   : > { %4699 = vmatprep.mubr.bf16.mxu0 %v11465_v45 }
 0x4e3   : > { %4539 = vmatmul.mubr.bf16.gmra.mrb[216].mxu1 %v11455_v30 }
 0x4e4   : > { %4546 = vmatprep.mubr.bf16.mxu1 %v11469_v41 }
 0x4e7   : > { %4700 = vmatmul.mubr.bf16.gmra.mrb[188].mxu0 %v11473_v56 }
 0x4e8   : > { %4707 = vmatprep.mubr.bf16.mxu0 %v11475_v59 }
 0x4eb   : > { %4547 = vmatmul.mubr.bf16.gmra.mrb[220].mxu1 %v11465_v45 }
 0x4ec   : > { %4554 = vmatprep.mubr.bf16.mxu1 %v11479_v39 }
 0x4ef   : > { %4708 = vmatmul.mubr.bf16.gmra.mrb[192].mxu0 %v11483_v0 }
 0x4f0   : > { %4715 = vmatprep.mubr.bf16.mxu0 %v11485_v12 }
 0x4f3   : > { %4555 = vmatmul.mubr.bf16.gmra.mrb[224].mxu1 %v11475_v59 }
 0x4f4   : > { %4562 = vmatprep.mubr.bf16.mxu1 %v3504_v19  ;;  %v11506_v19 = vpack.c.bf16 %v3584_v32, %v3583_v5  ;;  %v3537_v32 = vld [vmem:[#allocation2 + $0x16a] sm:$0xff]  ;;  %v3538_v5 = vld [vmem:[#allocation2 + $0x172] sm:$0xff] }
 0x4f5   : > { %v11521_v51 = vpack.c.bf16 %v3538_v5, %v3537_v32  ;;  %v3774_v5 = vld [vmem:[#allocation2 + $0x171] sm:$0xff] }
 0x4f7   : > { %4716 = vmatmul.mubr.bf16.gmra.mrb[196].mxu0 %v11494_v22 }
 0x4f8   : > { %4723 = vmatprep.mubr.bf16.mxu0 %v11496_v37 }
 0x4fb   : > { %4563 = vmatmul.mubr.bf16.gmra.mrb[228].mxu1 %v11485_v12 }
 0x4fc   : > { %4570 = vmatprep.mubr.bf16.mxu1 %v11500_v24 }
 0x4ff   : > { %4724 = vmatmul.mubr.bf16.gmra.mrb[200].mxu0 %v11504_v18 }
 0x500   : > { %4731 = vmatprep.mubr.bf16.mxu0 %v11506_v19 }
 0x503   : > { %4571 = vmatmul.mubr.bf16.gmra.mrb[232].mxu1 %v11496_v37 }
 0x504   : > { %4578 = vmatprep.mubr.bf16.mxu1 %v3506_v17 }
 0x507   : > { %4732 = vmatmul.mubr.bf16.gmra.mrb[204].mxu0 %v11513_v62 }
 0x508   : > { %4739 = vmatprep.mubr.bf16.mxu0 %v11515_v31 }
 0x50b   : > { %4579 = vmatmul.mubr.bf16.gmra.mrb[236].mxu1 %v11506_v19 }
 0x50c   : > { %4780 = vmatprep.mubr.bf16.mxu1 %v11335_v13  ;;  %v9561_v13 = vld [vmem:[#allocation6 + $0x218] sm:$0xff]  }
 0x50f   : > { %4740 = vmatmul.mubr.bf16.gmra.mrb[208].mxu0 %v11521_v51 }
 0x510   : > { %4941 = vmatprep.mubr.bf16.mxu0 %v11331_v27 }
 0x513   : > { %4781 = vmatmul.mubr.bf16.vlgmr.msra.gmra.mrb[240].mxu1 %v11310_v7  ;;  %v9562_v7 = vld [vmem:[#allocation6 + $0x220] sm:$0xff]  }
 0x514   : > { %9204 = vmatpush3.bf16.msra.mxu1 %v11380_v61  ;;  %4788 = vmatprep.mubr.bf16.mxu1 %v11356_v40  ;;  %v9563_v40 = vld [vmem:[#allocation6 + $0x228] sm:$0xff]  }
 0x515   : > { %9205 = vmatprep.subr.bf16.mxu1 %v9559_v63 }
 0x517   : > { %4942 = vmatmul.mubr.bf16.vlgmr.msra.gmra.mrb[212].mxu0 %v11324_v46  ;;  %v3754_v46 = vld [vmem:[#allocation2 + $0x81] sm:$0xff] }
 0x518   : > { %4949 = vmatprep.mubr.bf16.mxu0 %v11347_v48  ;;  %9206 = vmatpush3.bf16.msra.mxu1 %v9559_v63  ;;  %v9566_v63 = vld [vmem:[#allocation8 + $0x40] sm:$0xff]  }
 0x519   : > { %9207 = vmatprep.subr.bf16.mxu1 %v9560_v55  ;;  %8633 = vmatprep.subr.bf16.mxu0 %v9566_v63 }
 0x51b   : > { %4789 = vmatmul.mubr.bf16.gmra.mrb[244].mxu1 %v11331_v27  ;;  %v3782_v27 = vpack.c.bf16 %v3754_v46, %v11384_v58  ;;  %v3760_v58 = vld [vmem:[#allocation2 + $0xc9] sm:$0xff] }
 0x51c   : > { %4796 = vmatprep.mubr.bf16.mxu1 %v11376_v25  ;;  %9208 = vmatpush3.bf16.msra.mxu1 %v9560_v55  ;;  %v9564_v25 = vld [vmem:[#allocation6 + $0x230] sm:$0xff]   ;;  %v9567_v46 = vld [vmem:[#allocation8] sm:$0xff]  }
 0x51d   : > { %9209 = vmatprep.subr.bf16.mxu1 %v9561_v13  ;;  %8634 = vmatpush3.bf16.msra.mxu0 %v9567_v46 }
 0x51f   : > { %4950 = vmatmul.mubr.bf16.gmra.mrb[216].mxu0 %v11337_v34  ;;  %v9565_v34 = vld [vmem:[#allocation6 + $0x238] sm:$0xff]  }
 0x520   : > { %4957 = vmatprep.mubr.bf16.mxu0 %v11369_v35  ;;  %9210 = vmatpush3.bf16.msra.mxu1 %v9561_v13 }
 0x521   : > { %9211 = vmatprep.subr.bf16.mxu1 %v9562_v7 }
 0x523   : > { %4797 = vmatmul.mubr.bf16.gmra.mrb[248].mxu1 %v11347_v48  ;;  %v3758_v48 = vld [vmem:[#allocation2 + $0xb1] sm:$0xff] }
 0x524   : > { %4804 = vmatprep.mubr.bf16.mxu1 %v11395_v8  ;;  %9212 = vmatpush3.bf16.msra.mxu1 %v9562_v7 }
 0x525   : > { %9213 = vmatprep.subr.bf16.mxu1 %v9563_v40 }
 0x527   : > { %4958 = vmatmul.mubr.bf16.gmra.mrb[220].mxu0 %v11359_v53  ;;  %v3757_v53 = vld [vmem:[#allocation2 + $0xa9] sm:$0xff] }
 0x528   : > { %4965 = vmatprep.mubr.bf16.mxu0 %v3782_v27  ;;  %9214 = vmatpush3.bf16.msra.mxu1 %v9563_v40  ;;  %v3784_v61 = vpack.c.bf16 %v3758_v48, %v3757_v53  ;;  %v3773_v40 = vld [vmem:[#allocation2 + $0x169] sm:$0xff] }
 0x529   : > { %9215 = vmatprep.subr.bf16.mxu1 %v9564_v25 }
 0x52b   : > { %4805 = vmatmul.mubr.bf16.gmra.mrb[252].mxu1 %v11369_v35  ;;  %v3759_v35 = vld [vmem:[#allocation2 + $0xc1] sm:$0xff] }
 0x52c   : > { %4812 = vmatprep.mubr.bf16.mxu1 %v11416_v11  ;;  %9216 = vmatpush3.bf16.msra.mxu1 %v9564_v25  ;;  %v3785_v8 = vpack.c.bf16 %v3760_v58, %v3759_v35 }
 0x52d   : > { %9217 = vmatprep.subr.bf16.mxu1 %v9565_v34 }
 0x52f   : > { %4966 = vmatmul.mubr.bf16.gmra.mrb[224].mxu0 %v11378_v15  ;;  %v3770_v15 = vld [vmem:[#allocation2 + $0x141] sm:$0xff] }
 0x530   : > { %4973 = vmatprep.mubr.bf16.mxu0 %v11409_v16  ;;  %9218 = vmatpush3.bf16.msra.mxu1 %v9565_v34  ;;  %v3792_v34 = vpack.c.bf16 %v3774_v5, %v3773_v40  ;;  %v9568_v5 = vld [vmem:[#allocation8 + $0x48] sm:$0xff]  }
 0x531   : > { %8635 = vmatprep.subr.bf16.mxu0 %v9568_v5 }
 0x533   : > { %4813 = vmatmul.mubr.bf16.gmra.mrb[0].mxu1 %v3782_v27 }
 0x534   : > { %4820 = vmatprep.mubr.bf16.mxu1 %v11426_v21 }
 0x537   : > { %4974 = vmatmul.mubr.bf16.gmra.mrb[228].mxu0 %v11397_v3  ;;  %v3790_v3 = vpack.c.bf16 %v3770_v15, %v11488_v42 }
 0x538   : > { %4981 = vmatprep.mubr.bf16.mxu0 %v3784_v61 }
 0x53b   : > { %4821 = vmatmul.mubr.bf16.gmra.mrb[4].mxu1 %v11409_v16 }
 0x53c   : > { %4828 = vmatprep.mubr.bf16.mxu1 %v11443_v43 }
 0x53f   : > { %4982 = vmatmul.mubr.bf16.gmra.mrb[232].mxu0 %v11419_v2  ;;  %v11568_v2 = vld [vmem:[%s12353_s7] ss:$0 sm:$0xff] }
 0x540   : > { %4989 = vmatprep.mubr.bf16.mxu0 %v3785_v8 }
 0x543   : > { %4829 = vmatmul.mubr.bf16.gmra.mrb[8].mxu1 %v3784_v61 }
 0x544   : > { %4836 = vmatprep.mubr.bf16.mxu1 %v11453_v1 }
 0x547   : > { %4990 = vmatmul.mubr.bf16.gmra.mrb[236].mxu0 %v11431_v49 }
 0x548   : > { %4997 = vmatprep.mubr.bf16.mxu0 %v11449_v47 }
 0x54b   : > { %4837 = vmatmul.mubr.bf16.gmra.mrb[12].mxu1 %v3785_v8 }
 0x54c   : > { %4844 = vmatprep.mubr.bf16.mxu1 %v11463_v26 }
 0x54f   : > { %4998 = vmatmul.mubr.bf16.gmra.mrb[240].mxu0 %v11445_v29 }
 0x550   : > { %5005 = vmatprep.mubr.bf16.mxu0 %v11459_v52 }
 0x553   : > { %4845 = vmatmul.mubr.bf16.gmra.mrb[16].mxu1 %v11449_v47 }
 0x554   : > { %4852 = vmatprep.mubr.bf16.mxu1 %v11473_v56 }
 0x557   : > { %5006 = vmatmul.mubr.bf16.gmra.mrb[244].mxu0 %v11455_v30 }
 0x558   : > { %5013 = vmatprep.mubr.bf16.mxu0 %v11469_v41 }
 0x55b   : > { %4853 = vmatmul.mubr.bf16.gmra.mrb[20].mxu1 %v11459_v52 }
 0x55c   : > { %4860 = vmatprep.mubr.bf16.mxu1 %v11483_v0 }
 0x55f   : > { %5014 = vmatmul.mubr.bf16.gmra.mrb[248].mxu0 %v11465_v45 }
 0x560   : > { %5021 = vmatprep.mubr.bf16.mxu0 %v11479_v39 }
 0x563   : > { %4861 = vmatmul.mubr.bf16.gmra.mrb[24].mxu1 %v11469_v41 }
 0x564   : > { %4868 = vmatprep.mubr.bf16.mxu1 %v11494_v22 }
 0x566   : > { %v8177_v16 = vpop.f32.mrb[176].mxu1 }
 0x567   : > { %5022 = vmatmul.mubr.bf16.gmra.mrb[252].mxu0 %v11475_v59  ;;  %v8178_v11 = vpop.f32.mrb[177].mxu1 }
 0x568   : > { %5029 = vmatprep.mubr.bf16.mxu0 %v3790_v3  ;;  %v8179_v21 = vadd.f32 %v8178_v11, %v8177_v16  ;;  %v8180_v49 = vpop.f32.mrb[178].mxu1  ;;  %v3776_v11 = vld [vmem:[#allocation2 + $0x189] sm:$0xff] }
 0x569   : > { %v8181_v43 = vpop.f32.mrb[179].mxu1 }
 0x56a   : > { %v8289_v29 = vpop.f32.mrb[148].mxu0  ;;  %v8182_v47 = vadd.f32 %v8181_v43, %v8180_v49  ;;  %v4461_v30 = vadd.f32 %v8179_v21, %v11568_v2 }
 0x56b   : > { %v8290_v1 = vpop.f32.mrb[149].mxu0  ;;  %4869 = vmatmul.mubr.bf16.gmra.mrb[28].mxu1 %v11479_v39 }
 0x56c   : > { %v8291_v52 = vadd.f32 %v8290_v1, %v8289_v29  ;;  %v8292_v26 = vpop.f32.mrb[150].mxu0  ;;  %4876 = vmatprep.mubr.bf16.mxu1 %v11504_v18  ;;  %v4464_v41 = vadd.f32 %v8182_v47, %v11568_v2  ;;  %v3775_v29 = vld [vmem:[#allocation2 + $0x181] sm:$0xff] }
 0x56d   : > { %v8293_v45 = vpop.f32.mrb[151].mxu0 }
 0x56e   : > { %v8294_v56 = vadd.f32 %v8293_v45, %v8292_v26  ;;  %v11574_v59 = vadd.f32 %v8291_v52, %v4461_v30  ;;  %v8183_v0 = vpop.f32.mrb[180].mxu1  ;;  %v3793_v30 = vpack.c.bf16 %v3776_v11, %v3775_v29 }
 0x56f   : > { %5030 = vmatmul.mubr.bf16.gmra.mrb[0].mxu0 %v11485_v12  ;;  %v8184_v42 = vpop.f32.mrb[181].mxu1 }
 0x570   : > { %5037 = vmatprep.mubr.bf16.mxu0 %v11500_v24  ;;  %v11578_v22 = vadd.f32 %v8294_v56, %v4464_v41  ;;  %v8185_v17 = vadd.f32 %v8184_v42, %v8183_v0  ;;  %v8186_v39 = vpop.f32.mrb[182].mxu1  ;;  %v3681_v41 = vld [vmem:[#allocation2 + $0x182] sm:$0xff]  ;;  %v3682_v56 = vld [vmem:[#allocation2 + $0x18a] sm:$0xff] }
 0x571   : > { %v8187_v54 = vpop.f32.mrb[183].mxu1 }
 0x572   : > { %v8295_v28 = vpop.f32.mrb[152].mxu0  ;;  %v8188_v32 = vadd.f32 %v8187_v54, %v8186_v39  ;;  %v4469_v55 = vadd.f32 %v8185_v17, %v11568_v2  ;;  %v3778_v17 = vld [vmem:[#allocation2 + $0x1a1] sm:$0xff] }
 0x573   : > { %v8296_v18 = vpop.f32.mrb[153].mxu0  ;;  %4877 = vmatmul.mubr.bf16.gmra.mrb[32].mxu1 %v3790_v3 }
 0x574   : > { %v8297_v13 = vadd.f32 %v8296_v18, %v8295_v28  ;;  %v8298_v7 = vpop.f32.mrb[154].mxu0  ;;  %4884 = vmatprep.mubr.bf16.mxu1 %v11513_v62  ;;  %v4472_v27 = vadd.f32 %v8188_v32, %v11568_v2  ;;  %v11597_v32 = vpack.c.bf16 %v3682_v56, %v3681_v41  ;;  %v3797_v56 = vld [vmem:[#allocation2 + $0x4a] sm:$0xff] }
 0x575   : > { %v8299_v12 = vpop.f32.mrb[155].mxu0 }
 0x576   : > { %v8300_v25 = vadd.f32 %v8299_v12, %v8298_v7  ;;  %v11583_v48 = vadd.f32 %v8297_v13, %v4469_v55  ;;  %v8189_v53 = vpop.f32.mrb[184].mxu1  ;;  %v9569_v12 = vld [vmem:[#allocation8 + $0x8] sm:$0xff]  }
 0x577   : > { %5038 = vmatmul.mubr.bf16.gmra.mrb[4].mxu0 %v11496_v37  ;;  %v8190_v61 = vpop.f32.mrb[185].mxu1 }
 0x578   : > { %5045 = vmatprep.mubr.bf16.mxu0 %v3792_v34  ;;  %v11586_v58 = vadd.f32 %v8300_v25, %v4472_v27  ;;  %v8191_v35 = vadd.f32 %v8190_v61, %v8189_v53  ;;  %v8192_v62 = vpop.f32.mrb[186].mxu1  ;;  %v3795_v61 = vld [vmem:[#allocation2 + $0x32] sm:$0xff]  ;;  %8636 = vmatpush3.bf16.msra.mxu0 %v9569_v12 }
 0x579   : > { %v8193_v8 = vpop.f32.mrb[187].mxu1 }
 0x57a   : > { %v8301_v15 = vpop.f32.mrb[156].mxu0  ;;  %v8194_v3 = vadd.f32 %v8193_v8, %v8192_v62  ;;  %v4477_v21 = vadd.f32 %v8191_v35, %v11568_v2  ;;  %v3796_v35 = vld [vmem:[#allocation2 + $0x3a] sm:$0xff] }
 0x57b   : > { %v8302_v16 = vpop.f32.mrb[157].mxu0  ;;  %4885 = vmatmul.mubr.bf16.gmra.mrb[36].mxu1 %v11500_v24  ;;  %v3827_v11 = vpack.c.bf16 %v3796_v35, %v3795_v61 }
 0x57c   : > { %v8303_v49 = vadd.f32 %v8302_v16, %v8301_v15  ;;  %v8304_v43 = vpop.f32.mrb[158].mxu0  ;;  %4892 = vmatprep.mubr.bf16.mxu1 %v11521_v51  ;;  %v4480_v47 = vadd.f32 %v8194_v3, %v11568_v2  ;;  %v3777_v51 = vld [vmem:[#allocation2 + $0x199] sm:$0xff] }
 0x57d   : > { %v8305_v37 = vpop.f32.mrb[159].mxu0  ;;  %v3794_v13 = vpack.c.bf16 %v3778_v17, %v3777_v51  ;;  %v3799_v51 = vld [vmem:[#allocation2 + $0x62] sm:$0xff]  ;;  %v3800_v17 = vld [vmem:[#allocation2 + $0x6a] sm:$0xff] }
 0x57e   : > { %v8306_v1 = vadd.f32 %v8305_v37, %v8304_v43  ;;  %v11592_v52 = vadd.f32 %v8303_v49, %v4477_v21  ;;  %v8195_v26 = vpop.f32.mrb[188].mxu1  ;;  %v9896_v49 = vld [vmem:[#allocation2] sm:$0xff] }
 0x57f   : > { %5046 = vmatmul.mubr.bf16.gmra.mrb[8].mxu0 %v11506_v19  ;;  %v8196_v45 = vpop.f32.mrb[189].mxu1  ;;  %v11607_v43 = vpack.c.bf16 %v9896_v49, %v9896_v49 }
 0x580   : > { %5053 = vmatprep.mubr.bf16.mxu0 %v3793_v30  ;;  %v11595_v24 = vadd.f32 %v8306_v1, %v4480_v47  ;;  %v8197_v0 = vadd.f32 %v8196_v45, %v8195_v26  ;;  %v8198_v42 = vpop.f32.mrb[190].mxu1 }
 0x581   : > { %v8199_v39 = vpop.f32.mrb[191].mxu1 }
 0x582   : > { %v8307_v54 = vpop.f32.mrb[160].mxu0  ;;  %v8200_v28 = vadd.f32 %v8199_v39, %v8198_v42  ;;  %v4485_v63 = vadd.f32 %v8197_v0, %v11568_v2  ;;  %v3798_v0 = vld [vmem:[#allocation2 + $0x52] sm:$0xff] }
 0x583   : > { %v8308_v18 = vpop.f32.mrb[161].mxu0  ;;  %4893 = vmatmul.mubr.bf16.gmra.mrb[40].mxu1 %v3792_v34 }
 0x584   : > { %v8309_v19 = vadd.f32 %v8308_v18, %v8307_v54  ;;  %v8310_v55 = vpop.f32.mrb[162].mxu0  ;;  %4900 = vmatprep.mubr.bf16.mxu1 %v11597_v32  ;;  %v4488_v40 = vadd.f32 %v8200_v28, %v11568_v2  ;;  %v3828_v18 = vpack.c.bf16 %v3798_v0, %v3797_v56 }
 0x585   : > { %v8311_v7 = vpop.f32.mrb[163].mxu0 }
 0x586   : > { %v8312_v46 = vadd.f32 %v8311_v7, %v8310_v55  ;;  %v11602_v27 = vadd.f32 %v8309_v19, %v4485_v63  ;;  %v8201_v25 = vpop.f32.mrb[192].mxu1  ;;  %v3829_v19 = vpack.c.bf16 %v3800_v17, %v3799_v51 }
 0x587   : > { %5054 = vmatmul.mubr.bf16.gmra.mrb[12].mxu0 %v11515_v31  ;;  %v8202_v53 = vpop.f32.mrb[193].mxu1 }
 0x588   : > { %5061 = vmatprep.mubr.bf16.mxu0 %v3794_v13  ;;  %v11605_v34 = vadd.f32 %v8312_v46, %v4488_v40  ;;  %v8203_v62 = vadd.f32 %v8202_v53, %v8201_v25  ;;  %v8204_v8 = vpop.f32.mrb[194].mxu1  ;;  %v9570_v13 = vld [vmem:[#allocation8 + $0x50] sm:$0xff]  }
 0x589   : > { %v8205_v15 = vpop.f32.mrb[195].mxu1  ;;  %8637 = vmatprep.subr.bf16.mxu0 %v9570_v13  ;;  %v9571_v25 = vld [vmem:[#allocation8 + $0x10] sm:$0xff]  }
 0x58a   : > { %v8313_v3 = vpop.f32.mrb[164].mxu0  ;;  %v8206_v16 = vadd.f32 %v8205_v15, %v8204_v8  ;;  %v4493_v37 = vadd.f32 %v8203_v62, %v11568_v2  ;;  %v3801_v8 = vld [vmem:[#allocation2 + $0x7a] sm:$0xff]  ;;  %v3802_v15 = vld [vmem:[#allocation2 + $0x82] sm:$0xff]  ;;  %8638 = vmatpush3.bf16.msra.mxu0 %v9571_v25 }
 0x58b   : > { %v8314_v21 = vpop.f32.mrb[165].mxu0  ;;  %4901 = vmatmul.mubr.bf16.gmra.mrb[44].mxu1 %v3793_v30 }
 0x58c   : > { %v8315_v31 = vadd.f32 %v8314_v21, %v8313_v3  ;;  %v8316_v29 = vpop.f32.mrb[166].mxu0  ;;  %9219 = vmatprep.mubr.bf16.mxu1 %v3827_v11  ;;  %v4496_v1 = vadd.f32 %v8206_v16, %v11568_v2  ;;  %v3803_v16 = vld [vmem:[#allocation2 + $0x92] sm:$0xff]  ;;  %v3804_v11 = vld [vmem:[#allocation2 + $0x9a] sm:$0xff] }
 0x58d   : > { %v8317_v47 = vpop.f32.mrb[167].mxu0 }
 0x58e   : > { %v8318_v26 = vadd.f32 %v8317_v47, %v8316_v29  ;;  %v11611_v45 = vadd.f32 %v8315_v31, %v4493_v37  ;;  %v8207_v41 = vpop.f32.mrb[196].mxu1  ;;  %v3830_v29 = vpack.c.bf16 %v3802_v15, %v3801_v8  ;;  %v9572_v8 = vld [vmem:[#allocation8 + $0x58] sm:$0xff]  }
 0x58f   : > { %5062 = vmatmul.mubr.bf16.gmra.mrb[16].mxu0 %v11607_v43  ;;  %v8208_v42 = vpop.f32.mrb[197].mxu1  ;;  %8639 = vmatprep.subr.bf16.mxu0 %v9572_v8  ;;  %v3814_v8 = vld [vmem:[#allocation2 + $0x112] sm:$0xff] }
 0x590   : > { %v11614_v39 = vadd.f32 %v8318_v26, %v4496_v1  ;;  %v8209_v30 = vadd.f32 %v8208_v42, %v8207_v41  ;;  %v8210_v54 = vpop.f32.mrb[198].mxu1  ;;  %v3831_v26 = vpack.c.bf16 %v3804_v11, %v3803_v16 }
 0x591   : > { %v8211_v28 = vpop.f32.mrb[199].mxu1 }
 0x592   : > { %v8319_v5 = vpop.f32.mrb[168].mxu0  ;;  %v8212_v63 = vadd.f32 %v8211_v28, %v8210_v54  ;;  %v4501_v7 = vadd.f32 %v8209_v30, %v11568_v2 }
 0x593   : > { %v8320_v55 = vpop.f32.mrb[169].mxu0  ;;  %9220 = vmatmul.mubr.bf16.vlgmr.msra.gmra.mrb[48].mxu1 %v3828_v18  ;;  %v3805_v18 = vld [vmem:[#allocation2 + $0xaa] sm:$0xff] }
 0x594   : > { %v8321_v12 = vadd.f32 %v8320_v55, %v8319_v5  ;;  %v8322_v40 = vpop.f32.mrb[170].mxu0  ;;  %9223 = vmatprep.mubr.bf16.mxu1 %v3829_v19  ;;  %v4504_v53 = vadd.f32 %v8212_v63, %v11568_v2  ;;  %v3806_v5 = vld [vmem:[#allocation2 + $0xb2] sm:$0xff]  ;;  %v3807_v19 = vld [vmem:[#allocation2 + $0xc2] sm:$0xff]  ;;  %v3808_v55 = vld [vmem:[#allocation2 + $0xca] sm:$0xff] }
 0x595   : > { %v8323_v46 = vpop.f32.mrb[171].mxu0 }
 0x596   : > { %v8324_v61 = vadd.f32 %v8323_v46, %v8322_v40  ;;  %v11618_v35 = vadd.f32 %v8321_v12, %v4501_v7  ;;  %v8213_v62 = vpop.f32.mrb[200].mxu1  ;;  %v3832_v46 = vpack.c.bf16 %v3806_v5, %v3805_v18 }
 0x597   : > { %v8214_v3 = vpop.f32.mrb[201].mxu1 }
 0x598   : > { %v11620_v21 = vadd.f32 %v8324_v61, %v4504_v53  ;;  %v8215_v49 = vadd.f32 %v8214_v3, %v8213_v62  ;;  %v8216_v37 = vpop.f32.mrb[202].mxu1  ;;  %v3833_v61 = vpack.c.bf16 %v3808_v55, %v3807_v19 }
 0x599   : > { %v8217_v31 = vpop.f32.mrb[203].mxu1 }
 0x59a   : > { %v8325_v47 = vpop.f32.mrb[172].mxu0  ;;  %v8218_v1 = vadd.f32 %v8217_v31, %v8216_v37  ;;  %v4509_v56 = vadd.f32 %v8215_v49, %v11568_v2  ;;  %v9573_v49 = vld [vmem:[#allocation8 + $0x18] sm:$0xff]  }
 0x59b   : > { %v8326_v41 = vpop.f32.mrb[173].mxu0  ;;  %9224 = vmatmul.mubr.bf16.gmra.mrb[52].mxu1 %v3830_v29  ;;  %8640 = vmatpush3.bf16.msra.mxu0 %v9573_v49 }
 0x59c   : > { %v8327_v0 = vadd.f32 %v8326_v41, %v8325_v47  ;;  %v8328_v42 = vpop.f32.mrb[174].mxu0  ;;  %9227 = vmatprep.mubr.bf16.mxu1 %v3831_v26  ;;  %v4512_v17 = vadd.f32 %v8218_v1, %v11568_v2  ;;  %v3809_v1 = vld [vmem:[#allocation2 + $0xda] sm:$0xff]  ;;  %v3810_v26 = vld [vmem:[#allocation2 + $0xe2] sm:$0xff] }
 0x59d   : > { %v8329_v51 = vpop.f32.mrb[175].mxu0 }
 0x59e   : > { %v8330_v30 = vadd.f32 %v8329_v51, %v8328_v42  ;;  %v11624_v54 = vadd.f32 %v8327_v0, %v4509_v56  ;;  %v8219_v28 = vpop.f32.mrb[204].mxu1  ;;  %v3811_v56 = vld [vmem:[#allocation2 + $0xf2] sm:$0xff]  ;;  %v3812_v0 = vld [vmem:[#allocation2 + $0xfa] sm:$0xff] }
 0x59f   : > { %v8220_v63 = vpop.f32.mrb[205].mxu1 }
 0x5a0   : > { %v11626_v13 = vadd.f32 %v8330_v30, %v4512_v17  ;;  %v8221_v7 = vadd.f32 %v8220_v63, %v8219_v28  ;;  %v8222_v12 = vpop.f32.mrb[206].mxu1  ;;  %v3834_v28 = vpack.c.bf16 %v3810_v26, %v3809_v1  ;;  %v3835_v63 = vpack.c.bf16 %v3812_v0, %v3811_v56  ;;  %v9574_v0 = vld [vmem:[#allocation8 + $0x60] sm:$0xff]  }
 0x5a1   : > { %v8223_v40 = vpop.f32.mrb[207].mxu1  ;;  %8641 = vmatprep.subr.bf16.mxu0 %v9574_v0 }
 0x5a2   : > { %v8331_v25 = vpop.f32.mrb[176].mxu0  ;;  %v8224_v53 = vadd.f32 %v8223_v40, %v8222_v12  ;;  %v4517_v15 = vadd.f32 %v8221_v7, %v11568_v2 }
 0x5a3   : > { %v8332_v62 = vpop.f32.mrb[177].mxu0  ;;  %9228 = vmatmul.mubr.bf16.gmra.mrb[56].mxu1 %v3832_v46 }
 0x5a4   : > { %v8333_v3 = vadd.f32 %v8332_v62, %v8331_v25  ;;  %v8334_v16 = vpop.f32.mrb[178].mxu0  ;;  %9231 = vmatprep.mubr.bf16.mxu1 %v3833_v61  ;;  %v4520_v37 = vadd.f32 %v8224_v53, %v11568_v2  ;;  %v3813_v62 = vld [vmem:[#allocation2 + $0x10a] sm:$0xff] }
 0x5a5   : > { %v8335_v11 = vpop.f32.mrb[179].mxu0 }
 0x5a6   : > { %v8336_v31 = vadd.f32 %v8335_v11, %v8334_v16  ;;  %v11630_v29 = vadd.f32 %v8333_v3, %v4517_v15  ;;  %v8225_v47 = vpop.f32.mrb[208].mxu1  ;;  %v3815_v16 = vld [vmem:[#allocation2 + $0x122] sm:$0xff]  ;;  %v3816_v11 = vld [vmem:[#allocation2 + $0x12a] sm:$0xff] }
 0x5a7   : > { %v8226_v41 = vpop.f32.mrb[209].mxu1 }
 0x5a8   : > { %v11632_v42 = vadd.f32 %v8336_v31, %v4520_v37  ;;  %v8227_v51 = vadd.f32 %v8226_v41, %v8225_v47  ;;  %v8228_v17 = vpop.f32.mrb[210].mxu1  ;;  %v3836_v47 = vpack.c.bf16 %v3814_v8, %v3813_v62  ;;  %v3837_v41 = vpack.c.bf16 %v3816_v11, %v3815_v16 }
 0x5a9   : > { %v8229_v30 = vpop.f32.mrb[211].mxu1 }
 0x5aa   : > { %v8337_v18 = vpop.f32.mrb[180].mxu0  ;;  %v8230_v5 = vadd.f32 %v8229_v30, %v8228_v17  ;;  %v4525_v55 = vadd.f32 %v8227_v51, %v11568_v2 }
 0x5ab   : > { %v8338_v19 = vpop.f32.mrb[181].mxu0  ;;  %9232 = vmatmul.mubr.bf16.gmra.mrb[60].mxu1 %v3834_v28 }
 0x5ac   : > { %v8339_v7 = vadd.f32 %v8338_v19, %v8337_v18  ;;  %v8340_v12 = vpop.f32.mrb[182].mxu0  ;;  %9235 = vmatprep.mubr.bf16.mxu1 %v3835_v63  ;;  %v4528_v46 = vadd.f32 %v8230_v5, %v11568_v2  ;;  %v9575_v18 = vld [vmem:[#allocation8 + $0x20] sm:$0xff]  }
 0x5ad   : > { %v8341_v40 = vpop.f32.mrb[183].mxu0  ;;  %8642 = vmatpush3.bf16.msra.mxu0 %v9575_v18 }
 0x5ae   : > { %v11636_v25 = vadd.f32 %v8339_v7, %v4525_v55  ;;  %v8342_v53 = vadd.f32 %v8341_v40, %v8340_v12  ;;  %v8231_v61 = vpop.f32.mrb[212].mxu1  ;;  %v3817_v7 = vld [vmem:[#allocation2 + $0x13a] sm:$0xff]  ;;  %v3818_v12 = vld [vmem:[#allocation2 + $0x142] sm:$0xff] }
 0x5af   : > { %v8232_v15 = vpop.f32.mrb[213].mxu1  ;;  %v3838_v16 = vpack.c.bf16 %v3818_v12, %v3817_v7 }
 0x5b0   : > { %v11638_v3 = vadd.f32 %v8342_v53, %v4528_v46  ;;  %v8233_v49 = vadd.f32 %v8232_v15, %v8231_v61  ;;  %v8234_v37 = vpop.f32.mrb[214].mxu1  ;;  %v3819_v53 = vld [vmem:[#allocation2 + $0x152] sm:$0xff]  ;;  %v3820_v61 = vld [vmem:[#allocation2 + $0x15a] sm:$0xff] }
 0x5b1   : > { %v8235_v31 = vpop.f32.mrb[215].mxu1 }
 0x5b2   : > { %v8343_v1 = vpop.f32.mrb[184].mxu0  ;;  %v8236_v26 = vadd.f32 %v8235_v31, %v8234_v37  ;;  %v4533_v51 = vadd.f32 %v8233_v49, %v11568_v2  ;;  %v3839_v37 = vpack.c.bf16 %v3820_v61, %v3819_v53 }
 0x5b3   : > { %v8344_v56 = vpop.f32.mrb[185].mxu0  ;;  %9236 = vmatmul.mubr.bf16.gmra.mrb[64].mxu1 %v3836_v47 }
 0x5b4   : > { %v8345_v17 = vadd.f32 %v8344_v56, %v8343_v1  ;;  %v8346_v30 = vpop.f32.mrb[186].mxu0  ;;  %9239 = vmatprep.mubr.bf16.mxu1 %v3837_v41  ;;  %v4536_v5 = vadd.f32 %v8236_v26, %v11568_v2 }
 0x5b5   : > { %v8347_v28 = vpop.f32.mrb[187].mxu0 }
 0x5b6   : > { %v11642_v63 = vadd.f32 %v8345_v17, %v4533_v51  ;;  %v8348_v19 = vadd.f32 %v8347_v28, %v8346_v30  ;;  %v8237_v55 = vpop.f32.mrb[216].mxu1  ;;  %v3821_v30 = vld [vmem:[#allocation2 + $0x16a] sm:$0xff]  ;;  %v3822_v28 = vld [vmem:[#allocation2 + $0x172] sm:$0xff] }
 0x5b7   : > { %v8238_v40 = vpop.f32.mrb[217].mxu1  ;;  %v3840_v12 = vpack.c.bf16 %v3822_v28, %v3821_v30 }
 0x5b8   : > { %v11644_v46 = vadd.f32 %v8348_v19, %v4536_v5  ;;  %v8239_v62 = vadd.f32 %v8238_v40, %v8237_v55  ;;  %v8240_v8 = vpop.f32.mrb[218].mxu1 }
 0x5b9   : > { %v8241_v15 = vpop.f32.mrb[219].mxu1 }
 0x5ba   : > { %v8349_v11 = vpop.f32.mrb[188].mxu0  ;;  %v8242_v49 = vadd.f32 %v8241_v15, %v8240_v8  ;;  %v4541_v47 = vadd.f32 %v8239_v62, %v11568_v2  ;;  %v9576_v62 = vld [vmem:[#allocation8 + $0x68] sm:$0xff]  }
 0x5bb   : > { %v8350_v31 = vpop.f32.mrb[189].mxu0  ;;  %9240 = vmatmul.mubr.bf16.gmra.mrb[68].mxu1 %v3838_v16  ;;  %8643 = vmatprep.subr.bf16.mxu0 %v9576_v62 }
 0x5bc   : > { %v8351_v1 = vadd.f32 %v8350_v31, %v8349_v11  ;;  %v8352_v26 = vpop.f32.mrb[190].mxu0  ;;  %9243 = vmatprep.mubr.bf16.mxu1 %v3839_v37  ;;  %v4544_v56 = vadd.f32 %v8242_v49, %v11568_v2  ;;  %v3825_v49 = vld [vmem:[#allocation2 + $0x19a] sm:$0xff]  ;;  %v3826_v37 = vld [vmem:[#allocation2 + $0x1a2] sm:$0xff] }
 0x5bd   : > { %v8353_v41 = vpop.f32.mrb[191].mxu0  ;;  %v9577_v31 = vld [vmem:[#allocation8 + $0x28] sm:$0xff]  }
 0x5be   : > { %v11648_v0 = vadd.f32 %v8351_v1, %v4541_v47  ;;  %v8354_v51 = vadd.f32 %v8353_v41, %v8352_v26  ;;  %v8243_v17 = vpop.f32.mrb[220].mxu1  ;;  %8644 = vmatpush3.bf16.msra.mxu0 %v9577_v31 }
 0x5bf   : > { %v8244_v18 = vpop.f32.mrb[221].mxu1 }
 0x5c0   : > { %v11650_v5 = vadd.f32 %v8354_v51, %v4544_v56  ;;  %v8245_v19 = vadd.f32 %v8244_v18, %v8243_v17  ;;  %v8246_v55 = vpop.f32.mrb[222].mxu1  ;;  %v3842_v17 = vpack.c.bf16 %v3826_v37, %v3825_v49 }
 0x5c1   : > { %v8247_v7 = vpop.f32.mrb[223].mxu1 }
 0x5c2   : > { %v8355_v40 = vpop.f32.mrb[192].mxu0  ;;  %v8248_v53 = vadd.f32 %v8247_v7, %v8246_v55  ;;  %v4549_v8 = vadd.f32 %v8245_v19, %v11568_v2 }
 0x5c3   : > { %v8356_v61 = vpop.f32.mrb[193].mxu0  ;;  %9244 = vmatmul.mubr.bf16.gmra.mrb[72].mxu1 %v3840_v12 }
 0x5c4   : > { %v8357_v15 = vadd.f32 %v8356_v61, %v8355_v40  ;;  %v8358_v16 = vpop.f32.mrb[194].mxu0  ;;  %9247 = vmatprep.mubr.bf16.mxu1 %v11597_v32  ;;  %v4552_v47 = vadd.f32 %v8248_v53, %v11568_v2 }
 0x5c5   : > { %v8359_v11 = vpop.f32.mrb[195].mxu0 }
 0x5c6   : > { %v11655_v1 = vadd.f32 %v8357_v15, %v4549_v8  ;;  %v8360_v26 = vadd.f32 %v8359_v11, %v8358_v16  ;;  %v8249_v41 = vpop.f32.mrb[224].mxu1 }
 0x5c7   : > { %v8250_v56 = vpop.f32.mrb[225].mxu1 }
 0x5c8   : > { %v11657_v51 = vadd.f32 %v8360_v26, %v4552_v47  ;;  %v8251_v30 = vadd.f32 %v8250_v56, %v8249_v41  ;;  %v8252_v28 = vpop.f32.mrb[226].mxu1  ;;  %v9578_v56 = vld [vmem:[#allocation8 + $0x70] sm:$0xff]  }
 0x5c9   : > { %v8253_v18 = vpop.f32.mrb[227].mxu1  ;;  %8645 = vmatprep.subr.bf16.mxu0 %v9578_v56 }
 0x5ca   : > { %v8361_v32 = vpop.f32.mrb[196].mxu0  ;;  %v8254_v19 = vadd.f32 %v8253_v18, %v8252_v28  ;;  %v4557_v7 = vadd.f32 %v8251_v30, %v11568_v2 }
 0x5cb   : > { %v8362_v55 = vpop.f32.mrb[197].mxu0  ;;  %9248 = vmatmul.mubr.bf16.gmra.mrb[76].mxu1 %v3842_v17 }
 0x5cc   : > { %v8363_v12 = vadd.f32 %v8362_v55, %v8361_v32  ;;  %v8364_v40 = vpop.f32.mrb[198].mxu0  ;;  %v4560_v61 = vadd.f32 %v8254_v19, %v11568_v2  ;;  %v9579_v32 = vld [vmem:[#allocation8 + $0x30] sm:$0xff]  }
 0x5cd   : > { %v8365_v53 = vpop.f32.mrb[199].mxu0  ;;  %8646 = vmatpush3.bf16.msra.mxu0 %v9579_v32 }
 0x5ce   : > { %v11661_v62 = vadd.f32 %v8363_v12, %v4557_v7  ;;  %v8366_v8 = vadd.f32 %v8365_v53, %v8364_v40  ;;  %v8255_v15 = vpop.f32.mrb[228].mxu1  ;;  %8647 = vmatprep.subr.bf16.mxu0 %v9584_v36 }
 0x5cf   : > { %v8256_v16 = vpop.f32.mrb[229].mxu1 }
 0x5d0   : > { %v11663_v11 = vadd.f32 %v8366_v8, %v4560_v61  ;;  %v8257_v49 = vadd.f32 %v8256_v16, %v8255_v15  ;;  %v8258_v37 = vpop.f32.mrb[230].mxu1 }
 0x5d1   : > { %v8259_v31 = vpop.f32.mrb[231].mxu1 }
 0x5d2   : > { %v8367_v47 = vpop.f32.mrb[200].mxu0  ;;  %v8260_v26 = vadd.f32 %v8259_v31, %v8258_v37  ;;  %v4565_v17 = vadd.f32 %v8257_v49, %v11568_v2 }
 0x5d3   : > { %v8368_v41 = vpop.f32.mrb[201].mxu0 }
 0x5d4   : > { %v8369_v30 = vadd.f32 %v8368_v41, %v8367_v47  ;;  %v8370_v28 = vpop.f32.mrb[202].mxu0  ;;  %v4568_v19 = vadd.f32 %v8260_v26, %v11568_v2  ;;  %v9580_v26 = vld [vmem:[#allocation8 + $0xc0] sm:$0xff]  }
 0x5d5   : > { %v8371_v18 = vpop.f32.mrb[203].mxu0  ;;  %8745 = vmatprep.subr.bf16.mxu1 %v9580_v26  ;;  %v9586_v26 = vld [vmem:[#allocation8 + $0xd0] sm:$0xff]  }
 0x5d6   : > { %v11667_v55 = vadd.f32 %v8369_v30, %v4565_v17  ;;  %v8372_v7 = vadd.f32 %v8371_v18, %v8370_v28  ;;  %v8261_v12 = vpop.f32.mrb[232].mxu1  ;;  %v9581_v17 = vld [vmem:[#allocation8 + $0x80] sm:$0xff]   ;;  %v9582_v30 = vld [vmem:[#allocation8 + $0xc8] sm:$0xff]  }
 0x5d7   : > { %v8262_v40 = vpop.f32.mrb[233].mxu1  ;;  %8746 = vmatpush3.bf16.msra.mxu1 %v9581_v17 }
 0x5d8   : > { %v11669_v53 = vadd.f32 %v8372_v7, %v4568_v19  ;;  %v8263_v61 = vadd.f32 %v8262_v40, %v8261_v12  ;;  %v8264_v8 = vpop.f32.mrb[234].mxu1  ;;  %v9583_v40 = vld [vmem:[#allocation8 + $0x88] sm:$0xff]   ;;  %8747 = vmatprep.subr.bf16.mxu1 %v9582_v30 }
 0x5d9   : > { %v8265_v15 = vpop.f32.mrb[235].mxu1 }
 0x5da   : > { %v8373_v16 = vpop.f32.mrb[204].mxu0  ;;  %v8266_v49 = vadd.f32 %v8265_v15, %v8264_v8  ;;  %v4573_v31 = vadd.f32 %v8263_v61, %v11568_v2 }
 0x5db   : > { %v8374_v37 = vpop.f32.mrb[205].mxu0  ;;  %8748 = vmatpush3.bf16.msra.mxu1 %v9583_v40 }
 0x5dc   : > { %v8375_v47 = vadd.f32 %v8374_v37, %v8373_v16  ;;  %v8376_v41 = vpop.f32.mrb[206].mxu0  ;;  %v4576_v28 = vadd.f32 %v8266_v49, %v11568_v2  ;;  %8749 = vmatprep.subr.bf16.mxu1 %v9586_v26 }
 0x5dd   : > { %v8377_v56 = vpop.f32.mrb[207].mxu0 }
 0x5de   : > { %v11673_v18 = vadd.f32 %v8375_v47, %v4573_v31  ;;  %v8378_v32 = vadd.f32 %v8377_v56, %v8376_v41  ;;  %v8267_v19 = vpop.f32.mrb[236].mxu1  ;;  %v9585_v56 = vld [vmem:[#allocation8 + $0x38] sm:$0xff]  }
 0x5df   : > { %v8268_v7 = vpop.f32.mrb[237].mxu1  ;;  %8648 = vmatpush3.bf16.msra.mxu0 %v9585_v56 }
 0x5e0   : > { %v11675_v12 = vadd.f32 %v8378_v32, %v4576_v28  ;;  %v8269_v8 = vadd.f32 %v8268_v7, %v8267_v19  ;;  %v8270_v61 = vpop.f32.mrb[238].mxu1  ;;  %v9587_v28 = vld [vmem:[#allocation8 + $0x90] sm:$0xff]   ;;  %v9588_v19 = vld [vmem:[#allocation8 + $0xd8] sm:$0xff]  }
 0x5e1   : > { %v8271_v15 = vpop.f32.mrb[239].mxu1  ;;  %8750 = vmatpush3.bf16.msra.mxu1 %v9587_v28 }
 0x5e2   : > { %v8379_v16 = vpop.f32.mrb[208].mxu0  ;;  %v8272_v37 = vadd.f32 %v8271_v15, %v8270_v61  ;;  %v4581_v49 = vadd.f32 %v8269_v8, %v11568_v2  ;;  %8751 = vmatprep.subr.bf16.mxu1 %v9588_v19  ;;  %v5343_v19 = vld [vmem:[#allocation2 + $0x1] sm:$0xff] }
 0x5e3   : > { %v8380_v20 = vpop.f32.mrb[209].mxu0 }
 0x5e4   : > { %v8381_v31 = vadd.f32 %v8380_v20, %v8379_v16  ;;  %v8382_v47 = vpop.f32.mrb[210].mxu0  ;;  %v4584_v17 = vadd.f32 %v8272_v37, %v11568_v2 }
 0x5e5   : > { %v8383_v41 = vpop.f32.mrb[211].mxu0 }
 0x5e6   : > { %v11679_v32 = vadd.f32 %v8381_v31, %v4581_v49  ;;  %v8384_v30 = vadd.f32 %v8383_v41, %v8382_v47  ;;  %v8401_v7 = vpop.f32.mrb[240].mxu1  ;;  %v9589_v31 = vld [vmem:[#allocation8 + $0x98] sm:$0xff]  }
 0x5e7   : > { %v8402_v61 = vpop.f32.mrb[241].mxu1  ;;  %8752 = vmatpush3.bf16.msra.mxu1 %v9589_v31 }
 0x5e8   : > { %v11681_v15 = vadd.f32 %v8384_v30, %v4584_v17  ;;  %v8403_v20 = vadd.f32 %v8402_v61, %v8401_v7  ;;  %v8404_v40 = vpop.f32.mrb[242].mxu1  ;;  %v9590_v17 = vld [vmem:[#allocation8 + $0xe0] sm:$0xff]  }
 0x5e9   : > { %v8405_v36 = vpop.f32.mrb[243].mxu1  ;;  %v9591_v30 = vld [vmem:[#allocation8 + $0xa0] sm:$0xff]   ;;  %8753 = vmatprep.subr.bf16.mxu1 %v9590_v17 }
 0x5ea   : > { %v8513_v8 = vpop.f32.mrb[212].mxu0  ;;  %v4783_v16 = vadd.f32 %v8403_v20, %v11574_v59  ;;  %v8406_v4 = vadd.f32 %v8405_v36, %v8404_v40  ;;  %v5344_v59 = vld [vmem:[#allocation2 + $0x9] sm:$0xff]  ;;  %v9592_v20 = vld [vmem:[#allocation8 + $0xe8] sm:$0xff]  }
 0x5eb   : > { %v8514_v2 = vpop.f32.mrb[213].mxu0  ;;  %8754 = vmatpush3.bf16.msra.mxu1 %v9591_v30  ;;  %v9594_v17 = vld [vmem:[#allocation8 + $0x140] sm:$0xff]  }
 0x5ec   : > { %v8515_v37 = vadd.f32 %v8514_v2, %v8513_v8  ;;  %v8516_v49 = vpop.f32.mrb[214].mxu0  ;;  %v4786_v47 = vadd.f32 %v8406_v4, %v11578_v22  ;;  %v5375_v8 = vpack.c.bf16 %v5344_v59, %v5343_v19  ;;  %8755 = vmatprep.subr.bf16.mxu1 %v9592_v20  ;;  %v9595_v19 = vld [vmem:[#allocation8 + $0xf0] sm:$0xff]   ;;  %8857 = vmatprep.subr.bf16.mxu0 %v9594_v17  ;;  %v9598_v20 = vld [vmem:[#allocation8 + $0xf8] sm:$0xff]  }
 0x5ed   : > { %v8517_v41 = vpop.f32.mrb[215].mxu0 }
 0x5ee   : > { %v8518_v56 = vadd.f32 %v8517_v41, %v8516_v49  ;;  %v11685_v26 = vadd.f32 %v8515_v37, %v4783_v16  ;;  %v8407_v28 = vpop.f32.mrb[244].mxu1  ;;  %6342 = vmatprep.mubr.bf16.mxu0 %v5375_v8  ;;  %v9593_v41 = vld [vmem:[#allocation8 + $0xa8] sm:$0xff]  }
 0x5ef   : > { %v8408_v7 = vpop.f32.mrb[245].mxu1  ;;  %6343 = vmatmul.mubr.bf16.vlgmr.msra.gmra.mrb[20].mxu0 %v11607_v43  ;;  %8756 = vmatpush3.bf16.msra.mxu1 %v9593_v41 }
 0x5f0   : > { %v11687_v61 = vadd.f32 %v8518_v56, %v4786_v47  ;;  %v8409_v40 = vadd.f32 %v8408_v7, %v8407_v28  ;;  %v8410_v36 = vpop.f32.mrb[246].mxu1  ;;  %v9597_v7 = vld [vmem:[#allocation8 + $0xb0] sm:$0xff]   ;;  %8757 = vmatprep.subr.bf16.mxu1 %v9595_v19 }
 0x5f1   : > { %v8411_v2 = vpop.f32.mrb[247].mxu1 }
 0x5f2   : > { %v8519_v4 = vpop.f32.mrb[216].mxu0  ;;  %v4791_v22 = vadd.f32 %v8409_v40, %v11583_v48  ;;  %v8412_v16 = vadd.f32 %v8411_v2, %v8410_v36  ;;  %v9596_v48 = vld [vmem:[#allocation8 + $0x100] sm:$0xff]  }
 0x5f3   : > { %v8520_v37 = vpop.f32.mrb[217].mxu0  ;;  %8858 = vmatpush3.bf16.msra.mxu0 %v9596_v48  ;;  %8758 = vmatpush3.bf16.msra.mxu1 %v9597_v7 }
 0x5f4   : > { %v8521_v49 = vadd.f32 %v8520_v37, %v8519_v4  ;;  %v8522_v31 = vpop.f32.mrb[218].mxu0  ;;  %v4794_v47 = vadd.f32 %v8412_v16, %v11586_v58  ;;  %8759 = vmatprep.subr.bf16.mxu1 %v9598_v20 }
 0x5f5   : > { %v8523_v56 = vpop.f32.mrb[219].mxu0 }
 0x5f6   : > { %v8524_v44 = vadd.f32 %v8523_v56, %v8522_v31  ;;  %v11691_v28 = vadd.f32 %v8521_v49, %v4791_v22  ;;  %v8413_v30 = vpop.f32.mrb[248].mxu1  ;;  %v9599_v49 = vld [vmem:[#allocation8 + $0xb8] sm:$0xff]  }
 0x5f7   : > { %v8414_v59 = vpop.f32.mrb[249].mxu1  ;;  %8760 = vmatpush3.bf16.msra.mxu1 %v9599_v49 }
 0x5f8   : > { %v11694_v40 = vadd.f32 %v8524_v44, %v4794_v47  ;;  %v8415_v36 = vadd.f32 %v8414_v59, %v8413_v30  ;;  %v8416_v8 = vpop.f32.mrb[250].mxu1 }
 0x5f9   : > { %v8417_v58 = vpop.f32.mrb[251].mxu1 }
 0x5fa   : > { %v8525_v2 = vpop.f32.mrb[220].mxu0  ;;  %v4799_v43 = vadd.f32 %v8415_v36, %v11592_v52  ;;  %v8418_v4 = vadd.f32 %v8417_v58, %v8416_v8 }
 0x5fb   : > { %v8526_v22 = vpop.f32.mrb[221].mxu0 }
 0x5fc   : > { %v8527_v16 = vadd.f32 %v8526_v22, %v8525_v2  ;;  %v8528_v37 = vpop.f32.mrb[222].mxu0  ;;  %v4802_v44 = vadd.f32 %v8418_v4, %v11595_v24  ;;  %v9600_v22 = vld [vmem:[#allocation8 + $0x148] sm:$0xff]  }
 0x5fd   : > { %v8529_v31 = vpop.f32.mrb[223].mxu0  ;;  %8859 = vmatprep.subr.bf16.mxu0 %v9600_v22 }
 0x5fe   : > { %v8530_v41 = vadd.f32 %v8529_v31, %v8528_v37  ;;  %v11698_v47 = vadd.f32 %v8527_v16, %v4799_v43  ;;  %v8419_v56 = vpop.f32.mrb[252].mxu1  ;;  %v9601_v37 = vld [vmem:[#allocation8 + $0x108] sm:$0xff]  }
 0x5ff   : > { %v8420_v17 = vpop.f32.mrb[253].mxu1  ;;  %8860 = vmatpush3.bf16.msra.mxu0 %v9601_v37 }
 0x600   : > { %v11700_v30 = vadd.f32 %v8530_v41, %v4802_v44  ;;  %v8421_v19 = vadd.f32 %v8420_v17, %v8419_v56  ;;  %v8422_v48 = vpop.f32.mrb[254].mxu1 }
 0x601   : > { %v8423_v52 = vpop.f32.mrb[255].mxu1 }
 0x602   : > { %v8531_v7 = vpop.f32.mrb[224].mxu0  ;;  %v4807_v59 = vadd.f32 %v8421_v19, %v11602_v27  ;;  %v8424_v20 = vadd.f32 %v8423_v52, %v8422_v48 }
 0x603   : > { %v8532_v36 = vpop.f32.mrb[225].mxu0 }
 0x604   : > { %v8533_v8 = vadd.f32 %v8532_v36, %v8531_v7  ;;  %v8534_v58 = vpop.f32.mrb[226].mxu0  ;;  %v4810_v24 = vadd.f32 %v8424_v20, %v11605_v34 }
 0x605   : > { %v8535_v2 = vpop.f32.mrb[227].mxu0 }
 0x606   : > { %v8536_v43 = vadd.f32 %v8535_v2, %v8534_v58  ;;  %v11704_v4 = vadd.f32 %v8533_v8, %v4807_v59  ;;  %v8425_v16 = vpop.f32.mrb[0].mxu1 }
 0x607   : > { %v8426_v49 = vpop.f32.mrb[1].mxu1 }
 0x608   : > { %v11706_v44 = vadd.f32 %v8536_v43, %v4810_v24  ;;  %v8427_v31 = vadd.f32 %v8426_v49, %v8425_v16  ;;  %v8428_v41 = vpop.f32.mrb[2].mxu1 }
 0x609   : > { %v8429_v27 = vpop.f32.mrb[3].mxu1 }
 0x60a   : > { %v8537_v56 = vpop.f32.mrb[228].mxu0  ;;  %v4815_v17 = vadd.f32 %v8427_v31, %v11611_v45  ;;  %v8430_v19 = vadd.f32 %v8429_v27, %v8428_v41 }
 0x60b   : > { %v8538_v34 = vpop.f32.mrb[229].mxu0 }
 0x60c   : > { %v8539_v48 = vadd.f32 %v8538_v34, %v8537_v56  ;;  %v8540_v52 = vpop.f32.mrb[230].mxu0  ;;  %v4818_v7 = vadd.f32 %v8430_v19, %v11614_v39  ;;  %v9602_v19 = vld [vmem:[#allocation8 + $0x150] sm:$0xff]  }
 0x60d   : > { %v8541_v59 = vpop.f32.mrb[231].mxu0  ;;  %8861 = vmatprep.subr.bf16.mxu0 %v9602_v19 }
 0x60e   : > { %v8542_v20 = vadd.f32 %v8541_v59, %v8540_v52  ;;  %v11710_v36 = vadd.f32 %v8539_v48, %v4815_v17  ;;  %v8431_v8 = vpop.f32.mrb[4].mxu1  ;;  %v9603_v48 = vld [vmem:[#allocation8 + $0x110] sm:$0xff]  }
 0x60f   : > { %v8432_v58 = vpop.f32.mrb[5].mxu1  ;;  %8862 = vmatpush3.bf16.msra.mxu0 %v9603_v48 }
 0x610   : > { %v11712_v24 = vadd.f32 %v8542_v20, %v4818_v7  ;;  %v8433_v2 = vadd.f32 %v8432_v58, %v8431_v8  ;;  %v8434_v43 = vpop.f32.mrb[6].mxu1 }
 0x611   : > { %v8435_v22 = vpop.f32.mrb[7].mxu1 }
 0x612   : > { %v8543_v16 = vpop.f32.mrb[232].mxu0  ;;  %v4823_v45 = vadd.f32 %v8433_v2, %v11618_v35  ;;  %v8436_v37 = vadd.f32 %v8435_v22, %v8434_v43 }
 0x613   : > { %v8544_v49 = vpop.f32.mrb[233].mxu0 }
 0x614   : > { %v8545_v31 = vadd.f32 %v8544_v49, %v8543_v16  ;;  %v8546_v41 = vpop.f32.mrb[234].mxu0  ;;  %v4826_v39 = vadd.f32 %v8436_v37, %v11620_v21 }
 0x615   : > { %v8547_v27 = vpop.f32.mrb[235].mxu0 }
 0x616   : > { %v8548_v56 = vadd.f32 %v8547_v27, %v8546_v41  ;;  %v11716_v17 = vadd.f32 %v8545_v31, %v4823_v45  ;;  %v8437_v34 = vpop.f32.mrb[8].mxu1 }
 0x617   : > { %v8438_v52 = vpop.f32.mrb[9].mxu1 }
 0x618   : > { %v11718_v7 = vadd.f32 %v8548_v56, %v4826_v39  ;;  %v8439_v59 = vadd.f32 %v8438_v52, %v8437_v34  ;;  %v8440_v20 = vpop.f32.mrb[10].mxu1 }
 0x619   : > { %v8441_v35 = vpop.f32.mrb[11].mxu1 }
 0x61a   : > { %v8549_v8 = vpop.f32.mrb[236].mxu0  ;;  %v4831_v58 = vadd.f32 %v8439_v59, %v11624_v54  ;;  %v8442_v2 = vadd.f32 %v8441_v35, %v8440_v20 }
 0x61b   : > { %v8550_v21 = vpop.f32.mrb[237].mxu0 }
 0x61c   : > { %v8551_v43 = vadd.f32 %v8550_v21, %v8549_v8  ;;  %v8552_v22 = vpop.f32.mrb[238].mxu0  ;;  %v4834_v16 = vadd.f32 %v8442_v2, %v11626_v13  ;;  %v9604_v2 = vld [vmem:[#allocation8 + $0x158] sm:$0xff]  }
 0x61d   : > { %v8553_v45 = vpop.f32.mrb[239].mxu0  ;;  %8863 = vmatprep.subr.bf16.mxu0 %v9604_v2 }
 0x61e   : > { %v8554_v37 = vadd.f32 %v8553_v45, %v8552_v22  ;;  %v11722_v49 = vadd.f32 %v8551_v43, %v4831_v58  ;;  %v8443_v31 = vpop.f32.mrb[12].mxu1  ;;  %v9605_v43 = vld [vmem:[#allocation8 + $0x118] sm:$0xff]  }
 0x61f   : > { %v8444_v41 = vpop.f32.mrb[13].mxu1  ;;  %8864 = vmatpush3.bf16.msra.mxu0 %v9605_v43 }
 0x620   : > { %v11724_v39 = vadd.f32 %v8554_v37, %v4834_v16  ;;  %v8445_v27 = vadd.f32 %v8444_v41, %v8443_v31  ;;  %v8446_v56 = vpop.f32.mrb[14].mxu1 }
 0x621   : > { %v8447_v19 = vpop.f32.mrb[15].mxu1 }
 0x622   : > { %v8555_v34 = vpop.f32.mrb[240].mxu0  ;;  %v4839_v54 = vadd.f32 %v8445_v27, %v11630_v29  ;;  %v8448_v48 = vadd.f32 %v8447_v19, %v8446_v56  ;;  %v9606_v56 = vld [vmem:[#allocation8 + $0x1c0] sm:$0xff]  }
 0x623   : > { %v8556_v52 = vpop.f32.mrb[241].mxu0  ;;  %v9608_v19 = vld [vmem:[#allocation8 + $0x160] sm:$0xff]   ;;  %8969 = vmatprep.subr.bf16.mxu1 %v9606_v56 }
 0x624   : > { %v8557_v59 = vadd.f32 %v8556_v52, %v8555_v34  ;;  %v8558_v20 = vpop.f32.mrb[242].mxu0  ;;  %v4842_v13 = vadd.f32 %v8448_v48, %v11632_v42  ;;  %8865 = vmatprep.subr.bf16.mxu0 %v9608_v19 }
 0x625   : > { %v8559_v35 = vpop.f32.mrb[243].mxu0 }
 0x626   : > { %v8560_v8 = vadd.f32 %v8559_v35, %v8558_v20  ;;  %v11728_v58 = vadd.f32 %v8557_v59, %v4839_v54  ;;  %v8449_v21 = vpop.f32.mrb[16].mxu1 }
 0x627   : > { %v8450_v22 = vpop.f32.mrb[17].mxu1 }
 0x628   : > { %v11730_v16 = vadd.f32 %v8560_v8, %v4842_v13  ;;  %v8451_v45 = vadd.f32 %v8450_v22, %v8449_v21  ;;  %v8452_v37 = vpop.f32.mrb[18].mxu1  ;;  %v9609_v22 = vld [vmem:[#allocation8 + $0x120] sm:$0xff]  }
 0x629   : > { %v8453_v29 = vpop.f32.mrb[19].mxu1  ;;  %8866 = vmatpush3.bf16.msra.mxu0 %v9609_v22 }
 0x62a   : > { %v8561_v31 = vpop.f32.mrb[244].mxu0  ;;  %v4847_v41 = vadd.f32 %v8451_v45, %v11636_v25  ;;  %v8454_v27 = vadd.f32 %v8453_v29, %v8452_v37 }
 0x62b   : > { %v8562_v42 = vpop.f32.mrb[245].mxu0 }
 0x62c   : > { %v8563_v34 = vadd.f32 %v8562_v42, %v8561_v31  ;;  %v8564_v54 = vpop.f32.mrb[246].mxu0  ;;  %v4850_v48 = vadd.f32 %v8454_v27, %v11638_v3 }
 0x62d   : > { %v8565_v52 = vpop.f32.mrb[247].mxu0 }
 0x62e   : > { %v8566_v59 = vadd.f32 %v8565_v52, %v8564_v54  ;;  %v11734_v20 = vadd.f32 %v8563_v34, %v4847_v41  ;;  %v8455_v13 = vpop.f32.mrb[20].mxu1 }
 0x62f   : > { %v8456_v35 = vpop.f32.mrb[21].mxu1 }
 0x630   : > { %v11736_v8 = vadd.f32 %v8566_v59, %v4850_v48  ;;  %v8457_v2 = vadd.f32 %v8456_v35, %v8455_v13  ;;  %v8458_v25 = vpop.f32.mrb[22].mxu1 }
 0x631   : > { %v8459_v21 = vpop.f32.mrb[23].mxu1 }
 0x632   : > { %v8567_v43 = vpop.f32.mrb[248].mxu0  ;;  %v4855_v45 = vadd.f32 %v8457_v2, %v11642_v63  ;;  %v8460_v37 = vadd.f32 %v8459_v21, %v8458_v25  ;;  %v9612_v25 = vld [vmem:[#allocation8 + $0x168] sm:$0xff]  }
 0x633   : > { %v8568_v29 = vpop.f32.mrb[249].mxu0  ;;  %8867 = vmatprep.subr.bf16.mxu0 %v9612_v25 }
 0x634   : > { %v8569_v3 = vadd.f32 %v8568_v29, %v8567_v43  ;;  %v8570_v31 = vpop.f32.mrb[250].mxu0  ;;  %v4858_v27 = vadd.f32 %v8460_v37, %v11644_v46 }
 0x635   : > { %v8571_v41 = vpop.f32.mrb[251].mxu0 }
 0x636   : > { %v8572_v42 = vadd.f32 %v8571_v41, %v8570_v31  ;;  %v11740_v56 = vadd.f32 %v8569_v3, %v4855_v45  ;;  %v8461_v19 = vpop.f32.mrb[24].mxu1 }
 0x637   : > { %v8462_v34 = vpop.f32.mrb[25].mxu1 }
 0x638   : > { %v11742_v54 = vadd.f32 %v8572_v42, %v4858_v27  ;;  %v8463_v48 = vadd.f32 %v8462_v34, %v8461_v19  ;;  %v8464_v52 = vpop.f32.mrb[26].mxu1  ;;  %v9613_v19 = vld [vmem:[#allocation8 + $0x128] sm:$0xff]  }
 0x639   : > { %v8465_v59 = vpop.f32.mrb[27].mxu1  ;;  %8868 = vmatpush3.bf16.msra.mxu0 %v9613_v19 }
 0x63a   : > { %v8573_v13 = vpop.f32.mrb[252].mxu0  ;;  %v4863_v63 = vadd.f32 %v8463_v48, %v11648_v0  ;;  %v8466_v35 = vadd.f32 %v8465_v59, %v8464_v52 }
 0x63b   : > { %v8574_v2 = vpop.f32.mrb[253].mxu0 }
 0x63c   : > { %v8575_v21 = vadd.f32 %v8574_v2, %v8573_v13  ;;  %v8576_v43 = vpop.f32.mrb[254].mxu0  ;;  %v4866_v46 = vadd.f32 %v8466_v35, %v11650_v5 }
 0x63d   : > { %v8577_v22 = vpop.f32.mrb[255].mxu0 }
 0x63e   : > { %v8578_v45 = vadd.f32 %v8577_v22, %v8576_v43  ;;  %v11746_v37 = vadd.f32 %v8575_v21, %v4863_v63  ;;  %v8467_v29 = vpop.f32.mrb[28].mxu1 }
 0x63f   : > { %v8468_v3 = vpop.f32.mrb[29].mxu1 }
 0x640   : > { %v11748_v31 = vadd.f32 %v8578_v45, %v4866_v46  ;;  %v8469_v27 = vadd.f32 %v8468_v3, %v8467_v29  ;;  %v8470_v41 = vpop.f32.mrb[30].mxu1 }
 0x641   : > { %v8471_v42 = vpop.f32.mrb[31].mxu1 }
 0x642   : > { %v8579_v0 = vpop.f32.mrb[0].mxu0  ;;  %v4871_v34 = vadd.f32 %v8469_v27, %v11655_v1  ;;  %v8472_v48 = vadd.f32 %v8471_v42, %v8470_v41  ;;  %v9616_v41 = vld [vmem:[#allocation8 + $0x170] sm:$0xff]  }
 0x643   : > { %v8580_v52 = vpop.f32.mrb[1].mxu0  ;;  %8869 = vmatprep.subr.bf16.mxu0 %v9616_v41 }
 0x644   : > { %v8581_v59 = vadd.f32 %v8580_v52, %v8579_v0  ;;  %v8582_v5 = vpop.f32.mrb[2].mxu0  ;;  %v4874_v13 = vadd.f32 %v8472_v48, %v11657_v51 }
 0x645   : > { %v8583_v63 = vpop.f32.mrb[3].mxu0 }
 0x646   : > { %v8584_v35 = vadd.f32 %v8583_v63, %v8582_v5  ;;  %v11752_v2 = vadd.f32 %v8581_v59, %v4871_v34  ;;  %v8473_v25 = vpop.f32.mrb[32].mxu1 }
 0x647   : > { %v8474_v21 = vpop.f32.mrb[33].mxu1 }
 0x648   : > { %v11754_v43 = vadd.f32 %v8584_v35, %v4874_v13  ;;  %v8475_v46 = vadd.f32 %v8474_v21, %v8473_v25  ;;  %v8476_v22 = vpop.f32.mrb[34].mxu1  ;;  %v9617_v25 = vld [vmem:[#allocation8 + $0x130] sm:$0xff]  }
 0x649   : > { %v8477_v45 = vpop.f32.mrb[35].mxu1  ;;  %8870 = vmatpush3.bf16.msra.mxu0 %v9617_v25 }
 0x64a   : > { %v8585_v29 = vpop.f32.mrb[4].mxu0  ;;  %v4879_v1 = vadd.f32 %v8475_v46, %v11661_v62  ;;  %v8478_v3 = vadd.f32 %v8477_v45, %v8476_v22 }
 0x64b   : > { %v8586_v27 = vpop.f32.mrb[5].mxu0 }
 0x64c   : > { %v8587_v42 = vadd.f32 %v8586_v27, %v8585_v29  ;;  %v8588_v0 = vpop.f32.mrb[6].mxu0  ;;  %v4882_v51 = vadd.f32 %v8478_v3, %v11663_v11 }
 0x64d   : > { %v8589_v19 = vpop.f32.mrb[7].mxu0 }
 0x64e   : > { %v8590_v34 = vadd.f32 %v8589_v19, %v8588_v0  ;;  %v11758_v48 = vadd.f32 %v8587_v42, %v4879_v1  ;;  %v8479_v52 = vpop.f32.mrb[36].mxu1 }
 0x64f   : > { %v8480_v59 = vpop.f32.mrb[37].mxu1 }
 0x650   : > { %v11760_v5 = vadd.f32 %v8590_v34, %v4882_v51  ;;  %v8481_v13 = vadd.f32 %v8480_v59, %v8479_v52  ;;  %v8482_v63 = vpop.f32.mrb[38].mxu1 }
 0x651   : > { %v8483_v35 = vpop.f32.mrb[39].mxu1 }
 0x652   : > { %v8591_v62 = vpop.f32.mrb[8].mxu0  ;;  %v4887_v21 = vadd.f32 %v8481_v13, %v11667_v55  ;;  %v8484_v46 = vadd.f32 %v8483_v35, %v8482_v63  ;;  %v9620_v63 = vld [vmem:[#allocation8 + $0x178] sm:$0xff]  }
 0x653   : > { %v8592_v22 = vpop.f32.mrb[9].mxu0  ;;  %8871 = vmatprep.subr.bf16.mxu0 %v9620_v63 }
 0x654   : > { %v8593_v45 = vadd.f32 %v8592_v22, %v8591_v62  ;;  %v8594_v11 = vpop.f32.mrb[10].mxu0  ;;  %v4890_v29 = vadd.f32 %v8484_v46, %v11669_v53 }
 0x655   : > { %v8595_v1 = vpop.f32.mrb[11].mxu0 }
 0x656   : > { %v8596_v3 = vadd.f32 %v8595_v1, %v8594_v11  ;;  %v11764_v27 = vadd.f32 %v8593_v45, %v4887_v21  ;;  %v8485_v41 = vpop.f32.mrb[40].mxu1 }
 0x657   : > { %v8486_v42 = vpop.f32.mrb[41].mxu1 }
 0x658   : > { %v11766_v0 = vadd.f32 %v8596_v3, %v4890_v29  ;;  %v8487_v51 = vadd.f32 %v8486_v42, %v8485_v41  ;;  %v8488_v19 = vpop.f32.mrb[42].mxu1  ;;  %v9621_v41 = vld [vmem:[#allocation8 + $0x138] sm:$0xff]  }
 0x659   : > { %v8489_v34 = vpop.f32.mrb[43].mxu1  ;;  %8872 = vmatpush3.bf16.msra.mxu0 %v9621_v41 }
 0x65a   : > { %v8597_v52 = vpop.f32.mrb[12].mxu0  ;;  %v4895_v55 = vadd.f32 %v8487_v51, %v11673_v18  ;;  %v8490_v59 = vadd.f32 %v8489_v34, %v8488_v19 }
 0x65b   : > { %v8598_v13 = vpop.f32.mrb[13].mxu0 }
 0x65c   : > { %v8599_v35 = vadd.f32 %v8598_v13, %v8597_v52  ;;  %v8600_v62 = vpop.f32.mrb[14].mxu0  ;;  %v4898_v53 = vadd.f32 %v8490_v59, %v11675_v12 }
 0x65d   : > { %v8601_v25 = vpop.f32.mrb[15].mxu0 }
 0x65e   : > { %v8602_v21 = vadd.f32 %v8601_v25, %v8600_v62  ;;  %v11770_v46 = vadd.f32 %v8599_v35, %v4895_v55  ;;  %v8491_v22 = vpop.f32.mrb[44].mxu1 }
 0x65f   : > { %v8492_v45 = vpop.f32.mrb[45].mxu1 }
 0x660   : > { %v11772_v11 = vadd.f32 %v8602_v21, %v4898_v53  ;;  %v8493_v29 = vadd.f32 %v8492_v45, %v8491_v22  ;;  %v8494_v1 = vpop.f32.mrb[46].mxu1 }
 0x661   : > { %v8495_v3 = vpop.f32.mrb[47].mxu1 }
 0x662   : > { %v8603_v18 = vpop.f32.mrb[16].mxu0  ;;  %v4903_v42 = vadd.f32 %v8493_v29, %v11679_v32  ;;  %v8496_v51 = vadd.f32 %v8495_v3, %v8494_v1  ;;  %v11784_v3 = vld [vmem:[#allocation8 + $0x200] sm:$0xff]  }
 0x663   : > { %v8604_v19 = vpop.f32.mrb[17].mxu0  ;;  %9251 = vmatprep.subr.bf16.mxu0 %v11784_v3 }
 0x664   : > { %v8605_v34 = vadd.f32 %v8604_v19, %v8603_v18  ;;  %v8606_v12 = vpop.f32.mrb[18].mxu0  ;;  %v4906_v52 = vadd.f32 %v8496_v51, %v11681_v15 }
 0x665   : > { %v8607_v55 = vpop.f32.mrb[19].mxu0 }
 0x666   : > { %v8608_v59 = vadd.f32 %v8607_v55, %v8606_v12  ;;  %v11776_v13 = vadd.f32 %v8605_v34, %v4903_v42  ;;  %v9221_v63 = vpop.f32.mrb[48].mxu1 }
 0x667   : > { %v5113_v35 = vadd.f32 %v9221_v63, %v11691_v28  ;;  %v5104_v62 = vpop.f32.mrb[49].mxu1  ;;  %v5392_v63 = vld [vmem:[#allocation2 + $0xa] sm:$0xff] }
 0x668   : > { %v11779_v53 = vadd.f32 %v8608_v59, %v4906_v52  ;;  %v5105_v25 = vadd.f32 %v5104_v62, %v11685_v26  ;;  %v9222_v32 = vpop.f32.mrb[50].mxu1  ;;  %v5391_v59 = vld [vmem:[#allocation2 + $0x2] sm:$0xff] }
 0x669   : > { %v5233_v21 = vmax.f32 %v5113_v35, 0.0  ;;  %v5116_v22 = vadd.f32 %v9222_v32, %v11694_v40  ;;  %v5107_v45 = vpop.f32.mrb[51].mxu1  ;;  %v5423_v32 = vpack.c.bf16 %v5392_v63, %v5391_v59 }
 0x66a   : > { %v5231_v29 = vmax.f32 %v5105_v25, 0.0  ;;  %v5108_v15 = vadd.f32 %v5107_v45, %v11687_v61 }
 0x66b   : > { %5265 = vst [vmem:[#allocation2 + $0x31] sm:$0xff] %v5233_v21  ;;  %v5234_v1 = vmax.f32 %v5116_v22, 0.0 }
 0x66c   : > { %5263 = vst [vmem:[#allocation2 + $0x19] sm:$0xff] %v5231_v29  ;;  %v5232_v18 = vmax.f32 %v5108_v15, 0.0 }
 0x66d   : > { %5266 = vst [vmem:[#allocation2 + $0x39] sm:$0xff] %v5234_v1  ;;  %v5377_v28 = vpack.c.bf16 %v5234_v1, %v5233_v21 }
 0x66e   : > { %5264 = vst [vmem:[#allocation2 + $0x21] sm:$0xff] %v5232_v18  ;;  %v9225_v26 = vpop.f32.mrb[52].mxu1  ;;  %v5376_v41 = vpack.c.bf16 %v5232_v18, %v5231_v29  ;;  %v9607_v29 = vld [vmem:[#allocation8 + $0x180] sm:$0xff]   ;;  %v9610_v18 = vld [vmem:[#allocation8 + $0x1c8] sm:$0xff]  }
 0x66f   : > { %v5129_v42 = vadd.f32 %v9225_v26, %v11704_v4  ;;  %v5120_v40 = vpop.f32.mrb[53].mxu1 }
 0x670   : > { %v5121_v51 = vadd.f32 %v5120_v40, %v11698_v47  ;;  %v9226_v19 = vpop.f32.mrb[54].mxu1  ;;  %6350 = vmatprep.mubr.bf16.mxu0 %v5376_v41 }
 0x671   : > { %v5237_v61 = vmax.f32 %v5129_v42, 0.0  ;;  %v5132_v34 = vadd.f32 %v9226_v19, %v11706_v44  ;;  %v5123_v12 = vpop.f32.mrb[55].mxu1 }
 0x672   : > { %v5235_v52 = vmax.f32 %v5121_v51, 0.0  ;;  %v5124_v55 = vadd.f32 %v5123_v12, %v11700_v30  ;;  %v5441_v1 = vld [vmem:[#allocation2 + $0x30] sm:$0xff]  ;;  %v9614_v12 = vld [vmem:[#allocation8 + $0x1d0] sm:$0xff]  }
 0x673   : > { %5269 = vst [vmem:[#allocation2 + $0x61] sm:$0xff] %v5237_v61  ;;  %v5238_v35 = vmax.f32 %v5132_v34, 0.0  ;;  %v5439_v4 = vld [vmem:[#allocation2 + $0x18] sm:$0xff] }
 0x674   : > { %5267 = vst [vmem:[#allocation2 + $0x49] sm:$0xff] %v5235_v52  ;;  %v5236_v62 = vmax.f32 %v5124_v55, 0.0  ;;  %v5442_v47 = vld [vmem:[#allocation2 + $0x38] sm:$0xff] }
 0x675   : > { %5270 = vst [vmem:[#allocation2 + $0x69] sm:$0xff] %v5238_v35  ;;  %v5440_v25 = vld [vmem:[#allocation2 + $0x20] sm:$0xff]  ;;  %v11791_v21 = vpack.c.bf16 %v5238_v35, %v5237_v61  ;;  %v11795_v42 = vpack.c.bf16 %v5442_v47, %v5441_v1  ;;  %v9618_v47 = vld [vmem:[#allocation8 + $0x1d8] sm:$0xff]  }
 0x676   : > { %5268 = vst [vmem:[#allocation2 + $0x51] sm:$0xff] %v5236_v62  ;;  %v9229_v22 = vpop.f32.mrb[56].mxu1  ;;  %v5471_v44 = vpack.c.bf16 %v5440_v25, %v5439_v4  ;;  %v5378_v45 = vpack.c.bf16 %v5236_v62, %v5235_v52  ;;  %v5393_v55 = vld [vmem:[#allocation2 + $0x1a] sm:$0xff]  ;;  %v5394_v59 = vld [vmem:[#allocation2 + $0x22] sm:$0xff] }
 0x677   : > { %v5145_v30 = vadd.f32 %v9229_v22, %v11716_v17  ;;  %v5136_v15 = vpop.f32.mrb[57].mxu1  ;;  %v9611_v17 = vld [vmem:[#allocation8 + $0x188] sm:$0xff]   ;;  %v11805_v25 = vpack.c.bf16 %v5394_v59, %v5393_v55 }
 0x678   : > { %v5137_v26 = vadd.f32 %v5136_v15, %v11710_v36  ;;  %v9230_v41 = vpop.f32.mrb[58].mxu1  ;;  %6503 = vmatprep.mubr.bf16.mxu1 %v5471_v44  ;;  %6351 = vmatmul.mubr.bf16.gmra.mrb[24].mxu0 %v5471_v44  ;;  %v9624_v55 = vld [vmem:[#allocation8 + $0x1e8] sm:$0xff]  }
 0x679   : > { %v5241_v40 = vmax.f32 %v5145_v30, 0.0  ;;  %v5148_v51 = vadd.f32 %v9230_v41, %v11718_v7  ;;  %v5139_v19 = vpop.f32.mrb[59].mxu1  ;;  %6504 = vmatmul.mubr.bf16.vlgmr.msra.gmra.mrb[80].mxu1 %v5423_v32  ;;  %6358 = vmatprep.mubr.bf16.mxu0 %v5377_v28  ;;  %v9622_v41 = vld [vmem:[#allocation8 + $0x1e0] sm:$0xff]  }
 0x67a   : > { %v5239_v61 = vmax.f32 %v5137_v26, 0.0  ;;  %v5140_v34 = vadd.f32 %v5139_v19, %v11712_v24  ;;  %6511 = vmatprep.mubr.bf16.mxu1 %v11795_v42  ;;  %8970 = vmatpush3.bf16.msra.mxu1 %v9607_v29  ;;  %v9615_v24 = vld [vmem:[#allocation8 + $0x190] sm:$0xff]   ;;  %v9619_v26 = vld [vmem:[#allocation8 + $0x198] sm:$0xff]  }
 0x67b   : > { %5273 = vst [vmem:[#allocation2 + $0x91] sm:$0xff] %v5241_v40  ;;  %v5242_v36 = vmax.f32 %v5148_v51, 0.0  ;;  %8971 = vmatprep.subr.bf16.mxu1 %v9610_v18  ;;  %v5443_v32 = vld [vmem:[#allocation2 + $0x48] sm:$0xff]  ;;  %v5395_v51 = vld [vmem:[#allocation2 + $0x32] sm:$0xff]  ;;  %v5396_v19 = vld [vmem:[#allocation2 + $0x3a] sm:$0xff] }
 0x67c   : > { %5271 = vst [vmem:[#allocation2 + $0x79] sm:$0xff] %v5239_v61  ;;  %v5240_v52 = vmax.f32 %v5140_v34, 0.0 }
 0x67d   : > { %5274 = vst [vmem:[#allocation2 + $0x99] sm:$0xff] %v5242_v36  ;;  %v5444_v7 = vld [vmem:[#allocation2 + $0x50] sm:$0xff]  ;;  %v11800_v63 = vpack.c.bf16 %v5242_v36, %v5241_v40 }
 0x67e   : > { %5272 = vst [vmem:[#allocation2 + $0x81] sm:$0xff] %v5240_v52  ;;  %v9233_v28 = vpop.f32.mrb[60].mxu1  ;;  %v11802_v35 = vpack.c.bf16 %v5240_v52, %v5239_v61  ;;  %8972 = vmatpush3.bf16.msra.mxu1 %v9611_v17  ;;  %v11809_v29 = vpack.c.bf16 %v5444_v7, %v5443_v32  ;;  %v5445_v52 = vld [vmem:[#allocation2 + $0x60] sm:$0xff] }
 0x67f   : > { %v5161_v62 = vadd.f32 %v9233_v28, %v11728_v58  ;;  %v5152_v4 = vpop.f32.mrb[61].mxu1  ;;  %8973 = vmatprep.subr.bf16.mxu1 %v9614_v12  ;;  %v11820_v12 = vpack.c.bf16 %v5396_v19, %v5395_v51 }
 0x680   : > { %v5153_v22 = vadd.f32 %v5152_v4, %v11722_v49  ;;  %v9234_v44 = vpop.f32.mrb[62].mxu1  ;;  %6359 = vmatmul.mubr.bf16.gmra.mrb[28].mxu0 %v11795_v42 }
 0x681   : > { %v5245_v30 = vmax.f32 %v5161_v62, 0.0  ;;  %v5164_v15 = vadd.f32 %v9234_v44, %v11730_v16  ;;  %v5155_v1 = vpop.f32.mrb[63].mxu1  ;;  %6512 = vmatmul.mubr.bf16.gmra.mrb[84].mxu1 %v11805_v25  ;;  %6366 = vmatprep.mubr.bf16.mxu0 %v5378_v45  ;;  %v5446_v16 = vld [vmem:[#allocation2 + $0x68] sm:$0xff] }
 0x682   : > { %v5243_v58 = vmax.f32 %v5153_v22, 0.0  ;;  %v5156_v18 = vadd.f32 %v5155_v1, %v11724_v39  ;;  %6519 = vmatprep.mubr.bf16.mxu1 %v11809_v29  ;;  %8974 = vmatpush3.bf16.msra.mxu1 %v9615_v24  ;;  %v9623_v39 = vld [vmem:[#allocation8 + $0x1a0] sm:$0xff]   ;;  %v11824_v28 = vpack.c.bf16 %v5446_v16, %v5445_v52  ;;  %v9627_v22 = vld [vmem:[#allocation8 + $0x1f0] sm:$0xff]  }
 0x683   : > { %5277 = vst [vmem:[#allocation2 + $0xc1] sm:$0xff] %v5245_v30  ;;  %v5246_v49 = vmax.f32 %v5164_v15, 0.0  ;;  %8975 = vmatprep.subr.bf16.mxu1 %v9618_v47 }
 0x684   : > { %5275 = vst [vmem:[#allocation2 + $0xa9] sm:$0xff] %v5243_v58  ;;  %v5244_v40 = vmax.f32 %v5156_v18, 0.0 }
 0x685   : > { %5278 = vst [vmem:[#allocation2 + $0xc9] sm:$0xff] %v5246_v49  ;;  %v11815_v61 = vpack.c.bf16 %v5246_v49, %v5245_v30  ;;  %v5397_v30 = vld [vmem:[#allocation2 + $0x4a] sm:$0xff]  ;;  %v5448_v15 = vld [vmem:[#allocation2 + $0x80] sm:$0xff] }
 0x686   : > { %5276 = vst [vmem:[#allocation2 + $0xb1] sm:$0xff] %v5244_v40  ;;  %v9237_v45 = vpop.f32.mrb[64].mxu1  ;;  %v11817_v34 = vpack.c.bf16 %v5244_v40, %v5243_v58  ;;  %8976 = vmatpush3.bf16.msra.mxu1 %v9619_v26  ;;  %v9629_v40 = vld [vmem:[#allocation8 + $0x1f8] sm:$0xff]  }
 0x687   : > { %v5177_v17 = vadd.f32 %v9237_v45, %v11740_v56  ;;  %v5168_v36 = vpop.f32.mrb[65].mxu1  ;;  %8977 = vmatprep.subr.bf16.mxu1 %v9622_v41  ;;  %v5447_v41 = vld [vmem:[#allocation2 + $0x78] sm:$0xff] }
 0x688   : > { %v5169_v59 = vadd.f32 %v5168_v36, %v11734_v20  ;;  %v9238_v7 = vpop.f32.mrb[66].mxu1  ;;  %6367 = vmatmul.mubr.bf16.gmra.mrb[32].mxu0 %v11809_v29  ;;  %v9625_v20 = vld [vmem:[#allocation8 + $0x1a8] sm:$0xff]   ;;  %v11840_v16 = vpack.c.bf16 %v5448_v15, %v5447_v41 }
 0x689   : > { %v5249_v24 = vmax.f32 %v5177_v17, 0.0  ;;  %v5180_v62 = vadd.f32 %v9238_v7, %v11742_v54  ;;  %v5171_v4 = vpop.f32.mrb[67].mxu1  ;;  %6520 = vmatmul.mubr.bf16.gmra.mrb[88].mxu1 %v11820_v12  ;;  %6374 = vmatprep.mubr.bf16.mxu0 %v11791_v21  ;;  %v5398_v54 = vld [vmem:[#allocation2 + $0x52] sm:$0xff]  ;;  %v5400_v7 = vld [vmem:[#allocation2 + $0x6a] sm:$0xff] }
 0x68a   : > { %v5247_v56 = vmax.f32 %v5169_v59, 0.0  ;;  %v5172_v32 = vadd.f32 %v5171_v4, %v11736_v8  ;;  %6527 = vmatprep.mubr.bf16.mxu1 %v11824_v28  ;;  %8978 = vmatpush3.bf16.msra.mxu1 %v9623_v39  ;;  %v9628_v8 = vld [vmem:[#allocation8 + $0x1b0] sm:$0xff]   ;;  %v11836_v49 = vpack.c.bf16 %v5398_v54, %v5397_v30 }
 0x68b   : > { %5281 = vst [vmem:[#allocation2 + $0xf1] sm:$0xff] %v5249_v24  ;;  %v5250_v47 = vmax.f32 %v5180_v62, 0.0  ;;  %8979 = vmatprep.subr.bf16.mxu1 %v9624_v55  ;;  %v5399_v59 = vld [vmem:[#allocation2 + $0x62] sm:$0xff] }
 0x68c   : > { %5279 = vst [vmem:[#allocation2 + $0xd9] sm:$0xff] %v5247_v56  ;;  %v5248_v44 = vmax.f32 %v5172_v32, 0.0  ;;  %v5449_v32 = vld [vmem:[#allocation2 + $0x90] sm:$0xff] }
 0x68d   : > { %5282 = vst [vmem:[#allocation2 + $0xf9] sm:$0xff] %v5250_v47  ;;  %v11831_v1 = vpack.c.bf16 %v5250_v47, %v5249_v24 }
 0x68e   : > { %5280 = vst [vmem:[#allocation2 + $0xe1] sm:$0xff] %v5248_v44  ;;  %v9241_v21 = vpop.f32.mrb[68].mxu1  ;;  %v11833_v58 = vpack.c.bf16 %v5248_v44, %v5247_v56  ;;  %8980 = vmatpush3.bf16.msra.mxu1 %v9625_v20  ;;  %v11852_v56 = vpack.c.bf16 %v5400_v7, %v5399_v59  ;;  %v5403_v59 = vld [vmem:[#allocation2 + $0x92] sm:$0xff]  ;;  %v5404_v7 = vld [vmem:[#allocation2 + $0x9a] sm:$0xff] }
 0x68f   : > { %v5193_v18 = vadd.f32 %v9241_v21, %v11752_v2  ;;  %v5184_v26 = vpop.f32.mrb[69].mxu1  ;;  %8981 = vmatprep.subr.bf16.mxu1 %v9627_v22 }
 0x690   : > { %v5185_v51 = vadd.f32 %v5184_v26, %v11746_v37  ;;  %v9242_v19 = vpop.f32.mrb[70].mxu1  ;;  %6375 = vmatmul.mubr.bf16.gmra.mrb[36].mxu0 %v11824_v28  ;;  %v9630_v37 = vld [vmem:[#allocation8 + $0x1b8] sm:$0xff]   ;;  %v5452_v26 = vld [vmem:[#allocation2 + $0xb0] sm:$0xff] }
 0x691   : > { %v5253_v45 = vmax.f32 %v5193_v18, 0.0  ;;  %v5196_v39 = vadd.f32 %v9242_v19, %v11754_v43  ;;  %v5187_v17 = vpop.f32.mrb[71].mxu1  ;;  %6528 = vmatmul.mubr.bf16.gmra.mrb[92].mxu1 %v11836_v49  ;;  %6382 = vmatprep.mubr.bf16.mxu0 %v11802_v35  ;;  %v5450_v43 = vld [vmem:[#allocation2 + $0x98] sm:$0xff]  ;;  %v5402_v18 = vld [vmem:[#allocation2 + $0x82] sm:$0xff] }
 0x692   : > { %v5251_v2 = vmax.f32 %v5185_v51, 0.0  ;;  %v5188_v36 = vadd.f32 %v5187_v17, %v11748_v31  ;;  %6535 = vmatprep.mubr.bf16.mxu1 %v11840_v16  ;;  %8982 = vmatpush3.bf16.msra.mxu1 %v9628_v8  ;;  %v11856_v22 = vpack.c.bf16 %v5450_v43, %v5449_v32  ;;  %v5401_v8 = vld [vmem:[#allocation2 + $0x7a] sm:$0xff]  ;;  %v5451_v19 = vld [vmem:[#allocation2 + $0xa8] sm:$0xff] }
 0x693   : > { %5285 = vst [vmem:[#allocation2 + $0x121] sm:$0xff] %v5253_v45  ;;  %v5254_v52 = vmax.f32 %v5196_v39, 0.0  ;;  %8983 = vmatprep.subr.bf16.mxu1 %v9629_v40  ;;  %v11872_v17 = vpack.c.bf16 %v5452_v26, %v5451_v19  ;;  %v5454_v43 = vld [vmem:[#allocation2 + $0xc8] sm:$0xff] }
 0x694   : > { %5283 = vst [vmem:[#allocation2 + $0x109] sm:$0xff] %v5251_v2  ;;  %v5252_v55 = vmax.f32 %v5188_v36, 0.0 }
 0x695   : > { %5286 = vst [vmem:[#allocation2 + $0x129] sm:$0xff] %v5254_v52  ;;  %v11847_v24 = vpack.c.bf16 %v5254_v52, %v5253_v45  ;;  %v5456_v32 = vld [vmem:[#allocation2 + $0xe0] sm:$0xff] }
 0x696   : > { %5284 = vst [vmem:[#allocation2 + $0x111] sm:$0xff] %v5252_v55  ;;  %v9245_v35 = vpop.f32.mrb[72].mxu1  ;;  %v11849_v62 = vpack.c.bf16 %v5252_v55, %v5251_v2  ;;  %8984 = vmatpush3.bf16.msra.mxu1 %v9630_v37 }
 0x697   : > { %v5209_v31 = vadd.f32 %v9245_v35, %v11764_v27  ;;  %v5200_v4 = vpop.f32.mrb[73].mxu1  ;;  %v11881_v35 = vpack.c.bf16 %v5404_v7, %v5403_v59 }
 0x698   : > { %v5201_v20 = vadd.f32 %v5200_v4, %v11758_v48  ;;  %v9246_v47 = vpop.f32.mrb[74].mxu1  ;;  %6383 = vmatmul.mubr.bf16.gmra.mrb[40].mxu0 %v11840_v16  ;;  %v5406_v4 = vld [vmem:[#allocation2 + $0xb2] sm:$0xff] }
 0x699   : > { %v5257_v44 = vmax.f32 %v5209_v31, 0.0  ;;  %v5212_v30 = vadd.f32 %v9246_v47, %v11766_v0  ;;  %v5203_v54 = vpop.f32.mrb[75].mxu1  ;;  %6536 = vmatmul.mubr.bf16.gmra.mrb[96].mxu1 %v11852_v56  ;;  %6390 = vmatprep.mubr.bf16.mxu0 %v11800_v63  ;;  %v5453_v31 = vld [vmem:[#allocation2 + $0xc0] sm:$0xff]  ;;  %v5455_v47 = vld [vmem:[#allocation2 + $0xd8] sm:$0xff] }
 0x69a   : > { %v5255_v27 = vmax.f32 %v5201_v20, 0.0  ;;  %v5204_v15 = vadd.f32 %v5203_v54, %v11760_v5  ;;  %6543 = vmatprep.mubr.bf16.mxu1 %v11856_v22  ;;  %v11868_v5 = vpack.c.bf16 %v5402_v18, %v5401_v8  ;;  %v5458_v54 = vld [vmem:[#allocation2 + $0xf8] sm:$0xff] }
 0x69b   : > { %5289 = vst [vmem:[#allocation2 + $0x151] sm:$0xff] %v5257_v44  ;;  %v5258_v48 = vmax.f32 %v5212_v30, 0.0  ;;  %v5407_v30 = vld [vmem:[#allocation2 + $0xc2] sm:$0xff] }
 0x69c   : > { %5287 = vst [vmem:[#allocation2 + $0x139] sm:$0xff] %v5255_v27  ;;  %v5256_v21 = vmax.f32 %v5204_v15, 0.0  ;;  %v5457_v15 = vld [vmem:[#allocation2 + $0xf0] sm:$0xff]  ;;  %v5459_v26 = vld [vmem:[#allocation2 + $0x108] sm:$0xff] }
 0x69d   : > { %5290 = vst [vmem:[#allocation2 + $0x159] sm:$0xff] %v5258_v48  ;;  %v11863_v41 = vpack.c.bf16 %v5258_v48, %v5257_v44  ;;  %v11892_v44 = vpack.c.bf16 %v5456_v32, %v5455_v47  ;;  %v11900_v48 = vpack.c.bf16 %v5458_v54, %v5457_v15  ;;  %v5460_v8 = vld [vmem:[#allocation2 + $0x110] sm:$0xff] }
 0x69e   : > { %5288 = vst [vmem:[#allocation2 + $0x141] sm:$0xff] %v5256_v21  ;;  %v9249_v0 = vpop.f32.mrb[76].mxu1  ;;  %v11865_v40 = vpack.c.bf16 %v5256_v21, %v5255_v27  ;;  %v5409_v21 = vld [vmem:[#allocation2 + $0xda] sm:$0xff] }
 0x69f   : > { %v5225_v63 = vadd.f32 %v9249_v0, %v11776_v13  ;;  %v5216_v51 = vpop.f32.mrb[77].mxu1  ;;  %v11908_v0 = vpack.c.bf16 %v5460_v8, %v5459_v26 }
 0x6a0   : > { %v5217_v45 = vadd.f32 %v5216_v51, %v11770_v46  ;;  %v9250_v39 = vpop.f32.mrb[78].mxu1  ;;  %6391 = vmatmul.mubr.bf16.gmra.mrb[44].mxu0 %v11856_v22  ;;  %v5462_v51 = vld [vmem:[#allocation2 + $0x128] sm:$0xff] }
 0x6a1   : > { %v5261_v2 = vmax.f32 %v5225_v63, 0.0  ;;  %v5228_v36 = vadd.f32 %v9250_v39, %v11779_v53  ;;  %v5219_v37 = vpop.f32.mrb[79].mxu1  ;;  %6544 = vmatmul.mubr.bf16.gmra.mrb[100].mxu1 %v11868_v5  ;;  %6398 = vmatprep.mubr.bf16.mxu0 %v11817_v34  ;;  %v11884_v34 = vpack.c.bf16 %v5454_v43, %v5453_v31  ;;  %v5411_v63 = vld [vmem:[#allocation2 + $0xf2] sm:$0xff] }
 0x6a2   : > { %v5259_v13 = vmax.f32 %v5217_v45, 0.0  ;;  %v5220_v52 = vadd.f32 %v5219_v37, %v11772_v11  ;;  %6551 = vmatprep.mubr.bf16.mxu1 %v11872_v17  ;;  %v5405_v11 = vld [vmem:[#allocation2 + $0xaa] sm:$0xff]  ;;  %v5461_v45 = vld [vmem:[#allocation2 + $0x120] sm:$0xff] }
 0x6a3   : > { %5293 = vst [vmem:[#allocation2 + $0x181] sm:$0xff] %v5261_v2  ;;  %v5262_v46 = vmax.f32 %v5228_v36, 0.0  ;;  %v11889_v20 = vpack.c.bf16 %v5406_v4, %v5405_v11  ;;  %v11916_v39 = vpack.c.bf16 %v5462_v51, %v5461_v45  ;;  %v5463_v43 = vld [vmem:[#allocation2 + $0x138] sm:$0xff]  ;;  %v5416_v11 = vld [vmem:[#allocation2 + $0x12a] sm:$0xff]  ;;  %v5488_v45 = vld [vmem:[#allocation2 + $0x21] sm:$0xff] }
 0x6a4   : > { %5291 = vst [vmem:[#allocation2 + $0x169] sm:$0xff] %v5259_v13  ;;  %v5260_v55 = vmax.f32 %v5220_v52, 0.0  ;;  %v5413_v52 = vld [vmem:[#allocation2 + $0x10a] sm:$0xff]  ;;  %v5466_v4 = vld [vmem:[#allocation2 + $0x158] sm:$0xff] }
 0x6a5   : > { %5294 = vst [vmem:[#allocation2 + $0x189] sm:$0xff] %v5262_v46  ;;  %v5414_v46 = vld [vmem:[#allocation2 + $0x112] sm:$0xff]  ;;  %v5464_v59 = vld [vmem:[#allocation2 + $0x140] sm:$0xff] }
 0x6a6   : > { %5292 = vst [vmem:[#allocation2 + $0x171] sm:$0xff] %v5260_v55  ;;  %v11879_v53 = vpack.c.bf16 %v5260_v55, %v5259_v13  ;;  %v11925_v7 = vpack.c.bf16 %v5414_v46, %v5413_v52  ;;  %v11928_v31 = vpack.c.bf16 %v5464_v59, %v5463_v43  ;;  %v5465_v47 = vld [vmem:[#allocation2 + $0x150] sm:$0xff]  ;;  %v9631_v59 = vld [vmem:[#allocation8 + $0x208] sm:$0xff]  }
 0x6a7   : > { %v5419_v8 = vld [vmem:[#allocation2 + $0x152] sm:$0xff] }
 0x6a8   : > { %6399 = vmatmul.mubr.bf16.gmra.mrb[48].mxu0 %v11872_v17  ;;  %v5631_v46 = vld [vmem:[#allocation2 + $0x31] sm:$0xff] }
 0x6a9   : > { %6552 = vmatmul.mubr.bf16.gmra.mrb[104].mxu1 %v11881_v35  ;;  %6406 = vmatprep.mubr.bf16.mxu0 %v11815_v61  ;;  %v5408_v61 = vld [vmem:[#allocation2 + $0xca] sm:$0xff] }
 0x6aa   : > { %6559 = vmatprep.mubr.bf16.mxu1 %v11884_v34  ;;  %v11897_v27 = vpack.c.bf16 %v5408_v61, %v5407_v30  ;;  %v11936_v30 = vpack.c.bf16 %v5466_v4, %v5465_v47  ;;  %v5417_v61 = vld [vmem:[#allocation2 + $0x13a] sm:$0xff]  ;;  %v9633_v4 = vld [vmem:[#allocation8 + $0x218] sm:$0xff]  }
 0x6ac   : > { %v5470_v26 = vld [vmem:[#allocation2 + $0x188] sm:$0xff] }
 0x6ad   : > { %v5468_v54 = vld [vmem:[#allocation2 + $0x170] sm:$0xff] }
 0x6b0   : > { %6407 = vmatmul.mubr.bf16.gmra.mrb[52].mxu0 %v11884_v34 }
 0x6b1   : > { %6560 = vmatmul.mubr.bf16.gmra.mrb[108].mxu1 %v11889_v20  ;;  %6414 = vmatprep.mubr.bf16.mxu0 %v11833_v58  ;;  %v5410_v58 = vld [vmem:[#allocation2 + $0xe2] sm:$0xff] }
 0x6b2   : > { %6567 = vmatprep.mubr.bf16.mxu1 %v11892_v44  ;;  %v11905_v18 = vpack.c.bf16 %v5410_v58, %v5409_v21  ;;  %v5467_v21 = vld [vmem:[#allocation2 + $0x168] sm:$0xff] }
 0x6b3   : > { %v11944_v58 = vpack.c.bf16 %v5468_v54, %v5467_v21  ;;  %v5637_v21 = vld [vmem:[#allocation2 + $0x79] sm:$0xff] }
 0x6b8   : > { %6415 = vmatmul.mubr.bf16.gmra.mrb[56].mxu0 %v11892_v44 }
 0x6b9   : > { %6568 = vmatmul.mubr.bf16.gmra.mrb[112].mxu1 %v11897_v27  ;;  %6422 = vmatprep.mubr.bf16.mxu0 %v11831_v1  ;;  %v5412_v1 = vld [vmem:[#allocation2 + $0xfa] sm:$0xff] }
 0x6ba   : > { %6575 = vmatprep.mubr.bf16.mxu1 %v11900_v48  ;;  %v11913_v19 = vpack.c.bf16 %v5412_v1, %v5411_v63  ;;  %v5469_v1 = vld [vmem:[#allocation2 + $0x180] sm:$0xff] }
 0x6bb   : > { %v11952_v51 = vpack.c.bf16 %v5470_v26, %v5469_v1  ;;  %v5642_v1 = vld [vmem:[#allocation2 + $0xb1] sm:$0xff] }
 0x6c0   : > { %6423 = vmatmul.mubr.bf16.gmra.mrb[60].mxu0 %v11900_v48 }
 0x6c1   : > { %6576 = vmatmul.mubr.bf16.gmra.mrb[116].mxu1 %v11905_v18  ;;  %6430 = vmatprep.mubr.bf16.mxu0 %v11849_v62 }
 0x6c2   : > { %6583 = vmatprep.mubr.bf16.mxu1 %v11908_v0  ;;  %v8649_v2 = vpop.f32.mrb[20].mxu0 }
 0x6c3   : > { %v8650_v36 = vpop.f32.mrb[21].mxu0 }
 0x6c4   : > { %v11921_v62 = vadd.f32 %v8650_v36, %v8649_v2  ;;  %v8652_v37 = vpop.f32.mrb[22].mxu0  ;;  %v5422_v2 = vld [vmem:[#allocation2 + $0x172] sm:$0xff] }
 0x6c5   : > { %v8653_v13 = vpop.f32.mrb[23].mxu0  ;;  %v5487_v36 = vld [vmem:[#allocation2 + $0x19] sm:$0xff] }
 0x6c6   : > { %v11923_v55 = vadd.f32 %v8653_v13, %v8652_v37  ;;  %v5632_v37 = vld [vmem:[#allocation2 + $0x39] sm:$0xff]  ;;  %v5519_v13 = vpack.c.bf16 %v5488_v45, %v5487_v36  ;;  %v5641_v45 = vld [vmem:[#allocation2 + $0xa9] sm:$0xff] }
 0x6c7   : > { %v5663_v43 = vpack.c.bf16 %v5632_v37, %v5631_v46 }
 0x6c8   : > { %6431 = vmatmul.mubr.bf16.gmra.mrb[64].mxu0 %v11908_v0 }
 0x6c9   : > { %6584 = vmatmul.mubr.bf16.gmra.mrb[120].mxu1 %v11913_v19  ;;  %6438 = vmatprep.mubr.bf16.mxu0 %v11847_v24  ;;  %v5415_v24 = vld [vmem:[#allocation2 + $0x122] sm:$0xff] }
 0x6ca   : > { %6591 = vmatprep.mubr.bf16.mxu1 %v11916_v39  ;;  %v11933_v32 = vpack.c.bf16 %v5416_v11, %v5415_v24  ;;  %v5634_v24 = vld [vmem:[#allocation2 + $0x51] sm:$0xff]  ;;  %v5633_v11 = vld [vmem:[#allocation2 + $0x49] sm:$0xff] }
 0x6cb   : > { %v5664_v47 = vpack.c.bf16 %v5634_v24, %v5633_v11  ;;  %v5656_v11 = vld [vmem:[#allocation2 + $0x159] sm:$0xff] }
 0x6d0   : > { %6439 = vmatmul.mubr.bf16.gmra.mrb[68].mxu0 %v11916_v39 }
 0x6d1   : > { %6592 = vmatmul.mubr.bf16.gmra.mrb[124].mxu1 %v11925_v7  ;;  %6446 = vmatprep.mubr.bf16.mxu0 %v11865_v40  ;;  %v5418_v40 = vld [vmem:[#allocation2 + $0x142] sm:$0xff] }
 0x6d2   : > { %6599 = vmatprep.mubr.bf16.mxu1 %v11928_v31  ;;  %v11941_v15 = vpack.c.bf16 %v5418_v40, %v5417_v61  ;;  %v5636_v61 = vld [vmem:[#allocation2 + $0x69] sm:$0xff]  ;;  %v9635_v40 = vld [vmem:[#allocation8 + $0x228] sm:$0xff]  }
 0x6d8   : > { %6447 = vmatmul.mubr.bf16.gmra.mrb[72].mxu0 %v11928_v31 }
 0x6d9   : > { %6600 = vmatmul.mubr.bf16.gmra.mrb[128].mxu1 %v11933_v32  ;;  %6454 = vmatprep.mubr.bf16.mxu0 %v11863_v41  ;;  %v5420_v41 = vld [vmem:[#allocation2 + $0x15a] sm:$0xff] }
 0x6da   : > { %6607 = vmatprep.mubr.bf16.mxu1 %v11936_v30  ;;  %v11949_v63 = vpack.c.bf16 %v5420_v41, %v5419_v8  ;;  %v9637_v8 = vld [vmem:[#allocation8 + $0x238] sm:$0xff]  }
 0x6e0   : > { %6455 = vmatmul.mubr.bf16.gmra.mrb[76].mxu0 %v11936_v30 }
 0x6e1   : > { %6608 = vmatmul.mubr.bf16.gmra.mrb[132].mxu1 %v11941_v15  ;;  %6462 = vmatprep.mubr.bf16.mxu0 %v11879_v53  ;;  %v5421_v53 = vld [vmem:[#allocation2 + $0x16a] sm:$0xff] }
 0x6e2   : > { %6615 = vmatprep.mubr.bf16.mxu1 %v11944_v58  ;;  %v11957_v52 = vpack.c.bf16 %v5422_v2, %v5421_v53  ;;  %v5668_v53 = vpack.c.bf16 %v5642_v1, %v5641_v45  ;;  %v5658_v1 = vld [vmem:[#allocation2 + $0x171] sm:$0xff] }
 0x6e8   : > { %6463 = vmatmul.mubr.bf16.gmra.mrb[80].mxu0 %v11944_v58 }
 0x6e9   : > { %6616 = vmatmul.mubr.bf16.gmra.mrb[136].mxu1 %v11949_v63  ;;  %6664 = vmatprep.mubr.bf16.mxu0 %v11805_v25  ;;  %v9632_v25 = vld [vmem:[#allocation8 + $0x210] sm:$0xff]  }
 0x6ea   : > { %6623 = vmatprep.mubr.bf16.mxu1 %v11952_v51 }
 0x6f0   : > { %6665 = vmatmul.mubr.bf16.vlgmr.msra.gmra.mrb[84].mxu0 %v5519_v13 }
 0x6f1   : > { %6624 = vmatmul.mubr.bf16.gmra.mrb[140].mxu1 %v11957_v52  ;;  %9252 = vmatpush3.bf16.msra.mxu0 %v11784_v3  ;;  %v9634_v3 = vld [vmem:[#allocation8 + $0x220] sm:$0xff]  }
 0x6f2   : > { %6672 = vmatprep.mubr.bf16.mxu0 %v11820_v12  ;;  %6825 = vmatprep.mubr.bf16.mxu1 %v5663_v43  ;;  %v5635_v12 = vld [vmem:[#allocation2 + $0x61] sm:$0xff] }
 0x6f3   : > { %9253 = vmatprep.subr.bf16.mxu0 %v9631_v59  ;;  %v5665_v54 = vpack.c.bf16 %v5636_v61, %v5635_v12  ;;  %v5655_v12 = vld [vmem:[#allocation2 + $0x151] sm:$0xff] }
 0x6f5   : > { %9254 = vmatpush3.bf16.msra.mxu0 %v9631_v59 }
 0x6f6   : > { %9255 = vmatprep.subr.bf16.mxu0 %v9632_v25 }
 0x6f8   : > { %6673 = vmatmul.mubr.bf16.gmra.mrb[88].mxu0 %v5663_v43 }
 0x6f9   : > { %6826 = vmatmul.mubr.bf16.vlgmr.msra.gmra.mrb[144].mxu1 %v11795_v42  ;;  %6680 = vmatprep.mubr.bf16.mxu0 %v11836_v49  ;;  %v9636_v42 = vld [vmem:[#allocation8 + $0x230] sm:$0xff]  }
 0x6fa   : > { %6833 = vmatprep.mubr.bf16.mxu1 %v5664_v47  ;;  %9256 = vmatpush3.bf16.msra.mxu0 %v9632_v25  ;;  %v5638_v49 = vld [vmem:[#allocation2 + $0x81] sm:$0xff] }
 0x6fb   : > { %9257 = vmatprep.subr.bf16.mxu0 %v9633_v4  ;;  %v5666_v41 = vpack.c.bf16 %v5638_v49, %v5637_v21  ;;  %v5675_v49 = vpack.c.bf16 %v5656_v11, %v5655_v12 }
 0x6fe   : > { %9258 = vmatpush3.bf16.msra.mxu0 %v9633_v4 }
 0x6ff   : > { %9259 = vmatprep.subr.bf16.mxu0 %v9634_v3 }
 0x700   : > { %6681 = vmatmul.mubr.bf16.gmra.mrb[92].mxu0 %v5664_v47 }
 0x701   : > { %6834 = vmatmul.mubr.bf16.gmra.mrb[148].mxu1 %v11809_v29  ;;  %6688 = vmatprep.mubr.bf16.mxu0 %v11852_v56  ;;  %v5640_v29 = vld [vmem:[#allocation2 + $0x99] sm:$0xff]  ;;  %v5639_v56 = vld [vmem:[#allocation2 + $0x91] sm:$0xff] }
 0x702   : > { %6841 = vmatprep.mubr.bf16.mxu1 %v5665_v54  ;;  %9260 = vmatpush3.bf16.msra.mxu0 %v9634_v3  ;;  %v5667_v26 = vpack.c.bf16 %v5640_v29, %v5639_v56 }
 0x703   : > { %9261 = vmatprep.subr.bf16.mxu0 %v9635_v40 }
 0x706   : > { %9262 = vmatpush3.bf16.msra.mxu0 %v9635_v40 }
 0x707   : > { %9263 = vmatprep.subr.bf16.mxu0 %v9636_v42 }
 0x708   : > { %6689 = vmatmul.mubr.bf16.gmra.mrb[96].mxu0 %v5665_v54 }
 0x709   : > { %6842 = vmatmul.mubr.bf16.gmra.mrb[152].mxu1 %v11824_v28  ;;  %6696 = vmatprep.mubr.bf16.mxu0 %v11868_v5  ;;  %v5644_v28 = vld [vmem:[#allocation2 + $0xc9] sm:$0xff]  ;;  %v5643_v5 = vld [vmem:[#allocation2 + $0xc1] sm:$0xff] }
 0x70a   : > { %6849 = vmatprep.mubr.bf16.mxu1 %v5666_v41  ;;  %9264 = vmatpush3.bf16.msra.mxu0 %v9636_v42  ;;  %v5669_v2 = vpack.c.bf16 %v5644_v28, %v5643_v5 }
 0x70b   : > { %9265 = vmatprep.subr.bf16.mxu0 %v9637_v8 }
 0x70e   : > { %9266 = vmatpush3.bf16.msra.mxu0 %v9637_v8 }
 0x710   : > { %6697 = vmatmul.mubr.bf16.gmra.mrb[100].mxu0 %v5666_v41 }
 0x711   : > { %6850 = vmatmul.mubr.bf16.gmra.mrb[156].mxu1 %v11840_v16  ;;  %6704 = vmatprep.mubr.bf16.mxu0 %v11881_v35  ;;  %v5646_v16 = vld [vmem:[#allocation2 + $0xe1] sm:$0xff]  ;;  %v5645_v35 = vld [vmem:[#allocation2 + $0xd9] sm:$0xff] }
 0x712   : > { %6857 = vmatprep.mubr.bf16.mxu1 %v5667_v26  ;;  %v5670_v36 = vpack.c.bf16 %v5646_v16, %v5645_v35 }
 0x718   : > { %6705 = vmatmul.mubr.bf16.gmra.mrb[104].mxu0 %v5667_v26 }
 0x719   : > { %6858 = vmatmul.mubr.bf16.gmra.mrb[160].mxu1 %v11856_v22  ;;  %6712 = vmatprep.mubr.bf16.mxu0 %v11889_v20  ;;  %v5648_v22 = vld [vmem:[#allocation2 + $0xf9] sm:$0xff]  ;;  %v5647_v20 = vld [vmem:[#allocation2 + $0xf1] sm:$0xff] }
 0x71a   : > { %6865 = vmatprep.mubr.bf16.mxu1 %v5668_v53  ;;  %v5671_v37 = vpack.c.bf16 %v5648_v22, %v5647_v20 }
 0x720   : > { %6713 = vmatmul.mubr.bf16.gmra.mrb[108].mxu0 %v5668_v53 }
 0x721   : > { %6866 = vmatmul.mubr.bf16.gmra.mrb[164].mxu1 %v11872_v17  ;;  %6720 = vmatprep.mubr.bf16.mxu0 %v11897_v27  ;;  %v5650_v17 = vld [vmem:[#allocation2 + $0x111] sm:$0xff]  ;;  %v5649_v27 = vld [vmem:[#allocation2 + $0x109] sm:$0xff] }
 0x722   : > { %6873 = vmatprep.mubr.bf16.mxu1 %v5669_v2  ;;  %v5672_v13 = vpack.c.bf16 %v5650_v17, %v5649_v27  ;;  %v5565_v27 = vld [vmem:[#allocation2 + $0x182] sm:$0xff] }
 0x728   : > { %6721 = vmatmul.mubr.bf16.gmra.mrb[112].mxu0 %v5669_v2 }
 0x729   : > { %6874 = vmatmul.mubr.bf16.gmra.mrb[168].mxu1 %v11884_v34  ;;  %6728 = vmatprep.mubr.bf16.mxu0 %v11905_v18  ;;  %v5652_v34 = vld [vmem:[#allocation2 + $0x129] sm:$0xff]  ;;  %v5651_v18 = vld [vmem:[#allocation2 + $0x121] sm:$0xff] }
 0x72a   : > { %6881 = vmatprep.mubr.bf16.mxu1 %v5670_v36  ;;  %v5673_v46 = vpack.c.bf16 %v5652_v34, %v5651_v18 }
 0x730   : > { %6729 = vmatmul.mubr.bf16.gmra.mrb[116].mxu0 %v5670_v36 }
 0x731   : > { %6882 = vmatmul.mubr.bf16.gmra.mrb[172].mxu1 %v11892_v44  ;;  %6736 = vmatprep.mubr.bf16.mxu0 %v11913_v19  ;;  %v5654_v44 = vld [vmem:[#allocation2 + $0x141] sm:$0xff]  ;;  %v5653_v19 = vld [vmem:[#allocation2 + $0x139] sm:$0xff] }
 0x732   : > { %6889 = vmatprep.mubr.bf16.mxu1 %v5671_v37  ;;  %v5674_v59 = vpack.c.bf16 %v5654_v44, %v5653_v19  ;;  %v5660_v44 = vld [vmem:[#allocation2 + $0x189] sm:$0xff] }
 0x738   : > { %6737 = vmatmul.mubr.bf16.gmra.mrb[120].mxu0 %v5671_v37 }
 0x739   : > { %6890 = vmatmul.mubr.bf16.gmra.mrb[176].mxu1 %v11900_v48  ;;  %6744 = vmatprep.mubr.bf16.mxu0 %v11925_v7  ;;  %v11987_v48 = vld [vmem:[%s12355_s9] ss:$0 sm:$0xff] }
 0x73a   : > { %6897 = vmatprep.mubr.bf16.mxu1 %v5672_v13  ;;  %v6345_v4 = vadd.f32 %v11921_v62, %v11987_v48  ;;  %v6348_v40 = vadd.f32 %v11923_v55, %v11987_v48 }
 0x740   : > { %6745 = vmatmul.mubr.bf16.gmra.mrb[124].mxu0 %v5672_v13  ;;  %v5566_v13 = vld [vmem:[#allocation2 + $0x18a] sm:$0xff] }
 0x741   : > { %6898 = vmatmul.mubr.bf16.gmra.mrb[180].mxu1 %v11908_v0  ;;  %6752 = vmatprep.mubr.bf16.mxu0 %v11933_v32 }
 0x742   : > { %6905 = vmatprep.mubr.bf16.mxu1 %v5673_v46 }
 0x748   : > { %6753 = vmatmul.mubr.bf16.gmra.mrb[128].mxu0 %v5673_v46 }
 0x749   : > { %6906 = vmatmul.mubr.bf16.gmra.mrb[184].mxu1 %v11916_v39  ;;  %6760 = vmatprep.mubr.bf16.mxu0 %v11941_v15 }
 0x74a   : > { %6913 = vmatprep.mubr.bf16.mxu1 %v5674_v59 }
 0x74b   : > { %v8655_v7 = vpop.f32.mrb[24].mxu0 }
 0x74c   : > { %v8761_v43 = vpop.f32.mrb[80].mxu1  ;;  %v8656_v0 = vpop.f32.mrb[25].mxu0 }
 0x74d   : > { %v8657_v25 = vadd.f32 %v8656_v0, %v8655_v7  ;;  %v8762_v32 = vpop.f32.mrb[81].mxu1  ;;  %v8658_v24 = vpop.f32.mrb[26].mxu0 }
 0x74e   : > { %v8763_v47 = vadd.f32 %v8762_v32, %v8761_v43  ;;  %v8764_v39 = vpop.f32.mrb[82].mxu1  ;;  %v8659_v3 = vpop.f32.mrb[27].mxu0 }
 0x74f   : > { %v8660_v15 = vadd.f32 %v8659_v3, %v8658_v24  ;;  %v8765_v61 = vpop.f32.mrb[83].mxu1  ;;  %v6353_v55 = vadd.f32 %v8657_v25, %v11987_v48  ;;  %v5659_v25 = vld [vmem:[#allocation2 + $0x181] sm:$0xff]  ;;  %v5661_v3 = vld [vmem:[#allocation2 + $0x199] sm:$0xff] }
 0x750   : > { %v11993_v54 = vadd.f32 %v8763_v47, %v6345_v4  ;;  %v8766_v42 = vadd.f32 %v8765_v61, %v8764_v39  ;;  %6761 = vmatmul.mubr.bf16.gmra.mrb[132].mxu0 %v5674_v59  ;;  %v5677_v4 = vpack.c.bf16 %v5660_v44, %v5659_v25 }
 0x751   : > { %6914 = vmatmul.mubr.bf16.gmra.mrb[188].mxu1 %v11928_v31  ;;  %6768 = vmatprep.mubr.bf16.mxu0 %v11949_v63  ;;  %v5657_v31 = vld [vmem:[#allocation2 + $0x169] sm:$0xff]  ;;  %v6356_v63 = vadd.f32 %v8660_v15, %v11987_v48  ;;  %v5662_v15 = vld [vmem:[#allocation2 + $0x1a1] sm:$0xff] }
 0x752   : > { %v11997_v21 = vadd.f32 %v8766_v42, %v6348_v40  ;;  %6921 = vmatprep.mubr.bf16.mxu1 %v5675_v49  ;;  %v5676_v36 = vpack.c.bf16 %v5658_v1, %v5657_v31  ;;  %v5679_v40 = vld [vmem:[#allocation2 + $0x32] sm:$0xff]  ;;  %v5680_v42 = vld [vmem:[#allocation2 + $0x3a] sm:$0xff] }
 0x753   : > { %v8661_v62 = vpop.f32.mrb[28].mxu0 }
 0x754   : > { %v8767_v8 = vpop.f32.mrb[84].mxu1  ;;  %v8662_v41 = vpop.f32.mrb[29].mxu0 }
 0x755   : > { %v8663_v29 = vadd.f32 %v8662_v41, %v8661_v62  ;;  %v8768_v56 = vpop.f32.mrb[85].mxu1  ;;  %v8664_v26 = vpop.f32.mrb[30].mxu0 }
 0x756   : > { %v8769_v45 = vadd.f32 %v8768_v56, %v8767_v8  ;;  %v8770_v53 = vpop.f32.mrb[86].mxu1  ;;  %v8665_v28 = vpop.f32.mrb[31].mxu0 }
 0x757   : > { %v8666_v5 = vadd.f32 %v8665_v28, %v8664_v26  ;;  %v8771_v2 = vpop.f32.mrb[87].mxu1  ;;  %v6361_v19 = vadd.f32 %v8663_v29, %v11987_v48  ;;  %v5678_v26 = vpack.c.bf16 %v5662_v15, %v5661_v3  ;;  %v5685_v3 = vld [vmem:[#allocation2 + $0x7a] sm:$0xff]  ;;  %v5686_v15 = vld [vmem:[#allocation2 + $0x82] sm:$0xff] }
 0x758   : > { %v12001_v16 = vadd.f32 %v8769_v45, %v6353_v55  ;;  %v8772_v35 = vadd.f32 %v8771_v2, %v8770_v53  ;;  %6769 = vmatmul.mubr.bf16.gmra.mrb[136].mxu0 %v5675_v49  ;;  %v5711_v45 = vpack.c.bf16 %v5680_v42, %v5679_v40  ;;  %v5687_v40 = vld [vmem:[#allocation2 + $0x92] sm:$0xff]  ;;  %v5688_v42 = vld [vmem:[#allocation2 + $0x9a] sm:$0xff] }
 0x759   : > { %6922 = vmatmul.mubr.bf16.gmra.mrb[192].mxu1 %v11936_v30  ;;  %6776 = vmatprep.mubr.bf16.mxu0 %v11957_v52  ;;  %v12008_v52 = vpack.c.bf16 %v5566_v13, %v5565_v27  ;;  %v6364_v32 = vadd.f32 %v8666_v5, %v11987_v48 }
 0x75a   : > { %v12005_v22 = vadd.f32 %v8772_v35, %v6356_v63  ;;  %6929 = vmatprep.mubr.bf16.mxu1 %v5676_v36  ;;  %v5681_v63 = vld [vmem:[#allocation2 + $0x4a] sm:$0xff]  ;;  %v5682_v35 = vld [vmem:[#allocation2 + $0x52] sm:$0xff] }
 0x75b   : > { %v8667_v20 = vpop.f32.mrb[32].mxu0 }
 0x75c   : > { %v8773_v37 = vpop.f32.mrb[88].mxu1  ;;  %v8668_v17 = vpop.f32.mrb[33].mxu0 }
 0x75d   : > { %v8669_v34 = vadd.f32 %v8668_v17, %v8667_v20  ;;  %v8774_v18 = vpop.f32.mrb[89].mxu1  ;;  %v8670_v46 = vpop.f32.mrb[34].mxu0  ;;  %v5684_v17 = vld [vmem:[#allocation2 + $0x6a] sm:$0xff] }
 0x75e   : > { %v8775_v59 = vadd.f32 %v8774_v18, %v8773_v37  ;;  %v8776_v7 = vpop.f32.mrb[90].mxu1  ;;  %v8671_v43 = vpop.f32.mrb[35].mxu0  ;;  %v5683_v37 = vld [vmem:[#allocation2 + $0x62] sm:$0xff] }
 0x75f   : > { %v8672_v30 = vadd.f32 %v8671_v43, %v8670_v46  ;;  %v8777_v0 = vpop.f32.mrb[91].mxu1  ;;  %v6369_v41 = vadd.f32 %v8669_v34, %v11987_v48  ;;  %v9897_v18 = vld [vmem:[#allocation2] sm:$0xff] }
 0x760   : > { %v12011_v24 = vadd.f32 %v8775_v59, %v6361_v19  ;;  %v8778_v11 = vadd.f32 %v8777_v0, %v8776_v7  ;;  %6777 = vmatmul.mubr.bf16.gmra.mrb[140].mxu0 %v5676_v36  ;;  %v5630_v46 = vpack.c.bf16 %v9897_v18, %v9897_v18  ;;  %v5712_v7 = vpack.c.bf16 %v5682_v35, %v5681_v63 }
 0x761   : > { %6930 = vmatmul.mubr.bf16.gmra.mrb[196].mxu1 %v11944_v58  ;;  %6784 = vmatprep.mubr.bf16.mxu0 %v12008_v52  ;;  %v6372_v53 = vadd.f32 %v8672_v30, %v11987_v48  ;;  %v5713_v0 = vpack.c.bf16 %v5684_v17, %v5683_v37 }
 0x762   : > { %v12015_v47 = vadd.f32 %v8778_v11, %v6364_v32  ;;  %6937 = vmatprep.mubr.bf16.mxu1 %v5677_v4 }
 0x763   : > { %v8673_v39 = vpop.f32.mrb[36].mxu0 }
 0x764   : > { %v8779_v61 = vpop.f32.mrb[92].mxu1  ;;  %v8674_v12 = vpop.f32.mrb[37].mxu0 }
 0x765   : > { %v8675_v49 = vadd.f32 %v8674_v12, %v8673_v39  ;;  %v8780_v62 = vpop.f32.mrb[93].mxu1  ;;  %v8676_v8 = vpop.f32.mrb[38].mxu0 }
 0x766   : > { %v8781_v29 = vadd.f32 %v8780_v62, %v8779_v61  ;;  %v8782_v56 = vpop.f32.mrb[94].mxu1  ;;  %v8677_v58 = vpop.f32.mrb[39].mxu0 }
 0x767   : > { %v8678_v1 = vadd.f32 %v8677_v58, %v8676_v8  ;;  %v8783_v55 = vpop.f32.mrb[95].mxu1  ;;  %v6377_v44 = vadd.f32 %v8675_v49, %v11987_v48 }
 0x768   : > { %v12019_v28 = vadd.f32 %v8781_v29, %v6369_v41  ;;  %v8784_v5 = vadd.f32 %v8783_v55, %v8782_v56  ;;  %6785 = vmatmul.mubr.bf16.gmra.mrb[144].mxu0 %v5677_v4 }
 0x769   : > { %6938 = vmatmul.mubr.bf16.gmra.mrb[200].mxu1 %v11952_v51  ;;  %9267 = vmatprep.mubr.bf16.mxu0 %v5711_v45  ;;  %v6380_v25 = vadd.f32 %v8678_v1, %v11987_v48  ;;  %v5715_v45 = vpack.c.bf16 %v5688_v42, %v5687_v40 }
 0x76a   : > { %v12022_v2 = vadd.f32 %v8784_v5, %v6372_v53  ;;  %6945 = vmatprep.mubr.bf16.mxu1 %v5678_v26  ;;  %v5714_v26 = vpack.c.bf16 %v5686_v15, %v5685_v3 }
 0x76b   : > { %v8679_v31 = vpop.f32.mrb[40].mxu0 }
 0x76c   : > { %v8785_v36 = vpop.f32.mrb[96].mxu1  ;;  %v8680_v20 = vpop.f32.mrb[41].mxu0 }
 0x76d   : > { %v8681_v27 = vadd.f32 %v8680_v20, %v8679_v31  ;;  %v8786_v13 = vpop.f32.mrb[97].mxu1  ;;  %v8682_v34 = vpop.f32.mrb[42].mxu0  ;;  %v5690_v20 = vld [vmem:[#allocation2 + $0xb2] sm:$0xff] }
 0x76e   : > { %v8787_v19 = vadd.f32 %v8786_v13, %v8785_v36  ;;  %v8788_v51 = vpop.f32.mrb[98].mxu1  ;;  %v8683_v59 = vpop.f32.mrb[43].mxu0  ;;  %v5689_v36 = vld [vmem:[#allocation2 + $0xaa] sm:$0xff] }
 0x76f   : > { %v8684_v43 = vadd.f32 %v8683_v59, %v8682_v34  ;;  %v8789_v30 = vpop.f32.mrb[99].mxu1  ;;  %v6385_v41 = vadd.f32 %v8681_v27, %v11987_v48  ;;  %v5691_v27 = vld [vmem:[#allocation2 + $0xc2] sm:$0xff]  ;;  %v5692_v13 = vld [vmem:[#allocation2 + $0xca] sm:$0xff] }
 0x770   : > { %v12026_v32 = vadd.f32 %v8787_v19, %v6377_v44  ;;  %v8790_v11 = vadd.f32 %v8789_v30, %v8788_v51  ;;  %9268 = vmatmul.mubr.bf16.vlgmr.msra.gmra.mrb[148].mxu0 %v5712_v7  ;;  %v5716_v7 = vpack.c.bf16 %v5690_v20, %v5689_v36 }
 0x771   : > { %6946 = vmatmul.mubr.bf16.gmra.mrb[204].mxu1 %v5630_v46  ;;  %9271 = vmatprep.mubr.bf16.mxu0 %v5713_v0  ;;  %v6388_v53 = vadd.f32 %v8684_v43, %v11987_v48  ;;  %v5717_v0 = vpack.c.bf16 %v5692_v13, %v5691_v27  ;;  %v5697_v27 = vld [vmem:[#allocation2 + $0x10a] sm:$0xff]  ;;  %v5698_v13 = vld [vmem:[#allocation2 + $0x112] sm:$0xff] }
 0x772   : > { %v12028_v4 = vadd.f32 %v8790_v11, %v6380_v25 }
 0x773   : > { %v8685_v39 = vpop.f32.mrb[44].mxu0 }
 0x774   : > { %v8791_v61 = vpop.f32.mrb[100].mxu1  ;;  %v8686_v12 = vpop.f32.mrb[45].mxu0 }
 0x775   : > { %v8687_v49 = vadd.f32 %v8686_v12, %v8685_v39  ;;  %v8792_v62 = vpop.f32.mrb[101].mxu1  ;;  %v8688_v8 = vpop.f32.mrb[46].mxu0  ;;  %v5694_v12 = vld [vmem:[#allocation2 + $0xe2] sm:$0xff] }
 0x776   : > { %v8793_v29 = vadd.f32 %v8792_v62, %v8791_v61  ;;  %v8794_v56 = vpop.f32.mrb[102].mxu1  ;;  %v8689_v58 = vpop.f32.mrb[47].mxu0  ;;  %v5693_v61 = vld [vmem:[#allocation2 + $0xda] sm:$0xff] }
 0x777   : > { %v8690_v1 = vadd.f32 %v8689_v58, %v8688_v8  ;;  %v8795_v55 = vpop.f32.mrb[103].mxu1  ;;  %v6393_v44 = vadd.f32 %v8687_v49, %v11987_v48  ;;  %v5695_v49 = vld [vmem:[#allocation2 + $0xf2] sm:$0xff]  ;;  %v5696_v62 = vld [vmem:[#allocation2 + $0xfa] sm:$0xff] }
 0x778   : > { %v12032_v5 = vadd.f32 %v8793_v29, %v6385_v41  ;;  %v8796_v31 = vadd.f32 %v8795_v55, %v8794_v56  ;;  %9272 = vmatmul.mubr.bf16.gmra.mrb[152].mxu0 %v5714_v26  ;;  %v5718_v55 = vpack.c.bf16 %v5694_v12, %v5693_v61 }
 0x779   : > { %9275 = vmatprep.mubr.bf16.mxu0 %v5715_v45  ;;  %v6396_v25 = vadd.f32 %v8690_v1, %v11987_v48 }
 0x77a   : > { %v12034_v63 = vadd.f32 %v8796_v31, %v6388_v53  ;;  %v5719_v31 = vpack.c.bf16 %v5696_v62, %v5695_v49 }
 0x77b   : > { %v8691_v35 = vpop.f32.mrb[48].mxu0 }
 0x77c   : > { %v8797_v37 = vpop.f32.mrb[104].mxu1  ;;  %v8692_v17 = vpop.f32.mrb[49].mxu0 }
 0x77d   : > { %v8693_v34 = vadd.f32 %v8692_v17, %v8691_v35  ;;  %v8798_v18 = vpop.f32.mrb[105].mxu1  ;;  %v8694_v46 = vpop.f32.mrb[50].mxu0 }
 0x77e   : > { %v8799_v19 = vadd.f32 %v8798_v18, %v8797_v37  ;;  %v8800_v51 = vpop.f32.mrb[106].mxu1  ;;  %v8695_v59 = vpop.f32.mrb[51].mxu0 }
 0x77f   : > { %v8696_v43 = vadd.f32 %v8695_v59, %v8694_v46  ;;  %v8801_v30 = vpop.f32.mrb[107].mxu1  ;;  %v6401_v56 = vadd.f32 %v8693_v34, %v11987_v48  ;;  %v5699_v46 = vld [vmem:[#allocation2 + $0x122] sm:$0xff] }
 0x780   : > { %v12038_v11 = vadd.f32 %v8799_v19, %v6393_v44  ;;  %v8802_v39 = vadd.f32 %v8801_v30, %v8800_v51  ;;  %9276 = vmatmul.mubr.bf16.gmra.mrb[156].mxu0 %v5716_v7  ;;  %v5700_v44 = vld [vmem:[#allocation2 + $0x12a] sm:$0xff] }
 0x781   : > { %9279 = vmatprep.mubr.bf16.mxu0 %v5717_v0  ;;  %v6404_v35 = vadd.f32 %v8696_v43, %v11987_v48  ;;  %v5721_v61 = vpack.c.bf16 %v5700_v44, %v5699_v46 }
 0x782   : > { %v12040_v3 = vadd.f32 %v8802_v39, %v6396_v25  ;;  %v5720_v25 = vpack.c.bf16 %v5698_v13, %v5697_v27 }
 0x783   : > { %v8697_v15 = vpop.f32.mrb[52].mxu0 }
 0x784   : > { %v8803_v40 = vpop.f32.mrb[108].mxu1  ;;  %v8698_v42 = vpop.f32.mrb[53].mxu0 }
 0x785   : > { %v8699_v8 = vadd.f32 %v8698_v42, %v8697_v15  ;;  %v8804_v41 = vpop.f32.mrb[109].mxu1  ;;  %v8700_v29 = vpop.f32.mrb[54].mxu0 }
 0x786   : > { %v8805_v58 = vadd.f32 %v8804_v41, %v8803_v40  ;;  %v8806_v26 = vpop.f32.mrb[110].mxu1  ;;  %v8701_v1 = vpop.f32.mrb[55].mxu0  ;;  %v5701_v41 = vld [vmem:[#allocation2 + $0x13a] sm:$0xff] }
 0x787   : > { %v8702_v45 = vadd.f32 %v8701_v1, %v8700_v29  ;;  %v8807_v53 = vpop.f32.mrb[111].mxu1  ;;  %v6409_v7 = vadd.f32 %v8699_v8, %v11987_v48  ;;  %v5702_v29 = vld [vmem:[#allocation2 + $0x142] sm:$0xff] }
 0x788   : > { %v12044_v36 = vadd.f32 %v8805_v58, %v6401_v56  ;;  %v8808_v20 = vadd.f32 %v8807_v53, %v8806_v26  ;;  %9280 = vmatmul.mubr.bf16.gmra.mrb[160].mxu0 %v5718_v55  ;;  %v5703_v58 = vld [vmem:[#allocation2 + $0x152] sm:$0xff]  ;;  %v5704_v26 = vld [vmem:[#allocation2 + $0x15a] sm:$0xff] }
 0x789   : > { %9283 = vmatprep.mubr.bf16.mxu0 %v5719_v31  ;;  %v6412_v12 = vadd.f32 %v8702_v45, %v11987_v48 }
 0x78a   : > { %v12046_v37 = vadd.f32 %v8808_v20, %v6404_v35 }
 0x78b   : > { %v8703_v17 = vpop.f32.mrb[56].mxu0 }
 0x78c   : > { %v8809_v34 = vpop.f32.mrb[112].mxu1  ;;  %v8704_v18 = vpop.f32.mrb[57].mxu0 }
 0x78d   : > { %v8705_v19 = vadd.f32 %v8704_v18, %v8703_v17  ;;  %v8810_v51 = vpop.f32.mrb[113].mxu1  ;;  %v8706_v59 = vpop.f32.mrb[58].mxu0  ;;  %v5722_v17 = vpack.c.bf16 %v5702_v29, %v5701_v41 }
 0x78e   : > { %v8811_v43 = vadd.f32 %v8810_v51, %v8809_v34  ;;  %v8812_v30 = vpop.f32.mrb[114].mxu1  ;;  %v8707_v0 = vpop.f32.mrb[59].mxu0  ;;  %v5723_v34 = vpack.c.bf16 %v5704_v26, %v5703_v58  ;;  %v5709_v26 = vld [vmem:[#allocation2 + $0x19a] sm:$0xff] }
 0x78f   : > { %v8708_v39 = vadd.f32 %v8707_v0, %v8706_v59  ;;  %v8813_v15 = vpop.f32.mrb[115].mxu1  ;;  %v6417_v31 = vadd.f32 %v8705_v19, %v11987_v48 }
 0x790   : > { %v12050_v40 = vadd.f32 %v8811_v43, %v6409_v7  ;;  %v8814_v42 = vadd.f32 %v8813_v15, %v8812_v30  ;;  %9284 = vmatmul.mubr.bf16.gmra.mrb[164].mxu0 %v5720_v25  ;;  %v5705_v7 = vld [vmem:[#allocation2 + $0x16a] sm:$0xff]  ;;  %v5706_v43 = vld [vmem:[#allocation2 + $0x172] sm:$0xff] }
 0x791   : > { %9287 = vmatprep.mubr.bf16.mxu0 %v5721_v61  ;;  %v6420_v18 = vadd.f32 %v8708_v39, %v11987_v48 }
 0x792   : > { %v12052_v49 = vadd.f32 %v8814_v42, %v6412_v12 }
 0x793   : > { %v8709_v62 = vpop.f32.mrb[60].mxu0 }
 0x794   : > { %v8815_v8 = vpop.f32.mrb[116].mxu1  ;;  %v8710_v56 = vpop.f32.mrb[61].mxu0 }
 0x795   : > { %v8711_v1 = vadd.f32 %v8710_v56, %v8709_v62  ;;  %v8816_v55 = vpop.f32.mrb[117].mxu1  ;;  %v8712_v53 = vpop.f32.mrb[62].mxu0  ;;  %v5724_v62 = vpack.c.bf16 %v5706_v43, %v5705_v7 }
 0x796   : > { %v8817_v45 = vadd.f32 %v8816_v55, %v8815_v8  ;;  %v8818_v35 = vpop.f32.mrb[118].mxu1  ;;  %v8713_v20 = vpop.f32.mrb[63].mxu0  ;;  %v5710_v55 = vld [vmem:[#allocation2 + $0x1a2] sm:$0xff] }
 0x797   : > { %v8714_v27 = vadd.f32 %v8713_v20, %v8712_v53  ;;  %v8819_v13 = vpop.f32.mrb[119].mxu1  ;;  %v6425_v61 = vadd.f32 %v8711_v1, %v11987_v48 }
 0x798   : > { %v12056_v46 = vadd.f32 %v8817_v45, %v6417_v31  ;;  %v8820_v44 = vadd.f32 %v8819_v13, %v8818_v35  ;;  %9288 = vmatmul.mubr.bf16.gmra.mrb[168].mxu0 %v5722_v17  ;;  %v5726_v35 = vpack.c.bf16 %v5710_v55, %v5709_v26 }
 0x799   : > { %9291 = vmatprep.mubr.bf16.mxu0 %v5723_v34  ;;  %v6428_v8 = vadd.f32 %v8714_v27, %v11987_v48 }
 0x79a   : > { %v12058_v51 = vadd.f32 %v8820_v44, %v6420_v18 }
 0x79b   : > { %v8715_v59 = vpop.f32.mrb[64].mxu0 }
 0x79c   : > { %v8821_v19 = vpop.f32.mrb[120].mxu1  ;;  %v8716_v30 = vpop.f32.mrb[65].mxu0 }
 0x79d   : > { %v8717_v0 = vadd.f32 %v8716_v30, %v8715_v59  ;;  %v8822_v25 = vpop.f32.mrb[121].mxu1  ;;  %v8718_v15 = vpop.f32.mrb[66].mxu0 }
 0x79e   : > { %v8823_v12 = vadd.f32 %v8822_v25, %v8821_v19  ;;  %v8824_v42 = vpop.f32.mrb[122].mxu1  ;;  %v8719_v39 = vpop.f32.mrb[67].mxu0 }
 0x79f   : > { %v8720_v41 = vadd.f32 %v8719_v39, %v8718_v15  ;;  %v8825_v29 = vpop.f32.mrb[123].mxu1  ;;  %v6433_v34 = vadd.f32 %v8717_v0, %v11987_v48 }
 0x7a0   : > { %v12062_v56 = vadd.f32 %v8823_v12, %v6425_v61  ;;  %v8826_v58 = vadd.f32 %v8825_v29, %v8824_v42  ;;  %9292 = vmatmul.mubr.bf16.gmra.mrb[172].mxu0 %v5724_v62 }
 0x7a1   : > { %9295 = vmatprep.mubr.bf16.mxu0 %v12008_v52  ;;  %v6436_v52 = vadd.f32 %v8720_v41, %v11987_v48 }
 0x7a2   : > { %v12065_v53 = vadd.f32 %v8826_v58, %v6428_v8 }
 0x7a3   : > { %v8721_v31 = vpop.f32.mrb[68].mxu0 }
 0x7a4   : > { %v8827_v1 = vpop.f32.mrb[124].mxu1  ;;  %v8722_v45 = vpop.f32.mrb[69].mxu0 }
 0x7a5   : > { %v8723_v20 = vadd.f32 %v8722_v45, %v8721_v31  ;;  %v8828_v17 = vpop.f32.mrb[125].mxu1  ;;  %v8724_v13 = vpop.f32.mrb[70].mxu0 }
 0x7a6   : > { %v8829_v27 = vadd.f32 %v8828_v17, %v8827_v1  ;;  %v8830_v18 = vpop.f32.mrb[126].mxu1  ;;  %v8725_v44 = vpop.f32.mrb[71].mxu0 }
 0x7a7   : > { %v8726_v59 = vadd.f32 %v8725_v44, %v8724_v13  ;;  %v8831_v7 = vpop.f32.mrb[127].mxu1  ;;  %v6441_v0 = vadd.f32 %v8723_v20, %v11987_v48 }
 0x7a8   : > { %v12069_v43 = vadd.f32 %v8829_v27, %v6433_v34  ;;  %v8832_v19 = vadd.f32 %v8831_v7, %v8830_v18  ;;  %9296 = vmatmul.mubr.bf16.gmra.mrb[176].mxu0 %v5726_v35 }
 0x7a9   : > { %v6444_v41 = vadd.f32 %v8726_v59, %v11987_v48 }
 0x7aa   : > { %v12071_v30 = vadd.f32 %v8832_v19, %v6436_v52 }
 0x7ab   : > { %v8727_v25 = vpop.f32.mrb[72].mxu0 }
 0x7ac   : > { %v8833_v15 = vpop.f32.mrb[128].mxu1  ;;  %v8728_v61 = vpop.f32.mrb[73].mxu0 }
 0x7ad   : > { %v8729_v12 = vadd.f32 %v8728_v61, %v8727_v25  ;;  %v8834_v42 = vpop.f32.mrb[129].mxu1  ;;  %v8730_v39 = vpop.f32.mrb[74].mxu0 }
 0x7ae   : > { %v8835_v62 = vadd.f32 %v8834_v42, %v8833_v15  ;;  %v8836_v29 = vpop.f32.mrb[130].mxu1  ;;  %v8731_v8 = vpop.f32.mrb[75].mxu0 }
 0x7af   : > { %v8732_v58 = vadd.f32 %v8731_v8, %v8730_v39  ;;  %v8837_v26 = vpop.f32.mrb[131].mxu1  ;;  %v6449_v20 = vadd.f32 %v8729_v12, %v11987_v48 }
 0x7b0   : > { %v12075_v55 = vadd.f32 %v8835_v62, %v6441_v0  ;;  %v8838_v31 = vadd.f32 %v8837_v26, %v8836_v29 }
 0x7b1   : > { %v6452_v59 = vadd.f32 %v8732_v58, %v11987_v48 }
 0x7b2   : > { %v12077_v1 = vadd.f32 %v8838_v31, %v6444_v41 }
 0x7b3   : > { %v8733_v45 = vpop.f32.mrb[76].mxu0 }
 0x7b4   : > { %v8839_v35 = vpop.f32.mrb[132].mxu1  ;;  %v8734_v17 = vpop.f32.mrb[77].mxu0 }
 0x7b5   : > { %v8735_v13 = vadd.f32 %v8734_v17, %v8733_v45  ;;  %v8840_v34 = vpop.f32.mrb[133].mxu1  ;;  %v8736_v27 = vpop.f32.mrb[78].mxu0 }
 0x7b6   : > { %v8841_v18 = vadd.f32 %v8840_v34, %v8839_v35  ;;  %v8842_v44 = vpop.f32.mrb[134].mxu1  ;;  %v8737_v7 = vpop.f32.mrb[79].mxu0 }
 0x7b7   : > { %v8738_v52 = vadd.f32 %v8737_v7, %v8736_v27  ;;  %v8843_v19 = vpop.f32.mrb[135].mxu1  ;;  %v6457_v12 = vadd.f32 %v8735_v13, %v11987_v48 }
 0x7b8   : > { %v12081_v25 = vadd.f32 %v8841_v18, %v6449_v20  ;;  %v8844_v15 = vadd.f32 %v8843_v19, %v8842_v44 }
 0x7b9   : > { %v6460_v58 = vadd.f32 %v8738_v52, %v11987_v48 }
 0x7ba   : > { %v12083_v61 = vadd.f32 %v8844_v15, %v6452_v59 }
 0x7bb   : > { %v8739_v42 = vpop.f32.mrb[80].mxu0 }
 0x7bc   : > { %v8845_v39 = vpop.f32.mrb[136].mxu1  ;;  %v8740_v0 = vpop.f32.mrb[81].mxu0 }
 0x7bd   : > { %v8741_v62 = vadd.f32 %v8740_v0, %v8739_v42  ;;  %v8846_v29 = vpop.f32.mrb[137].mxu1  ;;  %v8742_v8 = vpop.f32.mrb[82].mxu0 }
 0x7be   : > { %v8847_v26 = vadd.f32 %v8846_v29, %v8845_v39  ;;  %v8848_v41 = vpop.f32.mrb[138].mxu1  ;;  %v8743_v31 = vpop.f32.mrb[83].mxu0 }
 0x7bf   : > { %v8744_v45 = vadd.f32 %v8743_v31, %v8742_v8  ;;  %v8849_v35 = vpop.f32.mrb[139].mxu1  ;;  %v6465_v13 = vadd.f32 %v8741_v62, %v11987_v48 }
 0x7c0   : > { %v12087_v17 = vadd.f32 %v8847_v26, %v6457_v12  ;;  %v8850_v34 = vadd.f32 %v8849_v35, %v8848_v41 }
 0x7c1   : > { %v6468_v8 = vadd.f32 %v8744_v45, %v11987_v48 }
 0x7c2   : > { %v12089_v27 = vadd.f32 %v8850_v34, %v6460_v58 }
 0x7c3   : > { %v8873_v20 = vpop.f32.mrb[84].mxu0 }
 0x7c4   : > { %v8851_v18 = vpop.f32.mrb[140].mxu1  ;;  %v8874_v44 = vpop.f32.mrb[85].mxu0 }
 0x7c5   : > { %v8852_v7 = vpop.f32.mrb[141].mxu1  ;;  %v8875_v19 = vadd.f32 %v8874_v44, %v8873_v20  ;;  %v8876_v59 = vpop.f32.mrb[86].mxu0 }
 0x7c6   : > { %v8853_v15 = vadd.f32 %v8852_v7, %v8851_v18  ;;  %v8854_v42 = vpop.f32.mrb[142].mxu1  ;;  %v8877_v39 = vpop.f32.mrb[87].mxu0 }
 0x7c7   : > { %v6667_v0 = vadd.f32 %v8875_v19, %v11993_v54  ;;  %v8855_v29 = vpop.f32.mrb[143].mxu1  ;;  %v8878_v52 = vadd.f32 %v8877_v39, %v8876_v59 }
 0x7c8   : > { %v12094_v12 = vadd.f32 %v8853_v15, %v6465_v13  ;;  %v8856_v26 = vadd.f32 %v8855_v29, %v8854_v42 }
 0x7c9   : > { %v6670_v41 = vadd.f32 %v8878_v52, %v11997_v21 }
 0x7ca   : > { %v12097_v31 = vadd.f32 %v8856_v26, %v6468_v8 }
 0x7cb   : > { %v8879_v35 = vpop.f32.mrb[88].mxu0 }
 0x7cc   : > { %v8985_v58 = vpop.f32.mrb[144].mxu1  ;;  %v8880_v34 = vpop.f32.mrb[89].mxu0 }
 0x7cd   : > { %v8881_v62 = vadd.f32 %v8880_v34, %v8879_v35  ;;  %v8986_v20 = vpop.f32.mrb[145].mxu1  ;;  %v8882_v18 = vpop.f32.mrb[90].mxu0 }
 0x7ce   : > { %v8987_v44 = vadd.f32 %v8986_v20, %v8985_v58  ;;  %v8988_v7 = vpop.f32.mrb[146].mxu1  ;;  %v8883_v54 = vpop.f32.mrb[91].mxu0 }
 0x7cf   : > { %v6675_v19 = vadd.f32 %v8881_v62, %v12001_v16  ;;  %v8884_v59 = vadd.f32 %v8883_v54, %v8882_v18  ;;  %v8989_v48 = vpop.f32.mrb[147].mxu1 }
 0x7d0   : > { %v8990_v45 = vadd.f32 %v8989_v48, %v8988_v7  ;;  %v12100_v13 = vadd.f32 %v8987_v44, %v6667_v0 }
 0x7d1   : > { %v6678_v21 = vadd.f32 %v8884_v59, %v12005_v22 }
 0x7d2   : > { %v12103_v15 = vadd.f32 %v8990_v45, %v6670_v41 }
 0x7d3   : > { %v8885_v42 = vpop.f32.mrb[92].mxu0 }
 0x7d4   : > { %v8991_v39 = vpop.f32.mrb[148].mxu1  ;;  %v8886_v29 = vpop.f32.mrb[93].mxu0 }
 0x7d5   : > { %v8887_v52 = vadd.f32 %v8886_v29, %v8885_v42  ;;  %v8992_v8 = vpop.f32.mrb[149].mxu1  ;;  %v8888_v26 = vpop.f32.mrb[94].mxu0 }
 0x7d6   : > { %v8993_v35 = vadd.f32 %v8992_v8, %v8991_v39  ;;  %v8994_v58 = vpop.f32.mrb[150].mxu1  ;;  %v8889_v34 = vpop.f32.mrb[95].mxu0 }
 0x7d7   : > { %v6683_v16 = vadd.f32 %v8887_v52, %v12011_v24  ;;  %v8890_v62 = vadd.f32 %v8889_v34, %v8888_v26  ;;  %v8995_v20 = vpop.f32.mrb[151].mxu1 }
 0x7d8   : > { %v8996_v18 = vadd.f32 %v8995_v20, %v8994_v58  ;;  %v12106_v0 = vadd.f32 %v8993_v35, %v6675_v19 }
 0x7d9   : > { %v6686_v22 = vadd.f32 %v8890_v62, %v12015_v47 }
 0x7da   : > { %v12109_v41 = vadd.f32 %v8996_v18, %v6678_v21 }
 0x7db   : > { %v8891_v44 = vpop.f32.mrb[96].mxu0 }
 0x7dc   : > { %v8997_v7 = vpop.f32.mrb[152].mxu1  ;;  %v8892_v54 = vpop.f32.mrb[97].mxu0 }
 0x7dd   : > { %v8893_v59 = vadd.f32 %v8892_v54, %v8891_v44  ;;  %v8998_v48 = vpop.f32.mrb[153].mxu1  ;;  %v8894_v45 = vpop.f32.mrb[98].mxu0 }
 0x7de   : > { %v8999_v42 = vadd.f32 %v8998_v48, %v8997_v7  ;;  %v9000_v39 = vpop.f32.mrb[154].mxu1  ;;  %v8895_v29 = vpop.f32.mrb[99].mxu0 }
 0x7df   : > { %v6691_v24 = vadd.f32 %v8893_v59, %v12019_v28  ;;  %v8896_v52 = vadd.f32 %v8895_v29, %v8894_v45  ;;  %v9001_v8 = vpop.f32.mrb[155].mxu1 }
 0x7e0   : > { %v9002_v26 = vadd.f32 %v9001_v8, %v9000_v39  ;;  %v12112_v19 = vadd.f32 %v8999_v42, %v6683_v16 }
 0x7e1   : > { %v6694_v47 = vadd.f32 %v8896_v52, %v12022_v2 }
 0x7e2   : > { %v12115_v21 = vadd.f32 %v9002_v26, %v6686_v22 }
 0x7e3   : > { %v8897_v35 = vpop.f32.mrb[100].mxu0 }
 0x7e4   : > { %v9003_v58 = vpop.f32.mrb[156].mxu1  ;;  %v8898_v34 = vpop.f32.mrb[101].mxu0 }
 0x7e5   : > { %v8899_v62 = vadd.f32 %v8898_v34, %v8897_v35  ;;  %v9004_v20 = vpop.f32.mrb[157].mxu1  ;;  %v8900_v18 = vpop.f32.mrb[102].mxu0 }
 0x7e6   : > { %v9005_v44 = vadd.f32 %v9004_v20, %v9003_v58  ;;  %v9006_v7 = vpop.f32.mrb[158].mxu1  ;;  %v8901_v54 = vpop.f32.mrb[103].mxu0 }
 0x7e7   : > { %v6699_v28 = vadd.f32 %v8899_v62, %v12026_v32  ;;  %v8902_v59 = vadd.f32 %v8901_v54, %v8900_v18  ;;  %v9007_v48 = vpop.f32.mrb[159].mxu1 }
 0x7e8   : > { %v9008_v45 = vadd.f32 %v9007_v48, %v9006_v7  ;;  %v12118_v16 = vadd.f32 %v9005_v44, %v6691_v24 }
 0x7e9   : > { %v6702_v2 = vadd.f32 %v8902_v59, %v12028_v4 }
 0x7ea   : > { %v12121_v22 = vadd.f32 %v9008_v45, %v6694_v47 }
 0x7eb   : > { %v8903_v42 = vpop.f32.mrb[104].mxu0 }
 0x7ec   : > { %v9009_v39 = vpop.f32.mrb[160].mxu1  ;;  %v8904_v29 = vpop.f32.mrb[105].mxu0 }
 0x7ed   : > { %v8905_v52 = vadd.f32 %v8904_v29, %v8903_v42  ;;  %v9010_v8 = vpop.f32.mrb[161].mxu1  ;;  %v8906_v26 = vpop.f32.mrb[106].mxu0 }
 0x7ee   : > { %v9011_v35 = vadd.f32 %v9010_v8, %v9009_v39  ;;  %v9012_v58 = vpop.f32.mrb[162].mxu1  ;;  %v8907_v34 = vpop.f32.mrb[107].mxu0 }
 0x7ef   : > { %v6707_v32 = vadd.f32 %v8905_v52, %v12032_v5  ;;  %v8908_v62 = vadd.f32 %v8907_v34, %v8906_v26  ;;  %v9013_v20 = vpop.f32.mrb[163].mxu1 }
 0x7f0   : > { %v9014_v18 = vadd.f32 %v9013_v20, %v9012_v58  ;;  %v12124_v24 = vadd.f32 %v9011_v35, %v6699_v28 }
 0x7f1   : > { %v6710_v4 = vadd.f32 %v8908_v62, %v12034_v63 }
 0x7f2   : > { %v12127_v47 = vadd.f32 %v9014_v18, %v6702_v2 }
 0x7f3   : > { %v8909_v44 = vpop.f32.mrb[108].mxu0 }
 0x7f4   : > { %v9015_v7 = vpop.f32.mrb[164].mxu1  ;;  %v8910_v54 = vpop.f32.mrb[109].mxu0 }
 0x7f5   : > { %v8911_v59 = vadd.f32 %v8910_v54, %v8909_v44  ;;  %v9016_v48 = vpop.f32.mrb[165].mxu1  ;;  %v8912_v45 = vpop.f32.mrb[110].mxu0 }
 0x7f6   : > { %v9017_v42 = vadd.f32 %v9016_v48, %v9015_v7  ;;  %v9018_v39 = vpop.f32.mrb[166].mxu1  ;;  %v8913_v29 = vpop.f32.mrb[111].mxu0 }
 0x7f7   : > { %v6715_v5 = vadd.f32 %v8911_v59, %v12038_v11  ;;  %v8914_v52 = vadd.f32 %v8913_v29, %v8912_v45  ;;  %v9019_v8 = vpop.f32.mrb[167].mxu1 }
 0x7f8   : > { %v9020_v26 = vadd.f32 %v9019_v8, %v9018_v39  ;;  %v12130_v28 = vadd.f32 %v9017_v42, %v6707_v32 }
 0x7f9   : > { %v6718_v63 = vadd.f32 %v8914_v52, %v12040_v3 }
 0x7fa   : > { %v12133_v2 = vadd.f32 %v9020_v26, %v6710_v4 }
 0x7fb   : > { %v8915_v35 = vpop.f32.mrb[112].mxu0 }
 0x7fc   : > { %v9021_v58 = vpop.f32.mrb[168].mxu1  ;;  %v8916_v34 = vpop.f32.mrb[113].mxu0 }
 0x7fd   : > { %v8917_v62 = vadd.f32 %v8916_v34, %v8915_v35  ;;  %v9022_v20 = vpop.f32.mrb[169].mxu1  ;;  %v8918_v18 = vpop.f32.mrb[114].mxu0 }
 0x7fe   : > { %v9023_v44 = vadd.f32 %v9022_v20, %v9021_v58  ;;  %v9024_v7 = vpop.f32.mrb[170].mxu1  ;;  %v8919_v54 = vpop.f32.mrb[115].mxu0 }
 0x7ff   : > { %v6723_v11 = vadd.f32 %v8917_v62, %v12044_v36  ;;  %v8920_v59 = vadd.f32 %v8919_v54, %v8918_v18  ;;  %v9025_v48 = vpop.f32.mrb[171].mxu1 }
 0x800   : > { %v9026_v45 = vadd.f32 %v9025_v48, %v9024_v7  ;;  %v12136_v32 = vadd.f32 %v9023_v44, %v6715_v5 }
 0x801   : > { %v6726_v3 = vadd.f32 %v8920_v59, %v12046_v37 }
 0x802   : > { %v12139_v4 = vadd.f32 %v9026_v45, %v6718_v63 }
 0x803   : > { %v8921_v42 = vpop.f32.mrb[116].mxu0 }
 0x804   : > { %v9027_v39 = vpop.f32.mrb[172].mxu1  ;;  %v8922_v29 = vpop.f32.mrb[117].mxu0 }
 0x805   : > { %v8923_v52 = vadd.f32 %v8922_v29, %v8921_v42  ;;  %v9028_v8 = vpop.f32.mrb[173].mxu1  ;;  %v8924_v26 = vpop.f32.mrb[118].mxu0 }
 0x806   : > { %v9029_v35 = vadd.f32 %v9028_v8, %v9027_v39  ;;  %v9030_v58 = vpop.f32.mrb[174].mxu1  ;;  %v8925_v34 = vpop.f32.mrb[119].mxu0 }
 0x807   : > { %v6731_v36 = vadd.f32 %v8923_v52, %v12050_v40  ;;  %v8926_v62 = vadd.f32 %v8925_v34, %v8924_v26  ;;  %v9031_v20 = vpop.f32.mrb[175].mxu1 }
 0x808   : > { %v9032_v18 = vadd.f32 %v9031_v20, %v9030_v58  ;;  %v12142_v5 = vadd.f32 %v9029_v35, %v6723_v11 }
 0x809   : > { %v6734_v37 = vadd.f32 %v8926_v62, %v12052_v49 }
 0x80a   : > { %v12145_v63 = vadd.f32 %v9032_v18, %v6726_v3 }
 0x80b   : > { %v8927_v44 = vpop.f32.mrb[120].mxu0 }
 0x80c   : > { %v9033_v7 = vpop.f32.mrb[176].mxu1  ;;  %v8928_v54 = vpop.f32.mrb[121].mxu0 }
 0x80d   : > { %v8929_v59 = vadd.f32 %v8928_v54, %v8927_v44  ;;  %v9034_v48 = vpop.f32.mrb[177].mxu1  ;;  %v8930_v45 = vpop.f32.mrb[122].mxu0 }
 0x80e   : > { %v9035_v42 = vadd.f32 %v9034_v48, %v9033_v7  ;;  %v9036_v39 = vpop.f32.mrb[178].mxu1  ;;  %v8931_v29 = vpop.f32.mrb[123].mxu0 }
 0x80f   : > { %v6739_v40 = vadd.f32 %v8929_v59, %v12056_v46  ;;  %v8932_v52 = vadd.f32 %v8931_v29, %v8930_v45  ;;  %v9037_v8 = vpop.f32.mrb[179].mxu1 }
 0x810   : > { %v9038_v26 = vadd.f32 %v9037_v8, %v9036_v39  ;;  %v12148_v11 = vadd.f32 %v9035_v42, %v6731_v36 }
 0x811   : > { %v6742_v49 = vadd.f32 %v8932_v52, %v12058_v51 }
 0x812   : > { %v12151_v3 = vadd.f32 %v9038_v26, %v6734_v37 }
 0x813   : > { %v8933_v35 = vpop.f32.mrb[124].mxu0 }
 0x814   : > { %v9039_v58 = vpop.f32.mrb[180].mxu1  ;;  %v8934_v34 = vpop.f32.mrb[125].mxu0 }
 0x815   : > { %v8935_v62 = vadd.f32 %v8934_v34, %v8933_v35  ;;  %v9040_v20 = vpop.f32.mrb[181].mxu1  ;;  %v8936_v18 = vpop.f32.mrb[126].mxu0 }
 0x816   : > { %v9041_v44 = vadd.f32 %v9040_v20, %v9039_v58  ;;  %v9042_v7 = vpop.f32.mrb[182].mxu1  ;;  %v8937_v54 = vpop.f32.mrb[127].mxu0 }
 0x817   : > { %v6747_v46 = vadd.f32 %v8935_v62, %v12062_v56  ;;  %v8938_v59 = vadd.f32 %v8937_v54, %v8936_v18  ;;  %v9043_v48 = vpop.f32.mrb[183].mxu1 }
 0x818   : > { %v9044_v45 = vadd.f32 %v9043_v48, %v9042_v7  ;;  %v12154_v36 = vadd.f32 %v9041_v44, %v6739_v40 }
 0x819   : > { %v6750_v51 = vadd.f32 %v8938_v59, %v12065_v53 }
 0x81a   : > { %v12157_v37 = vadd.f32 %v9044_v45, %v6742_v49 }
 0x81b   : > { %v8939_v42 = vpop.f32.mrb[128].mxu0 }
 0x81c   : > { %v9045_v39 = vpop.f32.mrb[184].mxu1  ;;  %v8940_v29 = vpop.f32.mrb[129].mxu0 }
 0x81d   : > { %v8941_v52 = vadd.f32 %v8940_v29, %v8939_v42  ;;  %v9046_v8 = vpop.f32.mrb[185].mxu1  ;;  %v8942_v26 = vpop.f32.mrb[130].mxu0 }
 0x81e   : > { %v9047_v35 = vadd.f32 %v9046_v8, %v9045_v39  ;;  %v9048_v58 = vpop.f32.mrb[186].mxu1  ;;  %v8943_v34 = vpop.f32.mrb[131].mxu0 }
 0x81f   : > { %v6755_v56 = vadd.f32 %v8941_v52, %v12069_v43  ;;  %v8944_v62 = vadd.f32 %v8943_v34, %v8942_v26  ;;  %v9049_v20 = vpop.f32.mrb[187].mxu1 }
 0x820   : > { %v9050_v18 = vadd.f32 %v9049_v20, %v9048_v58  ;;  %v12160_v40 = vadd.f32 %v9047_v35, %v6747_v46 }
 0x821   : > { %v6758_v53 = vadd.f32 %v8944_v62, %v12071_v30 }
 0x822   : > { %v12163_v49 = vadd.f32 %v9050_v18, %v6750_v51 }
 0x823   : > { %v8945_v44 = vpop.f32.mrb[132].mxu0 }
 0x824   : > { %v9051_v7 = vpop.f32.mrb[188].mxu1  ;;  %v8946_v54 = vpop.f32.mrb[133].mxu0 }
 0x825   : > { %v8947_v59 = vadd.f32 %v8946_v54, %v8945_v44  ;;  %v9052_v48 = vpop.f32.mrb[189].mxu1  ;;  %v8948_v45 = vpop.f32.mrb[134].mxu0 }
 0x826   : > { %v9053_v42 = vadd.f32 %v9052_v48, %v9051_v7  ;;  %v9054_v39 = vpop.f32.mrb[190].mxu1  ;;  %v8949_v29 = vpop.f32.mrb[135].mxu0 }
 0x827   : > { %v6763_v43 = vadd.f32 %v8947_v59, %v12075_v55  ;;  %v8950_v52 = vadd.f32 %v8949_v29, %v8948_v45  ;;  %v9055_v8 = vpop.f32.mrb[191].mxu1 }
 0x828   : > { %v9056_v26 = vadd.f32 %v9055_v8, %v9054_v39  ;;  %v12166_v46 = vadd.f32 %v9053_v42, %v6755_v56 }
 0x829   : > { %v6766_v30 = vadd.f32 %v8950_v52, %v12077_v1 }
 0x82a   : > { %v12169_v51 = vadd.f32 %v9056_v26, %v6758_v53 }
 0x82b   : > { %v8951_v35 = vpop.f32.mrb[136].mxu0 }
 0x82c   : > { %v9057_v58 = vpop.f32.mrb[192].mxu1  ;;  %v8952_v34 = vpop.f32.mrb[137].mxu0 }
 0x82d   : > { %v8953_v62 = vadd.f32 %v8952_v34, %v8951_v35  ;;  %v9058_v20 = vpop.f32.mrb[193].mxu1  ;;  %v8954_v18 = vpop.f32.mrb[138].mxu0 }
 0x82e   : > { %v9059_v44 = vadd.f32 %v9058_v20, %v9057_v58  ;;  %v9060_v7 = vpop.f32.mrb[194].mxu1  ;;  %v8955_v54 = vpop.f32.mrb[139].mxu0 }
 0x82f   : > { %v6771_v55 = vadd.f32 %v8953_v62, %v12081_v25  ;;  %v8956_v59 = vadd.f32 %v8955_v54, %v8954_v18  ;;  %v9061_v48 = vpop.f32.mrb[195].mxu1 }
 0x830   : > { %v9062_v45 = vadd.f32 %v9061_v48, %v9060_v7  ;;  %v12172_v56 = vadd.f32 %v9059_v44, %v6763_v43 }
 0x831   : > { %v6774_v1 = vadd.f32 %v8956_v59, %v12083_v61 }
 0x832   : > { %v12175_v53 = vadd.f32 %v9062_v45, %v6766_v30 }
 0x833   : > { %v8957_v42 = vpop.f32.mrb[140].mxu0 }
 0x834   : > { %v9063_v39 = vpop.f32.mrb[196].mxu1  ;;  %v8958_v29 = vpop.f32.mrb[141].mxu0 }
 0x835   : > { %v8959_v52 = vadd.f32 %v8958_v29, %v8957_v42  ;;  %v9064_v8 = vpop.f32.mrb[197].mxu1  ;;  %v8960_v26 = vpop.f32.mrb[142].mxu0 }
 0x836   : > { %v9065_v35 = vadd.f32 %v9064_v8, %v9063_v39  ;;  %v9066_v58 = vpop.f32.mrb[198].mxu1  ;;  %v8961_v34 = vpop.f32.mrb[143].mxu0 }
 0x837   : > { %v6779_v25 = vadd.f32 %v8959_v52, %v12087_v17  ;;  %v8962_v62 = vadd.f32 %v8961_v34, %v8960_v26  ;;  %v9067_v20 = vpop.f32.mrb[199].mxu1 }
 0x838   : > { %v9068_v18 = vadd.f32 %v9067_v20, %v9066_v58  ;;  %v12178_v43 = vadd.f32 %v9065_v35, %v6771_v55 }
 0x839   : > { %v6782_v61 = vadd.f32 %v8962_v62, %v12089_v27 }
 0x83a   : > { %v12181_v30 = vadd.f32 %v9068_v18, %v6774_v1 }
 0x83b   : > { %v8963_v44 = vpop.f32.mrb[144].mxu0 }
 0x83c   : > { %v9069_v7 = vpop.f32.mrb[200].mxu1  ;;  %v8964_v54 = vpop.f32.mrb[145].mxu0 }
 0x83d   : > { %v8965_v59 = vadd.f32 %v8964_v54, %v8963_v44  ;;  %v9070_v48 = vpop.f32.mrb[201].mxu1  ;;  %v8966_v45 = vpop.f32.mrb[146].mxu0 }
 0x83e   : > { %v9071_v42 = vadd.f32 %v9070_v48, %v9069_v7  ;;  %v9072_v39 = vpop.f32.mrb[202].mxu1  ;;  %v8967_v17 = vpop.f32.mrb[147].mxu0 }
 0x83f   : > { %v6787_v29 = vadd.f32 %v8965_v59, %v12094_v12  ;;  %v8968_v52 = vadd.f32 %v8967_v17, %v8966_v45  ;;  %v9073_v55 = vpop.f32.mrb[203].mxu1 }
 0x840   : > { %v9074_v8 = vadd.f32 %v9073_v55, %v9072_v39  ;;  %v12184_v26 = vadd.f32 %v9071_v42, %v6779_v25 }
 0x841   : > { %v6790_v27 = vadd.f32 %v8968_v52, %v12097_v31 }
 0x842   : > { %v12188_v1 = vadd.f32 %v9074_v8, %v6782_v61 }
 0x843   : > { %v9269_v35 = vpop.f32.mrb[148].mxu0 }
 0x844   : > { %v9075_v58 = vpop.f32.mrb[204].mxu1  ;;  %v6997_v34 = vadd.f32 %v9269_v35, %v12106_v0  ;;  %v6988_v62 = vpop.f32.mrb[149].mxu0 }
 0x845   : > { %v9076_v20 = vpop.f32.mrb[205].mxu1  ;;  %v6989_v12 = vadd.f32 %v6988_v62, %v12100_v13  ;;  %v9270_v18 = vpop.f32.mrb[150].mxu0 }
 0x846   : > { %v7117_v44 = vadd.f32 %v6997_v34, %v11086_v38  ;;  %v9077_v25 = vadd.f32 %v9076_v20, %v9075_v58  ;;  %v9078_v7 = vpop.f32.mrb[206].mxu1  ;;  %v7000_v31 = vadd.f32 %v9270_v18, %v12109_v41  ;;  %v6991_v54 = vpop.f32.mrb[151].mxu0 }
 0x847   : > { %v7115_v61 = vadd.f32 %v6989_v12, %v11090_v57  ;;  %v9079_v59 = vpop.f32.mrb[207].mxu1  ;;  %v6992_v48 = vadd.f32 %v6991_v54, %v12103_v15  ;;  %v12430_v54 = vld [vmem:[#allocation20_spill] sm:$0xff] }
 0x848   : > { %v7149_v45 = vmax.f32 %v7117_v44, 0.0  ;;  %v7118_v0 = vadd.f32 %v7000_v31, %v11094_v14  ;;  %v9080_v42 = vadd.f32 %v9079_v59, %v9078_v7  ;;  %v12199_v39 = vadd.f32 %v9077_v25, %v6787_v29  ;;  %v12431_v59 = vld [vmem:[#allocation27_spill] sm:$0xff] }
 0x849   : > { %v7147_v13 = vmax.f32 %v7115_v61, 0.0  ;;  %v7116_v17 = vadd.f32 %v6992_v48, %v11101_v9 }
 0x84a   : > { %7181 = vst [vmem:[%s12202_s28 + $0x10] sm:$0xff] %v7149_v45  ;;  %v7150_v38 = vmax.f32 %v7118_v0, 0.0  ;;  %v12205_v57 = vadd.f32 %v9080_v42, %v6790_v27  ;;  %v12432_v42 = vld [vmem:[#allocation29_spill] sm:$0xff] }
 0x84b   : > { %7179 = vst [vmem:[%s12202_s28] sm:$0xff] %v7147_v13  ;;  %v7148_v15 = vmax.f32 %v7116_v17, 0.0  ;;  %v9273_v41 = vpop.f32.mrb[152].mxu0 }
 0x84c   : > { %7182 = vst [vmem:[%s12202_s28 + $0x18] sm:$0xff] %v7150_v38  ;;  %v7013_v14 = vadd.f32 %v9273_v41, %v12118_v16  ;;  %v7004_v29 = vpop.f32.mrb[153].mxu0 }
 0x84d   : > { %7180 = vst [vmem:[%s12202_s28 + $0x8] sm:$0xff] %v7148_v15  ;;  %v7005_v9 = vadd.f32 %v7004_v29, %v12112_v19  ;;  %v9274_v52 = vpop.f32.mrb[154].mxu0  ;;  %v12433_v15 = vld [vmem:[#allocation31_spill] sm:$0xff] }
 0x84e   : > { %v7121_v55 = vadd.f32 %v7013_v14, %v11123_v10  ;;  %v7016_v8 = vadd.f32 %v9274_v52, %v12121_v22  ;;  %v7007_v27 = vpop.f32.mrb[155].mxu0 }
 0x84f   : > { %v7119_v35 = vadd.f32 %v7005_v9, %v11141_v50  ;;  %v7008_v58 = vadd.f32 %v7007_v27, %v12115_v21  ;;  %v12434_v9 = vld [vmem:[#allocation33_spill] sm:$0xff] }
 0x850   : > { %v7153_v34 = vmax.f32 %v7121_v55, 0.0  ;;  %v7122_v16 = vadd.f32 %v7016_v8, %v11173_v60  ;;  %v12435_v55 = vld [vmem:[#allocation35_spill] sm:$0xff] }
 0x851   : > { %v7151_v62 = vmax.f32 %v7119_v35, 0.0  ;;  %v7120_v20 = vadd.f32 %v7008_v58, %v11187_v6 }
 0x852   : > { %7185 = vst [vmem:[%s12202_s28 + $0x30] sm:$0xff] %v7153_v34  ;;  %v7154_v19 = vmax.f32 %v7122_v16, 0.0  ;;  %v12436_v16 = vld [vmem:[#allocation21_spill] sm:$0xff] }
 0x853   : > { %7183 = vst [vmem:[%s12202_s28 + $0x20] sm:$0xff] %v7151_v62  ;;  %v7152_v12 = vmax.f32 %v7120_v20, 0.0  ;;  %v9277_v18 = vpop.f32.mrb[156].mxu0 }
 0x854   : > { %7186 = vst [vmem:[%s12202_s28 + $0x38] sm:$0xff] %v7154_v19  ;;  %v7029_v10 = vadd.f32 %v9277_v18, %v12130_v28  ;;  %v7020_v22 = vpop.f32.mrb[157].mxu0 }
 0x855   : > { %7184 = vst [vmem:[%s12202_s28 + $0x28] sm:$0xff] %v7152_v12  ;;  %v7021_v50 = vadd.f32 %v7020_v22, %v12124_v24  ;;  %v9278_v21 = vpop.f32.mrb[158].mxu0  ;;  %v12437_v12 = vld [vmem:[#allocation22_spill] sm:$0xff] }
 0x856   : > { %v7125_v60 = vadd.f32 %v7029_v10, %v11223_v33  ;;  %v7032_v6 = vadd.f32 %v9278_v21, %v12133_v2  ;;  %v7023_v44 = vpop.f32.mrb[159].mxu0 }
 0x857   : > { %v7123_v25 = vadd.f32 %v7021_v50, %v11254_v23  ;;  %v7024_v7 = vadd.f32 %v7023_v44, %v12127_v47  ;;  %v12438_v50 = vld [vmem:[#allocation23_spill] sm:$0xff] }
 0x858   : > { %v7157_v31 = vmax.f32 %v7125_v60, 0.0  ;;  %v7126_v28 = vadd.f32 %v7032_v6, %v12430_v54  ;;  %v12439_v60 = vld [vmem:[#allocation24_spill] sm:$0xff]  ;;  %v12440_v54 = vld [vmem:[#allocation25_spill] sm:$0xff] }
 0x859   : > { %v7155_v61 = vmax.f32 %v7123_v25, 0.0  ;;  %v7124_v48 = vadd.f32 %v7024_v7, %v12431_v59 }
 0x85a   : > { %7189 = vst [vmem:[%s12202_s28 + $0x50] sm:$0xff] %v7157_v31  ;;  %v7158_v24 = vmax.f32 %v7126_v28, 0.0 }
 0x85b   : > { %7187 = vst [vmem:[%s12202_s28 + $0x40] sm:$0xff] %v7155_v61  ;;  %v7156_v45 = vmax.f32 %v7124_v48, 0.0  ;;  %v9281_v0 = vpop.f32.mrb[160].mxu0  ;;  %v12441_v48 = vld [vmem:[#allocation26_spill] sm:$0xff] }
 0x85c   : > { %7190 = vst [vmem:[%s12202_s28 + $0x58] sm:$0xff] %v7158_v24  ;;  %v7045_v33 = vadd.f32 %v9281_v0, %v12142_v5  ;;  %v7036_v2 = vpop.f32.mrb[161].mxu0 }
 0x85d   : > { %7188 = vst [vmem:[%s12202_s28 + $0x48] sm:$0xff] %v7156_v45  ;;  %v7037_v23 = vadd.f32 %v7036_v2, %v12136_v32  ;;  %v9282_v47 = vpop.f32.mrb[162].mxu0 }
 0x85e   : > { %v7129_v13 = vadd.f32 %v7045_v33, %v12432_v42  ;;  %v7048_v17 = vadd.f32 %v9282_v47, %v12145_v63  ;;  %v7039_v38 = vpop.f32.mrb[163].mxu0  ;;  %v12442_v33 = vld [vmem:[#allocation19_spill] sm:$0xff] }
 0x85f   : > { %v7127_v41 = vadd.f32 %v7037_v23, %v12433_v15  ;;  %v7040_v14 = vadd.f32 %v7039_v38, %v12139_v4  ;;  %v12443_v23 = vld [vmem:[#allocation28_spill] sm:$0xff]  ;;  %v12444_v15 = vld [vmem:[#allocation30_spill] sm:$0xff] }
 0x860   : > { %v7161_v29 = vmax.f32 %v7129_v13, 0.0  ;;  %v7130_v5 = vadd.f32 %v7048_v17, %v12434_v9  ;;  %v12445_v9 = vld [vmem:[#allocation32_spill] sm:$0xff] }
 0x861   : > { %v7159_v52 = vmax.f32 %v7127_v41, 0.0  ;;  %v7128_v8 = vadd.f32 %v7040_v14, %v12435_v55 }
 0x862   : > { %7193 = vst [vmem:[%s12202_s28 + $0x70] sm:$0xff] %v7161_v29  ;;  %v7162_v32 = vmax.f32 %v7130_v5, 0.0 }
 0x863   : > { %7191 = vst [vmem:[%s12202_s28 + $0x60] sm:$0xff] %v7159_v52  ;;  %v7160_v27 = vmax.f32 %v7128_v8, 0.0  ;;  %v9285_v35 = vpop.f32.mrb[164].mxu0  ;;  %v12446_v8 = vld [vmem:[#allocation34_spill] sm:$0xff] }
 0x864   : > { %7194 = vst [vmem:[%s12202_s28 + $0x78] sm:$0xff] %v7162_v32  ;;  %v7061_v63 = vadd.f32 %v9285_v35, %v12154_v36  ;;  %v7052_v58 = vpop.f32.mrb[165].mxu0 }
 0x865   : > { %7192 = vst [vmem:[%s12202_s28 + $0x68] sm:$0xff] %v7160_v27  ;;  %v7053_v4 = vadd.f32 %v7052_v58, %v12148_v11  ;;  %v9286_v34 = vpop.f32.mrb[166].mxu0  ;;  %v12447_v27 = vld [vmem:[#allocation36_spill] sm:$0xff] }
 0x866   : > { %v7133_v62 = vadd.f32 %v7061_v63, %v12436_v16  ;;  %v7064_v20 = vadd.f32 %v9286_v34, %v12157_v37  ;;  %v7055_v19 = vpop.f32.mrb[167].mxu0  ;;  %v12448_v16 = vld [vmem:[#allocation37_spill] sm:$0xff] }
 0x867   : > { %v7131_v18 = vadd.f32 %v7053_v4, %v12437_v12  ;;  %v7056_v10 = vadd.f32 %v7055_v19, %v12151_v3  ;;  %v12449_v12 = vld [vmem:[#allocation38_spill] sm:$0xff] }
 0x868   : > { %v7165_v22 = vmax.f32 %v7133_v62, 0.0  ;;  %v7134_v36 = vadd.f32 %v7064_v20, %v12438_v50 }
 0x869   : > { %v7163_v21 = vmax.f32 %v7131_v18, 0.0  ;;  %v7132_v6 = vadd.f32 %v7056_v10, %v12439_v60 }
 0x86a   : > { %7197 = vst [vmem:[%s12202_s28 + $0x90] sm:$0xff] %v7165_v22  ;;  %v7166_v11 = vmax.f32 %v7134_v36, 0.0  ;;  %v12450_v22 = vld [vmem:[#allocation39_spill] sm:$0xff]  ;;  %v12451_v36 = vld [vmem:[#allocation40_spill] sm:$0xff] }
 0x86b   : > { %7195 = vst [vmem:[%s12202_s28 + $0x80] sm:$0xff] %v7163_v21  ;;  %v7164_v44 = vmax.f32 %v7132_v6, 0.0  ;;  %v9289_v25 = vpop.f32.mrb[168].mxu0 }
 0x86c   : > { %7198 = vst [vmem:[%s12202_s28 + $0x98] sm:$0xff] %v7166_v11  ;;  %v7077_v37 = vadd.f32 %v9289_v25, %v12166_v46  ;;  %v7068_v7 = vpop.f32.mrb[169].mxu0 }
 0x86d   : > { %7196 = vst [vmem:[%s12202_s28 + $0x88] sm:$0xff] %v7164_v44  ;;  %v7069_v3 = vadd.f32 %v7068_v7, %v12160_v40  ;;  %v9290_v31 = vpop.f32.mrb[170].mxu0 }
 0x86e   : > { %v7137_v28 = vadd.f32 %v7077_v37, %v12440_v54  ;;  %v7080_v61 = vadd.f32 %v9290_v31, %v12169_v51  ;;  %v7071_v59 = vpop.f32.mrb[171].mxu0 }
 0x86f   : > { %v7135_v24 = vadd.f32 %v7069_v3, %v12441_v48  ;;  %v7072_v45 = vadd.f32 %v7071_v59, %v12163_v49 }
 0x870   : > { %v7169_v0 = vmax.f32 %v7137_v28, 0.0  ;;  %v7138_v46 = vadd.f32 %v7080_v61, %v12442_v33 }
 0x871   : > { %v7167_v2 = vmax.f32 %v7135_v24, 0.0  ;;  %v7136_v47 = vadd.f32 %v7072_v45, %v12443_v23 }
 0x872   : > { %7201 = vst [vmem:[%s12202_s28 + $0xb0] sm:$0xff] %v7169_v0  ;;  %v7170_v40 = vmax.f32 %v7138_v46, 0.0 }
 0x873   : > { %7199 = vst [vmem:[%s12202_s28 + $0xa0] sm:$0xff] %v7167_v2  ;;  %v7168_v42 = vmax.f32 %v7136_v47, 0.0  ;;  %v9293_v13 = vpop.f32.mrb[172].mxu0 }
 0x874   : > { %7202 = vst [vmem:[%s12202_s28 + $0xb8] sm:$0xff] %v7170_v40  ;;  %v7093_v51 = vadd.f32 %v9293_v13, %v12178_v43  ;;  %v7084_v17 = vpop.f32.mrb[173].mxu0 }
 0x875   : > { %7200 = vst [vmem:[%s12202_s28 + $0xa8] sm:$0xff] %v7168_v42  ;;  %v7085_v49 = vadd.f32 %v7084_v17, %v12172_v56  ;;  %v9294_v38 = vpop.f32.mrb[174].mxu0 }
 0x876   : > { %v7141_v41 = vadd.f32 %v7093_v51, %v12444_v15  ;;  %v7096_v14 = vadd.f32 %v9294_v38, %v12181_v30  ;;  %v7087_v29 = vpop.f32.mrb[175].mxu0 }
 0x877   : > { %v7139_v5 = vadd.f32 %v7085_v49, %v12445_v9  ;;  %v7088_v52 = vadd.f32 %v7087_v29, %v12175_v53 }
 0x878   : > { %v7173_v55 = vmax.f32 %v7141_v41, 0.0  ;;  %v7142_v43 = vadd.f32 %v7096_v14, %v12446_v8 }
 0x879   : > { %v7171_v32 = vmax.f32 %v7139_v5, 0.0  ;;  %v7140_v35 = vadd.f32 %v7088_v52, %v12447_v27 }
 0x87a   : > { %7205 = vst [vmem:[%s12202_s28 + $0xd0] sm:$0xff] %v7173_v55  ;;  %v7174_v56 = vmax.f32 %v7142_v43, 0.0 }
 0x87b   : > { %7203 = vst [vmem:[%s12202_s28 + $0xc0] sm:$0xff] %v7171_v32  ;;  %v7172_v63 = vmax.f32 %v7140_v35, 0.0  ;;  %v9297_v58 = vpop.f32.mrb[176].mxu0 }
 0x87c   : > { %7206 = vst [vmem:[%s12202_s28 + $0xd8] sm:$0xff] %v7174_v56  ;;  %v7109_v30 = vadd.f32 %v9297_v58, %v12199_v39  ;;  %v7100_v4 = vpop.f32.mrb[177].mxu0 }
 0x87d   : > { %7204 = vst [vmem:[%s12202_s28 + $0xc8] sm:$0xff] %v7172_v63  ;;  %v7101_v53 = vadd.f32 %v7100_v4, %v12184_v26  ;;  %v9298_v34 = vpop.f32.mrb[178].mxu0 }
 0x87e   : > { %v7145_v62 = vadd.f32 %v7109_v30, %v12448_v16  ;;  %v7112_v20 = vadd.f32 %v9298_v34, %v12205_v57  ;;  %v7103_v19 = vpop.f32.mrb[179].mxu0 }
 0x87f   : > { %v7143_v18 = vadd.f32 %v7101_v53, %v12449_v12  ;;  %v7104_v10 = vadd.f32 %v7103_v19, %v12188_v1 }
 0x880   : > { %v7177_v39 = vmax.f32 %v7145_v62, 0.0  ;;  %v7146_v26 = vadd.f32 %v7112_v20, %v12450_v22 }
 0x881   : > { %v7175_v50 = vmax.f32 %v7143_v18, 0.0  ;;  %v7144_v21 = vadd.f32 %v7104_v10, %v12451_v36 }
 0x882   : > { %7209 = vst [vmem:[%s12202_s28 + $0xf0] sm:$0xff] %v7177_v39  ;;  %v7178_v60 = vmax.f32 %v7146_v26, 0.0 }
 0x883   : > { %7207 = vst [vmem:[%s12202_s28 + $0xe0] sm:$0xff] %v7175_v50  ;;  %v7176_v1 = vmax.f32 %v7144_v21, 0.0 }
 0x884   : > { %7210 = vst [vmem:[%s12202_s28 + $0xf8] sm:$0xff] %v7178_v60 }
 0x885   : > { %7208 = vst [vmem:[%s12202_s28 + $0xe8] sm:$0xff] %v7176_v1 }
 0x886   : > { %9995 = shalt.err (!%p9992_p9)
}
 0x887   : > { %s9996_s11 = scalar_lea.hbm %s12296_s19, 4096  ;;  %s10000_s27 = scalar_lea.hbm %s12356_s10, 8192 }
 0x888   : > { %p9997_p2 = scmp.ne.s32.totalorder %s12296_s19, %s9996_s11  ;;  %p10001_p5 = scmp.lt.u32.totalorder %s12296_s19, %s12356_s10 }
 0x889   : > { %p10002_p10 = scmp.lt.u32.totalorder %s10000_s27, %s9996_s11  ;;  %p10004_p12 = scmp.lt.u32.totalorder %s9996_s11, %s12296_s19 }
 0x88a   : > { %p9998_p0 = pnand %p9997_p2, %p12452_p7 }
 0x88b   : > { %p10003_p4 = por %p10002_p10, %p10001_p5 }
 0x88c   : > { %p9999_p3 = pneg %p9998_p0 }
 0x88d   : > { %p10005_p8 = por %p10004_p12, %p10003_p4 }
 0x88f   : > { %p10006_p11 = pnand %p10005_p8, %p9999_p3 }
 0x891   : > { %10009 = shalt.err (!%p10006_p11)
}
 0x892   : > { %s10062_s15 = smov 128   ;;  %s10063_s28 = smov 8  }
 0x893   : > { %9359 = dma.vmem_to_hbm [thread:$0]  (%p12452_p7), %s12298_s25, 4096, %s12296_s19, %s12305_s17, %s10062_s15, %s10062_s15, %s10063_s28  }
 0x894 PF: > { %s12453_s12 = sld [smem:[#allocation15_spill]]  ;;  %s12454_s20 = sld [smem:[#allocation13_spill]] }
 0x895   : > { %s12455_s16 = sld [smem:[#allocation18_spill]] }
 0x89a   : > { %p9381_p13 = scmp.ge.s32.totalorder %s12453_s12, 2  ;;  %s7240_s24 = sand.u32 1, %s12454_s20  }
 0x89b   : > { %p12456_p1 = scmp.ne.s32.totalorder %s12455_s16, 0  ;;  %s7241_s21 = scalar_lea.sflag [#allocation5], %s7240_s24 }
 0x89d   : > { %p9372_p6 = pnand %p9381_p13, %p12456_p1 }
 0x89f   : > { %10035 = dma.done.wait (!%p9372_p6), %s7241_s21, 4096  }
 0x8a0   : > { %10037 = vsyncadd (!%p9372_p6), %s7241_s21, 4294963200  ;;  %s12457_s16 = sld [smem:[#allocation16_spill]]  ;;  %s12458_s26 = sld [smem:[#allocation14_spill]] }
 0x8a1   : > { %s12459_s15 = sld [smem:[#allocation17_spill]]  ;;  %s12460_s13 = smov %s10044_s14 }
 0x8a6   : > { %p22_p9 = scmp.ge.s32.totalorder %s12457_s16, 4   ;;  %s12461_s14 = smov %s12458_s26 }
 0x8a8   :  { %24 = sbr.rel (!%p22_p9) target bundleno = 5 (0x5), region = 110 }
 0x8af   :  { %7246 = vsyncpa [#allocation4], 1 }
 0x8b0   :  { %7248 = vsyncpa [#allocation4 + $0x1], 1 }
 0x8b1   :  { %7249 = vsyncpa [#allocation7], 1 }
 0x8b2   :  { %7250 = vsyncpa [#allocation5], 1 }
 0x8b3   :  { %7252 = vsyncpa [#allocation5 + $0x1], 1 }

</bundles_post_ra>
